<compile_context>
chip_gen: v7x
topology: tpu7x:2x2x1
jax: 0.10.0
libtpu: 0.0.40
codegen_flags: <defaults>
</compile_context>

<pallas_src>
import functools

import jax
import jax.numpy as jnp
from jax.experimental import pallas as pl
from jax.experimental.pallas import tpu as pltpu

_EPS = 1e-5
_NEG_SLOPE = 0.2


def _cparams(sem):
    return pltpu.CompilerParams(
        dimension_semantics=sem, vmem_limit_bytes=32 * 1024 * 1024)


def _pick_tile(n, max_tile, align):
    """Largest divisor of n obtained by halving that is <= max_tile and a
    multiple of `align`; falls back to n (full extent) otherwise."""
    if n <= max_tile:
        return n
    t = n
    while t > max_tile and t % 2 == 0:
        t //= 2
    if t > max_tile or n % t != 0 or t % align != 0:
        return n
    return t


# ----------------------------------------------------------------------------
# Pallas kernels
# ----------------------------------------------------------------------------
def _mm_stats_kernel(*refs, n_in):
    """Pass 1: sum of bf16 matmuls (f32 accumulate) + per-channel sum / sumsq.

    refs = (x_0, w_0, ..., x_{n_in-1}, w_{n_in-1}, acc_out, stats_out)
      x_i:   (1, tile_hw, K_i)      bf16
      w_i:   (K_i, C_total)         bf16
      acc:   (1, tile_hw, C_total)  f32   pre-activation tile
      stats: (1, 2, C_total)        f32   [sum; sumsq], resident accumulator
                                          over the HW-tile grid axis
    """
    acc_ref = refs[2 * n_in]
    stats_ref = refs[2 * n_in + 1]

    acc = jnp.dot(refs[0][0], refs[1][...], preferred_element_type=jnp.float32)
    for i in range(1, n_in):
        acc = acc + jnp.dot(refs[2 * i][0], refs[2 * i + 1][...],
                            preferred_element_type=jnp.float32)
    acc_ref[0] = acc

    s = jnp.sum(acc, axis=0, keepdims=True)           # (1, C)
    ss = jnp.sum(acc * acc, axis=0, keepdims=True)    # (1, C)
    st = jnp.concatenate([s, ss], axis=0)             # (2, C)

    @pl.when(pl.program_id(1) == 0)
    def _():
        stats_ref[...] = jnp.zeros_like(stats_ref)

    stats_ref[0] += st


def _norm_lrelu_kernel(acc_ref, stats_ref, o_ref, *, inv_n):
    """Pass 2: InstanceNorm (E[x^2]-E[x]^2) + LeakyReLU(0.2), bf16 store."""
    a = acc_ref[0]                       # (tile_hw, C) f32
    st = stats_ref[0]                    # (2, C) f32
    mean = st[0:1, :] * inv_n
    var = jnp.maximum(st[1:2, :] * inv_n - mean * mean, 0.0)
    scale = jax.lax.rsqrt(var + _EPS)
    shift = -mean * scale
    y = a * scale + shift
    y = jnp.where(y >= 0.0, y, _NEG_SLOPE * y)
    o_ref[0] = y.astype(o_ref.dtype)


def _avgpool_kernel(x_ref, o_ref):
    """2x2 average pool on space-to-depth input.

    x_ref: (1, tile, 4*C) bf16, columns ordered (di*2+dj)*C + c
    o_ref: (1, tile, C)   bf16
    """
    c = o_ref.shape[2]
    x = x_ref[0].astype(jnp.float32)
    s = x[:, 0:c] + x[:, c:2 * c] + x[:, 2 * c:3 * c] + x[:, 3 * c:4 * c]
    o_ref[0] = (0.25 * s).astype(o_ref.dtype)


def _conv1x1_bias_t_kernel(x_ref, w_ref, b_ref, o_ref):
    """Lane-dense 1x1 conv with bias, computed in transposed form.

    x_ref: (1, Cin, tile_hw) bf16, w_ref: (Cout, Cin) bf16, b_ref: (Cout, 1) f32
    o_ref: (1, Cout, tile_hw) f32   (HW on the lane axis -> unmasked stores)
    """
    y = jnp.dot(w_ref[...], x_ref[0], preferred_element_type=jnp.float32)
    o_ref[0] = (y + b_ref[...]).astype(o_ref.dtype)


# ----------------------------------------------------------------------------
# Wrappers (glue = layout plumbing only)
# ----------------------------------------------------------------------------
def _im2col3x3(x):
    """x: (B,H,W,C) bf16 -> (B, HW, 9*C): zero-padded taps folded into K."""
    b, h, w, c = x.shape
    xp = jnp.pad(x, ((0, 0), (1, 1), (1, 1), (0, 0)))
    taps = [xp[:, dy:dy + h, dx:dx + w, :].reshape(b, h * w, c)
            for dy in range(3) for dx in range(3)]
    return jnp.concatenate(taps, axis=-1)


def _fused_conv_in_lrelu(xw_pairs, cout, groups):
    """Fused (sum of matmuls) + InstanceNorm + LeakyReLU.

    xw_pairs: list of (x (B,HW,K_i) bf16, w (K_i, groups*cout) bf16).
    For groups=4 (transpose conv) the 4 sub-pixel positions live in separate
    column groups; stats are combined across groups so the norm matches
    InstanceNorm over the full 2Hx2W output.
    Returns (B, HW, groups*cout) bf16.
    """
    b, hw, _ = xw_pairs[0][0].shape
    ctot = groups * cout
    n_in = len(xw_pairs)
    tile = _pick_tile(hw, 512, 8)
    grid = (b, hw // tile)

    in_specs, args = [], []
    for (xk, wk) in xw_pairs:
        kdim = xk.shape[-1]
        in_specs.append(pl.BlockSpec((1, tile, kdim), lambda i, t: (i, t, 0)))
        in_specs.append(pl.BlockSpec((kdim, ctot), lambda i, t: (0, 0)))
        args.extend([xk, wk])

    acc, stats = pl.pallas_call(
        functools.partial(_mm_stats_kernel, n_in=n_in),
        out_shape=(jax.ShapeDtypeStruct((b, hw, ctot), jnp.float32),
                   jax.ShapeDtypeStruct((b, 2, ctot), jnp.float32)),
        grid=grid,
        in_specs=in_specs,
        out_specs=(pl.BlockSpec((1, tile, ctot), lambda i, t: (i, t, 0)),
                   pl.BlockSpec((1, 2, ctot), lambda i, t: (i, 0, 0))),
        compiler_params=_cparams(("parallel", "arbitrary")),
    )(*args)

    if groups > 1:
        # Combine stats across the sub-pixel column groups, tile back per group.
        stats = stats.reshape(b, 2, groups, cout).sum(axis=2)
        stats = jnp.tile(stats, (1, 1, groups))
    inv_n = 1.0 / float(hw * groups)

    y = pl.pallas_call(
        functools.partial(_norm_lrelu_kernel, inv_n=inv_n),
        out_shape=jax.ShapeDtypeStruct((b, hw, ctot), jnp.bfloat16),
        grid=grid,
        in_specs=[pl.BlockSpec((1, tile, ctot), lambda i, t: (i, t, 0)),
                  pl.BlockSpec((1, 2, ctot), lambda i, t: (i, 0, 0))],
        out_specs=pl.BlockSpec((1, tile, ctot), lambda i, t: (i, t, 0)),
        compiler_params=_cparams(("parallel", "parallel")),
    )(acc, stats)
    return y


def _conv3x3_in_lrelu(xs, ws, h, wd):
    """Conv3x3(pad=1, no bias) + InstanceNorm + LeakyReLU over an implicit
    channel-concatenation of the feature maps in `xs` (skip-concat fusion).

    xs: list of (B,H,W,Ci) bf16; ws: list of (3,3,Ci,Cout) f32 weight slices.
    """
    b = xs[0].shape[0]
    cout = ws[0].shape[-1]
    pairs = []
    for xk, wk in zip(xs, ws):
        ci = xk.shape[-1]
        xc = _im2col3x3(xk)                                   # (B, HW, 9*ci) bf16
        wf = wk.reshape(9 * ci, cout).astype(jnp.bfloat16)    # taps folded into K
        pairs.append((xc, wf))
    y = _fused_conv_in_lrelu(pairs, cout, groups=1)
    return y.reshape(b, h, wd, cout)


def _conv_block(xs, w1, w2, h, wd):
    """ConvBlock: two fused conv+IN+LeakyReLU passes; Dropout(p=0) is identity.
    The first conv consumes `xs` as an implicit channel concat (w1 is split)."""
    sizes = [xk.shape[-1] for xk in xs]
    w1_splits, off = [], 0
    for s in sizes:
        w1_splits.append(w1[:, :, off:off + s, :])
        off += s
    x = _conv3x3_in_lrelu(xs, w1_splits, h, wd)
    x = _conv3x3_in_lrelu([x], [w2], h, wd)
    return x


def _avg_pool2x2(x, h, wd):
    """F.avg_pool2d(kernel=2, stride=2). x: (B,H,W,C) bf16 -> (B,H/2,W/2,C)."""
    b, c = x.shape[0], x.shape[-1]
    ho, wo = h // 2, wd // 2
    xs = (x.reshape(b, ho, 2, wo, 2, c)
          .transpose(0, 1, 3, 2, 4, 5)
          .reshape(b, ho * wo, 4 * c))
    tile = _pick_tile(ho * wo, 1024, 8)
    grid = (b, (ho * wo) // tile)
    out = pl.pallas_call(
        _avgpool_kernel,
        out_shape=jax.ShapeDtypeStruct((b, ho * wo, c), x.dtype),
        grid=grid,
        in_specs=[pl.BlockSpec((1, tile, 4 * c), lambda i, t: (i, t, 0))],
        out_specs=pl.BlockSpec((1, tile, c), lambda i, t: (i, t, 0)),
        compiler_params=_cparams(("parallel", "parallel")),
    )(xs)
    return out.reshape(b, ho, wo, c)


def _tconv2x2_in_lrelu(x, w, h, wd):
    """ConvTranspose2d(k=2, s=2, no bias) + InstanceNorm + LeakyReLU(0.2).

    x: (B,H,W,Cin) bf16, w: (2,2,Cin,Cout) f32 -> (B,2H,2W,Cout) bf16.
    """
    b, cin = x.shape[0], x.shape[-1]
    cout = w.shape[-1]
    xf = x.reshape(b, h * wd, cin)
    # columns ordered (di*2+dj)*Cout + co
    wf = jnp.transpose(w, (2, 0, 1, 3)).reshape(cin, 4 * cout).astype(jnp.bfloat16)
    z = _fused_conv_in_lrelu([(xf, wf)], cout, groups=4)      # (B, HW, 4*Cout)
    # pixel shuffle: y[b, 2i+di, 2j+dj, co] = z[b, i*W+j, (di*2+dj)*Cout+co]
    y = (z.reshape(b, h, wd, 2, 2, cout)
         .transpose(0, 1, 3, 2, 4, 5)
         .reshape(b, 2 * h, 2 * wd, cout))
    return y


def _conv1x1_bias(x, w, bias, h, wd):
    """Final Conv2d(k=1) with bias, lane-dense transposed output (NCHW)."""
    b, cin = x.shape[0], x.shape[-1]
    cout = w.shape[-1]
    hw = h * wd
    xt = jnp.transpose(x.reshape(b, hw, cin), (0, 2, 1))        # (B, Cin, HW) bf16
    wt = jnp.transpose(w, (1, 0)).astype(jnp.bfloat16)          # (Cout, Cin)
    bt = bias.reshape(cout, 1).astype(jnp.float32)
    tile = _pick_tile(hw, 2048, 128)
    grid = (b, hw // tile)
    out = pl.pallas_call(
        _conv1x1_bias_t_kernel,
        out_shape=jax.ShapeDtypeStruct((b, cout, hw), jnp.float32),
        grid=grid,
        in_specs=[pl.BlockSpec((1, cin, tile), lambda i, t: (i, 0, t)),
                  pl.BlockSpec((cout, cin), lambda i, t: (0, 0)),
                  pl.BlockSpec((cout, 1), lambda i, t: (0, 0))],
        out_specs=pl.BlockSpec((1, cout, tile), lambda i, t: (i, 0, t)),
        compiler_params=_cparams(("parallel", "parallel")),
    )(xt, wt, bt)
    return out.reshape(b, cout, h, wd)   # already NCHW


# ----------------------------------------------------------------------------
# Parameter init (deterministic, synthetic)
# ----------------------------------------------------------------------------
def init_unet_params(key, in_channels, out_channels, channels, num_pool_layers):
    counter = [0]

    def nrm(shape, fan_in):
        counter[0] += 1
        k = jax.random.fold_in(key, counter[0])
        return jax.random.normal(k, shape, jnp.float32) * (2.0 / fan_in) ** 0.5

    def conv_block_w(cin, cout):
        return (nrm((3, 3, cin, cout), 9 * cin), nrm((3, 3, cout, cout), 9 * cout))

    params = {"down": [], "up_t": [], "up_conv": []}
    ch = channels
    params["down"].append(conv_block_w(in_channels, channels))
    for _ in range(num_pool_layers - 1):
        params["down"].append(conv_block_w(ch, ch * 2))
        ch *= 2
    params["bottleneck"] = conv_block_w(ch, ch * 2)
    for _ in range(num_pool_layers - 1):
        params["up_t"].append(nrm((2, 2, 2 * ch, ch), 4 * 2 * ch))
        params["up_conv"].append(conv_block_w(2 * ch, ch))
        ch //= 2
    params["up_t"].append(nrm((2, 2, 2 * ch, ch), 4 * 2 * ch))
    params["up_conv"].append(conv_block_w(2 * ch, ch))
    params["final_w"] = nrm((ch, out_channels), ch)
    params["final_b"] = nrm((out_channels,), 1.0)
    return params


# ----------------------------------------------------------------------------
# UnetModel.base_forward
# ----------------------------------------------------------------------------
def unet_forward(params, x_nchw):
    """base_forward: x (B, in_ch, H, W) NCHW f32 -> (B, out_ch, H, W) NCHW f32."""
    x = jnp.transpose(x_nchw, (0, 2, 3, 1)).astype(jnp.bfloat16)  # NHWC bf16
    h, wd = x.shape[1], x.shape[2]
    stack = []
    for (w1, w2) in params["down"]:
        x = _conv_block([x], w1, w2, h, wd)
        stack.append((x, h, wd))
        x = _avg_pool2x2(x, h, wd)
        h, wd = h // 2, wd // 2
    x = _conv_block([x], params["bottleneck"][0], params["bottleneck"][1], h, wd)
    for wt, (w1, w2) in zip(params["up_t"], params["up_conv"]):
        skip, hs, ws_ = stack.pop()
        x = _tconv2x2_in_lrelu(x, wt, h, wd)
        h, wd = 2 * h, 2 * wd
        # torch.cat([x, skip], dim=1) is fused into the first up-conv (w1 split).
        x = _conv_block([x, skip], w1, w2, h, wd)
    return _conv1x1_bias(x, params["final_w"], params["final_b"], h, wd)


if __name__ == "__main__":
    key = jax.random.PRNGKey(0)
    # small config: in_channels=2 (real/imag), out_channels=2, channels=8, 2 pool layers
    B, IN_CH, H, W = 2, 2, 16, 16
    OUT_CH, CHANS, NUM_POOL = 2, 8, 2

    x = jax.random.normal(jax.random.fold_in(key, 1000), (B, IN_CH, H, W), jnp.float32)
    params = init_unet_params(key, IN_CH, OUT_CH, CHANS, NUM_POOL)

    y = jax.jit(unet_forward)(params, x)
    jax.block_until_ready(y)
    assert y.shape == (B, OUT_CH, H, W), y.shape
    assert bool(jnp.all(jnp.isfinite(y)))
    print("KERNEL_OK")
</pallas_src>

<mosaic_0001>
module attributes {stable_mosaic.version = 11 : i64} {
  func.func @_mm_stats_kernel(%arg0: i32, %arg1: i32, %arg2: memref<1x256x18xbf16, #tpu.memory_space<vmem>>, %arg3: memref<18x8xbf16, #tpu.memory_space<vmem>>, %arg4: memref<1x256x8xf32, #tpu.memory_space<vmem>>, %arg5: memref<1x2x8xf32, #tpu.memory_space<vmem>>) attributes {dimension_semantics = [#tpu.dimension_semantics<parallel>, #tpu.dimension_semantics<arbitrary>], iteration_bounds = array<i64: 2, 1>, scalar_prefetch = 0 : i64, scratch_operands = 0 : i64, tpu.core_type = #tpu.core_type<tc>, window_params = [{transform_indices = @transform_0, window_bounds = array<i64: 1, 256, 18>}, {pipeline_mode = #tpu.pipeline_mode<synchronous>, transform_indices = @transform_1, window_bounds = array<i64: 18, 8>}, {transform_indices = @transform_2, window_bounds = array<i64: 1, 256, 8>}, {transform_indices = @transform_3, window_bounds = array<i64: 1, 2, 8>}]} {
    %c0 = arith.constant 0 : index
    %c0_0 = arith.constant 0 : index
    %c0_1 = arith.constant 0 : index
    %0 = vector.load %arg2[%c0, %c0_0, %c0_1] : memref<1x256x18xbf16, #tpu.memory_space<vmem>>, vector<1x256x18xbf16>
    %1 = vector.shape_cast %0 : vector<1x256x18xbf16> to vector<256x18xbf16>
    %c0_2 = arith.constant 0 : index
    %c0_3 = arith.constant 0 : index
    %2 = vector.load %arg3[%c0_2, %c0_3] : memref<18x8xbf16, #tpu.memory_space<vmem>>, vector<18x8xbf16>
    %cst = arith.constant dense<0.000000e+00> : vector<256x8xf32>
    %3 = tpu.matmul %1, %2, %cst {dimension_numbers = #tpu.dot_dimension_numbers<[1], [0], [0], [1], [0, 0, 1, 1], [], []>} : vector<256x18xbf16>, vector<18x8xbf16>, vector<256x8xf32> -> vector<256x8xf32>
    %c0_4 = arith.constant 0 : index
    %c0_5 = arith.constant 0 : index
    %c0_6 = arith.constant 0 : index
    %4 = vector.load %arg4[%c0_4, %c0_5, %c0_6] : memref<1x256x8xf32, #tpu.memory_space<vmem>>, vector<1x256x8xf32>
    %5 = vector.shape_cast %4 : vector<1x256x8xf32> to vector<256x8xf32>
    %6 = vector.shape_cast %3 : vector<256x8xf32> to vector<1x256x8xf32>
    tpu.vector_store %arg4[%c0_4, %c0_5, %c0_6], %6 {strides = array<i32>} : memref<1x256x8xf32, #tpu.memory_space<vmem>>, vector<1x256x8xf32>,
    %cst_7 = arith.constant dense<0.000000e+00> : vector<8xf32>
    %7 = vector.multi_reduction <add>, %3, %cst_7 [0] : vector<256x8xf32> to vector<8xf32>
    %8 = vector.shape_cast %7 : vector<8xf32> to vector<1x8xf32>
    %9 = arith.mulf %3, %3 : vector<256x8xf32>
    %cst_8 = arith.constant dense<0.000000e+00> : vector<8xf32>
    %10 = vector.multi_reduction <add>, %9, %cst_8 [0] : vector<256x8xf32> to vector<8xf32>
    %11 = vector.shape_cast %10 : vector<8xf32> to vector<1x8xf32>
    %12 = tpu.concatenate %8, %11 in 0 : vector<1x8xf32>, vector<1x8xf32> -> vector<2x8xf32>
    %c0_i32 = arith.constant 0 : i32
    %13 = arith.cmpi eq, %arg1, %c0_i32 : i32
    %14 = arith.extui %13 : i1 to i32
    %c0_i32_9 = arith.constant 0 : i32
    %15 = arith.cmpi ne, %14, %c0_i32_9 : i32
    scf.if %15 {
      %cst_16 = arith.constant 0.000000e+00 : f32
      %22 = vector.broadcast %cst_16 : f32 to vector<1x2x8xf32>
      %c0_17 = arith.constant 0 : index
      %c0_18 = arith.constant 0 : index
      %c0_19 = arith.constant 0 : index
      %23 = vector.load %arg5[%c0_17, %c0_18, %c0_19] : memref<1x2x8xf32, #tpu.memory_space<vmem>>, vector<1x2x8xf32>
      tpu.vector_store %arg5[%c0_17, %c0_18, %c0_19], %22 {strides = array<i32>} : memref<1x2x8xf32, #tpu.memory_space<vmem>>, vector<1x2x8xf32>,
    } else {
    }
    %c0_10 = arith.constant 0 : index
    %c0_11 = arith.constant 0 : index
    %c0_12 = arith.constant 0 : index
    %16 = vector.load %arg5[%c0_10, %c0_11, %c0_12] : memref<1x2x8xf32, #tpu.memory_space<vmem>>, vector<1x2x8xf32>
    %17 = vector.shape_cast %16 : vector<1x2x8xf32> to vector<2x8xf32>
    %18 = arith.addf %17, %12 : vector<2x8xf32>
    %c0_13 = arith.constant 0 : index
    %c0_14 = arith.constant 0 : index
    %c0_15 = arith.constant 0 : index
    %19 = vector.load %arg5[%c0_13, %c0_14, %c0_15] : memref<1x2x8xf32, #tpu.memory_space<vmem>>, vector<1x2x8xf32>
    %20 = vector.shape_cast %19 : vector<1x2x8xf32> to vector<2x8xf32>
    %21 = vector.shape_cast %18 : vector<2x8xf32> to vector<1x2x8xf32>
    tpu.vector_store %arg5[%c0_13, %c0_14, %c0_15], %21 {strides = array<i32>} : memref<1x2x8xf32, #tpu.memory_space<vmem>>, vector<1x2x8xf32>,
    return
  }
  func.func @transform_0(%arg0: i32, %arg1: i32) -> (i32, i32, i32) {
    %c0_i32 = arith.constant 0 : i32
    %c0_i32_0 = arith.constant 0 : i32
    return %arg0, %arg1, %c0_i32 : i32, i32, i32
  }
  func.func @transform_1(%arg0: i32, %arg1: i32) -> (i32, i32) {
    %c0_i32 = arith.constant 0 : i32
    %c0_i32_0 = arith.constant 0 : i32
    %c0_i32_1 = arith.constant 0 : i32
    return %c0_i32, %c0_i32_0 : i32, i32
  }
  func.func @transform_2(%arg0: i32, %arg1: i32) -> (i32, i32, i32) {
    %c0_i32 = arith.constant 0 : i32
    %c0_i32_0 = arith.constant 0 : i32
    return %arg0, %arg1, %c0_i32 : i32, i32, i32
  }
  func.func @transform_3(%arg0: i32, %arg1: i32) -> (i32, i32, i32) {
    %c0_i32 = arith.constant 0 : i32
    %c0_i32_0 = arith.constant 0 : i32
    %c0_i32_1 = arith.constant 0 : i32
    return %arg0, %c0_i32, %c0_i32_0 : i32, i32, i32
  }
}

module attributes {stable_mosaic.version = 11 : i64} {
  func.func @_norm_lrelu_kernel(%arg0: i32, %arg1: i32, %arg2: memref<1x256x8xf32, #tpu.memory_space<vmem>>, %arg3: memref<1x2x8xf32, #tpu.memory_space<vmem>>, %arg4: memref<1x256x8xbf16, #tpu.memory_space<vmem>>) attributes {dimension_semantics = [#tpu.dimension_semantics<parallel>, #tpu.dimension_semantics<parallel>], iteration_bounds = array<i64: 2, 1>, scalar_prefetch = 0 : i64, scratch_operands = 0 : i64, tpu.core_type = #tpu.core_type<tc>, window_params = [{transform_indices = @transform_0, window_bounds = array<i64: 1, 256, 8>}, {transform_indices = @transform_1, window_bounds = array<i64: 1, 2, 8>}, {transform_indices = @transform_2, window_bounds = array<i64: 1, 256, 8>}]} {
    %c0 = arith.constant 0 : index
    %c0_0 = arith.constant 0 : index
    %c0_1 = arith.constant 0 : index
    %0 = vector.load %arg2[%c0, %c0_0, %c0_1] : memref<1x256x8xf32, #tpu.memory_space<vmem>>, vector<1x256x8xf32>
    %1 = vector.shape_cast %0 : vector<1x256x8xf32> to vector<256x8xf32>
    %c0_2 = arith.constant 0 : index
    %c0_3 = arith.constant 0 : index
    %c0_4 = arith.constant 0 : index
    %2 = vector.load %arg3[%c0_2, %c0_3, %c0_4] : memref<1x2x8xf32, #tpu.memory_space<vmem>>, vector<1x2x8xf32>
    %3 = vector.shape_cast %2 : vector<1x2x8xf32> to vector<2x8xf32>
    %4 = vector.extract_strided_slice %3 {offsets = [0, 0], sizes = [1, 8], strides = [1, 1]} : vector<2x8xf32> to vector<1x8xf32>
    %cst = arith.constant 3.906250e-03 : f32
    %5 = vector.broadcast %cst : f32 to vector<1x8xf32>
    %6 = arith.mulf %4, %5 : vector<1x8xf32>
    %7 = vector.extract_strided_slice %3 {offsets = [1, 0], sizes = [1, 8], strides = [1, 1]} : vector<2x8xf32> to vector<1x8xf32>
    %cst_5 = arith.constant 3.906250e-03 : f32
    %8 = vector.broadcast %cst_5 : f32 to vector<1x8xf32>
    %9 = arith.mulf %7, %8 : vector<1x8xf32>
    %10 = arith.mulf %6, %6 : vector<1x8xf32>
    %11 = arith.subf %9, %10 : vector<1x8xf32>
    %cst_6 = arith.constant 0.000000e+00 : f32
    %12 = vector.broadcast %cst_6 : f32 to vector<1x8xf32>
    %13 = arith.maximumf %11, %12 : vector<1x8xf32>
    %cst_7 = arith.constant 9.99999974E-6 : f32
    %14 = vector.broadcast %cst_7 : f32 to vector<1x8xf32>
    %15 = arith.addf %13, %14 : vector<1x8xf32>
    %16 = math.rsqrt %15 : vector<1x8xf32>
    %cst_8 = arith.constant 0.000000e+00 : f32
    %17 = vector.broadcast %cst_8 : f32 to vector<1x8xf32>
    %18 = arith.subf %17, %6 : vector<1x8xf32>
    %19 = arith.mulf %18, %16 : vector<1x8xf32>
    %20 = vector.broadcast %16 : vector<1x8xf32> to vector<256x8xf32>
    %21 = arith.mulf %1, %20 : vector<256x8xf32>
    %22 = vector.broadcast %19 : vector<1x8xf32> to vector<256x8xf32>
    %23 = arith.addf %21, %22 : vector<256x8xf32>
    %cst_9 = arith.constant 0.000000e+00 : f32
    %24 = vector.broadcast %cst_9 : f32 to vector<256x8xf32>
    %25 = arith.cmpf oge, %23, %24 : vector<256x8xf32>
    %cst_10 = arith.constant 2.000000e-01 : f32
    %26 = vector.broadcast %cst_10 : f32 to vector<256x8xf32>
    %27 = arith.mulf %26, %23 : vector<256x8xf32>
    %28 = arith.select %25, %23, %27 : vector<256x8xi1>, vector<256x8xf32>
    %29 = arith.truncf %28 : vector<256x8xf32> to vector<256x8xbf16>
    %c0_11 = arith.constant 0 : index
    %c0_12 = arith.constant 0 : index
    %c0_13 = arith.constant 0 : index
    %30 = vector.load %arg4[%c0_11, %c0_12, %c0_13] : memref<1x256x8xbf16, #tpu.memory_space<vmem>>, vector<1x256x8xbf16>
    %31 = vector.shape_cast %30 : vector<1x256x8xbf16> to vector<256x8xbf16>
    %32 = vector.shape_cast %29 : vector<256x8xbf16> to vector<1x256x8xbf16>
    tpu.vector_store %arg4[%c0_11, %c0_12, %c0_13], %32 {strides = array<i32>} : memref<1x256x8xbf16, #tpu.memory_space<vmem>>, vector<1x256x8xbf16>,
    return
  }
  func.func @transform_0(%arg0: i32, %arg1: i32) -> (i32, i32, i32) {
    %c0_i32 = arith.constant 0 : i32
    %c0_i32_0 = arith.constant 0 : i32
    return %arg0, %arg1, %c0_i32 : i32, i32, i32
  }
  func.func @transform_1(%arg0: i32, %arg1: i32) -> (i32, i32, i32) {
    %c0_i32 = arith.constant 0 : i32
    %c0_i32_0 = arith.constant 0 : i32
    %c0_i32_1 = arith.constant 0 : i32
    return %arg0, %c0_i32, %c0_i32_0 : i32, i32, i32
  }
  func.func @transform_2(%arg0: i32, %arg1: i32) -> (i32, i32, i32) {
    %c0_i32 = arith.constant 0 : i32
    %c0_i32_0 = arith.constant 0 : i32
    return %arg0, %arg1, %c0_i32 : i32, i32, i32
  }
}

module attributes {stable_mosaic.version = 11 : i64} {
  func.func @_mm_stats_kernel(%arg0: i32, %arg1: i32, %arg2: memref<1x256x72xbf16, #tpu.memory_space<vmem>>, %arg3: memref<72x8xbf16, #tpu.memory_space<vmem>>, %arg4: memref<1x256x8xf32, #tpu.memory_space<vmem>>, %arg5: memref<1x2x8xf32, #tpu.memory_space<vmem>>) attributes {dimension_semantics = [#tpu.dimension_semantics<parallel>, #tpu.dimension_semantics<arbitrary>], iteration_bounds = array<i64: 2, 1>, scalar_prefetch = 0 : i64, scratch_operands = 0 : i64, tpu.core_type = #tpu.core_type<tc>, window_params = [{transform_indices = @transform_0, window_bounds = array<i64: 1, 256, 72>}, {pipeline_mode = #tpu.pipeline_mode<synchronous>, transform_indices = @transform_1, window_bounds = array<i64: 72, 8>}, {transform_indices = @transform_2, window_bounds = array<i64: 1, 256, 8>}, {transform_indices = @transform_3, window_bounds = array<i64: 1, 2, 8>}]} {
    %c0 = arith.constant 0 : index
    %c0_0 = arith.constant 0 : index
    %c0_1 = arith.constant 0 : index
    %0 = vector.load %arg2[%c0, %c0_0, %c0_1] : memref<1x256x72xbf16, #tpu.memory_space<vmem>>, vector<1x256x72xbf16>
    %1 = vector.shape_cast %0 : vector<1x256x72xbf16> to vector<256x72xbf16>
    %c0_2 = arith.constant 0 : index
    %c0_3 = arith.constant 0 : index
    %2 = vector.load %arg3[%c0_2, %c0_3] : memref<72x8xbf16, #tpu.memory_space<vmem>>, vector<72x8xbf16>
    %cst = arith.constant dense<0.000000e+00> : vector<256x8xf32>
    %3 = tpu.matmul %1, %2, %cst {dimension_numbers = #tpu.dot_dimension_numbers<[1], [0], [0], [1], [0, 0, 1, 1], [], []>} : vector<256x72xbf16>, vector<72x8xbf16>, vector<256x8xf32> -> vector<256x8xf32>
    %c0_4 = arith.constant 0 : index
    %c0_5 = arith.constant 0 : index
    %c0_6 = arith.constant 0 : index
    %4 = vector.load %arg4[%c0_4, %c0_5, %c0_6] : memref<1x256x8xf32, #tpu.memory_space<vmem>>, vector<1x256x8xf32>
    %5 = vector.shape_cast %4 : vector<1x256x8xf32> to vector<256x8xf32>
    %6 = vector.shape_cast %3 : vector<256x8xf32> to vector<1x256x8xf32>
    tpu.vector_store %arg4[%c0_4, %c0_5, %c0_6], %6 {strides = array<i32>} : memref<1x256x8xf32, #tpu.memory_space<vmem>>, vector<1x256x8xf32>,
    %cst_7 = arith.constant dense<0.000000e+00> : vector<8xf32>
    %7 = vector.multi_reduction <add>, %3, %cst_7 [0] : vector<256x8xf32> to vector<8xf32>
    %8 = vector.shape_cast %7 : vector<8xf32> to vector<1x8xf32>
    %9 = arith.mulf %3, %3 : vector<256x8xf32>
    %cst_8 = arith.constant dense<0.000000e+00> : vector<8xf32>
    %10 = vector.multi_reduction <add>, %9, %cst_8 [0] : vector<256x8xf32> to vector<8xf32>
    %11 = vector.shape_cast %10 : vector<8xf32> to vector<1x8xf32>
    %12 = tpu.concatenate %8, %11 in 0 : vector<1x8xf32>, vector<1x8xf32> -> vector<2x8xf32>
    %c0_i32 = arith.constant 0 : i32
    %13 = arith.cmpi eq, %arg1, %c0_i32 : i32
    %14 = arith.extui %13 : i1 to i32
    %c0_i32_9 = arith.constant 0 : i32
    %15 = arith.cmpi ne, %14, %c0_i32_9 : i32
    scf.if %15 {
      %cst_16 = arith.constant 0.000000e+00 : f32
      %22 = vector.broadcast %cst_16 : f32 to vector<1x2x8xf32>
      %c0_17 = arith.constant 0 : index
      %c0_18 = arith.constant 0 : index
      %c0_19 = arith.constant 0 : index
      %23 = vector.load %arg5[%c0_17, %c0_18, %c0_19] : memref<1x2x8xf32, #tpu.memory_space<vmem>>, vector<1x2x8xf32>
      tpu.vector_store %arg5[%c0_17, %c0_18, %c0_19], %22 {strides = array<i32>} : memref<1x2x8xf32, #tpu.memory_space<vmem>>, vector<1x2x8xf32>,
    } else {
    }
    %c0_10 = arith.constant 0 : index
    %c0_11 = arith.constant 0 : index
    %c0_12 = arith.constant 0 : index
    %16 = vector.load %arg5[%c0_10, %c0_11, %c0_12] : memref<1x2x8xf32, #tpu.memory_space<vmem>>, vector<1x2x8xf32>
    %17 = vector.shape_cast %16 : vector<1x2x8xf32> to vector<2x8xf32>
    %18 = arith.addf %17, %12 : vector<2x8xf32>
    %c0_13 = arith.constant 0 : index
    %c0_14 = arith.constant 0 : index
    %c0_15 = arith.constant 0 : index
    %19 = vector.load %arg5[%c0_13, %c0_14, %c0_15] : memref<1x2x8xf32, #tpu.memory_space<vmem>>, vector<1x2x8xf32>
    %20 = vector.shape_cast %19 : vector<1x2x8xf32> to vector<2x8xf32>
    %21 = vector.shape_cast %18 : vector<2x8xf32> to vector<1x2x8xf32>
    tpu.vector_store %arg5[%c0_13, %c0_14, %c0_15], %21 {strides = array<i32>} : memref<1x2x8xf32, #tpu.memory_space<vmem>>, vector<1x2x8xf32>,
    return
  }
  func.func @transform_0(%arg0: i32, %arg1: i32) -> (i32, i32, i32) {
    %c0_i32 = arith.constant 0 : i32
    %c0_i32_0 = arith.constant 0 : i32
    return %arg0, %arg1, %c0_i32 : i32, i32, i32
  }
  func.func @transform_1(%arg0: i32, %arg1: i32) -> (i32, i32) {
    %c0_i32 = arith.constant 0 : i32
    %c0_i32_0 = arith.constant 0 : i32
    %c0_i32_1 = arith.constant 0 : i32
    return %c0_i32, %c0_i32_0 : i32, i32
  }
  func.func @transform_2(%arg0: i32, %arg1: i32) -> (i32, i32, i32) {
    %c0_i32 = arith.constant 0 : i32
    %c0_i32_0 = arith.constant 0 : i32
    return %arg0, %arg1, %c0_i32 : i32, i32, i32
  }
  func.func @transform_3(%arg0: i32, %arg1: i32) -> (i32, i32, i32) {
    %c0_i32 = arith.constant 0 : i32
    %c0_i32_0 = arith.constant 0 : i32
    %c0_i32_1 = arith.constant 0 : i32
    return %arg0, %c0_i32, %c0_i32_0 : i32, i32, i32
  }
}

module attributes {stable_mosaic.version = 11 : i64} {
  func.func @_avgpool_kernel(%arg0: i32, %arg1: i32, %arg2: memref<1x64x32xbf16, #tpu.memory_space<vmem>>, %arg3: memref<1x64x8xbf16, #tpu.memory_space<vmem>>) attributes {dimension_semantics = [#tpu.dimension_semantics<parallel>, #tpu.dimension_semantics<parallel>], iteration_bounds = array<i64: 2, 1>, scalar_prefetch = 0 : i64, scratch_operands = 0 : i64, tpu.core_type = #tpu.core_type<tc>, window_params = [{transform_indices = @transform_0, window_bounds = array<i64: 1, 64, 32>}, {transform_indices = @transform_1, window_bounds = array<i64: 1, 64, 8>}]} {
    %c0 = arith.constant 0 : index
    %c0_0 = arith.constant 0 : index
    %c0_1 = arith.constant 0 : index
    %0 = vector.load %arg2[%c0, %c0_0, %c0_1] : memref<1x64x32xbf16, #tpu.memory_space<vmem>>, vector<1x64x32xbf16>
    %1 = vector.shape_cast %0 : vector<1x64x32xbf16> to vector<64x32xbf16>
    %2 = arith.extf %1 : vector<64x32xbf16> to vector<64x32xf32>
    %3 = vector.extract_strided_slice %2 {offsets = [0, 0], sizes = [64, 8], strides = [1, 1]} : vector<64x32xf32> to vector<64x8xf32>
    %4 = vector.extract_strided_slice %2 {offsets = [0, 8], sizes = [64, 8], strides = [1, 1]} : vector<64x32xf32> to vector<64x8xf32>
    %5 = arith.addf %3, %4 : vector<64x8xf32>
    %6 = vector.extract_strided_slice %2 {offsets = [0, 16], sizes = [64, 8], strides = [1, 1]} : vector<64x32xf32> to vector<64x8xf32>
    %7 = arith.addf %5, %6 : vector<64x8xf32>
    %8 = vector.extract_strided_slice %2 {offsets = [0, 24], sizes = [64, 8], strides = [1, 1]} : vector<64x32xf32> to vector<64x8xf32>
    %9 = arith.addf %7, %8 : vector<64x8xf32>
    %cst = arith.constant 2.500000e-01 : f32
    %10 = vector.broadcast %cst : f32 to vector<64x8xf32>
    %11 = arith.mulf %10, %9 : vector<64x8xf32>
    %12 = arith.truncf %11 : vector<64x8xf32> to vector<64x8xbf16>
    %c0_2 = arith.constant 0 : index
    %c0_3 = arith.constant 0 : index
    %c0_4 = arith.constant 0 : index
    %13 = vector.load %arg3[%c0_2, %c0_3, %c0_4] : memref<1x64x8xbf16, #tpu.memory_space<vmem>>, vector<1x64x8xbf16>
    %14 = vector.shape_cast %13 : vector<1x64x8xbf16> to vector<64x8xbf16>
    %15 = vector.shape_cast %12 : vector<64x8xbf16> to vector<1x64x8xbf16>
    tpu.vector_store %arg3[%c0_2, %c0_3, %c0_4], %15 {strides = array<i32>} : memref<1x64x8xbf16, #tpu.memory_space<vmem>>, vector<1x64x8xbf16>,
    return
  }
  func.func @transform_0(%arg0: i32, %arg1: i32) -> (i32, i32, i32) {
    %c0_i32 = arith.constant 0 : i32
    %c0_i32_0 = arith.constant 0 : i32
    return %arg0, %arg1, %c0_i32 : i32, i32, i32
  }
  func.func @transform_1(%arg0: i32, %arg1: i32) -> (i32, i32, i32) {
    %c0_i32 = arith.constant 0 : i32
    %c0_i32_0 = arith.constant 0 : i32
    return %arg0, %arg1, %c0_i32 : i32, i32, i32
  }
}

module attributes {stable_mosaic.version = 11 : i64} {
  func.func @_mm_stats_kernel(%arg0: i32, %arg1: i32, %arg2: memref<1x64x72xbf16, #tpu.memory_space<vmem>>, %arg3: memref<72x16xbf16, #tpu.memory_space<vmem>>, %arg4: memref<1x64x16xf32, #tpu.memory_space<vmem>>, %arg5: memref<1x2x16xf32, #tpu.memory_space<vmem>>) attributes {dimension_semantics = [#tpu.dimension_semantics<parallel>, #tpu.dimension_semantics<arbitrary>], iteration_bounds = array<i64: 2, 1>, scalar_prefetch = 0 : i64, scratch_operands = 0 : i64, tpu.core_type = #tpu.core_type<tc>, window_params = [{transform_indices = @transform_0, window_bounds = array<i64: 1, 64, 72>}, {pipeline_mode = #tpu.pipeline_mode<synchronous>, transform_indices = @transform_1, window_bounds = array<i64: 72, 16>}, {transform_indices = @transform_2, window_bounds = array<i64: 1, 64, 16>}, {transform_indices = @transform_3, window_bounds = array<i64: 1, 2, 16>}]} {
    %c0 = arith.constant 0 : index
    %c0_0 = arith.constant 0 : index
    %c0_1 = arith.constant 0 : index
    %0 = vector.load %arg2[%c0, %c0_0, %c0_1] : memref<1x64x72xbf16, #tpu.memory_space<vmem>>, vector<1x64x72xbf16>
    %1 = vector.shape_cast %0 : vector<1x64x72xbf16> to vector<64x72xbf16>
    %c0_2 = arith.constant 0 : index
    %c0_3 = arith.constant 0 : index
    %2 = vector.load %arg3[%c0_2, %c0_3] : memref<72x16xbf16, #tpu.memory_space<vmem>>, vector<72x16xbf16>
    %cst = arith.constant dense<0.000000e+00> : vector<64x16xf32>
    %3 = tpu.matmul %1, %2, %cst {dimension_numbers = #tpu.dot_dimension_numbers<[1], [0], [0], [1], [0, 0, 1, 1], [], []>} : vector<64x72xbf16>, vector<72x16xbf16>, vector<64x16xf32> -> vector<64x16xf32>
    %c0_4 = arith.constant 0 : index
    %c0_5 = arith.constant 0 : index
    %c0_6 = arith.constant 0 : index
    %4 = vector.load %arg4[%c0_4, %c0_5, %c0_6] : memref<1x64x16xf32, #tpu.memory_space<vmem>>, vector<1x64x16xf32>
    %5 = vector.shape_cast %4 : vector<1x64x16xf32> to vector<64x16xf32>
    %6 = vector.shape_cast %3 : vector<64x16xf32> to vector<1x64x16xf32>
    tpu.vector_store %arg4[%c0_4, %c0_5, %c0_6], %6 {strides = array<i32>} : memref<1x64x16xf32, #tpu.memory_space<vmem>>, vector<1x64x16xf32>,
    %cst_7 = arith.constant dense<0.000000e+00> : vector<16xf32>
    %7 = vector.multi_reduction <add>, %3, %cst_7 [0] : vector<64x16xf32> to vector<16xf32>
    %8 = vector.shape_cast %7 : vector<16xf32> to vector<1x16xf32>
    %9 = arith.mulf %3, %3 : vector<64x16xf32>
    %cst_8 = arith.constant dense<0.000000e+00> : vector<16xf32>
    %10 = vector.multi_reduction <add>, %9, %cst_8 [0] : vector<64x16xf32> to vector<16xf32>
    %11 = vector.shape_cast %10 : vector<16xf32> to vector<1x16xf32>
    %12 = tpu.concatenate %8, %11 in 0 : vector<1x16xf32>, vector<1x16xf32> -> vector<2x16xf32>
    %c0_i32 = arith.constant 0 : i32
    %13 = arith.cmpi eq, %arg1, %c0_i32 : i32
    %14 = arith.extui %13 : i1 to i32
    %c0_i32_9 = arith.constant 0 : i32
    %15 = arith.cmpi ne, %14, %c0_i32_9 : i32
    scf.if %15 {
      %cst_16 = arith.constant 0.000000e+00 : f32
      %22 = vector.broadcast %cst_16 : f32 to vector<1x2x16xf32>
      %c0_17 = arith.constant 0 : index
      %c0_18 = arith.constant 0 : index
      %c0_19 = arith.constant 0 : index
      %23 = vector.load %arg5[%c0_17, %c0_18, %c0_19] : memref<1x2x16xf32, #tpu.memory_space<vmem>>, vector<1x2x16xf32>
      tpu.vector_store %arg5[%c0_17, %c0_18, %c0_19], %22 {strides = array<i32>} : memref<1x2x16xf32, #tpu.memory_space<vmem>>, vector<1x2x16xf32>,
    } else {
    }
    %c0_10 = arith.constant 0 : index
    %c0_11 = arith.constant 0 : index
    %c0_12 = arith.constant 0 : index
    %16 = vector.load %arg5[%c0_10, %c0_11, %c0_12] : memref<1x2x16xf32, #tpu.memory_space<vmem>>, vector<1x2x16xf32>
    %17 = vector.shape_cast %16 : vector<1x2x16xf32> to vector<2x16xf32>
    %18 = arith.addf %17, %12 : vector<2x16xf32>
    %c0_13 = arith.constant 0 : index
    %c0_14 = arith.constant 0 : index
    %c0_15 = arith.constant 0 : index
    %19 = vector.load %arg5[%c0_13, %c0_14, %c0_15] : memref<1x2x16xf32, #tpu.memory_space<vmem>>, vector<1x2x16xf32>
    %20 = vector.shape_cast %19 : vector<1x2x16xf32> to vector<2x16xf32>
    %21 = vector.shape_cast %18 : vector<2x16xf32> to vector<1x2x16xf32>
    tpu.vector_store %arg5[%c0_13, %c0_14, %c0_15], %21 {strides = array<i32>} : memref<1x2x16xf32, #tpu.memory_space<vmem>>, vector<1x2x16xf32>,
    return
  }
  func.func @transform_0(%arg0: i32, %arg1: i32) -> (i32, i32, i32) {
    %c0_i32 = arith.constant 0 : i32
    %c0_i32_0 = arith.constant 0 : i32
    return %arg0, %arg1, %c0_i32 : i32, i32, i32
  }
  func.func @transform_1(%arg0: i32, %arg1: i32) -> (i32, i32) {
    %c0_i32 = arith.constant 0 : i32
    %c0_i32_0 = arith.constant 0 : i32
    %c0_i32_1 = arith.constant 0 : i32
    return %c0_i32, %c0_i32_0 : i32, i32
  }
  func.func @transform_2(%arg0: i32, %arg1: i32) -> (i32, i32, i32) {
    %c0_i32 = arith.constant 0 : i32
    %c0_i32_0 = arith.constant 0 : i32
    return %arg0, %arg1, %c0_i32 : i32, i32, i32
  }
  func.func @transform_3(%arg0: i32, %arg1: i32) -> (i32, i32, i32) {
    %c0_i32 = arith.constant 0 : i32
    %c0_i32_0 = arith.constant 0 : i32
    %c0_i32_1 = arith.constant 0 : i32
    return %arg0, %c0_i32, %c0_i32_0 : i32, i32, i32
  }
}

module attributes {stable_mosaic.version = 11 : i64} {
  func.func @_norm_lrelu_kernel(%arg0: i32, %arg1: i32, %arg2: memref<1x64x16xf32, #tpu.memory_space<vmem>>, %arg3: memref<1x2x16xf32, #tpu.memory_space<vmem>>, %arg4: memref<1x64x16xbf16, #tpu.memory_space<vmem>>) attributes {dimension_semantics = [#tpu.dimension_semantics<parallel>, #tpu.dimension_semantics<parallel>], iteration_bounds = array<i64: 2, 1>, scalar_prefetch = 0 : i64, scratch_operands = 0 : i64, tpu.core_type = #tpu.core_type<tc>, window_params = [{transform_indices = @transform_0, window_bounds = array<i64: 1, 64, 16>}, {transform_indices = @transform_1, window_bounds = array<i64: 1, 2, 16>}, {transform_indices = @transform_2, window_bounds = array<i64: 1, 64, 16>}]} {
    %c0 = arith.constant 0 : index
    %c0_0 = arith.constant 0 : index
    %c0_1 = arith.constant 0 : index
    %0 = vector.load %arg2[%c0, %c0_0, %c0_1] : memref<1x64x16xf32, #tpu.memory_space<vmem>>, vector<1x64x16xf32>
    %1 = vector.shape_cast %0 : vector<1x64x16xf32> to vector<64x16xf32>
    %c0_2 = arith.constant 0 : index
    %c0_3 = arith.constant 0 : index
    %c0_4 = arith.constant 0 : index
    %2 = vector.load %arg3[%c0_2, %c0_3, %c0_4] : memref<1x2x16xf32, #tpu.memory_space<vmem>>, vector<1x2x16xf32>
    %3 = vector.shape_cast %2 : vector<1x2x16xf32> to vector<2x16xf32>
    %4 = vector.extract_strided_slice %3 {offsets = [0, 0], sizes = [1, 16], strides = [1, 1]} : vector<2x16xf32> to vector<1x16xf32>
    %cst = arith.constant 1.562500e-02 : f32
    %5 = vector.broadcast %cst : f32 to vector<1x16xf32>
    %6 = arith.mulf %4, %5 : vector<1x16xf32>
    %7 = vector.extract_strided_slice %3 {offsets = [1, 0], sizes = [1, 16], strides = [1, 1]} : vector<2x16xf32> to vector<1x16xf32>
    %cst_5 = arith.constant 1.562500e-02 : f32
    %8 = vector.broadcast %cst_5 : f32 to vector<1x16xf32>
    %9 = arith.mulf %7, %8 : vector<1x16xf32>
    %10 = arith.mulf %6, %6 : vector<1x16xf32>
    %11 = arith.subf %9, %10 : vector<1x16xf32>
    %cst_6 = arith.constant 0.000000e+00 : f32
    %12 = vector.broadcast %cst_6 : f32 to vector<1x16xf32>
    %13 = arith.maximumf %11, %12 : vector<1x16xf32>
    %cst_7 = arith.constant 9.99999974E-6 : f32
    %14 = vector.broadcast %cst_7 : f32 to vector<1x16xf32>
    %15 = arith.addf %13, %14 : vector<1x16xf32>
    %16 = math.rsqrt %15 : vector<1x16xf32>
    %cst_8 = arith.constant 0.000000e+00 : f32
    %17 = vector.broadcast %cst_8 : f32 to vector<1x16xf32>
    %18 = arith.subf %17, %6 : vector<1x16xf32>
    %19 = arith.mulf %18, %16 : vector<1x16xf32>
    %20 = vector.broadcast %16 : vector<1x16xf32> to vector<64x16xf32>
    %21 = arith.mulf %1, %20 : vector<64x16xf32>
    %22 = vector.broadcast %19 : vector<1x16xf32> to vector<64x16xf32>
    %23 = arith.addf %21, %22 : vector<64x16xf32>
    %cst_9 = arith.constant 0.000000e+00 : f32
    %24 = vector.broadcast %cst_9 : f32 to vector<64x16xf32>
    %25 = arith.cmpf oge, %23, %24 : vector<64x16xf32>
    %cst_10 = arith.constant 2.000000e-01 : f32
    %26 = vector.broadcast %cst_10 : f32 to vector<64x16xf32>
    %27 = arith.mulf %26, %23 : vector<64x16xf32>
    %28 = arith.select %25, %23, %27 : vector<64x16xi1>, vector<64x16xf32>
    %29 = arith.truncf %28 : vector<64x16xf32> to vector<64x16xbf16>
    %c0_11 = arith.constant 0 : index
    %c0_12 = arith.constant 0 : index
    %c0_13 = arith.constant 0 : index
    %30 = vector.load %arg4[%c0_11, %c0_12, %c0_13] : memref<1x64x16xbf16, #tpu.memory_space<vmem>>, vector<1x64x16xbf16>
    %31 = vector.shape_cast %30 : vector<1x64x16xbf16> to vector<64x16xbf16>
    %32 = vector.shape_cast %29 : vector<64x16xbf16> to vector<1x64x16xbf16>
    tpu.vector_store %arg4[%c0_11, %c0_12, %c0_13], %32 {strides = array<i32>} : memref<1x64x16xbf16, #tpu.memory_space<vmem>>, vector<1x64x16xbf16>,
    return
  }
  func.func @transform_0(%arg0: i32, %arg1: i32) -> (i32, i32, i32) {
    %c0_i32 = arith.constant 0 : i32
    %c0_i32_0 = arith.constant 0 : i32
    return %arg0, %arg1, %c0_i32 : i32, i32, i32
  }
  func.func @transform_1(%arg0: i32, %arg1: i32) -> (i32, i32, i32) {
    %c0_i32 = arith.constant 0 : i32
    %c0_i32_0 = arith.constant 0 : i32
    %c0_i32_1 = arith.constant 0 : i32
    return %arg0, %c0_i32, %c0_i32_0 : i32, i32, i32
  }
  func.func @transform_2(%arg0: i32, %arg1: i32) -> (i32, i32, i32) {
    %c0_i32 = arith.constant 0 : i32
    %c0_i32_0 = arith.constant 0 : i32
    return %arg0, %arg1, %c0_i32 : i32, i32, i32
  }
}

module attributes {stable_mosaic.version = 11 : i64} {
  func.func @_mm_stats_kernel(%arg0: i32, %arg1: i32, %arg2: memref<1x64x144xbf16, #tpu.memory_space<vmem>>, %arg3: memref<144x16xbf16, #tpu.memory_space<vmem>>, %arg4: memref<1x64x16xf32, #tpu.memory_space<vmem>>, %arg5: memref<1x2x16xf32, #tpu.memory_space<vmem>>) attributes {dimension_semantics = [#tpu.dimension_semantics<parallel>, #tpu.dimension_semantics<arbitrary>], iteration_bounds = array<i64: 2, 1>, scalar_prefetch = 0 : i64, scratch_operands = 0 : i64, tpu.core_type = #tpu.core_type<tc>, window_params = [{transform_indices = @transform_0, window_bounds = array<i64: 1, 64, 144>}, {pipeline_mode = #tpu.pipeline_mode<synchronous>, transform_indices = @transform_1, window_bounds = array<i64: 144, 16>}, {transform_indices = @transform_2, window_bounds = array<i64: 1, 64, 16>}, {transform_indices = @transform_3, window_bounds = array<i64: 1, 2, 16>}]} {
    %c0 = arith.constant 0 : index
    %c0_0 = arith.constant 0 : index
    %c0_1 = arith.constant 0 : index
    %0 = vector.load %arg2[%c0, %c0_0, %c0_1] : memref<1x64x144xbf16, #tpu.memory_space<vmem>>, vector<1x64x144xbf16>
    %1 = vector.shape_cast %0 : vector<1x64x144xbf16> to vector<64x144xbf16>
    %c0_2 = arith.constant 0 : index
    %c0_3 = arith.constant 0 : index
    %2 = vector.load %arg3[%c0_2, %c0_3] : memref<144x16xbf16, #tpu.memory_space<vmem>>, vector<144x16xbf16>
    %cst = arith.constant dense<0.000000e+00> : vector<64x16xf32>
    %3 = tpu.matmul %1, %2, %cst {dimension_numbers = #tpu.dot_dimension_numbers<[1], [0], [0], [1], [0, 0, 1, 1], [], []>} : vector<64x144xbf16>, vector<144x16xbf16>, vector<64x16xf32> -> vector<64x16xf32>
    %c0_4 = arith.constant 0 : index
    %c0_5 = arith.constant 0 : index
    %c0_6 = arith.constant 0 : index
    %4 = vector.load %arg4[%c0_4, %c0_5, %c0_6] : memref<1x64x16xf32, #tpu.memory_space<vmem>>, vector<1x64x16xf32>
    %5 = vector.shape_cast %4 : vector<1x64x16xf32> to vector<64x16xf32>
    %6 = vector.shape_cast %3 : vector<64x16xf32> to vector<1x64x16xf32>
    tpu.vector_store %arg4[%c0_4, %c0_5, %c0_6], %6 {strides = array<i32>} : memref<1x64x16xf32, #tpu.memory_space<vmem>>, vector<1x64x16xf32>,
    %cst_7 = arith.constant dense<0.000000e+00> : vector<16xf32>
    %7 = vector.multi_reduction <add>, %3, %cst_7 [0] : vector<64x16xf32> to vector<16xf32>
    %8 = vector.shape_cast %7 : vector<16xf32> to vector<1x16xf32>
    %9 = arith.mulf %3, %3 : vector<64x16xf32>
    %cst_8 = arith.constant dense<0.000000e+00> : vector<16xf32>
    %10 = vector.multi_reduction <add>, %9, %cst_8 [0] : vector<64x16xf32> to vector<16xf32>
    %11 = vector.shape_cast %10 : vector<16xf32> to vector<1x16xf32>
    %12 = tpu.concatenate %8, %11 in 0 : vector<1x16xf32>, vector<1x16xf32> -> vector<2x16xf32>
    %c0_i32 = arith.constant 0 : i32
    %13 = arith.cmpi eq, %arg1, %c0_i32 : i32
    %14 = arith.extui %13 : i1 to i32
    %c0_i32_9 = arith.constant 0 : i32
    %15 = arith.cmpi ne, %14, %c0_i32_9 : i32
    scf.if %15 {
      %cst_16 = arith.constant 0.000000e+00 : f32
      %22 = vector.broadcast %cst_16 : f32 to vector<1x2x16xf32>
      %c0_17 = arith.constant 0 : index
      %c0_18 = arith.constant 0 : index
      %c0_19 = arith.constant 0 : index
      %23 = vector.load %arg5[%c0_17, %c0_18, %c0_19] : memref<1x2x16xf32, #tpu.memory_space<vmem>>, vector<1x2x16xf32>
      tpu.vector_store %arg5[%c0_17, %c0_18, %c0_19], %22 {strides = array<i32>} : memref<1x2x16xf32, #tpu.memory_space<vmem>>, vector<1x2x16xf32>,
    } else {
    }
    %c0_10 = arith.constant 0 : index
    %c0_11 = arith.constant 0 : index
    %c0_12 = arith.constant 0 : index
    %16 = vector.load %arg5[%c0_10, %c0_11, %c0_12] : memref<1x2x16xf32, #tpu.memory_space<vmem>>, vector<1x2x16xf32>
    %17 = vector.shape_cast %16 : vector<1x2x16xf32> to vector<2x16xf32>
    %18 = arith.addf %17, %12 : vector<2x16xf32>
    %c0_13 = arith.constant 0 : index
    %c0_14 = arith.constant 0 : index
    %c0_15 = arith.constant 0 : index
    %19 = vector.load %arg5[%c0_13, %c0_14, %c0_15] : memref<1x2x16xf32, #tpu.memory_space<vmem>>, vector<1x2x16xf32>
    %20 = vector.shape_cast %19 : vector<1x2x16xf32> to vector<2x16xf32>
    %21 = vector.shape_cast %18 : vector<2x16xf32> to vector<1x2x16xf32>
    tpu.vector_store %arg5[%c0_13, %c0_14, %c0_15], %21 {strides = array<i32>} : memref<1x2x16xf32, #tpu.memory_space<vmem>>, vector<1x2x16xf32>,
    return
  }
  func.func @transform_0(%arg0: i32, %arg1: i32) -> (i32, i32, i32) {
    %c0_i32 = arith.constant 0 : i32
    %c0_i32_0 = arith.constant 0 : i32
    return %arg0, %arg1, %c0_i32 : i32, i32, i32
  }
  func.func @transform_1(%arg0: i32, %arg1: i32) -> (i32, i32) {
    %c0_i32 = arith.constant 0 : i32
    %c0_i32_0 = arith.constant 0 : i32
    %c0_i32_1 = arith.constant 0 : i32
    return %c0_i32, %c0_i32_0 : i32, i32
  }
  func.func @transform_2(%arg0: i32, %arg1: i32) -> (i32, i32, i32) {
    %c0_i32 = arith.constant 0 : i32
    %c0_i32_0 = arith.constant 0 : i32
    return %arg0, %arg1, %c0_i32 : i32, i32, i32
  }
  func.func @transform_3(%arg0: i32, %arg1: i32) -> (i32, i32, i32) {
    %c0_i32 = arith.constant 0 : i32
    %c0_i32_0 = arith.constant 0 : i32
    %c0_i32_1 = arith.constant 0 : i32
    return %arg0, %c0_i32, %c0_i32_0 : i32, i32, i32
  }
}

module attributes {stable_mosaic.version = 11 : i64} {
  func.func @_avgpool_kernel(%arg0: i32, %arg1: i32, %arg2: memref<1x16x64xbf16, #tpu.memory_space<vmem>>, %arg3: memref<1x16x16xbf16, #tpu.memory_space<vmem>>) attributes {dimension_semantics = [#tpu.dimension_semantics<parallel>, #tpu.dimension_semantics<parallel>], iteration_bounds = array<i64: 2, 1>, scalar_prefetch = 0 : i64, scratch_operands = 0 : i64, tpu.core_type = #tpu.core_type<tc>, window_params = [{transform_indices = @transform_0, window_bounds = array<i64: 1, 16, 64>}, {transform_indices = @transform_1, window_bounds = array<i64: 1, 16, 16>}]} {
    %c0 = arith.constant 0 : index
    %c0_0 = arith.constant 0 : index
    %c0_1 = arith.constant 0 : index
    %0 = vector.load %arg2[%c0, %c0_0, %c0_1] : memref<1x16x64xbf16, #tpu.memory_space<vmem>>, vector<1x16x64xbf16>
    %1 = vector.shape_cast %0 : vector<1x16x64xbf16> to vector<16x64xbf16>
    %2 = arith.extf %1 : vector<16x64xbf16> to vector<16x64xf32>
    %3 = vector.extract_strided_slice %2 {offsets = [0, 0], sizes = [16, 16], strides = [1, 1]} : vector<16x64xf32> to vector<16x16xf32>
    %4 = vector.extract_strided_slice %2 {offsets = [0, 16], sizes = [16, 16], strides = [1, 1]} : vector<16x64xf32> to vector<16x16xf32>
    %5 = arith.addf %3, %4 : vector<16x16xf32>
    %6 = vector.extract_strided_slice %2 {offsets = [0, 32], sizes = [16, 16], strides = [1, 1]} : vector<16x64xf32> to vector<16x16xf32>
    %7 = arith.addf %5, %6 : vector<16x16xf32>
    %8 = vector.extract_strided_slice %2 {offsets = [0, 48], sizes = [16, 16], strides = [1, 1]} : vector<16x64xf32> to vector<16x16xf32>
    %9 = arith.addf %7, %8 : vector<16x16xf32>
    %cst = arith.constant 2.500000e-01 : f32
    %10 = vector.broadcast %cst : f32 to vector<16x16xf32>
    %11 = arith.mulf %10, %9 : vector<16x16xf32>
    %12 = arith.truncf %11 : vector<16x16xf32> to vector<16x16xbf16>
    %c0_2 = arith.constant 0 : index
    %c0_3 = arith.constant 0 : index
    %c0_4 = arith.constant 0 : index
    %13 = vector.load %arg3[%c0_2, %c0_3, %c0_4] : memref<1x16x16xbf16, #tpu.memory_space<vmem>>, vector<1x16x16xbf16>
    %14 = vector.shape_cast %13 : vector<1x16x16xbf16> to vector<16x16xbf16>
    %15 = vector.shape_cast %12 : vector<16x16xbf16> to vector<1x16x16xbf16>
    tpu.vector_store %arg3[%c0_2, %c0_3, %c0_4], %15 {strides = array<i32>} : memref<1x16x16xbf16, #tpu.memory_space<vmem>>, vector<1x16x16xbf16>,
    return
  }
  func.func @transform_0(%arg0: i32, %arg1: i32) -> (i32, i32, i32) {
    %c0_i32 = arith.constant 0 : i32
    %c0_i32_0 = arith.constant 0 : i32
    return %arg0, %arg1, %c0_i32 : i32, i32, i32
  }
  func.func @transform_1(%arg0: i32, %arg1: i32) -> (i32, i32, i32) {
    %c0_i32 = arith.constant 0 : i32
    %c0_i32_0 = arith.constant 0 : i32
    return %arg0, %arg1, %c0_i32 : i32, i32, i32
  }
}

module attributes {stable_mosaic.version = 11 : i64} {
  func.func @_norm_lrelu_kernel(%arg0: i32, %arg1: i32, %arg2: memref<1x16x32xf32, #tpu.memory_space<vmem>>, %arg3: memref<1x2x32xf32, #tpu.memory_space<vmem>>, %arg4: memref<1x16x32xbf16, #tpu.memory_space<vmem>>) attributes {dimension_semantics = [#tpu.dimension_semantics<parallel>, #tpu.dimension_semantics<parallel>], iteration_bounds = array<i64: 2, 1>, scalar_prefetch = 0 : i64, scratch_operands = 0 : i64, tpu.core_type = #tpu.core_type<tc>, window_params = [{transform_indices = @transform_0, window_bounds = array<i64: 1, 16, 32>}, {transform_indices = @transform_1, window_bounds = array<i64: 1, 2, 32>}, {transform_indices = @transform_2, window_bounds = array<i64: 1, 16, 32>}]} {
    %c0 = arith.constant 0 : index
    %c0_0 = arith.constant 0 : index
    %c0_1 = arith.constant 0 : index
    %0 = vector.load %arg2[%c0, %c0_0, %c0_1] : memref<1x16x32xf32, #tpu.memory_space<vmem>>, vector<1x16x32xf32>
    %1 = vector.shape_cast %0 : vector<1x16x32xf32> to vector<16x32xf32>
    %c0_2 = arith.constant 0 : index
    %c0_3 = arith.constant 0 : index
    %c0_4 = arith.constant 0 : index
    %2 = vector.load %arg3[%c0_2, %c0_3, %c0_4] : memref<1x2x32xf32, #tpu.memory_space<vmem>>, vector<1x2x32xf32>
    %3 = vector.shape_cast %2 : vector<1x2x32xf32> to vector<2x32xf32>
    %4 = vector.extract_strided_slice %3 {offsets = [0, 0], sizes = [1, 32], strides = [1, 1]} : vector<2x32xf32> to vector<1x32xf32>
    %cst = arith.constant 6.250000e-02 : f32
    %5 = vector.broadcast %cst : f32 to vector<1x32xf32>
    %6 = arith.mulf %4, %5 : vector<1x32xf32>
    %7 = vector.extract_strided_slice %3 {offsets = [1, 0], sizes = [1, 32], strides = [1, 1]} : vector<2x32xf32> to vector<1x32xf32>
    %cst_5 = arith.constant 6.250000e-02 : f32
    %8 = vector.broadcast %cst_5 : f32 to vector<1x32xf32>
    %9 = arith.mulf %7, %8 : vector<1x32xf32>
    %10 = arith.mulf %6, %6 : vector<1x32xf32>
    %11 = arith.subf %9, %10 : vector<1x32xf32>
    %cst_6 = arith.constant 0.000000e+00 : f32
    %12 = vector.broadcast %cst_6 : f32 to vector<1x32xf32>
    %13 = arith.maximumf %11, %12 : vector<1x32xf32>
    %cst_7 = arith.constant 9.99999974E-6 : f32
    %14 = vector.broadcast %cst_7 : f32 to vector<1x32xf32>
    %15 = arith.addf %13, %14 : vector<1x32xf32>
    %16 = math.rsqrt %15 : vector<1x32xf32>
    %cst_8 = arith.constant 0.000000e+00 : f32
    %17 = vector.broadcast %cst_8 : f32 to vector<1x32xf32>
    %18 = arith.subf %17, %6 : vector<1x32xf32>
    %19 = arith.mulf %18, %16 : vector<1x32xf32>
    %20 = vector.broadcast %16 : vector<1x32xf32> to vector<16x32xf32>
    %21 = arith.mulf %1, %20 : vector<16x32xf32>
    %22 = vector.broadcast %19 : vector<1x32xf32> to vector<16x32xf32>
    %23 = arith.addf %21, %22 : vector<16x32xf32>
    %cst_9 = arith.constant 0.000000e+00 : f32
    %24 = vector.broadcast %cst_9 : f32 to vector<16x32xf32>
    %25 = arith.cmpf oge, %23, %24 : vector<16x32xf32>
    %cst_10 = arith.constant 2.000000e-01 : f32
    %26 = vector.broadcast %cst_10 : f32 to vector<16x32xf32>
    %27 = arith.mulf %26, %23 : vector<16x32xf32>
    %28 = arith.select %25, %23, %27 : vector<16x32xi1>, vector<16x32xf32>
    %29 = arith.truncf %28 : vector<16x32xf32> to vector<16x32xbf16>
    %c0_11 = arith.constant 0 : index
    %c0_12 = arith.constant 0 : index
    %c0_13 = arith.constant 0 : index
    %30 = vector.load %arg4[%c0_11, %c0_12, %c0_13] : memref<1x16x32xbf16, #tpu.memory_space<vmem>>, vector<1x16x32xbf16>
    %31 = vector.shape_cast %30 : vector<1x16x32xbf16> to vector<16x32xbf16>
    %32 = vector.shape_cast %29 : vector<16x32xbf16> to vector<1x16x32xbf16>
    tpu.vector_store %arg4[%c0_11, %c0_12, %c0_13], %32 {strides = array<i32>} : memref<1x16x32xbf16, #tpu.memory_space<vmem>>, vector<1x16x32xbf16>,
    return
  }
  func.func @transform_0(%arg0: i32, %arg1: i32) -> (i32, i32, i32) {
    %c0_i32 = arith.constant 0 : i32
    %c0_i32_0 = arith.constant 0 : i32
    return %arg0, %arg1, %c0_i32 : i32, i32, i32
  }
  func.func @transform_1(%arg0: i32, %arg1: i32) -> (i32, i32, i32) {
    %c0_i32 = arith.constant 0 : i32
    %c0_i32_0 = arith.constant 0 : i32
    %c0_i32_1 = arith.constant 0 : i32
    return %arg0, %c0_i32, %c0_i32_0 : i32, i32, i32
  }
  func.func @transform_2(%arg0: i32, %arg1: i32) -> (i32, i32, i32) {
    %c0_i32 = arith.constant 0 : i32
    %c0_i32_0 = arith.constant 0 : i32
    return %arg0, %arg1, %c0_i32 : i32, i32, i32
  }
}

module attributes {stable_mosaic.version = 11 : i64} {
  func.func @_mm_stats_kernel(%arg0: i32, %arg1: i32, %arg2: memref<1x16x144xbf16, #tpu.memory_space<vmem>>, %arg3: memref<144x32xbf16, #tpu.memory_space<vmem>>, %arg4: memref<1x16x32xf32, #tpu.memory_space<vmem>>, %arg5: memref<1x2x32xf32, #tpu.memory_space<vmem>>) attributes {dimension_semantics = [#tpu.dimension_semantics<parallel>, #tpu.dimension_semantics<arbitrary>], iteration_bounds = array<i64: 2, 1>, scalar_prefetch = 0 : i64, scratch_operands = 0 : i64, tpu.core_type = #tpu.core_type<tc>, window_params = [{transform_indices = @transform_0, window_bounds = array<i64: 1, 16, 144>}, {pipeline_mode = #tpu.pipeline_mode<synchronous>, transform_indices = @transform_1, window_bounds = array<i64: 144, 32>}, {transform_indices = @transform_2, window_bounds = array<i64: 1, 16, 32>}, {transform_indices = @transform_3, window_bounds = array<i64: 1, 2, 32>}]} {
    %c0 = arith.constant 0 : index
    %c0_0 = arith.constant 0 : index
    %c0_1 = arith.constant 0 : index
    %0 = vector.load %arg2[%c0, %c0_0, %c0_1] : memref<1x16x144xbf16, #tpu.memory_space<vmem>>, vector<1x16x144xbf16>
    %1 = vector.shape_cast %0 : vector<1x16x144xbf16> to vector<16x144xbf16>
    %c0_2 = arith.constant 0 : index
    %c0_3 = arith.constant 0 : index
    %2 = vector.load %arg3[%c0_2, %c0_3] : memref<144x32xbf16, #tpu.memory_space<vmem>>, vector<144x32xbf16>
    %cst = arith.constant dense<0.000000e+00> : vector<16x32xf32>
    %3 = tpu.matmul %1, %2, %cst {dimension_numbers = #tpu.dot_dimension_numbers<[1], [0], [0], [1], [0, 0, 1, 1], [], []>} : vector<16x144xbf16>, vector<144x32xbf16>, vector<16x32xf32> -> vector<16x32xf32>
    %c0_4 = arith.constant 0 : index
    %c0_5 = arith.constant 0 : index
    %c0_6 = arith.constant 0 : index
    %4 = vector.load %arg4[%c0_4, %c0_5, %c0_6] : memref<1x16x32xf32, #tpu.memory_space<vmem>>, vector<1x16x32xf32>
    %5 = vector.shape_cast %4 : vector<1x16x32xf32> to vector<16x32xf32>
    %6 = vector.shape_cast %3 : vector<16x32xf32> to vector<1x16x32xf32>
    tpu.vector_store %arg4[%c0_4, %c0_5, %c0_6], %6 {strides = array<i32>} : memref<1x16x32xf32, #tpu.memory_space<vmem>>, vector<1x16x32xf32>,
    %cst_7 = arith.constant dense<0.000000e+00> : vector<32xf32>
    %7 = vector.multi_reduction <add>, %3, %cst_7 [0] : vector<16x32xf32> to vector<32xf32>
    %8 = vector.shape_cast %7 : vector<32xf32> to vector<1x32xf32>
    %9 = arith.mulf %3, %3 : vector<16x32xf32>
    %cst_8 = arith.constant dense<0.000000e+00> : vector<32xf32>
    %10 = vector.multi_reduction <add>, %9, %cst_8 [0] : vector<16x32xf32> to vector<32xf32>
    %11 = vector.shape_cast %10 : vector<32xf32> to vector<1x32xf32>
    %12 = tpu.concatenate %8, %11 in 0 : vector<1x32xf32>, vector<1x32xf32> -> vector<2x32xf32>
    %c0_i32 = arith.constant 0 : i32
    %13 = arith.cmpi eq, %arg1, %c0_i32 : i32
    %14 = arith.extui %13 : i1 to i32
    %c0_i32_9 = arith.constant 0 : i32
    %15 = arith.cmpi ne, %14, %c0_i32_9 : i32
    scf.if %15 {
      %cst_16 = arith.constant 0.000000e+00 : f32
      %22 = vector.broadcast %cst_16 : f32 to vector<1x2x32xf32>
      %c0_17 = arith.constant 0 : index
      %c0_18 = arith.constant 0 : index
      %c0_19 = arith.constant 0 : index
      %23 = vector.load %arg5[%c0_17, %c0_18, %c0_19] : memref<1x2x32xf32, #tpu.memory_space<vmem>>, vector<1x2x32xf32>
      tpu.vector_store %arg5[%c0_17, %c0_18, %c0_19], %22 {strides = array<i32>} : memref<1x2x32xf32, #tpu.memory_space<vmem>>, vector<1x2x32xf32>,
    } else {
    }
    %c0_10 = arith.constant 0 : index
    %c0_11 = arith.constant 0 : index
    %c0_12 = arith.constant 0 : index
    %16 = vector.load %arg5[%c0_10, %c0_11, %c0_12] : memref<1x2x32xf32, #tpu.memory_space<vmem>>, vector<1x2x32xf32>
    %17 = vector.shape_cast %16 : vector<1x2x32xf32> to vector<2x32xf32>
    %18 = arith.addf %17, %12 : vector<2x32xf32>
    %c0_13 = arith.constant 0 : index
    %c0_14 = arith.constant 0 : index
    %c0_15 = arith.constant 0 : index
    %19 = vector.load %arg5[%c0_13, %c0_14, %c0_15] : memref<1x2x32xf32, #tpu.memory_space<vmem>>, vector<1x2x32xf32>
    %20 = vector.shape_cast %19 : vector<1x2x32xf32> to vector<2x32xf32>
    %21 = vector.shape_cast %18 : vector<2x32xf32> to vector<1x2x32xf32>
    tpu.vector_store %arg5[%c0_13, %c0_14, %c0_15], %21 {strides = array<i32>} : memref<1x2x32xf32, #tpu.memory_space<vmem>>, vector<1x2x32xf32>,
    return
  }
  func.func @transform_0(%arg0: i32, %arg1: i32) -> (i32, i32, i32) {
    %c0_i32 = arith.constant 0 : i32
    %c0_i32_0 = arith.constant 0 : i32
    return %arg0, %arg1, %c0_i32 : i32, i32, i32
  }
  func.func @transform_1(%arg0: i32, %arg1: i32) -> (i32, i32) {
    %c0_i32 = arith.constant 0 : i32
    %c0_i32_0 = arith.constant 0 : i32
    %c0_i32_1 = arith.constant 0 : i32
    return %c0_i32, %c0_i32_0 : i32, i32
  }
  func.func @transform_2(%arg0: i32, %arg1: i32) -> (i32, i32, i32) {
    %c0_i32 = arith.constant 0 : i32
    %c0_i32_0 = arith.constant 0 : i32
    return %arg0, %arg1, %c0_i32 : i32, i32, i32
  }
  func.func @transform_3(%arg0: i32, %arg1: i32) -> (i32, i32, i32) {
    %c0_i32 = arith.constant 0 : i32
    %c0_i32_0 = arith.constant 0 : i32
    %c0_i32_1 = arith.constant 0 : i32
    return %arg0, %c0_i32, %c0_i32_0 : i32, i32, i32
  }
}

module attributes {stable_mosaic.version = 11 : i64} {
  func.func @_mm_stats_kernel(%arg0: i32, %arg1: i32, %arg2: memref<1x16x288xbf16, #tpu.memory_space<vmem>>, %arg3: memref<288x32xbf16, #tpu.memory_space<vmem>>, %arg4: memref<1x16x32xf32, #tpu.memory_space<vmem>>, %arg5: memref<1x2x32xf32, #tpu.memory_space<vmem>>) attributes {dimension_semantics = [#tpu.dimension_semantics<parallel>, #tpu.dimension_semantics<arbitrary>], iteration_bounds = array<i64: 2, 1>, scalar_prefetch = 0 : i64, scratch_operands = 0 : i64, tpu.core_type = #tpu.core_type<tc>, window_params = [{transform_indices = @transform_0, window_bounds = array<i64: 1, 16, 288>}, {pipeline_mode = #tpu.pipeline_mode<synchronous>, transform_indices = @transform_1, window_bounds = array<i64: 288, 32>}, {transform_indices = @transform_2, window_bounds = array<i64: 1, 16, 32>}, {transform_indices = @transform_3, window_bounds = array<i64: 1, 2, 32>}]} {
    %c0 = arith.constant 0 : index
    %c0_0 = arith.constant 0 : index
    %c0_1 = arith.constant 0 : index
    %0 = vector.load %arg2[%c0, %c0_0, %c0_1] : memref<1x16x288xbf16, #tpu.memory_space<vmem>>, vector<1x16x288xbf16>
    %1 = vector.shape_cast %0 : vector<1x16x288xbf16> to vector<16x288xbf16>
    %c0_2 = arith.constant 0 : index
    %c0_3 = arith.constant 0 : index
    %2 = vector.load %arg3[%c0_2, %c0_3] : memref<288x32xbf16, #tpu.memory_space<vmem>>, vector<288x32xbf16>
    %cst = arith.constant dense<0.000000e+00> : vector<16x32xf32>
    %3 = tpu.matmul %1, %2, %cst {dimension_numbers = #tpu.dot_dimension_numbers<[1], [0], [0], [1], [0, 0, 1, 1], [], []>} : vector<16x288xbf16>, vector<288x32xbf16>, vector<16x32xf32> -> vector<16x32xf32>
    %c0_4 = arith.constant 0 : index
    %c0_5 = arith.constant 0 : index
    %c0_6 = arith.constant 0 : index
    %4 = vector.load %arg4[%c0_4, %c0_5, %c0_6] : memref<1x16x32xf32, #tpu.memory_space<vmem>>, vector<1x16x32xf32>
    %5 = vector.shape_cast %4 : vector<1x16x32xf32> to vector<16x32xf32>
    %6 = vector.shape_cast %3 : vector<16x32xf32> to vector<1x16x32xf32>
    tpu.vector_store %arg4[%c0_4, %c0_5, %c0_6], %6 {strides = array<i32>} : memref<1x16x32xf32, #tpu.memory_space<vmem>>, vector<1x16x32xf32>,
    %cst_7 = arith.constant dense<0.000000e+00> : vector<32xf32>
    %7 = vector.multi_reduction <add>, %3, %cst_7 [0] : vector<16x32xf32> to vector<32xf32>
    %8 = vector.shape_cast %7 : vector<32xf32> to vector<1x32xf32>
    %9 = arith.mulf %3, %3 : vector<16x32xf32>
    %cst_8 = arith.constant dense<0.000000e+00> : vector<32xf32>
    %10 = vector.multi_reduction <add>, %9, %cst_8 [0] : vector<16x32xf32> to vector<32xf32>
    %11 = vector.shape_cast %10 : vector<32xf32> to vector<1x32xf32>
    %12 = tpu.concatenate %8, %11 in 0 : vector<1x32xf32>, vector<1x32xf32> -> vector<2x32xf32>
    %c0_i32 = arith.constant 0 : i32
    %13 = arith.cmpi eq, %arg1, %c0_i32 : i32
    %14 = arith.extui %13 : i1 to i32
    %c0_i32_9 = arith.constant 0 : i32
    %15 = arith.cmpi ne, %14, %c0_i32_9 : i32
    scf.if %15 {
      %cst_16 = arith.constant 0.000000e+00 : f32
      %22 = vector.broadcast %cst_16 : f32 to vector<1x2x32xf32>
      %c0_17 = arith.constant 0 : index
      %c0_18 = arith.constant 0 : index
      %c0_19 = arith.constant 0 : index
      %23 = vector.load %arg5[%c0_17, %c0_18, %c0_19] : memref<1x2x32xf32, #tpu.memory_space<vmem>>, vector<1x2x32xf32>
      tpu.vector_store %arg5[%c0_17, %c0_18, %c0_19], %22 {strides = array<i32>} : memref<1x2x32xf32, #tpu.memory_space<vmem>>, vector<1x2x32xf32>,
    } else {
    }
    %c0_10 = arith.constant 0 : index
    %c0_11 = arith.constant 0 : index
    %c0_12 = arith.constant 0 : index
    %16 = vector.load %arg5[%c0_10, %c0_11, %c0_12] : memref<1x2x32xf32, #tpu.memory_space<vmem>>, vector<1x2x32xf32>
    %17 = vector.shape_cast %16 : vector<1x2x32xf32> to vector<2x32xf32>
    %18 = arith.addf %17, %12 : vector<2x32xf32>
    %c0_13 = arith.constant 0 : index
    %c0_14 = arith.constant 0 : index
    %c0_15 = arith.constant 0 : index
    %19 = vector.load %arg5[%c0_13, %c0_14, %c0_15] : memref<1x2x32xf32, #tpu.memory_space<vmem>>, vector<1x2x32xf32>
    %20 = vector.shape_cast %19 : vector<1x2x32xf32> to vector<2x32xf32>
    %21 = vector.shape_cast %18 : vector<2x32xf32> to vector<1x2x32xf32>
    tpu.vector_store %arg5[%c0_13, %c0_14, %c0_15], %21 {strides = array<i32>} : memref<1x2x32xf32, #tpu.memory_space<vmem>>, vector<1x2x32xf32>,
    return
  }
  func.func @transform_0(%arg0: i32, %arg1: i32) -> (i32, i32, i32) {
    %c0_i32 = arith.constant 0 : i32
    %c0_i32_0 = arith.constant 0 : i32
    return %arg0, %arg1, %c0_i32 : i32, i32, i32
  }
  func.func @transform_1(%arg0: i32, %arg1: i32) -> (i32, i32) {
    %c0_i32 = arith.constant 0 : i32
    %c0_i32_0 = arith.constant 0 : i32
    %c0_i32_1 = arith.constant 0 : i32
    return %c0_i32, %c0_i32_0 : i32, i32
  }
  func.func @transform_2(%arg0: i32, %arg1: i32) -> (i32, i32, i32) {
    %c0_i32 = arith.constant 0 : i32
    %c0_i32_0 = arith.constant 0 : i32
    return %arg0, %arg1, %c0_i32 : i32, i32, i32
  }
  func.func @transform_3(%arg0: i32, %arg1: i32) -> (i32, i32, i32) {
    %c0_i32 = arith.constant 0 : i32
    %c0_i32_0 = arith.constant 0 : i32
    %c0_i32_1 = arith.constant 0 : i32
    return %arg0, %c0_i32, %c0_i32_0 : i32, i32, i32
  }
}

module attributes {stable_mosaic.version = 11 : i64} {
  func.func @_mm_stats_kernel(%arg0: i32, %arg1: i32, %arg2: memref<1x16x32xbf16, #tpu.memory_space<vmem>>, %arg3: memref<32x64xbf16, #tpu.memory_space<vmem>>, %arg4: memref<1x16x64xf32, #tpu.memory_space<vmem>>, %arg5: memref<1x2x64xf32, #tpu.memory_space<vmem>>) attributes {dimension_semantics = [#tpu.dimension_semantics<parallel>, #tpu.dimension_semantics<arbitrary>], iteration_bounds = array<i64: 2, 1>, scalar_prefetch = 0 : i64, scratch_operands = 0 : i64, tpu.core_type = #tpu.core_type<tc>, window_params = [{transform_indices = @transform_0, window_bounds = array<i64: 1, 16, 32>}, {pipeline_mode = #tpu.pipeline_mode<synchronous>, transform_indices = @transform_1, window_bounds = array<i64: 32, 64>}, {transform_indices = @transform_2, window_bounds = array<i64: 1, 16, 64>}, {transform_indices = @transform_3, window_bounds = array<i64: 1, 2, 64>}]} {
    %c0 = arith.constant 0 : index
    %c0_0 = arith.constant 0 : index
    %c0_1 = arith.constant 0 : index
    %0 = vector.load %arg2[%c0, %c0_0, %c0_1] : memref<1x16x32xbf16, #tpu.memory_space<vmem>>, vector<1x16x32xbf16>
    %1 = vector.shape_cast %0 : vector<1x16x32xbf16> to vector<16x32xbf16>
    %c0_2 = arith.constant 0 : index
    %c0_3 = arith.constant 0 : index
    %2 = vector.load %arg3[%c0_2, %c0_3] : memref<32x64xbf16, #tpu.memory_space<vmem>>, vector<32x64xbf16>
    %cst = arith.constant dense<0.000000e+00> : vector<16x64xf32>
    %3 = tpu.matmul %1, %2, %cst {dimension_numbers = #tpu.dot_dimension_numbers<[1], [0], [0], [1], [0, 0, 1, 1], [], []>} : vector<16x32xbf16>, vector<32x64xbf16>, vector<16x64xf32> -> vector<16x64xf32>
    %c0_4 = arith.constant 0 : index
    %c0_5 = arith.constant 0 : index
    %c0_6 = arith.constant 0 : index
    %4 = vector.load %arg4[%c0_4, %c0_5, %c0_6] : memref<1x16x64xf32, #tpu.memory_space<vmem>>, vector<1x16x64xf32>
    %5 = vector.shape_cast %4 : vector<1x16x64xf32> to vector<16x64xf32>
    %6 = vector.shape_cast %3 : vector<16x64xf32> to vector<1x16x64xf32>
    tpu.vector_store %arg4[%c0_4, %c0_5, %c0_6], %6 {strides = array<i32>} : memref<1x16x64xf32, #tpu.memory_space<vmem>>, vector<1x16x64xf32>,
    %cst_7 = arith.constant dense<0.000000e+00> : vector<64xf32>
    %7 = vector.multi_reduction <add>, %3, %cst_7 [0] : vector<16x64xf32> to vector<64xf32>
    %8 = vector.shape_cast %7 : vector<64xf32> to vector<1x64xf32>
    %9 = arith.mulf %3, %3 : vector<16x64xf32>
    %cst_8 = arith.constant dense<0.000000e+00> : vector<64xf32>
    %10 = vector.multi_reduction <add>, %9, %cst_8 [0] : vector<16x64xf32> to vector<64xf32>
    %11 = vector.shape_cast %10 : vector<64xf32> to vector<1x64xf32>
    %12 = tpu.concatenate %8, %11 in 0 : vector<1x64xf32>, vector<1x64xf32> -> vector<2x64xf32>
    %c0_i32 = arith.constant 0 : i32
    %13 = arith.cmpi eq, %arg1, %c0_i32 : i32
    %14 = arith.extui %13 : i1 to i32
    %c0_i32_9 = arith.constant 0 : i32
    %15 = arith.cmpi ne, %14, %c0_i32_9 : i32
    scf.if %15 {
      %cst_16 = arith.constant 0.000000e+00 : f32
      %22 = vector.broadcast %cst_16 : f32 to vector<1x2x64xf32>
      %c0_17 = arith.constant 0 : index
      %c0_18 = arith.constant 0 : index
      %c0_19 = arith.constant 0 : index
      %23 = vector.load %arg5[%c0_17, %c0_18, %c0_19] : memref<1x2x64xf32, #tpu.memory_space<vmem>>, vector<1x2x64xf32>
      tpu.vector_store %arg5[%c0_17, %c0_18, %c0_19], %22 {strides = array<i32>} : memref<1x2x64xf32, #tpu.memory_space<vmem>>, vector<1x2x64xf32>,
    } else {
    }
    %c0_10 = arith.constant 0 : index
    %c0_11 = arith.constant 0 : index
    %c0_12 = arith.constant 0 : index
    %16 = vector.load %arg5[%c0_10, %c0_11, %c0_12] : memref<1x2x64xf32, #tpu.memory_space<vmem>>, vector<1x2x64xf32>
    %17 = vector.shape_cast %16 : vector<1x2x64xf32> to vector<2x64xf32>
    %18 = arith.addf %17, %12 : vector<2x64xf32>
    %c0_13 = arith.constant 0 : index
    %c0_14 = arith.constant 0 : index
    %c0_15 = arith.constant 0 : index
    %19 = vector.load %arg5[%c0_13, %c0_14, %c0_15] : memref<1x2x64xf32, #tpu.memory_space<vmem>>, vector<1x2x64xf32>
    %20 = vector.shape_cast %19 : vector<1x2x64xf32> to vector<2x64xf32>
    %21 = vector.shape_cast %18 : vector<2x64xf32> to vector<1x2x64xf32>
    tpu.vector_store %arg5[%c0_13, %c0_14, %c0_15], %21 {strides = array<i32>} : memref<1x2x64xf32, #tpu.memory_space<vmem>>, vector<1x2x64xf32>,
    return
  }
  func.func @transform_0(%arg0: i32, %arg1: i32) -> (i32, i32, i32) {
    %c0_i32 = arith.constant 0 : i32
    %c0_i32_0 = arith.constant 0 : i32
    return %arg0, %arg1, %c0_i32 : i32, i32, i32
  }
  func.func @transform_1(%arg0: i32, %arg1: i32) -> (i32, i32) {
    %c0_i32 = arith.constant 0 : i32
    %c0_i32_0 = arith.constant 0 : i32
    %c0_i32_1 = arith.constant 0 : i32
    return %c0_i32, %c0_i32_0 : i32, i32
  }
  func.func @transform_2(%arg0: i32, %arg1: i32) -> (i32, i32, i32) {
    %c0_i32 = arith.constant 0 : i32
    %c0_i32_0 = arith.constant 0 : i32
    return %arg0, %arg1, %c0_i32 : i32, i32, i32
  }
  func.func @transform_3(%arg0: i32, %arg1: i32) -> (i32, i32, i32) {
    %c0_i32 = arith.constant 0 : i32
    %c0_i32_0 = arith.constant 0 : i32
    %c0_i32_1 = arith.constant 0 : i32
    return %arg0, %c0_i32, %c0_i32_0 : i32, i32, i32
  }
}

module attributes {stable_mosaic.version = 11 : i64} {
  func.func @_norm_lrelu_kernel(%arg0: i32, %arg1: i32, %arg2: memref<1x16x64xf32, #tpu.memory_space<vmem>>, %arg3: memref<1x2x64xf32, #tpu.memory_space<vmem>>, %arg4: memref<1x16x64xbf16, #tpu.memory_space<vmem>>) attributes {dimension_semantics = [#tpu.dimension_semantics<parallel>, #tpu.dimension_semantics<parallel>], iteration_bounds = array<i64: 2, 1>, scalar_prefetch = 0 : i64, scratch_operands = 0 : i64, tpu.core_type = #tpu.core_type<tc>, window_params = [{transform_indices = @transform_0, window_bounds = array<i64: 1, 16, 64>}, {transform_indices = @transform_1, window_bounds = array<i64: 1, 2, 64>}, {transform_indices = @transform_2, window_bounds = array<i64: 1, 16, 64>}]} {
    %c0 = arith.constant 0 : index
    %c0_0 = arith.constant 0 : index
    %c0_1 = arith.constant 0 : index
    %0 = vector.load %arg2[%c0, %c0_0, %c0_1] : memref<1x16x64xf32, #tpu.memory_space<vmem>>, vector<1x16x64xf32>
    %1 = vector.shape_cast %0 : vector<1x16x64xf32> to vector<16x64xf32>
    %c0_2 = arith.constant 0 : index
    %c0_3 = arith.constant 0 : index
    %c0_4 = arith.constant 0 : index
    %2 = vector.load %arg3[%c0_2, %c0_3, %c0_4] : memref<1x2x64xf32, #tpu.memory_space<vmem>>, vector<1x2x64xf32>
    %3 = vector.shape_cast %2 : vector<1x2x64xf32> to vector<2x64xf32>
    %4 = vector.extract_strided_slice %3 {offsets = [0, 0], sizes = [1, 64], strides = [1, 1]} : vector<2x64xf32> to vector<1x64xf32>
    %cst = arith.constant 1.562500e-02 : f32
    %5 = vector.broadcast %cst : f32 to vector<1x64xf32>
    %6 = arith.mulf %4, %5 : vector<1x64xf32>
    %7 = vector.extract_strided_slice %3 {offsets = [1, 0], sizes = [1, 64], strides = [1, 1]} : vector<2x64xf32> to vector<1x64xf32>
    %cst_5 = arith.constant 1.562500e-02 : f32
    %8 = vector.broadcast %cst_5 : f32 to vector<1x64xf32>
    %9 = arith.mulf %7, %8 : vector<1x64xf32>
    %10 = arith.mulf %6, %6 : vector<1x64xf32>
    %11 = arith.subf %9, %10 : vector<1x64xf32>
    %cst_6 = arith.constant 0.000000e+00 : f32
    %12 = vector.broadcast %cst_6 : f32 to vector<1x64xf32>
    %13 = arith.maximumf %11, %12 : vector<1x64xf32>
    %cst_7 = arith.constant 9.99999974E-6 : f32
    %14 = vector.broadcast %cst_7 : f32 to vector<1x64xf32>
    %15 = arith.addf %13, %14 : vector<1x64xf32>
    %16 = math.rsqrt %15 : vector<1x64xf32>
    %cst_8 = arith.constant 0.000000e+00 : f32
    %17 = vector.broadcast %cst_8 : f32 to vector<1x64xf32>
    %18 = arith.subf %17, %6 : vector<1x64xf32>
    %19 = arith.mulf %18, %16 : vector<1x64xf32>
    %20 = vector.broadcast %16 : vector<1x64xf32> to vector<16x64xf32>
    %21 = arith.mulf %1, %20 : vector<16x64xf32>
    %22 = vector.broadcast %19 : vector<1x64xf32> to vector<16x64xf32>
    %23 = arith.addf %21, %22 : vector<16x64xf32>
    %cst_9 = arith.constant 0.000000e+00 : f32
    %24 = vector.broadcast %cst_9 : f32 to vector<16x64xf32>
    %25 = arith.cmpf oge, %23, %24 : vector<16x64xf32>
    %cst_10 = arith.constant 2.000000e-01 : f32
    %26 = vector.broadcast %cst_10 : f32 to vector<16x64xf32>
    %27 = arith.mulf %26, %23 : vector<16x64xf32>
    %28 = arith.select %25, %23, %27 : vector<16x64xi1>, vector<16x64xf32>
    %29 = arith.truncf %28 : vector<16x64xf32> to vector<16x64xbf16>
    %c0_11 = arith.constant 0 : index
    %c0_12 = arith.constant 0 : index
    %c0_13 = arith.constant 0 : index
    %30 = vector.load %arg4[%c0_11, %c0_12, %c0_13] : memref<1x16x64xbf16, #tpu.memory_space<vmem>>, vector<1x16x64xbf16>
    %31 = vector.shape_cast %30 : vector<1x16x64xbf16> to vector<16x64xbf16>
    %32 = vector.shape_cast %29 : vector<16x64xbf16> to vector<1x16x64xbf16>
    tpu.vector_store %arg4[%c0_11, %c0_12, %c0_13], %32 {strides = array<i32>} : memref<1x16x64xbf16, #tpu.memory_space<vmem>>, vector<1x16x64xbf16>,
    return
  }
  func.func @transform_0(%arg0: i32, %arg1: i32) -> (i32, i32, i32) {
    %c0_i32 = arith.constant 0 : i32
    %c0_i32_0 = arith.constant 0 : i32
    return %arg0, %arg1, %c0_i32 : i32, i32, i32
  }
  func.func @transform_1(%arg0: i32, %arg1: i32) -> (i32, i32, i32) {
    %c0_i32 = arith.constant 0 : i32
    %c0_i32_0 = arith.constant 0 : i32
    %c0_i32_1 = arith.constant 0 : i32
    return %arg0, %c0_i32, %c0_i32_0 : i32, i32, i32
  }
  func.func @transform_2(%arg0: i32, %arg1: i32) -> (i32, i32, i32) {
    %c0_i32 = arith.constant 0 : i32
    %c0_i32_0 = arith.constant 0 : i32
    return %arg0, %arg1, %c0_i32 : i32, i32, i32
  }
}

module attributes {stable_mosaic.version = 11 : i64} {
  func.func @_mm_stats_kernel(%arg0: i32, %arg1: i32, %arg2: memref<1x64x144xbf16, #tpu.memory_space<vmem>>, %arg3: memref<144x16xbf16, #tpu.memory_space<vmem>>, %arg4: memref<1x64x144xbf16, #tpu.memory_space<vmem>>, %arg5: memref<144x16xbf16, #tpu.memory_space<vmem>>, %arg6: memref<1x64x16xf32, #tpu.memory_space<vmem>>, %arg7: memref<1x2x16xf32, #tpu.memory_space<vmem>>) attributes {dimension_semantics = [#tpu.dimension_semantics<parallel>, #tpu.dimension_semantics<arbitrary>], iteration_bounds = array<i64: 2, 1>, scalar_prefetch = 0 : i64, scratch_operands = 0 : i64, tpu.core_type = #tpu.core_type<tc>, window_params = [{transform_indices = @transform_0, window_bounds = array<i64: 1, 64, 144>}, {pipeline_mode = #tpu.pipeline_mode<synchronous>, transform_indices = @transform_1, window_bounds = array<i64: 144, 16>}, {transform_indices = @transform_2, window_bounds = array<i64: 1, 64, 144>}, {pipeline_mode = #tpu.pipeline_mode<synchronous>, transform_indices = @transform_3, window_bounds = array<i64: 144, 16>}, {transform_indices = @transform_4, window_bounds = array<i64: 1, 64, 16>}, {transform_indices = @transform_5, window_bounds = array<i64: 1, 2, 16>}]} {
    %c0 = arith.constant 0 : index
    %c0_0 = arith.constant 0 : index
    %c0_1 = arith.constant 0 : index
    %0 = vector.load %arg2[%c0, %c0_0, %c0_1] : memref<1x64x144xbf16, #tpu.memory_space<vmem>>, vector<1x64x144xbf16>
    %1 = vector.shape_cast %0 : vector<1x64x144xbf16> to vector<64x144xbf16>
    %c0_2 = arith.constant 0 : index
    %c0_3 = arith.constant 0 : index
    %2 = vector.load %arg3[%c0_2, %c0_3] : memref<144x16xbf16, #tpu.memory_space<vmem>>, vector<144x16xbf16>
    %cst = arith.constant dense<0.000000e+00> : vector<64x16xf32>
    %3 = tpu.matmul %1, %2, %cst {dimension_numbers = #tpu.dot_dimension_numbers<[1], [0], [0], [1], [0, 0, 1, 1], [], []>} : vector<64x144xbf16>, vector<144x16xbf16>, vector<64x16xf32> -> vector<64x16xf32>
    %c0_4 = arith.constant 0 : index
    %c0_5 = arith.constant 0 : index
    %c0_6 = arith.constant 0 : index
    %4 = vector.load %arg4[%c0_4, %c0_5, %c0_6] : memref<1x64x144xbf16, #tpu.memory_space<vmem>>, vector<1x64x144xbf16>
    %5 = vector.shape_cast %4 : vector<1x64x144xbf16> to vector<64x144xbf16>
    %c0_7 = arith.constant 0 : index
    %c0_8 = arith.constant 0 : index
    %6 = vector.load %arg5[%c0_7, %c0_8] : memref<144x16xbf16, #tpu.memory_space<vmem>>, vector<144x16xbf16>
    %cst_9 = arith.constant dense<0.000000e+00> : vector<64x16xf32>
    %7 = tpu.matmul %5, %6, %cst_9 {dimension_numbers = #tpu.dot_dimension_numbers<[1], [0], [0], [1], [0, 0, 1, 1], [], []>} : vector<64x144xbf16>, vector<144x16xbf16>, vector<64x16xf32> -> vector<64x16xf32>
    %8 = arith.addf %3, %7 : vector<64x16xf32>
    %c0_10 = arith.constant 0 : index
    %c0_11 = arith.constant 0 : index
    %c0_12 = arith.constant 0 : index
    %9 = vector.load %arg6[%c0_10, %c0_11, %c0_12] : memref<1x64x16xf32, #tpu.memory_space<vmem>>, vector<1x64x16xf32>
    %10 = vector.shape_cast %9 : vector<1x64x16xf32> to vector<64x16xf32>
    %11 = vector.shape_cast %8 : vector<64x16xf32> to vector<1x64x16xf32>
    tpu.vector_store %arg6[%c0_10, %c0_11, %c0_12], %11 {strides = array<i32>} : memref<1x64x16xf32, #tpu.memory_space<vmem>>, vector<1x64x16xf32>,
    %cst_13 = arith.constant dense<0.000000e+00> : vector<16xf32>
    %12 = vector.multi_reduction <add>, %8, %cst_13 [0] : vector<64x16xf32> to vector<16xf32>
    %13 = vector.shape_cast %12 : vector<16xf32> to vector<1x16xf32>
    %14 = arith.mulf %8, %8 : vector<64x16xf32>
    %cst_14 = arith.constant dense<0.000000e+00> : vector<16xf32>
    %15 = vector.multi_reduction <add>, %14, %cst_14 [0] : vector<64x16xf32> to vector<16xf32>
    %16 = vector.shape_cast %15 : vector<16xf32> to vector<1x16xf32>
    %17 = tpu.concatenate %13, %16 in 0 : vector<1x16xf32>, vector<1x16xf32> -> vector<2x16xf32>
    %c0_i32 = arith.constant 0 : i32
    %18 = arith.cmpi eq, %arg1, %c0_i32 : i32
    %19 = arith.extui %18 : i1 to i32
    %c0_i32_15 = arith.constant 0 : i32
    %20 = arith.cmpi ne, %19, %c0_i32_15 : i32
    scf.if %20 {
      %cst_22 = arith.constant 0.000000e+00 : f32
      %27 = vector.broadcast %cst_22 : f32 to vector<1x2x16xf32>
      %c0_23 = arith.constant 0 : index
      %c0_24 = arith.constant 0 : index
      %c0_25 = arith.constant 0 : index
      %28 = vector.load %arg7[%c0_23, %c0_24, %c0_25] : memref<1x2x16xf32, #tpu.memory_space<vmem>>, vector<1x2x16xf32>
      tpu.vector_store %arg7[%c0_23, %c0_24, %c0_25], %27 {strides = array<i32>} : memref<1x2x16xf32, #tpu.memory_space<vmem>>, vector<1x2x16xf32>,
    } else {
    }
    %c0_16 = arith.constant 0 : index
    %c0_17 = arith.constant 0 : index
    %c0_18 = arith.constant 0 : index
    %21 = vector.load %arg7[%c0_16, %c0_17, %c0_18] : memref<1x2x16xf32, #tpu.memory_space<vmem>>, vector<1x2x16xf32>
    %22 = vector.shape_cast %21 : vector<1x2x16xf32> to vector<2x16xf32>
    %23 = arith.addf %22, %17 : vector<2x16xf32>
    %c0_19 = arith.constant 0 : index
    %c0_20 = arith.constant 0 : index
    %c0_21 = arith.constant 0 : index
    %24 = vector.load %arg7[%c0_19, %c0_20, %c0_21] : memref<1x2x16xf32, #tpu.memory_space<vmem>>, vector<1x2x16xf32>
    %25 = vector.shape_cast %24 : vector<1x2x16xf32> to vector<2x16xf32>
    %26 = vector.shape_cast %23 : vector<2x16xf32> to vector<1x2x16xf32>
    tpu.vector_store %arg7[%c0_19, %c0_20, %c0_21], %26 {strides = array<i32>} : memref<1x2x16xf32, #tpu.memory_space<vmem>>, vector<1x2x16xf32>,
    return
  }
  func.func @transform_0(%arg0: i32, %arg1: i32) -> (i32, i32, i32) {
    %c0_i32 = arith.constant 0 : i32
    %c0_i32_0 = arith.constant 0 : i32
    return %arg0, %arg1, %c0_i32 : i32, i32, i32
  }
  func.func @transform_1(%arg0: i32, %arg1: i32) -> (i32, i32) {
    %c0_i32 = arith.constant 0 : i32
    %c0_i32_0 = arith.constant 0 : i32
    %c0_i32_1 = arith.constant 0 : i32
    return %c0_i32, %c0_i32_0 : i32, i32
  }
  func.func @transform_2(%arg0: i32, %arg1: i32) -> (i32, i32, i32) {
    %c0_i32 = arith.constant 0 : i32
    %c0_i32_0 = arith.constant 0 : i32
    return %arg0, %arg1, %c0_i32 : i32, i32, i32
  }
  func.func @transform_3(%arg0: i32, %arg1: i32) -> (i32, i32) {
    %c0_i32 = arith.constant 0 : i32
    %c0_i32_0 = arith.constant 0 : i32
    %c0_i32_1 = arith.constant 0 : i32
    return %c0_i32, %c0_i32_0 : i32, i32
  }
  func.func @transform_4(%arg0: i32, %arg1: i32) -> (i32, i32, i32) {
    %c0_i32 = arith.constant 0 : i32
    %c0_i32_0 = arith.constant 0 : i32
    return %arg0, %arg1, %c0_i32 : i32, i32, i32
  }
  func.func @transform_5(%arg0: i32, %arg1: i32) -> (i32, i32, i32) {
    %c0_i32 = arith.constant 0 : i32
    %c0_i32_0 = arith.constant 0 : i32
    %c0_i32_1 = arith.constant 0 : i32
    return %arg0, %c0_i32, %c0_i32_0 : i32, i32, i32
  }
}

module attributes {stable_mosaic.version = 11 : i64} {
  func.func @_mm_stats_kernel(%arg0: i32, %arg1: i32, %arg2: memref<1x64x16xbf16, #tpu.memory_space<vmem>>, %arg3: memref<16x32xbf16, #tpu.memory_space<vmem>>, %arg4: memref<1x64x32xf32, #tpu.memory_space<vmem>>, %arg5: memref<1x2x32xf32, #tpu.memory_space<vmem>>) attributes {dimension_semantics = [#tpu.dimension_semantics<parallel>, #tpu.dimension_semantics<arbitrary>], iteration_bounds = array<i64: 2, 1>, scalar_prefetch = 0 : i64, scratch_operands = 0 : i64, tpu.core_type = #tpu.core_type<tc>, window_params = [{transform_indices = @transform_0, window_bounds = array<i64: 1, 64, 16>}, {pipeline_mode = #tpu.pipeline_mode<synchronous>, transform_indices = @transform_1, window_bounds = array<i64: 16, 32>}, {transform_indices = @transform_2, window_bounds = array<i64: 1, 64, 32>}, {transform_indices = @transform_3, window_bounds = array<i64: 1, 2, 32>}]} {
    %c0 = arith.constant 0 : index
    %c0_0 = arith.constant 0 : index
    %c0_1 = arith.constant 0 : index
    %0 = vector.load %arg2[%c0, %c0_0, %c0_1] : memref<1x64x16xbf16, #tpu.memory_space<vmem>>, vector<1x64x16xbf16>
    %1 = vector.shape_cast %0 : vector<1x64x16xbf16> to vector<64x16xbf16>
    %c0_2 = arith.constant 0 : index
    %c0_3 = arith.constant 0 : index
    %2 = vector.load %arg3[%c0_2, %c0_3] : memref<16x32xbf16, #tpu.memory_space<vmem>>, vector<16x32xbf16>
    %cst = arith.constant dense<0.000000e+00> : vector<64x32xf32>
    %3 = tpu.matmul %1, %2, %cst {dimension_numbers = #tpu.dot_dimension_numbers<[1], [0], [0], [1], [0, 0, 1, 1], [], []>} : vector<64x16xbf16>, vector<16x32xbf16>, vector<64x32xf32> -> vector<64x32xf32>
    %c0_4 = arith.constant 0 : index
    %c0_5 = arith.constant 0 : index
    %c0_6 = arith.constant 0 : index
    %4 = vector.load %arg4[%c0_4, %c0_5, %c0_6] : memref<1x64x32xf32, #tpu.memory_space<vmem>>, vector<1x64x32xf32>
    %5 = vector.shape_cast %4 : vector<1x64x32xf32> to vector<64x32xf32>
    %6 = vector.shape_cast %3 : vector<64x32xf32> to vector<1x64x32xf32>
    tpu.vector_store %arg4[%c0_4, %c0_5, %c0_6], %6 {strides = array<i32>} : memref<1x64x32xf32, #tpu.memory_space<vmem>>, vector<1x64x32xf32>,
    %cst_7 = arith.constant dense<0.000000e+00> : vector<32xf32>
    %7 = vector.multi_reduction <add>, %3, %cst_7 [0] : vector<64x32xf32> to vector<32xf32>
    %8 = vector.shape_cast %7 : vector<32xf32> to vector<1x32xf32>
    %9 = arith.mulf %3, %3 : vector<64x32xf32>
    %cst_8 = arith.constant dense<0.000000e+00> : vector<32xf32>
    %10 = vector.multi_reduction <add>, %9, %cst_8 [0] : vector<64x32xf32> to vector<32xf32>
    %11 = vector.shape_cast %10 : vector<32xf32> to vector<1x32xf32>
    %12 = tpu.concatenate %8, %11 in 0 : vector<1x32xf32>, vector<1x32xf32> -> vector<2x32xf32>
    %c0_i32 = arith.constant 0 : i32
    %13 = arith.cmpi eq, %arg1, %c0_i32 : i32
    %14 = arith.extui %13 : i1 to i32
    %c0_i32_9 = arith.constant 0 : i32
    %15 = arith.cmpi ne, %14, %c0_i32_9 : i32
    scf.if %15 {
      %cst_16 = arith.constant 0.000000e+00 : f32
      %22 = vector.broadcast %cst_16 : f32 to vector<1x2x32xf32>
      %c0_17 = arith.constant 0 : index
      %c0_18 = arith.constant 0 : index
      %c0_19 = arith.constant 0 : index
      %23 = vector.load %arg5[%c0_17, %c0_18, %c0_19] : memref<1x2x32xf32, #tpu.memory_space<vmem>>, vector<1x2x32xf32>
      tpu.vector_store %arg5[%c0_17, %c0_18, %c0_19], %22 {strides = array<i32>} : memref<1x2x32xf32, #tpu.memory_space<vmem>>, vector<1x2x32xf32>,
    } else {
    }
    %c0_10 = arith.constant 0 : index
    %c0_11 = arith.constant 0 : index
    %c0_12 = arith.constant 0 : index
    %16 = vector.load %arg5[%c0_10, %c0_11, %c0_12] : memref<1x2x32xf32, #tpu.memory_space<vmem>>, vector<1x2x32xf32>
    %17 = vector.shape_cast %16 : vector<1x2x32xf32> to vector<2x32xf32>
    %18 = arith.addf %17, %12 : vector<2x32xf32>
    %c0_13 = arith.constant 0 : index
    %c0_14 = arith.constant 0 : index
    %c0_15 = arith.constant 0 : index
    %19 = vector.load %arg5[%c0_13, %c0_14, %c0_15] : memref<1x2x32xf32, #tpu.memory_space<vmem>>, vector<1x2x32xf32>
    %20 = vector.shape_cast %19 : vector<1x2x32xf32> to vector<2x32xf32>
    %21 = vector.shape_cast %18 : vector<2x32xf32> to vector<1x2x32xf32>
    tpu.vector_store %arg5[%c0_13, %c0_14, %c0_15], %21 {strides = array<i32>} : memref<1x2x32xf32, #tpu.memory_space<vmem>>, vector<1x2x32xf32>,
    return
  }
  func.func @transform_0(%arg0: i32, %arg1: i32) -> (i32, i32, i32) {
    %c0_i32 = arith.constant 0 : i32
    %c0_i32_0 = arith.constant 0 : i32
    return %arg0, %arg1, %c0_i32 : i32, i32, i32
  }
  func.func @transform_1(%arg0: i32, %arg1: i32) -> (i32, i32) {
    %c0_i32 = arith.constant 0 : i32
    %c0_i32_0 = arith.constant 0 : i32
    %c0_i32_1 = arith.constant 0 : i32
    return %c0_i32, %c0_i32_0 : i32, i32
  }
  func.func @transform_2(%arg0: i32, %arg1: i32) -> (i32, i32, i32) {
    %c0_i32 = arith.constant 0 : i32
    %c0_i32_0 = arith.constant 0 : i32
    return %arg0, %arg1, %c0_i32 : i32, i32, i32
  }
  func.func @transform_3(%arg0: i32, %arg1: i32) -> (i32, i32, i32) {
    %c0_i32 = arith.constant 0 : i32
    %c0_i32_0 = arith.constant 0 : i32
    %c0_i32_1 = arith.constant 0 : i32
    return %arg0, %c0_i32, %c0_i32_0 : i32, i32, i32
  }
}

module attributes {stable_mosaic.version = 11 : i64} {
  func.func @_norm_lrelu_kernel(%arg0: i32, %arg1: i32, %arg2: memref<1x64x32xf32, #tpu.memory_space<vmem>>, %arg3: memref<1x2x32xf32, #tpu.memory_space<vmem>>, %arg4: memref<1x64x32xbf16, #tpu.memory_space<vmem>>) attributes {dimension_semantics = [#tpu.dimension_semantics<parallel>, #tpu.dimension_semantics<parallel>], iteration_bounds = array<i64: 2, 1>, scalar_prefetch = 0 : i64, scratch_operands = 0 : i64, tpu.core_type = #tpu.core_type<tc>, window_params = [{transform_indices = @transform_0, window_bounds = array<i64: 1, 64, 32>}, {transform_indices = @transform_1, window_bounds = array<i64: 1, 2, 32>}, {transform_indices = @transform_2, window_bounds = array<i64: 1, 64, 32>}]} {
    %c0 = arith.constant 0 : index
    %c0_0 = arith.constant 0 : index
    %c0_1 = arith.constant 0 : index
    %0 = vector.load %arg2[%c0, %c0_0, %c0_1] : memref<1x64x32xf32, #tpu.memory_space<vmem>>, vector<1x64x32xf32>
    %1 = vector.shape_cast %0 : vector<1x64x32xf32> to vector<64x32xf32>
    %c0_2 = arith.constant 0 : index
    %c0_3 = arith.constant 0 : index
    %c0_4 = arith.constant 0 : index
    %2 = vector.load %arg3[%c0_2, %c0_3, %c0_4] : memref<1x2x32xf32, #tpu.memory_space<vmem>>, vector<1x2x32xf32>
    %3 = vector.shape_cast %2 : vector<1x2x32xf32> to vector<2x32xf32>
    %4 = vector.extract_strided_slice %3 {offsets = [0, 0], sizes = [1, 32], strides = [1, 1]} : vector<2x32xf32> to vector<1x32xf32>
    %cst = arith.constant 3.906250e-03 : f32
    %5 = vector.broadcast %cst : f32 to vector<1x32xf32>
    %6 = arith.mulf %4, %5 : vector<1x32xf32>
    %7 = vector.extract_strided_slice %3 {offsets = [1, 0], sizes = [1, 32], strides = [1, 1]} : vector<2x32xf32> to vector<1x32xf32>
    %cst_5 = arith.constant 3.906250e-03 : f32
    %8 = vector.broadcast %cst_5 : f32 to vector<1x32xf32>
    %9 = arith.mulf %7, %8 : vector<1x32xf32>
    %10 = arith.mulf %6, %6 : vector<1x32xf32>
    %11 = arith.subf %9, %10 : vector<1x32xf32>
    %cst_6 = arith.constant 0.000000e+00 : f32
    %12 = vector.broadcast %cst_6 : f32 to vector<1x32xf32>
    %13 = arith.maximumf %11, %12 : vector<1x32xf32>
    %cst_7 = arith.constant 9.99999974E-6 : f32
    %14 = vector.broadcast %cst_7 : f32 to vector<1x32xf32>
    %15 = arith.addf %13, %14 : vector<1x32xf32>
    %16 = math.rsqrt %15 : vector<1x32xf32>
    %cst_8 = arith.constant 0.000000e+00 : f32
    %17 = vector.broadcast %cst_8 : f32 to vector<1x32xf32>
    %18 = arith.subf %17, %6 : vector<1x32xf32>
    %19 = arith.mulf %18, %16 : vector<1x32xf32>
    %20 = vector.broadcast %16 : vector<1x32xf32> to vector<64x32xf32>
    %21 = arith.mulf %1, %20 : vector<64x32xf32>
    %22 = vector.broadcast %19 : vector<1x32xf32> to vector<64x32xf32>
    %23 = arith.addf %21, %22 : vector<64x32xf32>
    %cst_9 = arith.constant 0.000000e+00 : f32
    %24 = vector.broadcast %cst_9 : f32 to vector<64x32xf32>
    %25 = arith.cmpf oge, %23, %24 : vector<64x32xf32>
    %cst_10 = arith.constant 2.000000e-01 : f32
    %26 = vector.broadcast %cst_10 : f32 to vector<64x32xf32>
    %27 = arith.mulf %26, %23 : vector<64x32xf32>
    %28 = arith.select %25, %23, %27 : vector<64x32xi1>, vector<64x32xf32>
    %29 = arith.truncf %28 : vector<64x32xf32> to vector<64x32xbf16>
    %c0_11 = arith.constant 0 : index
    %c0_12 = arith.constant 0 : index
    %c0_13 = arith.constant 0 : index
    %30 = vector.load %arg4[%c0_11, %c0_12, %c0_13] : memref<1x64x32xbf16, #tpu.memory_space<vmem>>, vector<1x64x32xbf16>
    %31 = vector.shape_cast %30 : vector<1x64x32xbf16> to vector<64x32xbf16>
    %32 = vector.shape_cast %29 : vector<64x32xbf16> to vector<1x64x32xbf16>
    tpu.vector_store %arg4[%c0_11, %c0_12, %c0_13], %32 {strides = array<i32>} : memref<1x64x32xbf16, #tpu.memory_space<vmem>>, vector<1x64x32xbf16>,
    return
  }
  func.func @transform_0(%arg0: i32, %arg1: i32) -> (i32, i32, i32) {
    %c0_i32 = arith.constant 0 : i32
    %c0_i32_0 = arith.constant 0 : i32
    return %arg0, %arg1, %c0_i32 : i32, i32, i32
  }
  func.func @transform_1(%arg0: i32, %arg1: i32) -> (i32, i32, i32) {
    %c0_i32 = arith.constant 0 : i32
    %c0_i32_0 = arith.constant 0 : i32
    %c0_i32_1 = arith.constant 0 : i32
    return %arg0, %c0_i32, %c0_i32_0 : i32, i32, i32
  }
  func.func @transform_2(%arg0: i32, %arg1: i32) -> (i32, i32, i32) {
    %c0_i32 = arith.constant 0 : i32
    %c0_i32_0 = arith.constant 0 : i32
    return %arg0, %arg1, %c0_i32 : i32, i32, i32
  }
}

module attributes {stable_mosaic.version = 11 : i64} {
  func.func @_mm_stats_kernel(%arg0: i32, %arg1: i32, %arg2: memref<1x256x72xbf16, #tpu.memory_space<vmem>>, %arg3: memref<72x8xbf16, #tpu.memory_space<vmem>>, %arg4: memref<1x256x72xbf16, #tpu.memory_space<vmem>>, %arg5: memref<72x8xbf16, #tpu.memory_space<vmem>>, %arg6: memref<1x256x8xf32, #tpu.memory_space<vmem>>, %arg7: memref<1x2x8xf32, #tpu.memory_space<vmem>>) attributes {dimension_semantics = [#tpu.dimension_semantics<parallel>, #tpu.dimension_semantics<arbitrary>], iteration_bounds = array<i64: 2, 1>, scalar_prefetch = 0 : i64, scratch_operands = 0 : i64, tpu.core_type = #tpu.core_type<tc>, window_params = [{transform_indices = @transform_0, window_bounds = array<i64: 1, 256, 72>}, {pipeline_mode = #tpu.pipeline_mode<synchronous>, transform_indices = @transform_1, window_bounds = array<i64: 72, 8>}, {transform_indices = @transform_2, window_bounds = array<i64: 1, 256, 72>}, {pipeline_mode = #tpu.pipeline_mode<synchronous>, transform_indices = @transform_3, window_bounds = array<i64: 72, 8>}, {transform_indices = @transform_4, window_bounds = array<i64: 1, 256, 8>}, {transform_indices = @transform_5, window_bounds = array<i64: 1, 2, 8>}]} {
    %c0 = arith.constant 0 : index
    %c0_0 = arith.constant 0 : index
    %c0_1 = arith.constant 0 : index
    %0 = vector.load %arg2[%c0, %c0_0, %c0_1] : memref<1x256x72xbf16, #tpu.memory_space<vmem>>, vector<1x256x72xbf16>
    %1 = vector.shape_cast %0 : vector<1x256x72xbf16> to vector<256x72xbf16>
    %c0_2 = arith.constant 0 : index
    %c0_3 = arith.constant 0 : index
    %2 = vector.load %arg3[%c0_2, %c0_3] : memref<72x8xbf16, #tpu.memory_space<vmem>>, vector<72x8xbf16>
    %cst = arith.constant dense<0.000000e+00> : vector<256x8xf32>
    %3 = tpu.matmul %1, %2, %cst {dimension_numbers = #tpu.dot_dimension_numbers<[1], [0], [0], [1], [0, 0, 1, 1], [], []>} : vector<256x72xbf16>, vector<72x8xbf16>, vector<256x8xf32> -> vector<256x8xf32>
    %c0_4 = arith.constant 0 : index
    %c0_5 = arith.constant 0 : index
    %c0_6 = arith.constant 0 : index
    %4 = vector.load %arg4[%c0_4, %c0_5, %c0_6] : memref<1x256x72xbf16, #tpu.memory_space<vmem>>, vector<1x256x72xbf16>
    %5 = vector.shape_cast %4 : vector<1x256x72xbf16> to vector<256x72xbf16>
    %c0_7 = arith.constant 0 : index
    %c0_8 = arith.constant 0 : index
    %6 = vector.load %arg5[%c0_7, %c0_8] : memref<72x8xbf16, #tpu.memory_space<vmem>>, vector<72x8xbf16>
    %cst_9 = arith.constant dense<0.000000e+00> : vector<256x8xf32>
    %7 = tpu.matmul %5, %6, %cst_9 {dimension_numbers = #tpu.dot_dimension_numbers<[1], [0], [0], [1], [0, 0, 1, 1], [], []>} : vector<256x72xbf16>, vector<72x8xbf16>, vector<256x8xf32> -> vector<256x8xf32>
    %8 = arith.addf %3, %7 : vector<256x8xf32>
    %c0_10 = arith.constant 0 : index
    %c0_11 = arith.constant 0 : index
    %c0_12 = arith.constant 0 : index
    %9 = vector.load %arg6[%c0_10, %c0_11, %c0_12] : memref<1x256x8xf32, #tpu.memory_space<vmem>>, vector<1x256x8xf32>
    %10 = vector.shape_cast %9 : vector<1x256x8xf32> to vector<256x8xf32>
    %11 = vector.shape_cast %8 : vector<256x8xf32> to vector<1x256x8xf32>
    tpu.vector_store %arg6[%c0_10, %c0_11, %c0_12], %11 {strides = array<i32>} : memref<1x256x8xf32, #tpu.memory_space<vmem>>, vector<1x256x8xf32>,
    %cst_13 = arith.constant dense<0.000000e+00> : vector<8xf32>
    %12 = vector.multi_reduction <add>, %8, %cst_13 [0] : vector<256x8xf32> to vector<8xf32>
    %13 = vector.shape_cast %12 : vector<8xf32> to vector<1x8xf32>
    %14 = arith.mulf %8, %8 : vector<256x8xf32>
    %cst_14 = arith.constant dense<0.000000e+00> : vector<8xf32>
    %15 = vector.multi_reduction <add>, %14, %cst_14 [0] : vector<256x8xf32> to vector<8xf32>
    %16 = vector.shape_cast %15 : vector<8xf32> to vector<1x8xf32>
    %17 = tpu.concatenate %13, %16 in 0 : vector<1x8xf32>, vector<1x8xf32> -> vector<2x8xf32>
    %c0_i32 = arith.constant 0 : i32
    %18 = arith.cmpi eq, %arg1, %c0_i32 : i32
    %19 = arith.extui %18 : i1 to i32
    %c0_i32_15 = arith.constant 0 : i32
    %20 = arith.cmpi ne, %19, %c0_i32_15 : i32
    scf.if %20 {
      %cst_22 = arith.constant 0.000000e+00 : f32
      %27 = vector.broadcast %cst_22 : f32 to vector<1x2x8xf32>
      %c0_23 = arith.constant 0 : index
      %c0_24 = arith.constant 0 : index
      %c0_25 = arith.constant 0 : index
      %28 = vector.load %arg7[%c0_23, %c0_24, %c0_25] : memref<1x2x8xf32, #tpu.memory_space<vmem>>, vector<1x2x8xf32>
      tpu.vector_store %arg7[%c0_23, %c0_24, %c0_25], %27 {strides = array<i32>} : memref<1x2x8xf32, #tpu.memory_space<vmem>>, vector<1x2x8xf32>,
    } else {
    }
    %c0_16 = arith.constant 0 : index
    %c0_17 = arith.constant 0 : index
    %c0_18 = arith.constant 0 : index
    %21 = vector.load %arg7[%c0_16, %c0_17, %c0_18] : memref<1x2x8xf32, #tpu.memory_space<vmem>>, vector<1x2x8xf32>
    %22 = vector.shape_cast %21 : vector<1x2x8xf32> to vector<2x8xf32>
    %23 = arith.addf %22, %17 : vector<2x8xf32>
    %c0_19 = arith.constant 0 : index
    %c0_20 = arith.constant 0 : index
    %c0_21 = arith.constant 0 : index
    %24 = vector.load %arg7[%c0_19, %c0_20, %c0_21] : memref<1x2x8xf32, #tpu.memory_space<vmem>>, vector<1x2x8xf32>
    %25 = vector.shape_cast %24 : vector<1x2x8xf32> to vector<2x8xf32>
    %26 = vector.shape_cast %23 : vector<2x8xf32> to vector<1x2x8xf32>
    tpu.vector_store %arg7[%c0_19, %c0_20, %c0_21], %26 {strides = array<i32>} : memref<1x2x8xf32, #tpu.memory_space<vmem>>, vector<1x2x8xf32>,
    return
  }
  func.func @transform_0(%arg0: i32, %arg1: i32) -> (i32, i32, i32) {
    %c0_i32 = arith.constant 0 : i32
    %c0_i32_0 = arith.constant 0 : i32
    return %arg0, %arg1, %c0_i32 : i32, i32, i32
  }
  func.func @transform_1(%arg0: i32, %arg1: i32) -> (i32, i32) {
    %c0_i32 = arith.constant 0 : i32
    %c0_i32_0 = arith.constant 0 : i32
    %c0_i32_1 = arith.constant 0 : i32
    return %c0_i32, %c0_i32_0 : i32, i32
  }
  func.func @transform_2(%arg0: i32, %arg1: i32) -> (i32, i32, i32) {
    %c0_i32 = arith.constant 0 : i32
    %c0_i32_0 = arith.constant 0 : i32
    return %arg0, %arg1, %c0_i32 : i32, i32, i32
  }
  func.func @transform_3(%arg0: i32, %arg1: i32) -> (i32, i32) {
    %c0_i32 = arith.constant 0 : i32
    %c0_i32_0 = arith.constant 0 : i32
    %c0_i32_1 = arith.constant 0 : i32
    return %c0_i32, %c0_i32_0 : i32, i32
  }
  func.func @transform_4(%arg0: i32, %arg1: i32) -> (i32, i32, i32) {
    %c0_i32 = arith.constant 0 : i32
    %c0_i32_0 = arith.constant 0 : i32
    return %arg0, %arg1, %c0_i32 : i32, i32, i32
  }
  func.func @transform_5(%arg0: i32, %arg1: i32) -> (i32, i32, i32) {
    %c0_i32 = arith.constant 0 : i32
    %c0_i32_0 = arith.constant 0 : i32
    %c0_i32_1 = arith.constant 0 : i32
    return %arg0, %c0_i32, %c0_i32_0 : i32, i32, i32
  }
}

module attributes {stable_mosaic.version = 11 : i64} {
  func.func @_conv1x1_bias_t_kernel(%arg0: i32, %arg1: i32, %arg2: memref<1x8x256xbf16, #tpu.memory_space<vmem>>, %arg3: memref<2x8xbf16, #tpu.memory_space<vmem>>, %arg4: memref<2x1xf32, #tpu.memory_space<vmem>>, %arg5: memref<1x2x256xf32, #tpu.memory_space<vmem>>) attributes {dimension_semantics = [#tpu.dimension_semantics<parallel>, #tpu.dimension_semantics<parallel>], iteration_bounds = array<i64: 2, 1>, scalar_prefetch = 0 : i64, scratch_operands = 0 : i64, tpu.core_type = #tpu.core_type<tc>, window_params = [{transform_indices = @transform_0, window_bounds = array<i64: 1, 8, 256>}, {pipeline_mode = #tpu.pipeline_mode<synchronous>, transform_indices = @transform_1, window_bounds = array<i64: 2, 8>}, {pipeline_mode = #tpu.pipeline_mode<synchronous>, transform_indices = @transform_2, window_bounds = array<i64: 2, 1>}, {transform_indices = @transform_3, window_bounds = array<i64: 1, 2, 256>}]} {
    %c0 = arith.constant 0 : index
    %c0_0 = arith.constant 0 : index
    %0 = vector.load %arg3[%c0, %c0_0] : memref<2x8xbf16, #tpu.memory_space<vmem>>, vector<2x8xbf16>
    %c0_1 = arith.constant 0 : index
    %c0_2 = arith.constant 0 : index
    %c0_3 = arith.constant 0 : index
    %1 = vector.load %arg2[%c0_1, %c0_2, %c0_3] : memref<1x8x256xbf16, #tpu.memory_space<vmem>>, vector<1x8x256xbf16>
    %2 = vector.shape_cast %1 : vector<1x8x256xbf16> to vector<8x256xbf16>
    %cst = arith.constant dense<0.000000e+00> : vector<2x256xf32>
    %3 = tpu.matmul %0, %2, %cst {dimension_numbers = #tpu.dot_dimension_numbers<[1], [0], [0], [1], [0, 0, 1, 1], [], []>} : vector<2x8xbf16>, vector<8x256xbf16>, vector<2x256xf32> -> vector<2x256xf32>
    %c0_4 = arith.constant 0 : index
    %c0_5 = arith.constant 0 : index
    %4 = vector.load %arg4[%c0_4, %c0_5] : memref<2x1xf32, #tpu.memory_space<vmem>>, vector<2x1xf32>
    %5 = vector.broadcast %4 : vector<2x1xf32> to vector<2x256xf32>
    %6 = arith.addf %3, %5 : vector<2x256xf32>
    %c0_6 = arith.constant 0 : index
    %c0_7 = arith.constant 0 : index
    %c0_8 = arith.constant 0 : index
    %7 = vector.load %arg5[%c0_6, %c0_7, %c0_8] : memref<1x2x256xf32, #tpu.memory_space<vmem>>, vector<1x2x256xf32>
    %8 = vector.shape_cast %7 : vector<1x2x256xf32> to vector<2x256xf32>
    %9 = vector.shape_cast %6 : vector<2x256xf32> to vector<1x2x256xf32>
    tpu.vector_store %arg5[%c0_6, %c0_7, %c0_8], %9 {strides = array<i32>} : memref<1x2x256xf32, #tpu.memory_space<vmem>>, vector<1x2x256xf32>,
    return
  }
  func.func @transform_0(%arg0: i32, %arg1: i32) -> (i32, i32, i32) {
    %c0_i32 = arith.constant 0 : i32
    %c0_i32_0 = arith.constant 0 : i32
    return %arg0, %c0_i32, %arg1 : i32, i32, i32
  }
  func.func @transform_1(%arg0: i32, %arg1: i32) -> (i32, i32) {
    %c0_i32 = arith.constant 0 : i32
    %c0_i32_0 = arith.constant 0 : i32
    %c0_i32_1 = arith.constant 0 : i32
    return %c0_i32, %c0_i32_0 : i32, i32
  }
  func.func @transform_2(%arg0: i32, %arg1: i32) -> (i32, i32) {
    %c0_i32 = arith.constant 0 : i32
    %c0_i32_0 = arith.constant 0 : i32
    %c0_i32_1 = arith.constant 0 : i32
    return %c0_i32, %c0_i32_0 : i32, i32
  }
  func.func @transform_3(%arg0: i32, %arg1: i32) -> (i32, i32, i32) {
    %c0_i32 = arith.constant 0 : i32
    %c0_i32_0 = arith.constant 0 : i32
    return %arg0, %c0_i32, %arg1 : i32, i32, i32
  }
}

</mosaic_0001>

<bundles_post_ra>
// kernel: unet_forward.28
= control target key start
LH: loop header
LB: loop body
LE: loop exit
PB: predicated region body
PF: predicated region fallthrough
CT: control target
= control target key end

     0   :  { %s818_s9 = smov 0   ;;  %s820_s10 = smov 0   ;;  %s1033_s0 = inlined_call_operand.vmem [shape: f32[2,256,8], index: 0, kind: input, shape index: {}]   ;;  %s1034_s1 = inlined_call_operand.vmem [shape: f32[2,2,8], index: 1, kind: input, shape index: {}]   ;;  %s1035_s2 = inlined_call_operand.vmem [shape: bf16[2,256,8], index: 2, kind: output, shape index: {}]  }
   0x1   :  { %s822_s11 = smov 0  }
   0x2 LB: > { %s24_s12 = sadd.s32 1, %s797_s10  ;;  %p679_p0 = scmp.ge.s32.totalorder %s801_s11, 1  ;;  %s801_s11 = sphi %s822_s11, %s12_s11   ;;  %s797_s10 = sphi %s820_s10, %s1037_s10   ;;  %s793_s9 = sphi %s818_s9, %s1036_s9  }
   0x3   : > { %p26_p1 = scmp.ge.s32.totalorder %s24_s12, 2  ;;  %p142_p2 = scmp.lt.s32.totalorder %s801_s11, 3 }
   0x5   : > { %s1039_s12 = smov (%p26_p1, %s24_s12), 0  ;;  %p143_p3 = pnand %p679_p0, %p142_p2 }
   0x6   : > { %p177_p4 = scmp.lt.s32.totalorder (!%p143_p3), %s793_s9, 1  ;;  %v247_v7 = vlaneseq (!%p143_p3)  ;;  %vm543_vm0 = vcmask (!%p143_p3), 60416  }
   0x7   : > { %146 = sbr.rel (%p143_p3) target bundleno = 96 (0x60), region = 28 }
   0x8   : > { %v248_v8 = vshrl.u32 (!%p143_p3), %v247_v7, 7 }
   0xa   : > { %v249_v9 = vsub.s32 (!%p143_p3), 1, %v248_v8  ;;  %v285_v19 = vsub.s32 (!%p143_p3), 0, %v248_v8 }
   0xe   : > { %s1041_s9 = smov (!%p177_p4, %s793_s9), 1 }
   0xf   : > { %s682_s13 = sshll.u32 %s1041_s9, 1  ;;  %s719_s17 = sshll.u32 %s1041_s9, 8 }
  0x10   : > { %s189_s16 = scalar_lea.vmem %s1034_s1, %s682_s13  ;;  %s846_s20 = scalar_lea.vmem %s1033_s0, %s719_s17 }
  0x11   : > { %v232_v0 = vld [vmem:[%s189_s16] sm:$0x3]  ;;  %v201_v12 = vld [vmem:[%s846_s20 + $0x8] sm:$0xff]  ;;  %v202_v14 = vld [vmem:[%s846_s20 + $0x10] sm:$0xff]  ;;  %s720_s21 = sshll.u32 %s1041_s9, 7 }
  0x12   : > { %v233_v1 = vmul.f32 0.00390625, %v232_v0  ;;  %v200_v10 = vld [vmem:[%s846_s20] sm:$0xff]  ;;  %v203_v15 = vld [vmem:[%s846_s20 + $0x18] sm:$0xff]  ;;  %v205_v20 = vld [vmem:[%s846_s20 + $0x28] sm:$0xff]  ;;  %s896_s24 = scalar_lea.vmem %s1035_s2, %s720_s21 }
  0x13   : > { %v204_v16 = vld [vmem:[%s846_s20 + $0x20] sm:$0xff]  ;;  %v206_v21 = vld [vmem:[%s846_s20 + $0x30] sm:$0xff]  ;;  %v207_v22 = vld [vmem:[%s846_s20 + $0x38] sm:$0xff] }
  0x14   : > { %v234_v2 = vmul.f32 %v233_v1, %v233_v1  ;;  %v242_v11 = vsub.f32 0.0, %v233_v1  ;;  %v208_v23 = vld [vmem:[%s846_s20 + $0x40] sm:$0xff]  ;;  %v209_v24 = vld [vmem:[%s846_s20 + $0x48] sm:$0xff]  ;;  %v210_v25 = vld [vmem:[%s846_s20 + $0x50] sm:$0xff] }
  0x15   : > { %v211_v30 = vld [vmem:[%s846_s20 + $0x58] sm:$0xff]  ;;  %v212_v31 = vld [vmem:[%s846_s20 + $0x60] sm:$0xff]  ;;  %v213_v32 = vld [vmem:[%s846_s20 + $0x68] sm:$0xff] }
  0x16   : > { %v236_v3 = vrot.slane %v234_v2, 7 }
  0x18   : > { %v238_v4 = vsub.f32 %v233_v1, %v236_v3 }
  0x1a   : > { %v239_v5 = vmax.f32 %v238_v4, 0.0 }
  0x1c   : > { %v240_v6 = vadd.f32 1e-05, %v239_v5 }
  0x1e   : > { %777 = vrsqrt.f32 %v240_v6 }
  0x28   : > { %v778_v13 = vpop.eup %777 }
  0x29   : > { %v244_v17 = vrot.slane %v778_v13, 1  ;;  %v853_v18 = vrot.slane %v778_v13, %v249_v9 }
  0x2b   : > { %v246_v26 = vmul.f32 %v244_v17, %v242_v11  ;;  %v251_v27 = vmul.f32 %v853_v18, %v200_v10  ;;  %v252_v28 = vmul.f32 %v853_v18, %v201_v12  ;;  %v253_v29 = vmul.f32 %v853_v18, %v202_v14 }
  0x2c   : > { %v254_v33 = vmul.f32 %v853_v18, %v203_v15  ;;  %v255_v34 = vmul.f32 %v853_v18, %v204_v16  ;;  %v256_v35 = vmul.f32 %v853_v18, %v205_v20  ;;  %v257_v36 = vmul.f32 %v853_v18, %v206_v21 }
  0x2d   : > { %v871_v37 = vrot.slane %v246_v26, %v285_v19  ;;  %v258_v38 = vmul.f32 %v853_v18, %v207_v22  ;;  %v259_v39 = vmul.f32 %v853_v18, %v208_v23  ;;  %v260_v40 = vmul.f32 %v853_v18, %v209_v24  ;;  %v214_v26 = vld [vmem:[%s846_s20 + $0x70] sm:$0xff] }
  0x2e   : > { %v261_v41 = vmul.f32 %v853_v18, %v210_v25  ;;  %v262_v42 = vmul.f32 %v853_v18, %v211_v30  ;;  %v879_v43 = vmul.f32 %v853_v18, %v212_v31  ;;  %v882_v44 = vmul.f32 %v853_v18, %v213_v32  ;;  %v216_v32 = vld [vmem:[%s846_s20 + $0x80] sm:$0xff] }
  0x2f   : > { %v287_v45 = vadd.f32 %v871_v37, %v251_v27  ;;  %v288_v46 = vadd.f32 %v871_v37, %v252_v28  ;;  %v289_v47 = vadd.f32 %v871_v37, %v253_v29  ;;  %v290_v48 = vadd.f32 %v871_v37, %v254_v33  ;;  %v215_v27 = vld [vmem:[%s846_s20 + $0x78] sm:$0xff]  ;;  %v217_v33 = vld [vmem:[%s846_s20 + $0x88] sm:$0xff] }
  0x30   : > { %v291_v49 = vadd.f32 %v871_v37, %v255_v34  ;;  %v292_v50 = vadd.f32 %v871_v37, %v256_v35  ;;  %v293_v51 = vadd.f32 %v871_v37, %v257_v36  ;;  %v294_v52 = vadd.f32 %v871_v37, %v258_v38  ;;  %v218_v34 = vld [vmem:[%s846_s20 + $0x90] sm:$0xff] }
  0x31   : > { %vm319_vm1 = vcmp.ge.f32.partialorder %v287_v45, 0.0  ;;  %v351_v53 = vmul.f32 0.2, %v287_v45  ;;  %vm320_vm2 = vcmp.ge.f32.partialorder %v288_v46, 0.0  ;;  %v352_v54 = vmul.f32 0.2, %v288_v46 }
  0x32   : > { %vm321_vm3 = vcmp.ge.f32.partialorder %v289_v47, 0.0  ;;  %v353_v55 = vmul.f32 0.2, %v289_v47  ;;  %vm322_vm4 = vcmp.ge.f32.partialorder %v290_v48, 0.0  ;;  %v354_v56 = vmul.f32 0.2, %v290_v48 }
  0x33   : > { %v383_v57 = vsel %vm319_vm1, %v287_v45, %v351_v53  ;;  %v384_v58 = vsel %vm320_vm2, %v288_v46, %v352_v54  ;;  %vm323_vm5 = vcmp.ge.f32.partialorder %v291_v49, 0.0  ;;  %v355_v59 = vmul.f32 0.2, %v291_v49  ;;  %v219_v54 = vld [vmem:[%s846_s20 + $0x98] sm:$0xff] }
  0x34   : > { %v721_v60 = vpack.c.bf16 %v383_v57, %v383_v57  ;;  %v722_v61 = vpack.c.bf16 %v384_v58, %v384_v58  ;;  %v385_v62 = vsel %vm321_vm3, %v289_v47, %v353_v55  ;;  %v386_v63 = vsel %vm322_vm4, %v290_v48, %v354_v56 }
  0x35   : > { %v723_v0 = vpack.c.bf16 %v385_v62, %v385_v62  ;;  %v724_v1 = vpack.c.bf16 %v386_v63, %v386_v63  ;;  %v387_v2 = vsel %vm323_vm5, %v291_v49, %v355_v59  ;;  %vm324_vm6 = vcmp.ge.f32.partialorder %v292_v50, 0.0  ;;  %v220_v62 = vld [vmem:[%s846_s20 + $0xa0] sm:$0xff]  ;;  %v221_v63 = vld [vmem:[%s846_s20 + $0xa8] sm:$0xff] }
  0x36   : > { %544 = vst.msk [vmem:[%s896_s24] sm:$0xf] %vm543_vm0, %v721_v60  ;;  %545 = vst.msk [vmem:[%s896_s24 + $0x4] sm:$0xf] %vm543_vm0, %v722_v61  ;;  %v725_v3 = vpack.c.bf16 %v387_v2, %v387_v2  ;;  %v356_v4 = vmul.f32 0.2, %v292_v50  ;;  %v295_v7 = vadd.f32 %v871_v37, %v259_v39  ;;  %v296_v8 = vadd.f32 %v871_v37, %v260_v40 }
  0x37   : > { %vm325_vm7 = vcmp.ge.f32.partialorder %v293_v51, 0.0  ;;  %v357_v5 = vmul.f32 0.2, %v293_v51  ;;  %546 = vst.msk [vmem:[%s896_s24 + $0x8] sm:$0xf] %vm543_vm0, %v723_v0  ;;  %vm326_vm8 = vcmp.ge.f32.partialorder %v294_v52, 0.0  ;;  %v297_v11 = vadd.f32 %v871_v37, %v261_v41 }
  0x38   : > { %547 = vst.msk [vmem:[%s896_s24 + $0xc] sm:$0xf] %vm543_vm0, %v724_v1  ;;  %v358_v6 = vmul.f32 0.2, %v294_v52  ;;  %548 = vst.msk [vmem:[%s896_s24 + $0x10] sm:$0xf] %vm543_vm0, %v725_v3  ;;  %v388_v9 = vsel %vm324_vm6, %v292_v50, %v356_v4  ;;  %v298_v12 = vadd.f32 %v871_v37, %v262_v42  ;;  %v299_v24 = vadd.f32 %v871_v37, %v879_v43 }
  0x39   : > { %v389_v10 = vsel %vm325_vm7, %v293_v51, %v357_v5  ;;  %v726_v13 = vpack.c.bf16 %v388_v9, %v388_v9  ;;  %vm327_vm9 = vcmp.ge.f32.partialorder %v295_v7, 0.0  ;;  %v359_v17 = vmul.f32 0.2, %v295_v7  ;;  %v222_v0 = vld [vmem:[%s846_s20 + $0xb0] sm:$0xff]  ;;  %v223_v5 = vld [vmem:[%s846_s20 + $0xb8] sm:$0xff] }
  0x3a   : > { %v727_v14 = vpack.c.bf16 %v389_v10, %v389_v10  ;;  %v390_v15 = vsel %vm326_vm8, %v294_v52, %v358_v6  ;;  %vm328_vm10 = vcmp.ge.f32.partialorder %v296_v8, 0.0  ;;  %v360_v19 = vmul.f32 0.2, %v296_v8  ;;  %v224_v6 = vld [vmem:[%s846_s20 + $0xc0] sm:$0xff] }
  0x3b   : > { %v728_v16 = vpack.c.bf16 %v390_v15, %v390_v15  ;;  %549 = vst.msk [vmem:[%s896_s24 + $0x14] sm:$0xf] %vm543_vm0, %v726_v13  ;;  %vm329_vm11 = vcmp.ge.f32.partialorder %v297_v11, 0.0  ;;  %v361_v20 = vmul.f32 0.2, %v297_v11  ;;  %vm330_vm12 = vcmp.ge.f32.partialorder %v298_v12, 0.0 }
  0x3c   : > { %550 = vst.msk [vmem:[%s896_s24 + $0x18] sm:$0xf] %vm543_vm0, %v727_v14  ;;  %v362_v21 = vmul.f32 0.2, %v298_v12  ;;  %v391_v22 = vsel %vm327_vm9, %v295_v7, %v359_v17  ;;  %v392_v23 = vsel %vm328_vm10, %v296_v8, %v360_v19  ;;  %v300_v25 = vadd.f32 %v871_v37, %v882_v44  ;;  %v225_v7 = vld [vmem:[%s846_s20 + $0xc8] sm:$0xff] }
  0x3d   : > { %551 = vst.msk [vmem:[%s896_s24 + $0x1c] sm:$0xf] %vm543_vm0, %v728_v16  ;;  %v729_v28 = vpack.c.bf16 %v391_v22, %v391_v22  ;;  %v730_v29 = vpack.c.bf16 %v392_v23, %v392_v23  ;;  %v393_v30 = vsel %vm329_vm11, %v297_v11, %v361_v20  ;;  %vm331_vm13 = vcmp.ge.f32.partialorder %v299_v24, 0.0 }
  0x3e   : > { %v394_v31 = vsel %vm330_vm12, %v298_v12, %v362_v21  ;;  %v731_v35 = vpack.c.bf16 %v393_v30, %v393_v30  ;;  %v363_v38 = vmul.f32 0.2, %v299_v24  ;;  %vm332_vm14 = vcmp.ge.f32.partialorder %v300_v25, 0.0  ;;  %v226_v12 = vld [vmem:[%s846_s20 + $0xd0] sm:$0xff] }
  0x3f   : > { %v732_v36 = vpack.c.bf16 %v394_v31, %v394_v31  ;;  %552 = vst.msk [vmem:[%s896_s24 + $0x20] sm:$0xf] %vm543_vm0, %v729_v28  ;;  %553 = vst.msk [vmem:[%s896_s24 + $0x24] sm:$0xf] %vm543_vm0, %v730_v29  ;;  %v364_v39 = vmul.f32 0.2, %v300_v25  ;;  %v265_v40 = vmul.f32 %v853_v18, %v214_v26  ;;  %v266_v41 = vmul.f32 %v853_v18, %v215_v27 }
  0x40   : > { %554 = vst.msk [vmem:[%s896_s24 + $0x28] sm:$0xf] %vm543_vm0, %v731_v35  ;;  %v395_v42 = vsel %vm331_vm13, %v299_v24, %v363_v38  ;;  %v267_v43 = vmul.f32 %v853_v18, %v216_v32  ;;  %v268_v44 = vmul.f32 %v853_v18, %v217_v33  ;;  %v269_v45 = vmul.f32 %v853_v18, %v218_v34  ;;  %v227_v38 = vld [vmem:[%s846_s20 + $0xd8] sm:$0xff] }
  0x41   : > { %555 = vst.msk [vmem:[%s896_s24 + $0x2c] sm:$0xf] %vm543_vm0, %v732_v36  ;;  %v733_v46 = vpack.c.bf16 %v395_v42, %v395_v42  ;;  %v396_v47 = vsel %vm332_vm14, %v300_v25, %v364_v39  ;;  %v301_v48 = vadd.f32 %v871_v37, %v265_v40  ;;  %v302_v49 = vadd.f32 %v871_v37, %v266_v41  ;;  %v228_v39 = vld [vmem:[%s846_s20 + $0xe0] sm:$0xff] }
  0x42   : > { %v734_v50 = vpack.c.bf16 %v396_v47, %v396_v47  ;;  %v303_v51 = vadd.f32 %v871_v37, %v267_v43  ;;  %v304_v52 = vadd.f32 %v871_v37, %v268_v44  ;;  %v305_v53 = vadd.f32 %v871_v37, %v269_v45  ;;  %v229_v43 = vld [vmem:[%s846_s20 + $0xe8] sm:$0xff] }
  0x43   : > { %556 = vst.msk [vmem:[%s896_s24 + $0x30] sm:$0xf] %vm543_vm0, %v733_v46  ;;  %vm333_vm15 = vcmp.ge.f32.partialorder %v301_v48, 0.0  ;;  %v365_v55 = vmul.f32 0.2, %v301_v48  ;;  %vm334_vm1 = vcmp.ge.f32.partialorder %v302_v49, 0.0  ;;  %v270_v11 = vmul.f32 %v853_v18, %v219_v54 }
  0x44   : > { %v366_v56 = vmul.f32 0.2, %v302_v49  ;;  %557 = vst.msk [vmem:[%s896_s24 + $0x34] sm:$0xf] %vm543_vm0, %v734_v50  ;;  %vm335_vm2 = vcmp.ge.f32.partialorder %v303_v51, 0.0  ;;  %vm336_vm3 = vcmp.ge.f32.partialorder %v304_v52, 0.0  ;;  %v271_v14 = vmul.f32 %v853_v18, %v220_v62 }
  0x45   : > { %v367_v57 = vmul.f32 0.2, %v303_v51  ;;  %v368_v58 = vmul.f32 0.2, %v304_v52  ;;  %v397_v59 = vsel %vm333_vm15, %v301_v48, %v365_v55  ;;  %vm337_vm4 = vcmp.ge.f32.partialorder %v305_v53, 0.0 }
  0x46   : > { %v398_v60 = vsel %vm334_vm1, %v302_v49, %v366_v56  ;;  %v369_v61 = vmul.f32 0.2, %v305_v53  ;;  %v735_v1 = vpack.c.bf16 %v397_v59, %v397_v59  ;;  %v272_v15 = vmul.f32 %v853_v18, %v221_v63  ;;  %v231_v63 = vld [vmem:[%s846_s20 + $0xf8] sm:$0xff] }
  0x47   : > { %v736_v2 = vpack.c.bf16 %v398_v60, %v398_v60  ;;  %v399_v3 = vsel %vm335_vm2, %v303_v51, %v367_v57  ;;  %v400_v4 = vsel %vm336_vm3, %v304_v52, %v368_v58  ;;  %v273_v16 = vmul.f32 %v853_v18, %v222_v0  ;;  %v230_v52 = vld [vmem:[%s846_s20 + $0xf0] sm:$0xff] }
  0x48   : > { %v737_v8 = vpack.c.bf16 %v399_v3, %v399_v3  ;;  %v738_v9 = vpack.c.bf16 %v400_v4, %v400_v4  ;;  %v401_v10 = vsel %vm337_vm4, %v305_v53, %v369_v61  ;;  %558 = vst.msk [vmem:[%s896_s24 + $0x38] sm:$0xf] %vm543_vm0, %v735_v1  ;;  %v306_v17 = vadd.f32 %v871_v37, %v270_v11 }
  0x49   : > { %559 = vst.msk [vmem:[%s896_s24 + $0x3c] sm:$0xf] %vm543_vm0, %v736_v2  ;;  %v739_v13 = vpack.c.bf16 %v401_v10, %v401_v10  ;;  %v274_v19 = vmul.f32 %v853_v18, %v223_v5  ;;  %v275_v20 = vmul.f32 %v853_v18, %v224_v6  ;;  %v276_v21 = vmul.f32 %v853_v18, %v225_v7 }
  0x4a   : > { %560 = vst.msk [vmem:[%s896_s24 + $0x40] sm:$0xf] %vm543_vm0, %v737_v8  ;;  %561 = vst.msk [vmem:[%s896_s24 + $0x44] sm:$0xf] %vm543_vm0, %v738_v9  ;;  %v307_v22 = vadd.f32 %v871_v37, %v271_v14  ;;  %v308_v23 = vadd.f32 %v871_v37, %v272_v15  ;;  %v309_v24 = vadd.f32 %v871_v37, %v273_v16  ;;  %vm338_vm5 = vcmp.ge.f32.partialorder %v306_v17, 0.0 }
  0x4b   : > { %562 = vst.msk [vmem:[%s896_s24 + $0x48] sm:$0xf] %vm543_vm0, %v739_v13  ;;  %v277_v25 = vmul.f32 %v853_v18, %v226_v12  ;;  %v370_v26 = vmul.f32 0.2, %v306_v17  ;;  %v310_v27 = vadd.f32 %v871_v37, %v274_v19  ;;  %v311_v28 = vadd.f32 %v871_v37, %v275_v20 }
  0x4c   : > { %vm339_vm6 = vcmp.ge.f32.partialorder %v307_v22, 0.0  ;;  %v371_v29 = vmul.f32 0.2, %v307_v22  ;;  %vm340_vm7 = vcmp.ge.f32.partialorder %v308_v23, 0.0  ;;  %v372_v30 = vmul.f32 0.2, %v308_v23 }
  0x4d   : > { %v402_v31 = vsel %vm338_vm5, %v306_v17, %v370_v26  ;;  %vm341_vm8 = vcmp.ge.f32.partialorder %v309_v24, 0.0  ;;  %v373_v32 = vmul.f32 0.2, %v309_v24  ;;  %vm342_vm9 = vcmp.ge.f32.partialorder %v310_v27, 0.0 }
  0x4e   : > { %v740_v33 = vpack.c.bf16 %v402_v31, %v402_v31  ;;  %v403_v34 = vsel %vm339_vm6, %v307_v22, %v371_v29  ;;  %v404_v35 = vsel %vm340_vm7, %v308_v23, %v372_v30  ;;  %v374_v36 = vmul.f32 0.2, %v310_v27 }
  0x4f   : > { %v741_v40 = vpack.c.bf16 %v403_v34, %v403_v34  ;;  %v742_v41 = vpack.c.bf16 %v404_v35, %v404_v35  ;;  %v405_v42 = vsel %vm341_vm8, %v309_v24, %v373_v32  ;;  %vm343_vm10 = vcmp.ge.f32.partialorder %v311_v28, 0.0 }
  0x50   : > { %563 = vst.msk [vmem:[%s896_s24 + $0x4c] sm:$0xf] %vm543_vm0, %v740_v33  ;;  %v743_v44 = vpack.c.bf16 %v405_v42, %v405_v42  ;;  %v406_v45 = vsel %vm342_vm9, %v310_v27, %v374_v36  ;;  %v375_v46 = vmul.f32 0.2, %v311_v28  ;;  %v312_v47 = vadd.f32 %v871_v37, %v276_v21 }
  0x51   : > { %564 = vst.msk [vmem:[%s896_s24 + $0x50] sm:$0xf] %vm543_vm0, %v741_v40  ;;  %565 = vst.msk [vmem:[%s896_s24 + $0x54] sm:$0xf] %vm543_vm0, %v742_v41  ;;  %v744_v48 = vpack.c.bf16 %v406_v45, %v406_v45  ;;  %v313_v49 = vadd.f32 %v871_v37, %v277_v25  ;;  %v278_v50 = vmul.f32 %v853_v18, %v227_v38 }
  0x52   : > { %v279_v51 = vmul.f32 %v853_v18, %v228_v39  ;;  %566 = vst.msk [vmem:[%s896_s24 + $0x58] sm:$0xf] %vm543_vm0, %v743_v44  ;;  %v407_v53 = vsel %vm343_vm10, %v311_v28, %v375_v46  ;;  %vm344_vm11 = vcmp.ge.f32.partialorder %v312_v47, 0.0  ;;  %v376_v54 = vmul.f32 0.2, %v312_v47 }
  0x53   : > { %v280_v55 = vmul.f32 %v853_v18, %v229_v43  ;;  %567 = vst.msk [vmem:[%s896_s24 + $0x5c] sm:$0xf] %vm543_vm0, %v744_v48  ;;  %v745_v56 = vpack.c.bf16 %v407_v53, %v407_v53  ;;  %vm345_vm12 = vcmp.ge.f32.partialorder %v313_v49, 0.0  ;;  %v377_v57 = vmul.f32 0.2, %v313_v49 }
  0x54   : > { %v314_v58 = vadd.f32 %v871_v37, %v278_v50  ;;  %v408_v59 = vsel %vm344_vm11, %v312_v47, %v376_v54  ;;  %v315_v60 = vadd.f32 %v871_v37, %v279_v51  ;;  %v281_v62 = vmul.f32 %v853_v18, %v230_v52 }
  0x55   : > { %v316_v61 = vadd.f32 %v871_v37, %v280_v55  ;;  %568 = vst.msk [vmem:[%s896_s24 + $0x60] sm:$0xf] %vm543_vm0, %v745_v56  ;;  %v746_v0 = vpack.c.bf16 %v408_v59, %v408_v59  ;;  %v409_v1 = vsel %vm345_vm12, %v313_v49, %v377_v57  ;;  %v282_v8 = vmul.f32 %v853_v18, %v231_v63 }
  0x56   : > { %vm346_vm13 = vcmp.ge.f32.partialorder %v314_v58, 0.0  ;;  %v378_v2 = vmul.f32 0.2, %v314_v58  ;;  %v747_v3 = vpack.c.bf16 %v409_v1, %v409_v1  ;;  %vm347_vm14 = vcmp.ge.f32.partialorder %v315_v60, 0.0 }
  0x57   : > { %v379_v4 = vmul.f32 0.2, %v315_v60  ;;  %vm348_vm15 = vcmp.ge.f32.partialorder %v316_v61, 0.0  ;;  %569 = vst.msk [vmem:[%s896_s24 + $0x64] sm:$0xf] %vm543_vm0, %v746_v0  ;;  %v317_v7 = vadd.f32 %v871_v37, %v281_v62  ;;  %v318_v15 = vadd.f32 %v871_v37, %v282_v8 }
  0x58   : > { %v410_v5 = vsel %vm346_vm13, %v314_v58, %v378_v2  ;;  %v380_v6 = vmul.f32 0.2, %v316_v61  ;;  %570 = vst.msk [vmem:[%s896_s24 + $0x68] sm:$0xf] %vm543_vm0, %v747_v3 }
  0x59   : > { %v748_v9 = vpack.c.bf16 %v410_v5, %v410_v5  ;;  %v411_v10 = vsel %vm347_vm14, %v315_v60, %v379_v4  ;;  %vm349_vm1 = vcmp.ge.f32.partialorder %v317_v7, 0.0  ;;  %v381_v13 = vmul.f32 0.2, %v317_v7 }
  0x5a   : > { %v749_v11 = vpack.c.bf16 %v411_v10, %v411_v10  ;;  %v412_v12 = vsel %vm348_vm15, %v316_v61, %v380_v6  ;;  %vm350_vm2 = vcmp.ge.f32.partialorder %v318_v15, 0.0  ;;  %v382_v17 = vmul.f32 0.2, %v318_v15 }
  0x5b   : > { %571 = vst.msk [vmem:[%s896_s24 + $0x6c] sm:$0xf] %vm543_vm0, %v748_v9  ;;  %v750_v14 = vpack.c.bf16 %v412_v12, %v412_v12  ;;  %v413_v16 = vsel %vm349_vm1, %v317_v7, %v381_v13 }
  0x5c   : > { %572 = vst.msk [vmem:[%s896_s24 + $0x70] sm:$0xf] %vm543_vm0, %v749_v11  ;;  %v751_v18 = vpack.c.bf16 %v413_v16, %v413_v16  ;;  %v414_v19 = vsel %vm350_vm2, %v318_v15, %v382_v17 }
  0x5d   : > { %573 = vst.msk [vmem:[%s896_s24 + $0x74] sm:$0xf] %vm543_vm0, %v750_v14  ;;  %v752_v20 = vpack.c.bf16 %v414_v19, %v414_v19 }
  0x5e   : > { %574 = vst.msk [vmem:[%s896_s24 + $0x78] sm:$0xf] %vm543_vm0, %v751_v18 }
  0x5f   : > { %575 = vst.msk [vmem:[%s896_s24 + $0x7c] sm:$0xf] %vm543_vm0, %v752_v20 }
  0x60 PF: > { %s12_s11 = sadd.s32 1, %s801_s11   ;;  %s1036_s9 = smov %s797_s10 }
  0x61   : > { %p9_p5 = scmp.ge.s32.totalorder %s12_s11, 4   ;;  %s1037_s10 = smov %s1039_s12 }
  0x63   :  { %11 = sbr.rel (!%p9_p5) target bundleno = 2 (0x2), region = 61 }

// kernel: unet_forward.27
= control target key start
LH: loop header
LB: loop body
LE: loop exit
PB: predicated region body
PF: predicated region fallthrough
CT: control target
= control target key end

     0   :  { %s1088_s12 = smov 0   ;;  %s1090_s13 = smov 0   ;;  %s1406_s0 = inlined_call_operand.vmem [shape: bf16[2,256,18], index: 0, kind: input, shape index: {}]   ;;  %s1407_s1 = inlined_call_operand.vmem [shape: bf16[18,8], index: 1, kind: input, shape index: {}]   ;;  %s1408_s2 = inlined_call_operand.vmem [shape: f32[2,256,8], index: 2, kind: output, shape index: {0}]   ;;  %s1409_s3 = inlined_call_operand.vmem [shape: f32[2,2,8], index: 3, kind: output, shape index: {1}]  }
   0x1   :  { %s1092_s14 = smov 0  }
   0x2 LB: > { %s26_s15 = sadd.s32 1, %s1061_s13  ;;  %p896_p0 = scmp.ge.s32.totalorder %s1065_s14, 1  ;;  %s1065_s14 = sphi %s1092_s14, %s14_s14   ;;  %s1061_s13 = sphi %s1090_s13, %s1411_s13   ;;  %s1057_s12 = sphi %s1088_s12, %s1410_s12  }
   0x3   : > { %p28_p1 = scmp.ge.s32.totalorder %s26_s15, 2  ;;  %p161_p2 = scmp.lt.s32.totalorder %s1065_s14, 3 }
   0x5   : > { %s1413_s15 = smov (%p28_p1, %s26_s15), 0  ;;  %p162_p3 = pnand %p896_p0, %p161_p2 }
   0x6   : > { %v1025_v0 = vld [vmem:[%s1407_s1] sm:$0xff] (!%p162_p3)   ;;  %vm395_vm0 = vcmask (!%p162_p3), 1040384   ;;  %v1026_v1 = vld [vmem:[%s1407_s1 + $0x8] ss:$0 sps:$4 sm:$0x11] (!%p162_p3)   ;;  %p198_p4 = scmp.lt.s32.totalorder (!%p162_p3), %s1057_s12, 1 }
   0x7   : > { %165 = sbr.rel (%p162_p3) target bundleno = 315 (0x13b), region = 28  ;;  %958 = vmatprep.subr.bf16.mxu0 (!%p162_p3), %v1025_v0  ;;  %994 = vmatprep.subr.bf16.mxu1 (!%p162_p3), %v1025_v0  ;;  %v397_v2 = vsel (!%p162_p3), %vm395_vm0, %v1026_v1, 0  ;;  %vm346_vm1 = vcmask (!%p162_p3), 146432   ;;  %vm768_vm2 = vcmask (!%p162_p3), 58368   ;;  %v1067_v19 = vmov (!%p162_p3), 0.0  }
   0x8   : > { %959 = vmatpush3.bf16.msra.mxu0 (!%p162_p3), %v1025_v0  ;;  %996 = vmatpush3.bf16.msra.mxu1 (!%p162_p3), %v1025_v0  ;;  %vm560_vm3 = vcmask (!%p162_p3), 64512  }
   0x9   : > { %998 = vmatprep.subr.msk.bf16.mxu0 (!%p162_p3), %vm395_vm0, %v1026_v1  ;;  %999 = vmatprep.subr.msk.bf16.mxu1 (!%p162_p3), %vm395_vm0, %v1026_v1 }
   0xc   : > { %961 = vmatpush3.bf16.msra.mxu0 (!%p162_p3), %v397_v2  ;;  %997 = vmatpush3.bf16.msra.mxu1 (!%p162_p3), %v397_v2 }
   0xe   : > { %s1415_s12 = smov (!%p198_p4, %s1057_s12), 1 }
   0xf   : > { %s938_s20 = sshll.u32 %s1415_s12, 7  ;;  %s901_s24 = sshll.u32 %s1415_s12, 1 }
  0x10   : > { %s1121_s23 = scalar_lea.vmem %s1406_s0, %s938_s20  ;;  %s1159_s27 = scalar_lea.vmem %s1409_s3, %s901_s24 }
  0x11   : > { %v1027_v3 = vld [vmem:[%s1121_s23] sm:$0xff]   ;;  %v1028_v4 = vld [vmem:[%s1121_s23 + $0x8] sm:$0xff]   ;;  %v1029_v5 = vld [vmem:[%s1121_s23 + $0x10] sm:$0xff]   ;;  %769 = vst.msk [vmem:[%s1159_s27] sm:$0x3] %vm768_vm2, %v1067_v19  ;;  %s939_s28 = sshll.u32 %s1415_s12, 8 }
  0x12   : > { %962 = vmatprep.mubr.msk.bf16.mxu0 %vm346_vm1, %v1027_v3  ;;  %v1030_v6 = vld [vmem:[%s1121_s23 + $0x18] sm:$0xff]   ;;  %v1031_v7 = vld [vmem:[%s1121_s23 + $0x20] sm:$0xff]   ;;  %v1036_v9 = vld [vmem:[%s1121_s23 + $0x48] sm:$0xff]   ;;  %s1167_s4 = scalar_lea.vmem %s1408_s2, %s939_s28 }
  0x13   : > { %963 = vmatmul.mubr.msk.bf16.vlgmr.msra.gmra.mrb[0].mxu0 %vm346_vm1, %v1028_v4  ;;  %v1035_v8 = vld [vmem:[%s1121_s23 + $0x40] sm:$0xff]   ;;  %v1037_v10 = vld [vmem:[%s1121_s23 + $0x50] sm:$0xff]   ;;  %v1032_v11 = vld [vmem:[%s1121_s23 + $0x28] sm:$0xff]  }
  0x14   : > { %966 = vmatprep.mubr.msk.bf16.mxu0 %vm346_vm1, %v1029_v5  ;;  %978 = vmatprep.mubr.msk.bf16.mxu1 %vm346_vm1, %v1035_v8  ;;  %v1038_v12 = vld [vmem:[%s1121_s23 + $0x58] sm:$0xff]   ;;  %v1033_v13 = vld [vmem:[%s1121_s23 + $0x30] sm:$0xff]   ;;  %v1039_v14 = vld [vmem:[%s1121_s23 + $0x60] sm:$0xff]  }
  0x15   : > { %979 = vmatmul.mubr.msk.bf16.vlgmr.msra.gmra.mrb[0].mxu1 %vm346_vm1, %v1036_v9  ;;  %v1034_v15 = vld [vmem:[%s1121_s23 + $0x38] sm:$0xff]   ;;  %v1040_v16 = vld [vmem:[%s1121_s23 + $0x68] sm:$0xff]   ;;  %v1041_v17 = vld [vmem:[%s1121_s23 + $0x70] sm:$0xff]  }
  0x16   : > { %982 = vmatprep.mubr.msk.bf16.mxu1 %vm346_vm1, %v1037_v10  ;;  %v1042_v18 = vld [vmem:[%s1121_s23 + $0x78] sm:$0xff]  }
  0x1b   : > { %967 = vmatmul.mubr.msk.bf16.gmra.mrb[4].mxu0 %vm346_vm1, %v1030_v6 }
  0x1c   : > { %970 = vmatprep.mubr.msk.bf16.mxu0 %vm346_vm1, %v1031_v7 }
  0x1d   : > { %983 = vmatmul.mubr.msk.bf16.gmra.mrb[4].mxu1 %vm346_vm1, %v1038_v12 }
  0x1e   : > { %986 = vmatprep.mubr.msk.bf16.mxu1 %vm346_vm1, %v1039_v14 }
  0x23   : > { %971 = vmatmul.mubr.msk.bf16.gmra.mrb[8].mxu0 %vm346_vm1, %v1032_v11 }
  0x24   : > { %974 = vmatprep.mubr.msk.bf16.mxu0 %vm346_vm1, %v1033_v13 }
  0x25   : > { %987 = vmatmul.mubr.msk.bf16.gmra.mrb[8].mxu1 %vm346_vm1, %v1040_v16 }
  0x26   : > { %990 = vmatprep.mubr.msk.bf16.mxu1 %vm346_vm1, %v1041_v17 }
  0x2b   : > { %975 = vmatmul.mubr.msk.bf16.gmra.mrb[12].mxu0 %vm346_vm1, %v1034_v15 }
  0x2d   : > { %991 = vmatmul.mubr.msk.bf16.gmra.mrb[12].mxu1 %vm346_vm1, %v1042_v18 }
  0xe6   : > { %v964_v20 = vpop.f32.mrb[0].mxu0 }
  0xe7   : > { %563 = vst.msk [vmem:[%s1167_s4 + $0x10] sm:$0xff] %vm560_vm3, %v964_v20  ;;  %v433_v21 = vpop.f32.mrb[1].mxu0  ;;  %v664_v25 = vmul.f32 %v964_v20, %v964_v20  ;;  %v596_v30 = vsel %vm560_vm3, %v964_v20, 0.0 }
  0xe8   : > { %561 = vst.msk [vmem:[%s1167_s4] sm:$0xff] %vm560_vm3, %v433_v21  ;;  %v662_v22 = vmul.f32 %v433_v21, %v433_v21  ;;  %v965_v23 = vpop.f32.mrb[2].mxu0  ;;  %v593_v26 = vsel %vm560_vm3, %v433_v21, 0.0  ;;  %v1184_v39 = vpop.f32.mrb[0].mxu1 }
  0xe9   : > { %564 = vst.msk [vmem:[%s1167_s4 + $0x18] sm:$0xff] %vm560_vm3, %v965_v23  ;;  %v436_v24 = vpop.f32.mrb[3].mxu0  ;;  %v665_v32 = vmul.f32 %v965_v23, %v965_v23  ;;  %v697_v36 = vsel %vm560_vm3, %v664_v25, 0.0  ;;  %v598_v37 = vsel %vm560_vm3, %v965_v23, 0.0  ;;  %579 = vst.msk [vmem:[%s1167_s4 + $0x90] sm:$0xff] %vm560_vm3, %v1184_v39  ;;  %v1191_v43 = vpop.f32.mrb[1].mxu1 }
  0xea   : > { %562 = vst.msk [vmem:[%s1167_s4 + $0x8] sm:$0xff] %vm560_vm3, %v436_v24  ;;  %v594_v27 = vsel %vm560_vm3, %v436_v24, 0.0  ;;  %v663_v28 = vmul.f32 %v436_v24, %v436_v24  ;;  %v694_v31 = vsel %vm560_vm3, %v662_v22, 0.0  ;;  %577 = vst.msk [vmem:[%s1167_s4 + $0x80] sm:$0xff] %vm560_vm3, %v1191_v43  ;;  %v1200_v48 = vpop.f32.mrb[2].mxu1 }
  0xeb   : > { %v595_v29 = vadd.f32 %v594_v27, %v593_v26  ;;  %v699_v44 = vsel %vm560_vm3, %v665_v32, 0.0  ;;  %580 = vst.msk [vmem:[%s1167_s4 + $0x98] sm:$0xff] %vm560_vm3, %v1200_v48  ;;  %v1207_v52 = vpop.f32.mrb[3].mxu1 }
  0xec   : > { %v695_v33 = vsel %vm560_vm3, %v663_v28, 0.0  ;;  %578 = vst.msk [vmem:[%s1167_s4 + $0x88] sm:$0xff] %vm560_vm3, %v1207_v52 }
  0xed   : > { %v597_v34 = vadd.f32 %v596_v30, %v595_v29  ;;  %v696_v35 = vadd.f32 %v695_v33, %v694_v31 }
  0xee   : > { %v968_v38 = vpop.f32.mrb[4].mxu0 }
  0xef   : > { %v698_v40 = vadd.f32 %v697_v36, %v696_v35  ;;  %567 = vst.msk [vmem:[%s1167_s4 + $0x30] sm:$0xff] %vm560_vm3, %v968_v38  ;;  %v449_v41 = vpop.f32.mrb[5].mxu0  ;;  %v599_v42 = vadd.f32 %v598_v37, %v597_v34  ;;  %v668_v53 = vmul.f32 %v968_v38, %v968_v38  ;;  %v604_v59 = vsel %vm560_vm3, %v968_v38, 0.0 }
  0xf0   : > { %565 = vst.msk [vmem:[%s1167_s4 + $0x20] sm:$0xff] %vm560_vm3, %v449_v41  ;;  %v600_v45 = vsel %vm560_vm3, %v449_v41, 0.0  ;;  %v666_v46 = vmul.f32 %v449_v41, %v449_v41  ;;  %v969_v47 = vpop.f32.mrb[6].mxu0  ;;  %v1220_v3 = vpop.f32.mrb[4].mxu1 }
  0xf1   : > { %v601_v49 = vadd.f32 %v600_v45, %v599_v42  ;;  %v700_v50 = vadd.f32 %v699_v44, %v698_v40  ;;  %568 = vst.msk [vmem:[%s1167_s4 + $0x38] sm:$0xff] %vm560_vm3, %v969_v47  ;;  %v452_v51 = vpop.f32.mrb[7].mxu0  ;;  %v669_v60 = vmul.f32 %v969_v47, %v969_v47  ;;  %v705_v0 = vsel %vm560_vm3, %v668_v53, 0.0  ;;  %583 = vst.msk [vmem:[%s1167_s4 + $0xb0] sm:$0xff] %vm560_vm3, %v1220_v3  ;;  %v1227_v7 = vpop.f32.mrb[5].mxu1 }
  0xf2   : > { %v701_v54 = vsel %vm560_vm3, %v666_v46, 0.0  ;;  %566 = vst.msk [vmem:[%s1167_s4 + $0x28] sm:$0xff] %vm560_vm3, %v452_v51  ;;  %v602_v55 = vsel %vm560_vm3, %v452_v51, 0.0  ;;  %v667_v56 = vmul.f32 %v452_v51, %v452_v51  ;;  %v606_v1 = vsel %vm560_vm3, %v969_v47, 0.0  ;;  %581 = vst.msk [vmem:[%s1167_s4 + $0xa0] sm:$0xff] %vm560_vm3, %v1227_v7  ;;  %v1236_v12 = vpop.f32.mrb[6].mxu1 }
  0xf3   : > { %v702_v57 = vadd.f32 %v701_v54, %v700_v50  ;;  %v603_v58 = vadd.f32 %v602_v55, %v601_v49  ;;  %v707_v8 = vsel %vm560_vm3, %v669_v60, 0.0  ;;  %584 = vst.msk [vmem:[%s1167_s4 + $0xb8] sm:$0xff] %vm560_vm3, %v1236_v12  ;;  %v1243_v16 = vpop.f32.mrb[7].mxu1 }
  0xf4   : > { %v703_v61 = vsel %vm560_vm3, %v667_v56, 0.0  ;;  %582 = vst.msk [vmem:[%s1167_s4 + $0xa8] sm:$0xff] %vm560_vm3, %v1243_v16 }
  0xf5   : > { %v605_v62 = vadd.f32 %v604_v59, %v603_v58  ;;  %v704_v63 = vadd.f32 %v703_v61, %v702_v57  ;;  %v678_v58 = vmul.f32 %v1191_v43, %v1191_v43 }
  0xf6   : > { %v972_v2 = vpop.f32.mrb[8].mxu0 }
  0xf7   : > { %v706_v4 = vadd.f32 %v705_v0, %v704_v63  ;;  %571 = vst.msk [vmem:[%s1167_s4 + $0x50] sm:$0xff] %vm560_vm3, %v972_v2  ;;  %v465_v5 = vpop.f32.mrb[9].mxu0  ;;  %v607_v6 = vadd.f32 %v606_v1, %v605_v62  ;;  %v672_v17 = vmul.f32 %v972_v2, %v972_v2  ;;  %v612_v23 = vsel %vm560_vm3, %v972_v2, 0.0 }
  0xf8   : > { %569 = vst.msk [vmem:[%s1167_s4 + $0x40] sm:$0xff] %vm560_vm3, %v465_v5  ;;  %v608_v9 = vsel %vm560_vm3, %v465_v5, 0.0  ;;  %v670_v10 = vmul.f32 %v465_v5, %v465_v5  ;;  %v973_v11 = vpop.f32.mrb[10].mxu0  ;;  %v1256_v31 = vpop.f32.mrb[8].mxu1  ;;  %v624_v63 = vsel %vm560_vm3, %v1191_v43, 0.0 }
  0xf9   : > { %v609_v13 = vadd.f32 %v608_v9, %v607_v6  ;;  %v708_v14 = vadd.f32 %v707_v8, %v706_v4  ;;  %572 = vst.msk [vmem:[%s1167_s4 + $0x58] sm:$0xff] %vm560_vm3, %v973_v11  ;;  %v468_v15 = vpop.f32.mrb[11].mxu0  ;;  %v673_v24 = vmul.f32 %v973_v11, %v973_v11  ;;  %v713_v28 = vsel %vm560_vm3, %v672_v17, 0.0  ;;  %587 = vst.msk [vmem:[%s1167_s4 + $0xd0] sm:$0xff] %vm560_vm3, %v1256_v31  ;;  %v1263_v35 = vpop.f32.mrb[9].mxu1 }
  0xfa   : > { %v709_v18 = vsel %vm560_vm3, %v670_v10, 0.0  ;;  %570 = vst.msk [vmem:[%s1167_s4 + $0x48] sm:$0xff] %vm560_vm3, %v468_v15  ;;  %v610_v19 = vsel %vm560_vm3, %v468_v15, 0.0  ;;  %v671_v20 = vmul.f32 %v468_v15, %v468_v15  ;;  %v614_v29 = vsel %vm560_vm3, %v973_v11, 0.0  ;;  %585 = vst.msk [vmem:[%s1167_s4 + $0xc0] sm:$0xff] %vm560_vm3, %v1263_v35  ;;  %v1272_v41 = vpop.f32.mrb[10].mxu1 }
  0xfb   : > { %v710_v21 = vadd.f32 %v709_v18, %v708_v14  ;;  %v611_v22 = vadd.f32 %v610_v19, %v609_v13  ;;  %v715_v36 = vsel %vm560_vm3, %v673_v24, 0.0  ;;  %588 = vst.msk [vmem:[%s1167_s4 + $0xd8] sm:$0xff] %vm560_vm3, %v1272_v41  ;;  %v1279_v46 = vpop.f32.mrb[11].mxu1  ;;  %v725_v6 = vsel %vm560_vm3, %v678_v58, 0.0 }
  0xfc   : > { %v711_v25 = vsel %vm560_vm3, %v671_v20, 0.0  ;;  %586 = vst.msk [vmem:[%s1167_s4 + $0xc8] sm:$0xff] %vm560_vm3, %v1279_v46  ;;  %v679_v8 = vmul.f32 %v1207_v52, %v1207_v52  ;;  %v680_v14 = vmul.f32 %v1184_v39, %v1184_v39  ;;  %v626_v15 = vsel %vm560_vm3, %v1207_v52, 0.0 }
  0xfd   : > { %v613_v26 = vadd.f32 %v612_v23, %v611_v22  ;;  %v712_v27 = vadd.f32 %v711_v25, %v710_v21  ;;  %v628_v18 = vsel %vm560_vm3, %v1184_v39, 0.0  ;;  %v681_v21 = vmul.f32 %v1200_v48, %v1200_v48 }
  0xfe   : > { %v976_v30 = vpop.f32.mrb[12].mxu0  ;;  %v727_v22 = vsel %vm560_vm3, %v679_v8, 0.0  ;;  %v682_v23 = vmul.f32 %v1227_v7, %v1227_v7  ;;  %v630_v39 = vsel %vm560_vm3, %v1200_v48, 0.0  ;;  %v634_v48 = vsel %vm560_vm3, %v1243_v16, 0.0 }
  0xff   : > { %v714_v32 = vadd.f32 %v713_v28, %v712_v27  ;;  %575 = vst.msk [vmem:[%s1167_s4 + $0x70] sm:$0xff] %vm560_vm3, %v976_v30  ;;  %v481_v33 = vpop.f32.mrb[13].mxu0  ;;  %v615_v34 = vadd.f32 %v614_v29, %v613_v26  ;;  %v676_v47 = vmul.f32 %v976_v30, %v976_v30  ;;  %v620_v55 = vsel %vm560_vm3, %v976_v30, 0.0 }
 0x100   : > { %573 = vst.msk [vmem:[%s1167_s4 + $0x60] sm:$0xff] %vm560_vm3, %v481_v33  ;;  %v616_v37 = vsel %vm560_vm3, %v481_v33, 0.0  ;;  %v674_v38 = vmul.f32 %v481_v33, %v481_v33  ;;  %v977_v40 = vpop.f32.mrb[14].mxu0  ;;  %v1296_v0 = vpop.f32.mrb[12].mxu1  ;;  %v729_v26 = vsel %vm560_vm3, %v680_v14, 0.0  ;;  %v632_v27 = vsel %vm560_vm3, %v1227_v7, 0.0 }
 0x101   : > { %v617_v42 = vadd.f32 %v616_v37, %v615_v34  ;;  %v716_v44 = vadd.f32 %v715_v36, %v714_v32  ;;  %576 = vst.msk [vmem:[%s1167_s4 + $0x78] sm:$0xff] %vm560_vm3, %v977_v40  ;;  %v484_v45 = vpop.f32.mrb[15].mxu0  ;;  %v677_v56 = vmul.f32 %v977_v40, %v977_v40  ;;  %v721_v61 = vsel %vm560_vm3, %v676_v47, 0.0  ;;  %591 = vst.msk [vmem:[%s1167_s4 + $0xf0] sm:$0xff] %vm560_vm3, %v1296_v0  ;;  %v1301_v4 = vpop.f32.mrb[13].mxu1 }
 0x102   : > { %v717_v49 = vsel %vm560_vm3, %v674_v38, 0.0  ;;  %574 = vst.msk [vmem:[%s1167_s4 + $0x68] sm:$0xff] %vm560_vm3, %v484_v45  ;;  %v618_v50 = vsel %vm560_vm3, %v484_v45, 0.0  ;;  %v675_v51 = vmul.f32 %v484_v45, %v484_v45  ;;  %v622_v62 = vsel %vm560_vm3, %v977_v40, 0.0  ;;  %589 = vst.msk [vmem:[%s1167_s4 + $0xe0] sm:$0xff] %vm560_vm3, %v1301_v4  ;;  %v993_v43 = vpop.f32.mrb[14].mxu1 }
 0x103   : > { %v718_v53 = vadd.f32 %v717_v49, %v716_v44  ;;  %v619_v54 = vadd.f32 %v618_v50, %v617_v42  ;;  %v723_v5 = vsel %vm560_vm3, %v677_v56, 0.0  ;;  %592 = vst.msk [vmem:[%s1167_s4 + $0xf8] sm:$0xff] %vm560_vm3, %v993_v43  ;;  %v1313_v11 = vsel %vm560_vm3, %v993_v43, 0.0  ;;  %v1315_v13 = vpop.f32.mrb[15].mxu1 }
 0x104   : > { %v719_v57 = vsel %vm560_vm3, %v675_v51, 0.0  ;;  %v693_v17 = vmul.f32 %v993_v43, %v993_v43  ;;  %590 = vst.msk [vmem:[%s1167_s4 + $0xe8] sm:$0xff] %vm560_vm3, %v1315_v13  ;;  %v731_v30 = vsel %vm560_vm3, %v681_v21, 0.0  ;;  %v733_v32 = vsel %vm560_vm3, %v682_v23, 0.0 }
 0x105   : > { %v621_v59 = vadd.f32 %v620_v55, %v619_v54  ;;  %v720_v60 = vadd.f32 %v719_v57, %v718_v53  ;;  %v683_v33 = vmul.f32 %v1243_v16, %v1243_v16  ;;  %v684_v37 = vmul.f32 %v1220_v3, %v1220_v3 }
 0x106   : > { %v1332_v24 = vsel %vm560_vm3, %v693_v17, 0.0  ;;  %v636_v7 = vsel %vm560_vm3, %v1220_v3, 0.0  ;;  %v685_v42 = vmul.f32 %v1236_v12, %v1236_v12  ;;  %v686_v45 = vmul.f32 %v1263_v35, %v1263_v35 }
 0x107   : > { %v722_v1 = vadd.f32 %v721_v61, %v720_v60  ;;  %v623_v2 = vadd.f32 %v622_v62, %v621_v59  ;;  %v735_v44 = vsel %vm560_vm3, %v683_v33, 0.0  ;;  %v737_v50 = vsel %vm560_vm3, %v684_v37, 0.0 }
 0x108   : > { %v638_v16 = vsel %vm560_vm3, %v1236_v12, 0.0  ;;  %v640_v51 = vsel %vm560_vm3, %v1263_v35, 0.0  ;;  %v739_v54 = vsel %vm560_vm3, %v685_v42, 0.0  ;;  %v741_v55 = vsel %vm560_vm3, %v686_v45, 0.0 }
 0x109   : > { %v625_v9 = vadd.f32 %v624_v63, %v623_v2  ;;  %v724_v10 = vadd.f32 %v723_v5, %v722_v1  ;;  %v687_v56 = vmul.f32 %v1279_v46, %v1279_v46  ;;  %v688_v59 = vmul.f32 %v1256_v31, %v1256_v31 }
 0x10a   : > { %v642_v12 = vsel %vm560_vm3, %v1279_v46, 0.0  ;;  %v644_v35 = vsel %vm560_vm3, %v1256_v31, 0.0  ;;  %v689_v62 = vmul.f32 %v1272_v41, %v1272_v41  ;;  %v690_v1 = vmul.f32 %v1301_v4, %v1301_v4 }
 0x10b   : > { %v726_v19 = vadd.f32 %v725_v6, %v724_v10  ;;  %v627_v20 = vadd.f32 %v626_v15, %v625_v9  ;;  %v743_v63 = vsel %vm560_vm3, %v687_v56, 0.0  ;;  %v745_v6 = vsel %vm560_vm3, %v688_v59, 0.0 }
 0x10c   : > { %v646_v46 = vsel %vm560_vm3, %v1272_v41, 0.0  ;;  %v648_v8 = vsel %vm560_vm3, %v1301_v4, 0.0  ;;  %v747_v9 = vsel %vm560_vm3, %v689_v62, 0.0  ;;  %v749_v10 = vsel %vm560_vm3, %v690_v1, 0.0 }
 0x10d   : > { %v629_v52 = vadd.f32 %v628_v18, %v627_v20  ;;  %v728_v25 = vadd.f32 %v727_v22, %v726_v19  ;;  %v691_v14 = vmul.f32 %v1315_v13, %v1315_v13  ;;  %v692_v18 = vmul.f32 %v1296_v0, %v1296_v0 }
 0x10e   : > { %v650_v41 = vsel %vm560_vm3, %v1315_v13, 0.0  ;;  %v652_v4 = vsel %vm560_vm3, %v1296_v0, 0.0 }
 0x10f   : > { %v730_v28 = vadd.f32 %v729_v26, %v728_v25  ;;  %v631_v29 = vadd.f32 %v630_v39, %v629_v52  ;;  %v751_v21 = vsel %vm560_vm3, %v691_v14, 0.0  ;;  %v753_v52 = vsel %vm560_vm3, %v692_v18, 0.0 }
 0x111   : > { %v633_v34 = vadd.f32 %v632_v27, %v631_v29  ;;  %v732_v36 = vadd.f32 %v731_v30, %v730_v28 }
 0x113   : > { %v734_v38 = vadd.f32 %v733_v32, %v732_v36  ;;  %v635_v40 = vadd.f32 %v634_v48, %v633_v34 }
 0x115   : > { %v637_v47 = vadd.f32 %v636_v7, %v635_v40  ;;  %v736_v49 = vadd.f32 %v735_v44, %v734_v38  ;;  %v770_v38 = vld [vmem:[%s1159_s27] sm:$0x3] }
 0x117   : > { %v738_v53 = vadd.f32 %v737_v50, %v736_v49  ;;  %v639_v3 = vadd.f32 %v638_v16, %v637_v47 }
 0x119   : > { %v641_v57 = vadd.f32 %v640_v51, %v639_v3  ;;  %v740_v58 = vadd.f32 %v739_v54, %v738_v53 }
 0x11b   : > { %v742_v60 = vadd.f32 %v741_v55, %v740_v58  ;;  %v643_v61 = vadd.f32 %v642_v12, %v641_v57 }
 0x11d   : > { %v645_v2 = vadd.f32 %v644_v35, %v643_v61  ;;  %v744_v5 = vadd.f32 %v743_v63, %v742_v60 }
 0x11f   : > { %v746_v43 = vadd.f32 %v745_v6, %v744_v5  ;;  %v647_v31 = vadd.f32 %v646_v46, %v645_v2 }
 0x121   : > { %v649_v15 = vadd.f32 %v648_v8, %v647_v31  ;;  %v748_v17 = vadd.f32 %v747_v9, %v746_v43 }
 0x123   : > { %v750_v19 = vadd.f32 %v749_v10, %v748_v17  ;;  %v651_v20 = vadd.f32 %v650_v41, %v649_v15 }
 0x125   : > { %v653_v22 = vadd.f32 %v652_v4, %v651_v20  ;;  %v752_v23 = vadd.f32 %v751_v21, %v750_v19 }
 0x127   : > { %v655_v25 = vadd.f32 %v1313_v11, %v653_v22  ;;  %v754_v26 = vadd.f32 %v753_v52, %v752_v23 }
 0x129   : > { %v656_v39 = vrot.slane %v655_v25, 4  ;;  %v756_v27 = vadd.f32 %v1332_v24, %v754_v26 }
 0x12b   : > { %v657_v13 = vadd.f32 %v656_v39, %v655_v25  ;;  %v757_v28 = vrot.slane %v756_v27, 4 }
 0x12d   : > { %v658_v29 = vrot.slane %v657_v13, 2  ;;  %v758_v30 = vadd.f32 %v757_v28, %v756_v27 }
 0x12f   : > { %v659_v32 = vadd.f32 %v658_v29, %v657_v13  ;;  %v759_v0 = vrot.slane %v758_v30, 2 }
 0x131   : > { %v660_v33 = vrot.slane %v659_v32, 1  ;;  %v760_v34 = vadd.f32 %v759_v0, %v758_v30 }
 0x133   : > { %v761_v36 = vrot.slane %v760_v34, 1  ;;  %v661_v37 = vadd.f32 %v660_v33, %v659_v32 }
 0x135   : > { %v762_v48 = vadd.f32 %v761_v36, %v760_v34 }
 0x137   : > { %v763_v40 = vsel %vm395_vm0, %v661_v37, %v762_v48 }
 0x138   : > { %v771_v11 = vadd.f32 %v770_v38, %v763_v40 }
 0x13a   : > { %773 = vst.msk [vmem:[%s1159_s27] sm:$0x3] %vm768_vm2, %v771_v11 }
 0x13b PF: > { %s14_s14 = sadd.s32 1, %s1065_s14   ;;  %s1410_s12 = smov %s1061_s13 }
 0x13c   : > { %p11_p5 = scmp.ge.s32.totalorder %s14_s14, 4   ;;  %s1411_s13 = smov %s1413_s15 }
 0x13e   :  { %13 = sbr.rel (!%p11_p5) target bundleno = 2 (0x2), region = 74 }

// kernel: unet_forward.29
= control target key start
LH: loop header
LB: loop body
LE: loop exit
PB: predicated region body
PF: predicated region fallthrough
CT: control target
= control target key end

     0   :  { %s1134_s12 = smov 0   ;;  %s1136_s13 = smov 0   ;;  %s1457_s0 = inlined_call_operand.vmem [shape: bf16[2,256,72], index: 0, kind: input, shape index: {}]   ;;  %s1458_s1 = inlined_call_operand.vmem [shape: bf16[72,8], index: 1, kind: input, shape index: {}]   ;;  %s1459_s2 = inlined_call_operand.vmem [shape: f32[2,256,8], index: 2, kind: output, shape index: {0}]   ;;  %s1460_s3 = inlined_call_operand.vmem [shape: f32[2,2,8], index: 3, kind: output, shape index: {1}]  }
   0x1   :  { %s1138_s14 = smov 0  }
   0x2 LB: > { %s26_s15 = sadd.s32 1, %s1107_s13  ;;  %p921_p0 = scmp.ge.s32.totalorder %s1111_s14, 1  ;;  %s1111_s14 = sphi %s1138_s14, %s14_s14   ;;  %s1107_s13 = sphi %s1136_s13, %s1462_s13   ;;  %s1103_s12 = sphi %s1134_s12, %s1461_s12  }
   0x3   : > { %p28_p1 = scmp.ge.s32.totalorder %s26_s15, 2  ;;  %p161_p2 = scmp.lt.s32.totalorder %s1111_s14, 3 }
   0x5   : > { %s1464_s15 = smov (%p28_p1, %s26_s15), 0  ;;  %p162_p3 = pnand %p921_p0, %p161_p2 }
   0x6   : > { %v1068_v0 = vld [vmem:[%s1458_s1] sm:$0xff] (!%p162_p3)   ;;  %v1069_v1 = vld [vmem:[%s1458_s1 + $0x8] sm:$0xff] (!%p162_p3)   ;;  %p198_p4 = scmp.lt.s32.totalorder (!%p162_p3), %s1103_s12, 1  ;;  %v1070_v2 = vld [vmem:[%s1458_s1 + $0x10] sm:$0xff] (!%p162_p3)   ;;  %vm370_vm0 = vcmask (!%p162_p3), 588800   ;;  %vm419_vm1 = vcmask (!%p162_p3), 1043456  }
   0x7   : > { %165 = sbr.rel (%p162_p3) target bundleno = 323 (0x143), region = 28  ;;  %989 = vmatprep.subr.bf16.mxu0 (!%p162_p3), %v1068_v0  ;;  %1031 = vmatprep.subr.bf16.mxu1 (!%p162_p3), %v1068_v0  ;;  %v1071_v4 = vld [vmem:[%s1458_s1 + $0x18] sm:$0xff] (!%p162_p3)   ;;  %v1072_v5 = vld [vmem:[%s1458_s1 + $0x20] ss:$0 sps:$4 sm:$0xff] (!%p162_p3)   ;;  %vm793_vm2 = vcmask (!%p162_p3), 58368   ;;  %v1113_v22 = vmov (!%p162_p3), 0.0  }
   0x8   : > { %990 = vmatpush3.bf16.msra.mxu0 (!%p162_p3), %v1068_v0  ;;  %1036 = vmatpush3.bf16.msra.mxu1 (!%p162_p3), %v1068_v0  ;;  %v421_v7 = vsel (!%p162_p3), %vm419_vm1, %v1072_v5, 0  ;;  %vm584_vm3 = vcmask (!%p162_p3), 64512   ;;  %vm787_vm4 = vcmask (!%p162_p3), 1040384  }
   0x9   : > { %991 = vmatprep.subr.bf16.mxu0 (!%p162_p3), %v1069_v1  ;;  %1032 = vmatprep.subr.bf16.mxu1 (!%p162_p3), %v1069_v1 }
   0xc   : > { %992 = vmatpush3.bf16.msra.mxu0 (!%p162_p3), %v1069_v1  ;;  %1037 = vmatpush3.bf16.msra.mxu1 (!%p162_p3), %v1069_v1 }
   0xd   : > { %993 = vmatprep.subr.bf16.mxu0 (!%p162_p3), %v1070_v2  ;;  %1033 = vmatprep.subr.bf16.mxu1 (!%p162_p3), %v1070_v2 }
   0xe   : > { %s1466_s12 = smov (!%p198_p4, %s1103_s12), 1 }
   0xf   : > { %s966_s22 = sshll.u32 %s1466_s12, 7  ;;  %s926_s30 = sshll.u32 %s1466_s12, 1 }
  0x10   : > { %s1167_s25 = scalar_lea.vmem %s1457_s0, %s966_s22  ;;  %994 = vmatpush3.bf16.msra.mxu0 %v1070_v2  ;;  %1038 = vmatpush3.bf16.msra.mxu1 %v1070_v2  ;;  %s1211_s6 = scalar_lea.vmem %s1460_s3, %s926_s30 }
  0x11   : > { %v1073_v3 = vld [vmem:[%s1167_s25] sm:$0xff]   ;;  %995 = vmatprep.subr.bf16.mxu0 %v1071_v4  ;;  %1034 = vmatprep.subr.bf16.mxu1 %v1071_v4  ;;  %v1074_v8 = vld [vmem:[%s1167_s25 + $0x8] sm:$0xff]   ;;  %v1075_v9 = vld [vmem:[%s1167_s25 + $0x10] sm:$0xff]   ;;  %794 = vst.msk [vmem:[%s1211_s6] sm:$0x3] %vm793_vm2, %v1113_v22  ;;  %s967_s7 = sshll.u32 %s1466_s12, 8 }
  0x12   : > { %999 = vmatprep.mubr.msk.bf16.mxu0 %vm370_vm0, %v1073_v3  ;;  %v1081_v6 = vld [vmem:[%s1167_s25 + $0x40] sm:$0xff]   ;;  %v1082_v10 = vld [vmem:[%s1167_s25 + $0x48] sm:$0xff]   ;;  %v1083_v11 = vld [vmem:[%s1167_s25 + $0x50] sm:$0xff]   ;;  %s1219_s10 = scalar_lea.vmem %s1459_s2, %s967_s7 }
  0x13   : > { %1015 = vmatprep.mubr.msk.bf16.mxu1 %vm370_vm0, %v1081_v6  ;;  %v1076_v12 = vld [vmem:[%s1167_s25 + $0x18] sm:$0xff]   ;;  %v1077_v14 = vld [vmem:[%s1167_s25 + $0x20] sm:$0xff]   ;;  %v1078_v16 = vld [vmem:[%s1167_s25 + $0x28] sm:$0xff]  }
  0x14   : > { %996 = vmatpush3.bf16.msra.mxu0 %v1071_v4  ;;  %1039 = vmatpush3.bf16.msra.mxu1 %v1071_v4  ;;  %v1084_v13 = vld [vmem:[%s1167_s25 + $0x58] sm:$0xff]   ;;  %v1085_v15 = vld [vmem:[%s1167_s25 + $0x60] sm:$0xff]   ;;  %v1086_v17 = vld [vmem:[%s1167_s25 + $0x68] sm:$0xff]  }
  0x15   : > { %1041 = vmatprep.subr.msk.bf16.mxu0 %vm419_vm1, %v1072_v5  ;;  %1042 = vmatprep.subr.msk.bf16.mxu1 %vm419_vm1, %v1072_v5  ;;  %v1079_v18 = vld [vmem:[%s1167_s25 + $0x30] sm:$0xff]   ;;  %v1080_v20 = vld [vmem:[%s1167_s25 + $0x38] sm:$0xff]  }
  0x16   : > { %v1087_v19 = vld [vmem:[%s1167_s25 + $0x70] sm:$0xff]   ;;  %v1088_v21 = vld [vmem:[%s1167_s25 + $0x78] sm:$0xff]  }
  0x18   : > { %998 = vmatpush3.bf16.msra.mxu0 %v421_v7  ;;  %1040 = vmatpush3.bf16.msra.mxu1 %v421_v7 }
  0x1b   : > { %1000 = vmatmul.mubr.msk.bf16.vlgmr.msra.gmra.mrb[0].mxu0 %vm370_vm0, %v1074_v8  ;;  %1016 = vmatmul.mubr.msk.bf16.vlgmr.msra.gmra.mrb[0].mxu1 %vm370_vm0, %v1082_v10 }
  0x1c   : > { %1003 = vmatprep.mubr.msk.bf16.mxu0 %vm370_vm0, %v1075_v9  ;;  %1019 = vmatprep.mubr.msk.bf16.mxu1 %vm370_vm0, %v1083_v11 }
  0x23   : > { %1004 = vmatmul.mubr.msk.bf16.gmra.mrb[4].mxu0 %vm370_vm0, %v1076_v12  ;;  %1020 = vmatmul.mubr.msk.bf16.gmra.mrb[4].mxu1 %vm370_vm0, %v1084_v13 }
  0x24   : > { %1007 = vmatprep.mubr.msk.bf16.mxu0 %vm370_vm0, %v1077_v14  ;;  %1023 = vmatprep.mubr.msk.bf16.mxu1 %vm370_vm0, %v1085_v15 }
  0x2b   : > { %1008 = vmatmul.mubr.msk.bf16.gmra.mrb[8].mxu0 %vm370_vm0, %v1078_v16  ;;  %1024 = vmatmul.mubr.msk.bf16.gmra.mrb[8].mxu1 %vm370_vm0, %v1086_v17 }
  0x2c   : > { %1011 = vmatprep.mubr.msk.bf16.mxu0 %vm370_vm0, %v1079_v18  ;;  %1027 = vmatprep.mubr.msk.bf16.mxu1 %vm370_vm0, %v1087_v19 }
  0x33   : > { %1012 = vmatmul.mubr.msk.bf16.gmra.mrb[12].mxu0 %vm370_vm0, %v1080_v20  ;;  %1028 = vmatmul.mubr.msk.bf16.gmra.mrb[12].mxu1 %vm370_vm0, %v1088_v21 }
  0xee   : > { %v1001_v23 = vpop.f32.mrb[0].mxu0  ;;  %v1221_v24 = vpop.f32.mrb[0].mxu1 }
  0xef   : > { %587 = vst.msk [vmem:[%s1219_s10 + $0x10] sm:$0xff] %vm584_vm3, %v1001_v23  ;;  %v457_v25 = vpop.f32.mrb[1].mxu0  ;;  %603 = vst.msk [vmem:[%s1219_s10 + $0x90] sm:$0xff] %vm584_vm3, %v1221_v24  ;;  %v1228_v26 = vpop.f32.mrb[1].mxu1  ;;  %v688_v32 = vmul.f32 %v1001_v23, %v1001_v23  ;;  %v620_v37 = vsel %vm584_vm3, %v1001_v23, 0.0 }
  0xf0   : > { %585 = vst.msk [vmem:[%s1219_s10] sm:$0xff] %vm584_vm3, %v457_v25  ;;  %v686_v27 = vmul.f32 %v457_v25, %v457_v25  ;;  %v1002_v28 = vpop.f32.mrb[2].mxu0  ;;  %601 = vst.msk [vmem:[%s1219_s10 + $0x80] sm:$0xff] %vm584_vm3, %v1228_v26  ;;  %v1235_v29 = vpop.f32.mrb[2].mxu1  ;;  %v617_v33 = vsel %vm584_vm3, %v457_v25, 0.0 }
  0xf1   : > { %588 = vst.msk [vmem:[%s1219_s10 + $0x18] sm:$0xff] %vm584_vm3, %v1002_v28  ;;  %v460_v30 = vpop.f32.mrb[3].mxu0  ;;  %604 = vst.msk [vmem:[%s1219_s10 + $0x98] sm:$0xff] %vm584_vm3, %v1235_v29  ;;  %v1242_v31 = vpop.f32.mrb[3].mxu1  ;;  %v689_v39 = vmul.f32 %v1002_v28, %v1002_v28  ;;  %v721_v43 = vsel %vm584_vm3, %v688_v32, 0.0  ;;  %v622_v44 = vsel %vm584_vm3, %v1002_v28, 0.0 }
  0xf2   : > { %586 = vst.msk [vmem:[%s1219_s10 + $0x8] sm:$0xff] %vm584_vm3, %v460_v30  ;;  %v618_v34 = vsel %vm584_vm3, %v460_v30, 0.0  ;;  %v687_v35 = vmul.f32 %v460_v30, %v460_v30  ;;  %602 = vst.msk [vmem:[%s1219_s10 + $0x88] sm:$0xff] %vm584_vm3, %v1242_v31  ;;  %v718_v38 = vsel %vm584_vm3, %v686_v27, 0.0 }
  0xf3   : > { %v619_v36 = vadd.f32 %v618_v34, %v617_v33  ;;  %v723_v51 = vsel %vm584_vm3, %v689_v39, 0.0 }
  0xf4   : > { %v719_v40 = vsel %vm584_vm3, %v687_v35, 0.0 }
  0xf5   : > { %v621_v41 = vadd.f32 %v620_v37, %v619_v36  ;;  %v720_v42 = vadd.f32 %v719_v40, %v718_v38 }
  0xf6   : > { %v1005_v45 = vpop.f32.mrb[4].mxu0  ;;  %v1256_v46 = vpop.f32.mrb[4].mxu1 }
  0xf7   : > { %v722_v47 = vadd.f32 %v721_v43, %v720_v42  ;;  %591 = vst.msk [vmem:[%s1219_s10 + $0x30] sm:$0xff] %vm584_vm3, %v1005_v45  ;;  %v473_v48 = vpop.f32.mrb[5].mxu0  ;;  %v623_v49 = vadd.f32 %v622_v44, %v621_v41  ;;  %607 = vst.msk [vmem:[%s1219_s10 + $0xb0] sm:$0xff] %vm584_vm3, %v1256_v46  ;;  %v1263_v50 = vpop.f32.mrb[5].mxu1  ;;  %v692_v60 = vmul.f32 %v1005_v45, %v1005_v45  ;;  %v628_v2 = vsel %vm584_vm3, %v1005_v45, 0.0 }
  0xf8   : > { %589 = vst.msk [vmem:[%s1219_s10 + $0x20] sm:$0xff] %vm584_vm3, %v473_v48  ;;  %v624_v52 = vsel %vm584_vm3, %v473_v48, 0.0  ;;  %v690_v53 = vmul.f32 %v473_v48, %v473_v48  ;;  %v1006_v54 = vpop.f32.mrb[6].mxu0  ;;  %605 = vst.msk [vmem:[%s1219_s10 + $0xa0] sm:$0xff] %vm584_vm3, %v1263_v50  ;;  %v1272_v55 = vpop.f32.mrb[6].mxu1 }
  0xf9   : > { %v625_v56 = vadd.f32 %v624_v52, %v623_v49  ;;  %v724_v57 = vadd.f32 %v723_v51, %v722_v47  ;;  %592 = vst.msk [vmem:[%s1219_s10 + $0x38] sm:$0xff] %vm584_vm3, %v1006_v54  ;;  %v476_v58 = vpop.f32.mrb[7].mxu0  ;;  %608 = vst.msk [vmem:[%s1219_s10 + $0xb8] sm:$0xff] %vm584_vm3, %v1272_v55  ;;  %v1279_v59 = vpop.f32.mrb[7].mxu1  ;;  %v693_v3 = vmul.f32 %v1006_v54, %v1006_v54  ;;  %v729_v7 = vsel %vm584_vm3, %v692_v60, 0.0 }
  0xfa   : > { %v725_v61 = vsel %vm584_vm3, %v690_v53, 0.0  ;;  %590 = vst.msk [vmem:[%s1219_s10 + $0x28] sm:$0xff] %vm584_vm3, %v476_v58  ;;  %v626_v62 = vsel %vm584_vm3, %v476_v58, 0.0  ;;  %v691_v63 = vmul.f32 %v476_v58, %v476_v58  ;;  %606 = vst.msk [vmem:[%s1219_s10 + $0xa8] sm:$0xff] %vm584_vm3, %v1279_v59  ;;  %v630_v8 = vsel %vm584_vm3, %v1006_v54, 0.0 }
  0xfb   : > { %v726_v0 = vadd.f32 %v725_v61, %v724_v57  ;;  %v627_v1 = vadd.f32 %v626_v62, %v625_v56  ;;  %v731_v15 = vsel %vm584_vm3, %v693_v3, 0.0 }
  0xfc   : > { %v727_v4 = vsel %vm584_vm3, %v691_v63, 0.0 }
  0xfd   : > { %v629_v5 = vadd.f32 %v628_v2, %v627_v1  ;;  %v728_v6 = vadd.f32 %v727_v4, %v726_v0 }
  0xfe   : > { %v1009_v9 = vpop.f32.mrb[8].mxu0  ;;  %v1292_v10 = vpop.f32.mrb[8].mxu1 }
  0xff   : > { %v730_v11 = vadd.f32 %v729_v7, %v728_v6  ;;  %595 = vst.msk [vmem:[%s1219_s10 + $0x50] sm:$0xff] %vm584_vm3, %v1009_v9  ;;  %v489_v12 = vpop.f32.mrb[9].mxu0  ;;  %v631_v13 = vadd.f32 %v630_v8, %v629_v5  ;;  %611 = vst.msk [vmem:[%s1219_s10 + $0xd0] sm:$0xff] %vm584_vm3, %v1292_v10  ;;  %v1299_v14 = vpop.f32.mrb[9].mxu1  ;;  %v696_v25 = vmul.f32 %v1009_v9, %v1009_v9  ;;  %v636_v34 = vsel %vm584_vm3, %v1009_v9, 0.0 }
 0x100   : > { %593 = vst.msk [vmem:[%s1219_s10 + $0x40] sm:$0xff] %vm584_vm3, %v489_v12  ;;  %v632_v16 = vsel %vm584_vm3, %v489_v12, 0.0  ;;  %v694_v17 = vmul.f32 %v489_v12, %v489_v12  ;;  %v1010_v18 = vpop.f32.mrb[10].mxu0  ;;  %609 = vst.msk [vmem:[%s1219_s10 + $0xc0] sm:$0xff] %vm584_vm3, %v1299_v14  ;;  %v1308_v19 = vpop.f32.mrb[10].mxu1  ;;  %v702_v5 = vmul.f32 %v1228_v26, %v1228_v26  ;;  %v648_v12 = vsel %vm584_vm3, %v1228_v26, 0.0 }
 0x101   : > { %v633_v20 = vadd.f32 %v632_v16, %v631_v13  ;;  %v732_v21 = vadd.f32 %v731_v15, %v730_v11  ;;  %596 = vst.msk [vmem:[%s1219_s10 + $0x58] sm:$0xff] %vm584_vm3, %v1010_v18  ;;  %v492_v22 = vpop.f32.mrb[11].mxu0  ;;  %612 = vst.msk [vmem:[%s1219_s10 + $0xd8] sm:$0xff] %vm584_vm3, %v1308_v19  ;;  %v1315_v23 = vpop.f32.mrb[11].mxu1  ;;  %v697_v35 = vmul.f32 %v1010_v18, %v1010_v18  ;;  %v737_v39 = vsel %vm584_vm3, %v696_v25, 0.0 }
 0x102   : > { %v733_v27 = vsel %vm584_vm3, %v694_v17, 0.0  ;;  %594 = vst.msk [vmem:[%s1219_s10 + $0x48] sm:$0xff] %vm584_vm3, %v492_v22  ;;  %v634_v28 = vsel %vm584_vm3, %v492_v22, 0.0  ;;  %v695_v30 = vmul.f32 %v492_v22, %v492_v22  ;;  %610 = vst.msk [vmem:[%s1219_s10 + $0xc8] sm:$0xff] %vm584_vm3, %v1315_v23  ;;  %v638_v40 = vsel %vm584_vm3, %v1010_v18, 0.0 }
 0x103   : > { %v734_v32 = vadd.f32 %v733_v27, %v732_v21  ;;  %v635_v33 = vadd.f32 %v634_v28, %v633_v20  ;;  %v739_v48 = vsel %vm584_vm3, %v697_v35, 0.0  ;;  %v749_v18 = vsel %vm584_vm3, %v702_v5, 0.0 }
 0x104   : > { %v735_v36 = vsel %vm584_vm3, %v695_v30, 0.0  ;;  %v703_v20 = vmul.f32 %v1242_v31, %v1242_v31  ;;  %v704_v27 = vmul.f32 %v1221_v24, %v1221_v24  ;;  %v650_v26 = vsel %vm584_vm3, %v1242_v31, 0.0 }
 0x105   : > { %v637_v37 = vadd.f32 %v636_v34, %v635_v33  ;;  %v736_v38 = vadd.f32 %v735_v36, %v734_v32  ;;  %v652_v32 = vsel %vm584_vm3, %v1221_v24, 0.0  ;;  %v705_v33 = vmul.f32 %v1235_v29, %v1235_v29 }
 0x106   : > { %v1013_v41 = vpop.f32.mrb[12].mxu0  ;;  %v1328_v42 = vpop.f32.mrb[12].mxu1  ;;  %v751_v34 = vsel %vm584_vm3, %v703_v20, 0.0  ;;  %v706_v35 = vmul.f32 %v1263_v50, %v1263_v50  ;;  %v654_v31 = vsel %vm584_vm3, %v1235_v29, 0.0  ;;  %v658_v29 = vsel %vm584_vm3, %v1279_v59, 0.0 }
 0x107   : > { %v738_v43 = vadd.f32 %v737_v39, %v736_v38  ;;  %599 = vst.msk [vmem:[%s1219_s10 + $0x70] sm:$0xff] %vm584_vm3, %v1013_v41  ;;  %v505_v44 = vpop.f32.mrb[13].mxu0  ;;  %v639_v45 = vadd.f32 %v638_v40, %v637_v37  ;;  %615 = vst.msk [vmem:[%s1219_s10 + $0xf0] sm:$0xff] %vm584_vm3, %v1328_v42  ;;  %v1335_v47 = vpop.f32.mrb[13].mxu1  ;;  %v700_v60 = vmul.f32 %v1013_v41, %v1013_v41  ;;  %v644_v2 = vsel %vm584_vm3, %v1013_v41, 0.0 }
 0x108   : > { %597 = vst.msk [vmem:[%s1219_s10 + $0x60] sm:$0xff] %vm584_vm3, %v505_v44  ;;  %v640_v49 = vsel %vm584_vm3, %v505_v44, 0.0  ;;  %v698_v51 = vmul.f32 %v505_v44, %v505_v44  ;;  %v1014_v52 = vpop.f32.mrb[14].mxu0  ;;  %613 = vst.msk [vmem:[%s1219_s10 + $0xe0] sm:$0xff] %vm584_vm3, %v1335_v47  ;;  %v1030_v53 = vpop.f32.mrb[14].mxu1  ;;  %v753_v38 = vsel %vm584_vm3, %v704_v27, 0.0  ;;  %v707_v44 = vmul.f32 %v1279_v59, %v1279_v59 }
 0x109   : > { %v641_v54 = vadd.f32 %v640_v49, %v639_v45  ;;  %v740_v56 = vadd.f32 %v739_v48, %v738_v43  ;;  %600 = vst.msk [vmem:[%s1219_s10 + $0x78] sm:$0xff] %vm584_vm3, %v1014_v52  ;;  %v508_v57 = vpop.f32.mrb[15].mxu0  ;;  %616 = vst.msk [vmem:[%s1219_s10 + $0xf8] sm:$0xff] %vm584_vm3, %v1030_v53  ;;  %v1348_v58 = vpop.f32.mrb[15].mxu1  ;;  %v701_v3 = vmul.f32 %v1014_v52, %v1014_v52  ;;  %v1362_v8 = vsel %vm584_vm3, %v1030_v53, 0.0 }
 0x10a   : > { %v741_v61 = vsel %vm584_vm3, %v698_v51, 0.0  ;;  %598 = vst.msk [vmem:[%s1219_s10 + $0x68] sm:$0xff] %vm584_vm3, %v508_v57  ;;  %v642_v62 = vsel %vm584_vm3, %v508_v57, 0.0  ;;  %v699_v63 = vmul.f32 %v508_v57, %v508_v57  ;;  %614 = vst.msk [vmem:[%s1219_s10 + $0xe8] sm:$0xff] %vm584_vm3, %v1348_v58  ;;  %v745_v9 = vsel %vm584_vm3, %v700_v60, 0.0 }
 0x10b   : > { %v742_v0 = vadd.f32 %v741_v61, %v740_v56  ;;  %v643_v1 = vadd.f32 %v642_v62, %v641_v54  ;;  %v646_v11 = vsel %vm584_vm3, %v1014_v52, 0.0  ;;  %v717_v13 = vmul.f32 %v1030_v53, %v1030_v53 }
 0x10c   : > { %v743_v4 = vsel %vm584_vm3, %v699_v63, 0.0  ;;  %v747_v17 = vsel %vm584_vm3, %v701_v3, 0.0  ;;  %v656_v39 = vsel %vm584_vm3, %v1263_v50, 0.0  ;;  %v755_v41 = vsel %vm584_vm3, %v705_v33, 0.0 }
 0x10d   : > { %v645_v6 = vadd.f32 %v644_v2, %v643_v1  ;;  %v744_v7 = vadd.f32 %v743_v4, %v742_v0  ;;  %v1373_v21 = vsel %vm584_vm3, %v717_v13, 0.0  ;;  %v757_v43 = vsel %vm584_vm3, %v706_v35, 0.0 }
 0x10e   : > { %v708_v49 = vmul.f32 %v1256_v46, %v1256_v46  ;;  %v660_v50 = vsel %vm584_vm3, %v1256_v46, 0.0  ;;  %v709_v53 = vmul.f32 %v1272_v55, %v1272_v55  ;;  %v759_v54 = vsel %vm584_vm3, %v707_v44, 0.0 }
 0x10f   : > { %v746_v15 = vadd.f32 %v745_v9, %v744_v7  ;;  %v647_v16 = vadd.f32 %v646_v11, %v645_v6  ;;  %v710_v56 = vmul.f32 %v1299_v14, %v1299_v14  ;;  %v662_v59 = vsel %vm584_vm3, %v1272_v55, 0.0 }
 0x110   : > { %v761_v61 = vsel %vm584_vm3, %v708_v49, 0.0  ;;  %v664_v62 = vsel %vm584_vm3, %v1299_v14, 0.0  ;;  %v763_v0 = vsel %vm584_vm3, %v709_v53, 0.0  ;;  %v711_v2 = vmul.f32 %v1315_v23, %v1315_v23 }
 0x111   : > { %v649_v22 = vadd.f32 %v648_v12, %v647_v16  ;;  %v748_v25 = vadd.f32 %v747_v17, %v746_v15  ;;  %v765_v1 = vsel %vm584_vm3, %v710_v56, 0.0  ;;  %v712_v5 = vmul.f32 %v1292_v10, %v1292_v10 }
 0x112   : > { %v666_v55 = vsel %vm584_vm3, %v1315_v23, 0.0  ;;  %v668_v14 = vsel %vm584_vm3, %v1292_v10, 0.0  ;;  %v713_v9 = vmul.f32 %v1308_v19, %v1308_v19  ;;  %v767_v11 = vsel %vm584_vm3, %v711_v2, 0.0 }
 0x113   : > { %v750_v28 = vadd.f32 %v749_v18, %v748_v25  ;;  %v651_v30 = vadd.f32 %v650_v26, %v649_v22  ;;  %v714_v12 = vmul.f32 %v1335_v47, %v1335_v47  ;;  %v769_v16 = vsel %vm584_vm3, %v712_v5, 0.0 }
 0x114   : > { %v670_v23 = vsel %vm584_vm3, %v1308_v19, 0.0  ;;  %v672_v17 = vsel %vm584_vm3, %v1335_v47, 0.0  ;;  %v771_v20 = vsel %vm584_vm3, %v713_v9, 0.0  ;;  %v715_v25 = vmul.f32 %v1348_v58, %v1348_v58 }
 0x115   : > { %v653_v36 = vadd.f32 %v652_v32, %v651_v30  ;;  %v752_v37 = vadd.f32 %v751_v34, %v750_v28  ;;  %v773_v22 = vsel %vm584_vm3, %v714_v12, 0.0  ;;  %v716_v28 = vmul.f32 %v1328_v42, %v1328_v42 }
 0x116   : > { %v674_v19 = vsel %vm584_vm3, %v1348_v58, 0.0  ;;  %v676_v47 = vsel %vm584_vm3, %v1328_v42, 0.0  ;;  %v775_v33 = vsel %vm584_vm3, %v715_v25, 0.0 }
 0x117   : > { %v754_v40 = vadd.f32 %v753_v38, %v752_v37  ;;  %v655_v24 = vadd.f32 %v654_v31, %v653_v36  ;;  %v777_v36 = vsel %vm584_vm3, %v716_v28, 0.0 }
 0x119   : > { %v657_v45 = vadd.f32 %v656_v39, %v655_v24  ;;  %v756_v48 = vadd.f32 %v755_v41, %v754_v40 }
 0x11b   : > { %v758_v51 = vadd.f32 %v757_v43, %v756_v48  ;;  %v659_v52 = vadd.f32 %v658_v29, %v657_v45 }
 0x11d   : > { %v661_v57 = vadd.f32 %v660_v50, %v659_v52  ;;  %v760_v60 = vadd.f32 %v759_v54, %v758_v51  ;;  %v795_v51 = vld [vmem:[%s1211_s6] sm:$0x3] }
 0x11f   : > { %v762_v63 = vadd.f32 %v761_v61, %v760_v60  ;;  %v663_v46 = vadd.f32 %v662_v59, %v661_v57 }
 0x121   : > { %v665_v3 = vadd.f32 %v664_v62, %v663_v46  ;;  %v764_v4 = vadd.f32 %v763_v0, %v762_v63 }
 0x123   : > { %v766_v6 = vadd.f32 %v765_v1, %v764_v4  ;;  %v667_v7 = vadd.f32 %v666_v55, %v665_v3 }
 0x125   : > { %v669_v13 = vadd.f32 %v668_v14, %v667_v7  ;;  %v768_v15 = vadd.f32 %v767_v11, %v766_v6 }
 0x127   : > { %v770_v18 = vadd.f32 %v769_v16, %v768_v15  ;;  %v671_v10 = vadd.f32 %v670_v23, %v669_v13 }
 0x129   : > { %v673_v27 = vadd.f32 %v672_v17, %v671_v10  ;;  %v772_v26 = vadd.f32 %v771_v20, %v770_v18 }
 0x12b   : > { %v774_v30 = vadd.f32 %v773_v22, %v772_v26  ;;  %v675_v32 = vadd.f32 %v674_v19, %v673_v27 }
 0x12d   : > { %v677_v34 = vadd.f32 %v676_v47, %v675_v32  ;;  %v776_v35 = vadd.f32 %v775_v33, %v774_v30 }
 0x12f   : > { %v679_v37 = vadd.f32 %v1362_v8, %v677_v34  ;;  %v778_v38 = vadd.f32 %v777_v36, %v776_v35 }
 0x131   : > { %v680_v31 = vrot.slane %v679_v37, 4  ;;  %v780_v39 = vadd.f32 %v1373_v21, %v778_v38 }
 0x133   : > { %v681_v58 = vadd.f32 %v680_v31, %v679_v37  ;;  %v781_v40 = vrot.slane %v780_v39, 4 }
 0x135   : > { %v682_v24 = vrot.slane %v681_v58, 2  ;;  %v782_v41 = vadd.f32 %v781_v40, %v780_v39 }
 0x137   : > { %v683_v43 = vadd.f32 %v682_v24, %v681_v58  ;;  %v783_v42 = vrot.slane %v782_v41, 2 }
 0x139   : > { %v684_v44 = vrot.slane %v683_v43, 1  ;;  %v784_v45 = vadd.f32 %v783_v42, %v782_v41 }
 0x13b   : > { %v785_v48 = vrot.slane %v784_v45, 1  ;;  %v685_v49 = vadd.f32 %v684_v44, %v683_v43 }
 0x13d   : > { %v786_v29 = vadd.f32 %v785_v48, %v784_v45 }
 0x13f   : > { %v788_v8 = vsel %vm787_vm4, %v685_v49, %v786_v29 }
 0x140   : > { %v796_v52 = vadd.f32 %v795_v51, %v788_v8 }
 0x142   : > { %798 = vst.msk [vmem:[%s1211_s6] sm:$0x3] %vm793_vm2, %v796_v52 }
 0x143 PF: > { %s14_s14 = sadd.s32 1, %s1111_s14   ;;  %s1461_s12 = smov %s1107_s13 }
 0x144   : > { %p11_p5 = scmp.ge.s32.totalorder %s14_s14, 4   ;;  %s1462_s13 = smov %s1464_s15 }
 0x146   :  { %13 = sbr.rel (!%p11_p5) target bundleno = 2 (0x2), region = 74 }

// kernel: unet_forward.31
= control target key start
LH: loop header
LB: loop body
LE: loop exit
PB: predicated region body
PF: predicated region fallthrough
CT: control target
= control target key end

     0   :  { %s608_s6 = smov 0   ;;  %s610_s7 = smov 0   ;;  %s656_s0 = inlined_call_operand.vmem [shape: bf16[2,64,32], index: 0, kind: input, shape index: {}]   ;;  %s657_s1 = inlined_call_operand.vmem [shape: bf16[2,64,8], index: 1, kind: output, shape index: {}]  }
   0x1   :  { %s612_s8 = smov 0  }
   0x2 LB: > { %s23_s9 = sadd.s32 1, %s589_s7  ;;  %p416_p0 = scmp.ge.s32.totalorder %s593_s8, 1  ;;  %s593_s8 = sphi %s612_s8, %s11_s8   ;;  %s589_s7 = sphi %s610_s7, %s659_s7   ;;  %s585_s6 = sphi %s608_s6, %s658_s6  }
   0x3   : > { %p25_p1 = scmp.ge.s32.totalorder %s23_s9, 2  ;;  %p108_p2 = scmp.lt.s32.totalorder %s593_s8, 3 }
   0x5   : > { %s661_s9 = smov (%p25_p1, %s23_s9), 0  ;;  %p109_p3 = pnand %p416_p0, %p108_p2 }
   0x6   : > { %p137_p4 = scmp.lt.s32.totalorder (!%p109_p3), %s585_s6, 1  ;;  %s595_s14 = smov (!%p109_p3), 120   ;;  %vm316_vm0 = vcmask (!%p109_p3), 60416  }
   0x7   : > { %112 = sbr.rel (%p109_p3) target bundleno = 166 (0xa6), region = 24  ;;  %s596_s15 = smov (!%p109_p3), 112  }
   0x8   : > { %s597_s16 = smov (!%p109_p3), 104  }
   0xe   : > { %s663_s6 = smov (!%p137_p4, %s585_s6), 1 }
   0xf   : > { %s431_s10 = sshll.u32 %s663_s6, 5 }
  0x10   : > { %s144_s13 = scalar_lea.vmem %s656_s0, %s431_s10  ;;  %s154_s19 = scalar_lea.vmem %s657_s1, %s431_s10 }
  0x11   : > { %v458_v0 = vld [vmem:[%s144_s13 + $0x10] sm:$0xff]   ;;  %v442_v1 = vld [vmem:[%s144_s13] sm:$0xff]   ;;  %v459_v2 = vld [vmem:[%s144_s13 + $0x18] sm:$0xff]  }
  0x12   : > { %v451_v3 = vunpack.c.l.bf16 %v458_v0  ;;  %v452_v4 = vunpack.c.h.bf16 %v458_v0  ;;  %v443_v5 = vunpack.c.l.bf16 %v442_v1  ;;  %v444_v6 = vunpack.c.h.bf16 %v442_v1  ;;  %v457_v7 = vld [vmem:[%s144_s13 + $0x8] sm:$0xff]  }
  0x13   : > { %v455_v8 = vunpack.c.l.bf16 %v459_v2  ;;  %v456_v9 = vunpack.c.h.bf16 %v459_v2  ;;  %v447_v10 = vunpack.c.l.bf16 %v457_v7  ;;  %v448_v11 = vunpack.c.h.bf16 %v457_v7 }
  0x14   : > { %v497_v12 = vpack.i.bf16 %v452_v4, %v451_v3  ;;  %v487_v13 = vpack.i.bf16 %v444_v6, %v443_v5 }
  0x15   : > { %v502_v14 = vpack.i.bf16 %v456_v9, %v455_v8  ;;  %v492_v15 = vpack.i.bf16 %v448_v11, %v447_v10 }
  0x16   : > { %498 = vrot.lane.b32.xlu1 %v497_v12, %s595_s14  ;;  %488 = vrot.lane.b32.xlu0 %v487_v13, %s595_s14 }
  0x1a   : > { %503 = vrot.lane.b32.xlu1 %v502_v14, %s595_s14  ;;  %493 = vrot.lane.b32.xlu0 %v492_v15, %s595_s14 }
  0x1e   : > { %513 = vrot.lane.b32.xlu1 %v492_v15, %s596_s15  ;;  %508 = vrot.lane.b32.xlu0 %v487_v13, %s596_s15 }
  0x22   : > { %523 = vrot.lane.b32.xlu1 %v502_v14, %s596_s15  ;;  %518 = vrot.lane.b32.xlu0 %v497_v12, %s596_s15 }
  0x26   : > { %533 = vrot.lane.b32.xlu1 %v492_v15, %s597_s16  ;;  %528 = vrot.lane.b32.xlu0 %v487_v13, %s597_s16 }
  0x2a   : > { %543 = vrot.lane.b32.xlu1 %v502_v14, %s597_s16  ;;  %538 = vrot.lane.b32.xlu0 %v497_v12, %s597_s16 }
  0x88   : > { %v499_v16 = vpop.permute.xlu1 %498  ;;  %v489_v17 = vpop.permute.xlu0 %488 }
  0x89   : > { %v547_v24 = vadd.high.f32.bf16 %v444_v6, %v489_v17  ;;  %v548_v25 = vadd.low.f32.bf16 %v443_v5, %v489_v17  ;;  %v555_v34 = vadd.high.f32.bf16 %v452_v4, %v499_v16  ;;  %v556_v35 = vadd.low.f32.bf16 %v451_v3, %v499_v16 }
  0x8c   : > { %v504_v18 = vpop.permute.xlu1 %503  ;;  %v494_v19 = vpop.permute.xlu0 %493 }
  0x8d   : > { %v549_v26 = vadd.high.f32.bf16 %v448_v11, %v494_v19  ;;  %v550_v27 = vadd.low.f32.bf16 %v447_v10, %v494_v19  ;;  %v557_v36 = vadd.high.f32.bf16 %v456_v9, %v504_v18  ;;  %v558_v37 = vadd.low.f32.bf16 %v455_v8, %v504_v18 }
  0x90   : > { %v514_v20 = vpop.permute.xlu1 %513  ;;  %v509_v21 = vpop.permute.xlu0 %508 }
  0x91   : > { %v551_v28 = vadd.low.f32.bf16 %v550_v27, %v514_v20  ;;  %v552_v29 = vadd.high.f32.bf16 %v549_v26, %v514_v20  ;;  %v553_v30 = vadd.low.f32.bf16 %v548_v25, %v509_v21  ;;  %v554_v31 = vadd.high.f32.bf16 %v547_v24, %v509_v21 }
  0x94   : > { %v524_v22 = vpop.permute.xlu1 %523  ;;  %v519_v23 = vpop.permute.xlu0 %518 }
  0x95   : > { %v563_v42 = vadd.high.f32.bf16 %v557_v36, %v524_v22  ;;  %v564_v43 = vadd.low.f32.bf16 %v558_v37, %v524_v22  ;;  %v565_v44 = vadd.high.f32.bf16 %v555_v34, %v519_v23  ;;  %v566_v45 = vadd.low.f32.bf16 %v556_v35, %v519_v23 }
  0x98   : > { %v534_v32 = vpop.permute.xlu1 %533  ;;  %v529_v33 = vpop.permute.xlu0 %528 }
  0x99   : > { %v559_v38 = vadd.low.f32.bf16 %v551_v28, %v534_v32  ;;  %v560_v39 = vadd.high.f32.bf16 %v552_v29, %v534_v32  ;;  %v561_v40 = vadd.low.f32.bf16 %v553_v30, %v529_v33  ;;  %v562_v41 = vadd.high.f32.bf16 %v554_v31, %v529_v33 }
  0x9b   : > { %v278_v48 = vmul.f32 0.25, %v559_v38  ;;  %v279_v49 = vmul.f32 0.25, %v560_v39  ;;  %v276_v50 = vmul.f32 0.25, %v561_v40  ;;  %v277_v51 = vmul.f32 0.25, %v562_v41 }
  0x9c   : > { %v544_v46 = vpop.permute.xlu1 %543  ;;  %v539_v47 = vpop.permute.xlu0 %538 }
  0x9d   : > { %v435_v52 = vpack.c.bf16 %v278_v48, %v278_v48  ;;  %v436_v53 = vpack.c.bf16 %v279_v49, %v279_v49  ;;  %v433_v54 = vpack.c.bf16 %v276_v50, %v276_v50  ;;  %v434_v55 = vpack.c.bf16 %v277_v51, %v277_v51 }
  0x9e   : > { %v567_v56 = vadd.low.f32.bf16 %v564_v43, %v544_v46  ;;  %v568_v57 = vadd.high.f32.bf16 %v563_v42, %v544_v46  ;;  %v569_v58 = vadd.low.f32.bf16 %v566_v45, %v539_v47  ;;  %v570_v59 = vadd.high.f32.bf16 %v565_v44, %v539_v47 }
  0x9f   : > { %319 = vst.msk [vmem:[%s154_s19 + $0x8] sm:$0xf] %vm316_vm0, %v435_v52  ;;  %320 = vst.msk [vmem:[%s154_s19 + $0xc] sm:$0xf] %vm316_vm0, %v436_v53 }
  0xa0   : > { %317 = vst.msk [vmem:[%s154_s19] sm:$0xf] %vm316_vm0, %v433_v54  ;;  %318 = vst.msk [vmem:[%s154_s19 + $0x4] sm:$0xf] %vm316_vm0, %v434_v55  ;;  %v282_v60 = vmul.f32 0.25, %v567_v56  ;;  %v283_v61 = vmul.f32 0.25, %v568_v57 }
  0xa1   : > { %v280_v62 = vmul.f32 0.25, %v569_v58  ;;  %v281_v63 = vmul.f32 0.25, %v570_v59 }
  0xa2   : > { %v439_v0 = vpack.c.bf16 %v282_v60, %v282_v60  ;;  %v440_v1 = vpack.c.bf16 %v283_v61, %v283_v61 }
  0xa3   : > { %v437_v2 = vpack.c.bf16 %v280_v62, %v280_v62  ;;  %v438_v3 = vpack.c.bf16 %v281_v63, %v281_v63 }
  0xa4   : > { %323 = vst.msk [vmem:[%s154_s19 + $0x18] sm:$0xf] %vm316_vm0, %v439_v0  ;;  %324 = vst.msk [vmem:[%s154_s19 + $0x1c] sm:$0xf] %vm316_vm0, %v440_v1 }
  0xa5   : > { %321 = vst.msk [vmem:[%s154_s19 + $0x10] sm:$0xf] %vm316_vm0, %v437_v2  ;;  %322 = vst.msk [vmem:[%s154_s19 + $0x14] sm:$0xf] %vm316_vm0, %v438_v3 }
  0xa6 PF: > { %s11_s8 = sadd.s32 1, %s593_s8   ;;  %s658_s6 = smov %s589_s7 }
  0xa7   : > { %p8_p5 = scmp.ge.s32.totalorder %s11_s8, 4   ;;  %s659_s7 = smov %s661_s9 }
  0xa9   :  { %10 = sbr.rel (!%p8_p5) target bundleno = 2 (0x2), region = 54 }

// kernel: unet_forward.32
= control target key start
LH: loop header
LB: loop body
LE: loop exit
PB: predicated region body
PF: predicated region fallthrough
CT: control target
= control target key end

     0   :  { %s702_s12 = smov 0   ;;  %s704_s13 = smov 0   ;;  %s793_s0 = inlined_call_operand.vmem [shape: bf16[2,64,72], index: 0, kind: input, shape index: {}]   ;;  %s794_s1 = inlined_call_operand.vmem [shape: bf16[72,16], index: 1, kind: input, shape index: {}]   ;;  %s795_s2 = inlined_call_operand.vmem [shape: f32[2,64,16], index: 2, kind: output, shape index: {0}]   ;;  %s796_s3 = inlined_call_operand.vmem [shape: f32[2,2,16], index: 3, kind: output, shape index: {1}]  }
   0x1   :  { %s706_s14 = smov 0  }
   0x2 LB: > { %s26_s15 = sadd.s32 1, %s675_s13  ;;  %p561_p0 = scmp.ge.s32.totalorder %s679_s14, 1  ;;  %s679_s14 = sphi %s706_s14, %s14_s14   ;;  %s675_s13 = sphi %s704_s13, %s798_s13   ;;  %s671_s12 = sphi %s702_s12, %s797_s12  }
   0x3   : > { %p28_p1 = scmp.ge.s32.totalorder %s26_s15, 2  ;;  %p161_p2 = scmp.lt.s32.totalorder %s679_s14, 3 }
   0x5   : > { %s800_s15 = smov (%p28_p1, %s26_s15), 0  ;;  %p162_p3 = pnand %p561_p0, %p161_p2 }
   0x6   : > { %v648_v0 = vld [vmem:[%s794_s1] sm:$0xff] (!%p162_p3)   ;;  %v649_v1 = vld [vmem:[%s794_s1 + $0x8] sm:$0xff] (!%p162_p3)   ;;  %p198_p4 = scmp.lt.s32.totalorder (!%p162_p3), %s671_s12, 1  ;;  %v650_v2 = vld [vmem:[%s794_s1 + $0x10] sm:$0xff] (!%p162_p3)   ;;  %vm286_vm0 = vcmask (!%p162_p3), 588800   ;;  %vm299_vm1 = vcmask (!%p162_p3), 1043456  }
   0x7   : > { %165 = sbr.rel (%p162_p3) target bundleno = 275 (0x113), region = 28  ;;  %593 = vmatprep.subr.bf16.mxu0 (!%p162_p3), %v648_v0  ;;  %611 = vmatprep.subr.bf16.mxu1 (!%p162_p3), %v648_v0  ;;  %v651_v4 = vld [vmem:[%s794_s1 + $0x18] sm:$0xff] (!%p162_p3)   ;;  %v652_v6 = vld [vmem:[%s794_s1 + $0x20] ss:$0 sps:$4 sm:$0xff] (!%p162_p3)   ;;  %vm433_vm2 = vcmask (!%p162_p3), 123904   ;;  %v681_v10 = vmov (!%p162_p3), 0.0  }
   0x8   : > { %594 = vmatpush3.bf16.msra.mxu0 (!%p162_p3), %v648_v0  ;;  %616 = vmatpush3.bf16.msra.mxu1 (!%p162_p3), %v648_v0  ;;  %v301_v7 = vsel (!%p162_p3), %vm299_vm1, %v652_v6, 0  ;;  %vm368_vm3 = vcmask (!%p162_p3), 130048   ;;  %vm427_vm4 = vcmask (!%p162_p3), 1040384  }
   0x9   : > { %595 = vmatprep.subr.bf16.mxu0 (!%p162_p3), %v649_v1  ;;  %612 = vmatprep.subr.bf16.mxu1 (!%p162_p3), %v649_v1 }
   0xc   : > { %596 = vmatpush3.bf16.msra.mxu0 (!%p162_p3), %v649_v1  ;;  %617 = vmatpush3.bf16.msra.mxu1 (!%p162_p3), %v649_v1 }
   0xd   : > { %597 = vmatprep.subr.bf16.mxu0 (!%p162_p3), %v650_v2  ;;  %613 = vmatprep.subr.bf16.mxu1 (!%p162_p3), %v650_v2 }
   0xe   : > { %s802_s12 = smov (!%p198_p4, %s671_s12), 1 }
   0xf   : > { %s582_s22 = sshll.u32 %s802_s12, 5  ;;  %s566_s30 = sshll.u32 %s802_s12, 1 }
  0x10   : > { %s205_s25 = scalar_lea.vmem %s793_s0, %s582_s22  ;;  %598 = vmatpush3.bf16.msra.mxu0 %v650_v2  ;;  %618 = vmatpush3.bf16.msra.mxu1 %v650_v2  ;;  %s749_s6 = scalar_lea.vmem %s796_s3, %s566_s30 }
  0x11   : > { %v653_v3 = vld [vmem:[%s205_s25] sm:$0xff]   ;;  %v655_v5 = vld [vmem:[%s205_s25 + $0x10] sm:$0xff]   ;;  %599 = vmatprep.subr.bf16.mxu0 %v651_v4  ;;  %614 = vmatprep.subr.bf16.mxu1 %v651_v4  ;;  %v654_v8 = vld [vmem:[%s205_s25 + $0x8] sm:$0xff]   ;;  %434 = vst.msk [vmem:[%s749_s6] sm:$0x3] %vm433_vm2, %v681_v10  ;;  %s583_s7 = sshll.u32 %s802_s12, 6 }
  0x12   : > { %603 = vmatprep.mubr.msk.bf16.mxu0 %vm286_vm0, %v653_v3  ;;  %607 = vmatprep.mubr.msk.bf16.mxu1 %vm286_vm0, %v655_v5  ;;  %v656_v9 = vld [vmem:[%s205_s25 + $0x18] sm:$0xff]   ;;  %s215_s10 = scalar_lea.vmem %s795_s2, %s583_s7 }
  0x14   : > { %600 = vmatpush3.bf16.msra.mxu0 %v651_v4  ;;  %619 = vmatpush3.bf16.msra.mxu1 %v651_v4 }
  0x15   : > { %621 = vmatprep.subr.msk.bf16.mxu0 %vm299_vm1, %v652_v6  ;;  %622 = vmatprep.subr.msk.bf16.mxu1 %vm299_vm1, %v652_v6 }
  0x18   : > { %602 = vmatpush3.bf16.msra.mxu0 %v301_v7  ;;  %620 = vmatpush3.bf16.msra.mxu1 %v301_v7  ;;  %v435_v5 = vld [vmem:[%s749_s6] sm:$0x3] }
  0x1b   : > { %604 = vmatmul.mubr.msk.bf16.vlgmr.msra.gmra.mrb[0].mxu0 %vm286_vm0, %v654_v8  ;;  %608 = vmatmul.mubr.msk.bf16.vlgmr.msra.gmra.mrb[0].mxu1 %vm286_vm0, %v656_v9 }
  0xee   : > { %v605_v11 = vpop.f32.mrb[0].mxu0  ;;  %v609_v12 = vpop.f32.mrb[0].mxu1 }
  0xef   : > { %371 = vst.msk [vmem:[%s215_s10 + $0x10] sm:$0xff] %vm368_vm3, %v605_v11  ;;  %v337_v13 = vpop.f32.mrb[1].mxu0  ;;  %375 = vst.msk [vmem:[%s215_s10 + $0x30] sm:$0xff] %vm368_vm3, %v609_v12  ;;  %v353_v14 = vpop.f32.mrb[1].mxu1  ;;  %v400_v20 = vmul.f32 %v605_v11, %v605_v11  ;;  %v380_v24 = vsel %vm368_vm3, %v605_v11, 0.0  ;;  %v404_v42 = vmul.f32 %v609_v12, %v609_v12  ;;  %v388_v46 = vsel %vm368_vm3, %v609_v12, 0.0 }
  0xf0   : > { %369 = vst.msk [vmem:[%s215_s10] sm:$0xff] %vm368_vm3, %v337_v13  ;;  %v398_v15 = vmul.f32 %v337_v13, %v337_v13  ;;  %v606_v16 = vpop.f32.mrb[2].mxu0  ;;  %373 = vst.msk [vmem:[%s215_s10 + $0x20] sm:$0xff] %vm368_vm3, %v353_v14  ;;  %v610_v17 = vpop.f32.mrb[2].mxu1  ;;  %v377_v21 = vsel %vm368_vm3, %v337_v13, 0.0  ;;  %v402_v29 = vmul.f32 %v353_v14, %v353_v14  ;;  %v384_v34 = vsel %vm368_vm3, %v353_v14, 0.0 }
  0xf1   : > { %372 = vst.msk [vmem:[%s215_s10 + $0x18] sm:$0xff] %vm368_vm3, %v606_v16  ;;  %v340_v18 = vpop.f32.mrb[3].mxu0  ;;  %376 = vst.msk [vmem:[%s215_s10 + $0x38] sm:$0xff] %vm368_vm3, %v610_v17  ;;  %v356_v19 = vpop.f32.mrb[3].mxu1  ;;  %v401_v27 = vmul.f32 %v606_v16, %v606_v16  ;;  %v409_v32 = vsel %vm368_vm3, %v400_v20, 0.0  ;;  %v382_v33 = vsel %vm368_vm3, %v606_v16, 0.0  ;;  %v405_v47 = vmul.f32 %v610_v17, %v610_v17 }
  0xf2   : > { %370 = vst.msk [vmem:[%s215_s10 + $0x8] sm:$0xff] %vm368_vm3, %v340_v18  ;;  %v378_v22 = vsel %vm368_vm3, %v340_v18, 0.0  ;;  %v399_v23 = vmul.f32 %v340_v18, %v340_v18  ;;  %374 = vst.msk [vmem:[%s215_s10 + $0x28] sm:$0xff] %vm368_vm3, %v356_v19  ;;  %v406_v26 = vsel %vm368_vm3, %v398_v15, 0.0  ;;  %v413_v38 = vsel %vm368_vm3, %v402_v29, 0.0 }
  0xf3   : > { %v379_v25 = vadd.f32 %v378_v22, %v377_v21  ;;  %v411_v37 = vsel %vm368_vm3, %v401_v27, 0.0  ;;  %v403_v39 = vmul.f32 %v356_v19, %v356_v19  ;;  %v386_v43 = vsel %vm368_vm3, %v356_v19, 0.0 }
  0xf4   : > { %v407_v28 = vsel %vm368_vm3, %v399_v23, 0.0  ;;  %v417_v51 = vsel %vm368_vm3, %v404_v42, 0.0  ;;  %v390_v52 = vsel %vm368_vm3, %v610_v17, 0.0  ;;  %v419_v55 = vsel %vm368_vm3, %v405_v47, 0.0 }
  0xf5   : > { %v381_v30 = vadd.f32 %v380_v24, %v379_v25  ;;  %v408_v31 = vadd.f32 %v407_v28, %v406_v26  ;;  %v415_v48 = vsel %vm368_vm3, %v403_v39, 0.0 }
  0xf7   : > { %v410_v35 = vadd.f32 %v409_v32, %v408_v31  ;;  %v383_v36 = vadd.f32 %v382_v33, %v381_v30 }
  0xf9   : > { %v385_v40 = vadd.f32 %v384_v34, %v383_v36  ;;  %v412_v41 = vadd.f32 %v411_v37, %v410_v35 }
  0xfb   : > { %v414_v44 = vadd.f32 %v413_v38, %v412_v41  ;;  %v387_v45 = vadd.f32 %v386_v43, %v385_v40 }
  0xfd   : > { %v389_v49 = vadd.f32 %v388_v46, %v387_v45  ;;  %v416_v50 = vadd.f32 %v415_v48, %v414_v44 }
  0xff   : > { %v391_v53 = vadd.f32 %v390_v52, %v389_v49  ;;  %v418_v54 = vadd.f32 %v417_v51, %v416_v50 }
 0x101   : > { %v392_v56 = vrot.slane %v391_v53, 4  ;;  %v420_v57 = vadd.f32 %v419_v55, %v418_v54 }
 0x103   : > { %v393_v58 = vadd.f32 %v392_v56, %v391_v53  ;;  %v421_v59 = vrot.slane %v420_v57, 4 }
 0x105   : > { %v394_v60 = vrot.slane %v393_v58, 2  ;;  %v422_v61 = vadd.f32 %v421_v59, %v420_v57 }
 0x107   : > { %v395_v62 = vadd.f32 %v394_v60, %v393_v58  ;;  %v423_v63 = vrot.slane %v422_v61, 2 }
 0x109   : > { %v396_v0 = vrot.slane %v395_v62, 1  ;;  %v424_v1 = vadd.f32 %v423_v63, %v422_v61 }
 0x10b   : > { %v425_v2 = vrot.slane %v424_v1, 1  ;;  %v397_v3 = vadd.f32 %v396_v0, %v395_v62 }
 0x10d   : > { %v426_v4 = vadd.f32 %v425_v2, %v424_v1 }
 0x10f   : > { %v428_v6 = vsel %vm427_vm4, %v397_v3, %v426_v4 }
 0x110   : > { %v436_v7 = vadd.f32 %v435_v5, %v428_v6 }
 0x112   : > { %438 = vst.msk [vmem:[%s749_s6] sm:$0x3] %vm433_vm2, %v436_v7 }
 0x113 PF: > { %s14_s14 = sadd.s32 1, %s679_s14   ;;  %s797_s12 = smov %s675_s13 }
 0x114   : > { %p11_p5 = scmp.ge.s32.totalorder %s14_s14, 4   ;;  %s798_s13 = smov %s800_s15 }
 0x116   :  { %13 = sbr.rel (!%p11_p5) target bundleno = 2 (0x2), region = 74 }

// kernel: unet_forward.33
= control target key start
LH: loop header
LB: loop body
LE: loop exit
PB: predicated region body
PF: predicated region fallthrough
CT: control target
= control target key end

     0   :  { %s506_s9 = smov 0   ;;  %s508_s10 = smov 0   ;;  %s565_s0 = inlined_call_operand.vmem [shape: f32[2,64,16], index: 0, kind: input, shape index: {}]   ;;  %s566_s1 = inlined_call_operand.vmem [shape: f32[2,2,16], index: 1, kind: input, shape index: {}]   ;;  %s567_s2 = inlined_call_operand.vmem [shape: bf16[2,64,16], index: 2, kind: output, shape index: {}]  }
   0x1   :  { %s510_s11 = smov 0  }
   0x2 LB: > { %s24_s12 = sadd.s32 1, %s485_s10  ;;  %p415_p0 = scmp.ge.s32.totalorder %s489_s11, 1  ;;  %s489_s11 = sphi %s510_s11, %s12_s11   ;;  %s485_s10 = sphi %s508_s10, %s569_s10   ;;  %s481_s9 = sphi %s506_s9, %s568_s9  }
   0x3   : > { %p26_p1 = scmp.ge.s32.totalorder %s24_s12, 2  ;;  %p142_p2 = scmp.lt.s32.totalorder %s489_s11, 3 }
   0x5   : > { %s571_s12 = smov (%p26_p1, %s24_s12), 0  ;;  %p143_p3 = pnand %p415_p0, %p142_p2 }
   0x6   : > { %p177_p4 = scmp.lt.s32.totalorder (!%p143_p3), %s481_s9, 1  ;;  %v223_v7 = vlaneseq (!%p143_p3)  ;;  %vm303_vm0 = vcmask (!%p143_p3), 125952  }
   0x7   : > { %146 = sbr.rel (%p143_p3) target bundleno = 62 (0x3e), region = 28 }
   0x8   : > { %v224_v8 = vshrl.u32 (!%p143_p3), %v223_v7, 7 }
   0xa   : > { %v225_v9 = vsub.s32 (!%p143_p3), 1, %v224_v8  ;;  %v237_v18 = vsub.s32 (!%p143_p3), 0, %v224_v8 }
   0xe   : > { %s573_s9 = smov (!%p177_p4, %s481_s9), 1 }
   0xf   : > { %s418_s13 = sshll.u32 %s573_s9, 1  ;;  %s431_s17 = sshll.u32 %s573_s9, 6 }
  0x10   : > { %s189_s16 = scalar_lea.vmem %s566_s1, %s418_s13  ;;  %s184_s20 = scalar_lea.vmem %s565_s0, %s431_s17 }
  0x11   : > { %v208_v0 = vld [vmem:[%s189_s16] sm:$0x3]  ;;  %v201_v13 = vld [vmem:[%s184_s20 + $0x8] sm:$0xff]  ;;  %v202_v14 = vld [vmem:[%s184_s20 + $0x10] sm:$0xff]  ;;  %s432_s21 = sshll.u32 %s573_s9, 5 }
  0x12   : > { %v209_v1 = vmul.f32 0.015625, %v208_v0  ;;  %v200_v10 = vld [vmem:[%s184_s20] sm:$0xff]  ;;  %v203_v15 = vld [vmem:[%s184_s20 + $0x18] sm:$0xff]  ;;  %v205_v20 = vld [vmem:[%s184_s20 + $0x28] sm:$0xff]  ;;  %s538_s24 = scalar_lea.vmem %s567_s2, %s432_s21 }
  0x13   : > { %v204_v19 = vld [vmem:[%s184_s20 + $0x20] sm:$0xff]  ;;  %v206_v21 = vld [vmem:[%s184_s20 + $0x30] sm:$0xff]  ;;  %v207_v22 = vld [vmem:[%s184_s20 + $0x38] sm:$0xff] }
  0x14   : > { %v210_v2 = vmul.f32 %v209_v1, %v209_v1  ;;  %v218_v11 = vsub.f32 0.0, %v209_v1 }
  0x16   : > { %v212_v3 = vrot.slane %v210_v2, 7 }
  0x18   : > { %v214_v4 = vsub.f32 %v209_v1, %v212_v3 }
  0x1a   : > { %v215_v5 = vmax.f32 %v214_v4, 0.0 }
  0x1c   : > { %v216_v6 = vadd.f32 1e-05, %v215_v5 }
  0x1e   : > { %465 = vrsqrt.f32 %v216_v6 }
  0x28   : > { %v466_v12 = vpop.eup %465 }
  0x29   : > { %v220_v16 = vrot.slane %v466_v12, 1  ;;  %v226_v17 = vrot.slane %v466_v12, %v225_v9 }
  0x2b   : > { %v222_v23 = vmul.f32 %v220_v16, %v218_v11  ;;  %v227_v24 = vmul.f32 %v226_v17, %v200_v10  ;;  %v228_v25 = vmul.f32 %v226_v17, %v201_v13  ;;  %v229_v26 = vmul.f32 %v226_v17, %v202_v14 }
  0x2c   : > { %v230_v27 = vmul.f32 %v226_v17, %v203_v15  ;;  %v231_v28 = vmul.f32 %v226_v17, %v204_v19  ;;  %v232_v29 = vmul.f32 %v226_v17, %v205_v20  ;;  %v233_v30 = vmul.f32 %v226_v17, %v206_v21 }
  0x2d   : > { %v238_v31 = vrot.slane %v222_v23, %v237_v18  ;;  %v234_v32 = vmul.f32 %v226_v17, %v207_v22 }
  0x2f   : > { %v239_v33 = vadd.f32 %v238_v31, %v227_v24  ;;  %v240_v34 = vadd.f32 %v238_v31, %v228_v25  ;;  %v241_v35 = vadd.f32 %v238_v31, %v229_v26  ;;  %v242_v36 = vadd.f32 %v238_v31, %v230_v27 }
  0x30   : > { %v243_v37 = vadd.f32 %v238_v31, %v231_v28  ;;  %v244_v38 = vadd.f32 %v238_v31, %v232_v29  ;;  %v245_v39 = vadd.f32 %v238_v31, %v233_v30  ;;  %v246_v40 = vadd.f32 %v238_v31, %v234_v32 }
  0x31   : > { %vm247_vm1 = vcmp.ge.f32.partialorder %v239_v33, 0.0  ;;  %v255_v41 = vmul.f32 0.2, %v239_v33  ;;  %vm248_vm2 = vcmp.ge.f32.partialorder %v240_v34, 0.0  ;;  %v256_v42 = vmul.f32 0.2, %v240_v34 }
  0x32   : > { %vm249_vm3 = vcmp.ge.f32.partialorder %v241_v35, 0.0  ;;  %v257_v43 = vmul.f32 0.2, %v241_v35  ;;  %vm250_vm4 = vcmp.ge.f32.partialorder %v242_v36, 0.0  ;;  %v258_v44 = vmul.f32 0.2, %v242_v36 }
  0x33   : > { %v263_v45 = vsel %vm247_vm1, %v239_v33, %v255_v41  ;;  %v264_v46 = vsel %vm248_vm2, %v240_v34, %v256_v42  ;;  %vm251_vm5 = vcmp.ge.f32.partialorder %v243_v37, 0.0  ;;  %v259_v47 = vmul.f32 0.2, %v243_v37 }
  0x34   : > { %v433_v48 = vpack.c.bf16 %v263_v45, %v263_v45  ;;  %v434_v49 = vpack.c.bf16 %v264_v46, %v264_v46  ;;  %v265_v50 = vsel %vm249_vm3, %v241_v35, %v257_v43  ;;  %v266_v51 = vsel %vm250_vm4, %v242_v36, %v258_v44 }
  0x35   : > { %v435_v52 = vpack.c.bf16 %v265_v50, %v265_v50  ;;  %v436_v53 = vpack.c.bf16 %v266_v51, %v266_v51  ;;  %v267_v54 = vsel %vm251_vm5, %v243_v37, %v259_v47  ;;  %vm252_vm6 = vcmp.ge.f32.partialorder %v244_v38, 0.0 }
  0x36   : > { %304 = vst.msk [vmem:[%s538_s24] sm:$0xf] %vm303_vm0, %v433_v48  ;;  %305 = vst.msk [vmem:[%s538_s24 + $0x4] sm:$0xf] %vm303_vm0, %v434_v49  ;;  %v437_v55 = vpack.c.bf16 %v267_v54, %v267_v54  ;;  %v260_v56 = vmul.f32 0.2, %v244_v38 }
  0x37   : > { %vm253_vm7 = vcmp.ge.f32.partialorder %v245_v39, 0.0  ;;  %v261_v57 = vmul.f32 0.2, %v245_v39  ;;  %306 = vst.msk [vmem:[%s538_s24 + $0x8] sm:$0xf] %vm303_vm0, %v435_v52  ;;  %vm254_vm8 = vcmp.ge.f32.partialorder %v246_v40, 0.0 }
  0x38   : > { %307 = vst.msk [vmem:[%s538_s24 + $0xc] sm:$0xf] %vm303_vm0, %v436_v53  ;;  %v262_v58 = vmul.f32 0.2, %v246_v40  ;;  %308 = vst.msk [vmem:[%s538_s24 + $0x10] sm:$0xf] %vm303_vm0, %v437_v55  ;;  %v268_v59 = vsel %vm252_vm6, %v244_v38, %v260_v56 }
  0x39   : > { %v269_v60 = vsel %vm253_vm7, %v245_v39, %v261_v57  ;;  %v438_v61 = vpack.c.bf16 %v268_v59, %v268_v59 }
  0x3a   : > { %v439_v62 = vpack.c.bf16 %v269_v60, %v269_v60  ;;  %v270_v63 = vsel %vm254_vm8, %v246_v40, %v262_v58 }
  0x3b   : > { %v440_v0 = vpack.c.bf16 %v270_v63, %v270_v63  ;;  %309 = vst.msk [vmem:[%s538_s24 + $0x14] sm:$0xf] %vm303_vm0, %v438_v61 }
  0x3c   : > { %310 = vst.msk [vmem:[%s538_s24 + $0x18] sm:$0xf] %vm303_vm0, %v439_v62 }
  0x3d   : > { %311 = vst.msk [vmem:[%s538_s24 + $0x1c] sm:$0xf] %vm303_vm0, %v440_v0 }
  0x3e PF: > { %s12_s11 = sadd.s32 1, %s489_s11   ;;  %s568_s9 = smov %s485_s10 }
  0x3f   : > { %p9_p5 = scmp.ge.s32.totalorder %s12_s11, 4   ;;  %s569_s10 = smov %s571_s12 }
  0x41   :  { %11 = sbr.rel (!%p9_p5) target bundleno = 2 (0x2), region = 61 }

// kernel: unet_forward.34
= control target key start
LH: loop header
LB: loop body
LE: loop exit
PB: predicated region body
PF: predicated region fallthrough
CT: control target
= control target key end

     0   :  { %s756_s12 = smov 0   ;;  %s758_s13 = smov 0   ;;  %s882_s0 = inlined_call_operand.vmem [shape: bf16[2,64,144], index: 0, kind: input, shape index: {}]   ;;  %s883_s1 = inlined_call_operand.vmem [shape: bf16[144,16], index: 1, kind: input, shape index: {}]   ;;  %s884_s2 = inlined_call_operand.vmem [shape: f32[2,64,16], index: 2, kind: output, shape index: {0}]   ;;  %s885_s3 = inlined_call_operand.vmem [shape: f32[2,2,16], index: 3, kind: output, shape index: {1}]  }
   0x1   :  { %s760_s14 = smov 0  }
   0x2 LB: > { %s26_s15 = sadd.s32 1, %s728_s13  ;;  %p614_p0 = scmp.ge.s32.totalorder %s732_s14, 1  ;;  %s732_s14 = sphi %s760_s14, %s14_s14   ;;  %s728_s13 = sphi %s758_s13, %s887_s13   ;;  %s724_s12 = sphi %s756_s12, %s886_s12  }
   0x3   : > { %p28_p1 = scmp.ge.s32.totalorder %s26_s15, 2  ;;  %p162_p2 = scmp.lt.s32.totalorder %s732_s14, 3 }
   0x5   : > { %s889_s15 = smov (%p28_p1, %s26_s15), 0  ;;  %p163_p3 = pnand %p614_p0, %p162_p2 }
   0x6   : > { %v689_v0 = vld [vmem:[%s883_s1] sm:$0xff] (!%p163_p3)   ;;  %v734_v1 = vmov (!%p163_p3), 0   ;;  %p200_p4 = scmp.lt.s32.totalorder (!%p163_p3), %s724_s12, 1  ;;  %v690_v2 = vld [vmem:[%s883_s1 + $0x8] sm:$0xff] (!%p163_p3)   ;;  %v691_v3 = vld [vmem:[%s883_s1 + $0x10] sm:$0xff] (!%p163_p3)   ;;  %vm341_vm0 = vcmask (!%p163_p3), 130048  }
   0x7   : > { %166 = sbr.rel (%p163_p3) target bundleno = 294 (0x126), region = 28  ;;  %354 = vmatprep.subr.bf16.mxu0 (!%p163_p3), %v734_v1  ;;  %645 = vmatprep.subr.bf16.mxu1 (!%p163_p3), %v734_v1  ;;  %v692_v4 = vld [vmem:[%s883_s1 + $0x18] sm:$0xff] (!%p163_p3)   ;;  %v693_v7 = vld [vmem:[%s883_s1 + $0x20] sm:$0xff] (!%p163_p3)   ;;  %v694_v8 = vld [vmem:[%s883_s1 + $0x28] sm:$0xff] (!%p163_p3)   ;;  %vm483_vm1 = vcmask (!%p163_p3), 123904   ;;  %v735_v18 = vmov (!%p163_p3), 0.0  }
   0x8   : > { %355 = vmatpush1.bf16.msra.mxu0 (!%p163_p3), %v689_v0  ;;  %654 = vmatpush1.bf16.msra.mxu1 (!%p163_p3), %v689_v0  ;;  %v695_v9 = vld [vmem:[%s883_s1 + $0x30] sm:$0xff] (!%p163_p3)   ;;  %v696_v10 = vld [vmem:[%s883_s1 + $0x38] sm:$0xff] (!%p163_p3)   ;;  %v697_v11 = vld [vmem:[%s883_s1 + $0x40] sm:$0xff] (!%p163_p3)   ;;  %vm477_vm2 = vcmask (!%p163_p3), 1040384  }
   0x9   : > { %356 = vmatprep.subr.bf16.mxu0 (!%p163_p3), %v734_v1  ;;  %646 = vmatprep.subr.bf16.mxu1 (!%p163_p3), %v734_v1 }
   0xc   : > { %357 = vmatpush1.bf16.msra.mxu0 (!%p163_p3), %v690_v2  ;;  %655 = vmatpush1.bf16.msra.mxu1 (!%p163_p3), %v690_v2 }
   0xd   : > { %358 = vmatprep.subr.bf16.mxu0 (!%p163_p3), %v734_v1  ;;  %647 = vmatprep.subr.bf16.mxu1 (!%p163_p3), %v734_v1 }
   0xe   : > { %s891_s12 = smov (!%p200_p4, %s724_s12), 1 }
   0xf   : > { %s643_s20 = sshll.u32 %s891_s12, 6  ;;  %s619_s11 = sshll.u32 %s891_s12, 1 }
  0x10   : > { %s791_s25 = scalar_lea.vmem %s882_s0, %s643_s20  ;;  %359 = vmatpush1.bf16.msra.mxu0 %v691_v3  ;;  %656 = vmatpush1.bf16.msra.mxu1 %v691_v3  ;;  %s827_s18 = scalar_lea.vmem %s885_s3, %s619_s11 }
  0x11   : > { %v700_v5 = vld [vmem:[%s791_s25 + $0x4] ss:$8 sps:$4 sm:$0xff]   ;;  %360 = vmatprep.subr.bf16.mxu0 %v734_v1  ;;  %648 = vmatprep.subr.bf16.mxu1 %v734_v1  ;;  %v698_v12 = vld [vmem:[%s791_s25] ss:$8 sps:$4 sm:$0xff]   ;;  %v704_v14 = vld [vmem:[%s791_s25 + $0x14] ss:$8 sps:$4 sm:$0xff]   ;;  %s836_s22 = scalar_lea.vmem %s884_s2, %s643_s20 }
  0x12   : > { %v703_v6 = vld [vmem:[%s791_s25 + $0x24] ss:$8 sps:$4 sm:$0xff]   ;;  %637 = vmatprep.mubr.msk.bf16.mxu0 %vm341_vm0, %v700_v5  ;;  %v701_v13 = vld [vmem:[%s791_s25 + $0x20] ss:$8 sps:$4 sm:$0xff]   ;;  %v707_v15 = vld [vmem:[%s791_s25 + $0x34] ss:$8 sps:$4 sm:$0xff]  }
  0x13   : > { %639 = vmatprep.mubr.msk.bf16.mxu1 %vm341_vm0, %v703_v6  ;;  %v706_v16 = vld [vmem:[%s791_s25 + $0x10] ss:$8 sps:$4 sm:$0xff]   ;;  %484 = vst.msk [vmem:[%s827_s18] sm:$0x3] %vm483_vm1, %v735_v18 }
  0x14   : > { %361 = vmatpush1.bf16.msra.mxu0 %v692_v4  ;;  %657 = vmatpush1.bf16.msra.mxu1 %v692_v4  ;;  %v709_v17 = vld [vmem:[%s791_s25 + $0x30] ss:$8 sps:$4 sm:$0xff]  }
  0x15   : > { %362 = vmatprep.subr.bf16.mxu0 %v734_v1  ;;  %649 = vmatprep.subr.bf16.mxu1 %v734_v1 }
  0x18   : > { %363 = vmatpush1.bf16.msra.mxu0 %v693_v7  ;;  %658 = vmatpush1.bf16.msra.mxu1 %v693_v7 }
  0x19   : > { %364 = vmatprep.subr.bf16.mxu0 %v734_v1  ;;  %650 = vmatprep.subr.bf16.mxu1 %v734_v1 }
  0x1c   : > { %365 = vmatpush1.bf16.msra.mxu0 %v694_v8  ;;  %659 = vmatpush1.bf16.msra.mxu1 %v694_v8 }
  0x1d   : > { %366 = vmatprep.subr.bf16.mxu0 %v734_v1  ;;  %651 = vmatprep.subr.bf16.mxu1 %v734_v1 }
  0x20   : > { %367 = vmatpush1.bf16.msra.mxu0 %v695_v9  ;;  %660 = vmatpush1.bf16.msra.mxu1 %v695_v9 }
  0x21   : > { %368 = vmatprep.subr.bf16.mxu0 %v734_v1  ;;  %652 = vmatprep.subr.bf16.mxu1 %v734_v1 }
  0x24   : > { %369 = vmatpush1.bf16.msra.mxu0 %v696_v10  ;;  %661 = vmatpush1.bf16.msra.mxu1 %v696_v10 }
  0x25   : > { %370 = vmatprep.subr.bf16.mxu0 %v734_v1  ;;  %653 = vmatprep.subr.bf16.mxu1 %v734_v1 }
  0x28   : > { %371 = vmatpush1.bf16.msra.mxu0 %v697_v11  ;;  %662 = vmatpush1.bf16.msra.mxu1 %v697_v11 }
  0x2b   : > { %387 = vmatmul.mubr.bf16.vlgmr.msra.gmra.mrb[0].mxu0 %v698_v12  ;;  %403 = vmatmul.mubr.bf16.vlgmr.msra.gmra.mrb[0].mxu1 %v701_v13 }
  0x2c   : > { %638 = vmatprep.mubr.msk.bf16.mxu0 %vm341_vm0, %v704_v14  ;;  %640 = vmatprep.mubr.msk.bf16.mxu1 %vm341_vm0, %v707_v15 }
  0x33   : > { %395 = vmatmul.mubr.bf16.gmra.mrb[4].mxu0 %v706_v16  ;;  %411 = vmatmul.mubr.bf16.gmra.mrb[4].mxu1 %v709_v17 }
  0xfe   : > { %v388_v19 = vpop.f32.mrb[0].mxu0  ;;  %v404_v20 = vpop.f32.mrb[0].mxu1 }
  0xff   : > { %419 = vst.msk [vmem:[%s836_s22] sm:$0xff] %vm341_vm0, %v388_v19  ;;  %v448_v21 = vmul.f32 %v388_v19, %v388_v19  ;;  %v390_v22 = vpop.f32.mrb[1].mxu0  ;;  %423 = vst.msk [vmem:[%s836_s22 + $0x20] sm:$0xff] %vm341_vm0, %v404_v20  ;;  %v406_v23 = vpop.f32.mrb[1].mxu1  ;;  %v427_v26 = vsel %vm341_vm0, %v388_v19, 0.0  ;;  %v452_v44 = vmul.f32 %v404_v20, %v404_v20  ;;  %v434_v52 = vsel %vm341_vm0, %v404_v20, 0.0 }
 0x100   : > { %v391_v24 = vpop.f32.mrb[2].mxu0  ;;  %v407_v25 = vpop.f32.mrb[2].mxu1 }
 0x101   : > { %420 = vst.msk [vmem:[%s836_s22 + $0x8] sm:$0xff] %vm341_vm0, %v391_v24  ;;  %v428_v27 = vsel %vm341_vm0, %v391_v24, 0.0  ;;  %v449_v28 = vmul.f32 %v391_v24, %v391_v24  ;;  %v393_v29 = vpop.f32.mrb[3].mxu0  ;;  %424 = vst.msk [vmem:[%s836_s22 + $0x28] sm:$0xff] %vm341_vm0, %v407_v25  ;;  %v409_v30 = vpop.f32.mrb[3].mxu1  ;;  %v456_v32 = vsel %vm341_vm0, %v448_v21, 0.0  ;;  %v453_v53 = vmul.f32 %v407_v25, %v407_v25 }
 0x102   : > { %v429_v31 = vadd.f32 %v428_v27, %v427_v26  ;;  %v463_v58 = vsel %vm341_vm0, %v452_v44, 0.0  ;;  %v436_v59 = vsel %vm341_vm0, %v407_v25, 0.0  ;;  %v485_v21 = vld [vmem:[%s827_s18] sm:$0x3] }
 0x103   : > { %v457_v33 = vsel %vm341_vm0, %v449_v28, 0.0  ;;  %v465_v63 = vsel %vm341_vm0, %v453_v53, 0.0 }
 0x104   : > { %v458_v34 = vadd.f32 %v457_v33, %v456_v32 }
 0x106   : > { %v396_v35 = vpop.f32.mrb[4].mxu0  ;;  %v412_v36 = vpop.f32.mrb[4].mxu1 }
 0x107   : > { %421 = vst.msk [vmem:[%s836_s22 + $0x10] sm:$0xff] %vm341_vm0, %v396_v35  ;;  %v430_v37 = vsel %vm341_vm0, %v396_v35, 0.0  ;;  %v450_v38 = vmul.f32 %v396_v35, %v396_v35  ;;  %v398_v39 = vpop.f32.mrb[5].mxu0  ;;  %425 = vst.msk [vmem:[%s836_s22 + $0x30] sm:$0xff] %vm341_vm0, %v412_v36  ;;  %v414_v40 = vpop.f32.mrb[5].mxu1  ;;  %v454_v55 = vmul.f32 %v412_v36, %v412_v36  ;;  %v438_v60 = vsel %vm341_vm0, %v412_v36, 0.0 }
 0x108   : > { %v431_v41 = vadd.f32 %v430_v37, %v429_v31  ;;  %v399_v42 = vpop.f32.mrb[6].mxu0  ;;  %v415_v43 = vpop.f32.mrb[6].mxu1 }
 0x109   : > { %v459_v45 = vsel %vm341_vm0, %v450_v38, 0.0  ;;  %422 = vst.msk [vmem:[%s836_s22 + $0x18] sm:$0xff] %vm341_vm0, %v399_v42  ;;  %v432_v46 = vsel %vm341_vm0, %v399_v42, 0.0  ;;  %v451_v47 = vmul.f32 %v399_v42, %v399_v42  ;;  %v401_v48 = vpop.f32.mrb[7].mxu0  ;;  %426 = vst.msk [vmem:[%s836_s22 + $0x38] sm:$0xff] %vm341_vm0, %v415_v43  ;;  %v417_v49 = vpop.f32.mrb[7].mxu1  ;;  %v455_v1 = vmul.f32 %v415_v43, %v415_v43 }
 0x10a   : > { %v460_v50 = vadd.f32 %v459_v45, %v458_v34  ;;  %v433_v51 = vadd.f32 %v432_v46, %v431_v41  ;;  %v467_v0 = vsel %vm341_vm0, %v454_v55, 0.0  ;;  %v440_v4 = vsel %vm341_vm0, %v415_v43, 0.0 }
 0x10b   : > { %v461_v54 = vsel %vm341_vm0, %v451_v47, 0.0  ;;  %v469_v7 = vsel %vm341_vm0, %v455_v1, 0.0 }
 0x10c   : > { %v435_v56 = vadd.f32 %v434_v52, %v433_v51  ;;  %v462_v57 = vadd.f32 %v461_v54, %v460_v50 }
 0x10e   : > { %v464_v61 = vadd.f32 %v463_v58, %v462_v57  ;;  %v437_v62 = vadd.f32 %v436_v59, %v435_v56 }
 0x110   : > { %v439_v2 = vadd.f32 %v438_v60, %v437_v62  ;;  %v466_v3 = vadd.f32 %v465_v63, %v464_v61 }
 0x112   : > { %v468_v5 = vadd.f32 %v467_v0, %v466_v3  ;;  %v441_v6 = vadd.f32 %v440_v4, %v439_v2 }
 0x114   : > { %v442_v8 = vrot.slane %v441_v6, 4  ;;  %v470_v9 = vadd.f32 %v469_v7, %v468_v5 }
 0x116   : > { %v443_v10 = vadd.f32 %v442_v8, %v441_v6  ;;  %v471_v11 = vrot.slane %v470_v9, 4 }
 0x118   : > { %v444_v12 = vrot.slane %v443_v10, 2  ;;  %v472_v13 = vadd.f32 %v471_v11, %v470_v9 }
 0x11a   : > { %v445_v14 = vadd.f32 %v444_v12, %v443_v10  ;;  %v473_v15 = vrot.slane %v472_v13, 2 }
 0x11c   : > { %v446_v16 = vrot.slane %v445_v14, 1  ;;  %v474_v17 = vadd.f32 %v473_v15, %v472_v13 }
 0x11e   : > { %v475_v18 = vrot.slane %v474_v17, 1  ;;  %v447_v19 = vadd.f32 %v446_v16, %v445_v14 }
 0x120   : > { %v476_v20 = vadd.f32 %v475_v18, %v474_v17 }
 0x122   : > { %v478_v22 = vsel %vm477_vm2, %v447_v19, %v476_v20 }
 0x123   : > { %v486_v23 = vadd.f32 %v485_v21, %v478_v22 }
 0x125   : > { %488 = vst.msk [vmem:[%s827_s18] sm:$0x3] %vm483_vm1, %v486_v23 }
 0x126 PF: > { %s14_s14 = sadd.s32 1, %s732_s14   ;;  %s886_s12 = smov %s728_s13 }
 0x127   : > { %p11_p5 = scmp.ge.s32.totalorder %s14_s14, 4   ;;  %s887_s13 = smov %s889_s15 }
 0x129   :  { %13 = sbr.rel (!%p11_p5) target bundleno = 2 (0x2), region = 74 }

// kernel: unet_forward.36
= control target key start
LH: loop header
LB: loop body
LE: loop exit
PB: predicated region body
PF: predicated region fallthrough
CT: control target
= control target key end

     0   :  { %s392_s6 = smov 0   ;;  %s394_s7 = smov 0   ;;  %s425_s0 = inlined_call_operand.vmem [shape: bf16[2,16,64], index: 0, kind: input, shape index: {}]   ;;  %s426_s1 = inlined_call_operand.vmem [shape: bf16[2,16,16], index: 1, kind: output, shape index: {}]  }
   0x1   :  { %s396_s8 = smov 0  }
   0x2 LB: > { %s23_s9 = sadd.s32 1, %s373_s7  ;;  %p290_p0 = scmp.ge.s32.totalorder %s377_s8, 1  ;;  %s377_s8 = sphi %s396_s8, %s11_s8   ;;  %s373_s7 = sphi %s394_s7, %s428_s7   ;;  %s369_s6 = sphi %s392_s6, %s427_s6  }
   0x3   : > { %p25_p1 = scmp.ge.s32.totalorder %s23_s9, 2  ;;  %p108_p2 = scmp.lt.s32.totalorder %s377_s8, 3 }
   0x5   : > { %s430_s9 = smov (%p25_p1, %s23_s9), 0  ;;  %p109_p3 = pnand %p290_p0, %p108_p2 }
   0x6   : > { %p137_p4 = scmp.lt.s32.totalorder (!%p109_p3), %s369_s6, 1  ;;  %s379_s14 = smov (!%p109_p3), 112   ;;  %vm196_vm0 = vcmask (!%p109_p3), 125952  }
   0x7   : > { %112 = sbr.rel (%p109_p3) target bundleno = 150 (0x96), region = 24  ;;  %s380_s15 = smov (!%p109_p3), 80  }
   0x8   : > { %s381_s16 = smov (!%p109_p3), 96  }
   0xe   : > { %s432_s6 = smov (!%p137_p4, %s369_s6), 1 }
   0xf   : > { %s299_s10 = sshll.u32 %s432_s6, 3 }
  0x10   : > { %s144_s13 = scalar_lea.vmem %s425_s0, %s299_s10  ;;  %s154_s19 = scalar_lea.vmem %s426_s1, %s299_s10 }
  0x11   : > { %v304_v0 = vld [vmem:[%s144_s13] sm:$0xff]  }
  0x12   : > { %v305_v1 = vunpack.c.l.bf16 %v304_v0  ;;  %v306_v2 = vunpack.c.h.bf16 %v304_v0 }
  0x14   : > { %v334_v3 = vpack.i.bf16 %v306_v2, %v305_v1 }
  0x16   : > { %335 = vrot.lane.b32.xlu0 %v334_v3, %s379_s14  ;;  %345 = vrot.lane.b32.xlu1 %v334_v3, %s380_s15 }
  0x1a   : > { %340 = vrot.lane.b32.xlu0 %v334_v3, %s381_s16 }
  0x88   : > { %v336_v4 = vpop.permute.xlu0 %335  ;;  %v346_v5 = vpop.permute.xlu1 %345 }
  0x89   : > { %v349_v7 = vadd.high.f32.bf16 %v306_v2, %v336_v4  ;;  %v350_v8 = vadd.low.f32.bf16 %v305_v1, %v336_v4 }
  0x8c   : > { %v341_v6 = vpop.permute.xlu0 %340 }
  0x8d   : > { %v351_v9 = vadd.low.f32.bf16 %v350_v8, %v341_v6  ;;  %v352_v10 = vadd.high.f32.bf16 %v349_v7, %v341_v6 }
  0x8f   : > { %v353_v11 = vadd.low.f32.bf16 %v351_v9, %v346_v5  ;;  %v354_v12 = vadd.high.f32.bf16 %v352_v10, %v346_v5 }
  0x91   : > { %v186_v13 = vmul.f32 0.25, %v353_v11  ;;  %v187_v14 = vmul.f32 0.25, %v354_v12 }
  0x93   : > { %v301_v15 = vpack.c.bf16 %v186_v13, %v186_v13  ;;  %v302_v16 = vpack.c.bf16 %v187_v14, %v187_v14 }
  0x95   : > { %197 = vst.msk [vmem:[%s154_s19] sm:$0xf] %vm196_vm0, %v301_v15  ;;  %198 = vst.msk [vmem:[%s154_s19 + $0x4] sm:$0xf] %vm196_vm0, %v302_v16 }
  0x96 PF: > { %s11_s8 = sadd.s32 1, %s377_s8   ;;  %s427_s6 = smov %s373_s7 }
  0x97   : > { %p8_p5 = scmp.ge.s32.totalorder %s11_s8, 4   ;;  %s428_s7 = smov %s430_s9 }
  0x99   :  { %10 = sbr.rel (!%p8_p5) target bundleno = 2 (0x2), region = 54 }

// kernel: unet_forward.38
= control target key start
LH: loop header
LB: loop body
LE: loop exit
PB: predicated region body
PF: predicated region fallthrough
CT: control target
= control target key end

     0   :  { %s428_s9 = smov 0   ;;  %s430_s10 = smov 0   ;;  %s469_s0 = inlined_call_operand.vmem [shape: f32[2,16,32], index: 0, kind: input, shape index: {}]   ;;  %s470_s1 = inlined_call_operand.vmem [shape: f32[2,2,32], index: 1, kind: input, shape index: {}]   ;;  %s471_s2 = inlined_call_operand.vmem [shape: bf16[2,16,32], index: 2, kind: output, shape index: {}]  }
   0x1   :  { %s432_s11 = smov 0  }
   0x2 LB: > { %s24_s12 = sadd.s32 1, %s407_s10  ;;  %p349_p0 = scmp.ge.s32.totalorder %s411_s11, 1  ;;  %s411_s11 = sphi %s432_s11, %s12_s11   ;;  %s407_s10 = sphi %s430_s10, %s473_s10   ;;  %s403_s9 = sphi %s428_s9, %s472_s9  }
   0x3   : > { %p26_p1 = scmp.ge.s32.totalorder %s24_s12, 2  ;;  %p142_p2 = scmp.lt.s32.totalorder %s411_s11, 3 }
   0x5   : > { %s475_s12 = smov (%p26_p1, %s24_s12), 0  ;;  %p143_p3 = pnand %p349_p0, %p142_p2 }
   0x6   : > { %p177_p4 = scmp.lt.s32.totalorder (!%p143_p3), %s403_s9, 1  ;;  %v217_v7 = vlaneseq (!%p143_p3)  ;;  %vm243_vm2 = vcmask (!%p143_p3), 257024  }
   0x7   : > { %146 = sbr.rel (%p143_p3) target bundleno = 55 (0x37), region = 28 }
   0x8   : > { %v218_v8 = vshrl.u32 (!%p143_p3), %v217_v7, 7 }
   0xa   : > { %v219_v9 = vsub.s32 (!%p143_p3), 1, %v218_v8  ;;  %v225_v16 = vsub.s32 (!%p143_p3), 0, %v218_v8 }
   0xe   : > { %s477_s9 = smov (!%p177_p4, %s403_s9), 1 }
   0xf   : > { %s352_s13 = sshll.u32 %s477_s9, 1  ;;  %s359_s17 = sshll.u32 %s477_s9, 4 }
  0x10   : > { %s189_s16 = scalar_lea.vmem %s470_s1, %s352_s13  ;;  %s184_s20 = scalar_lea.vmem %s469_s0, %s359_s17 }
  0x11   : > { %v202_v0 = vld [vmem:[%s189_s16] sm:$0x3]  ;;  %v201_v13 = vld [vmem:[%s184_s20 + $0x8] sm:$0xff]  ;;  %s360_s21 = sshll.u32 %s477_s9, 3 }
  0x12   : > { %v203_v1 = vmul.f32 0.0625, %v202_v0  ;;  %v200_v12 = vld [vmem:[%s184_s20] sm:$0xff]  ;;  %s198_s24 = scalar_lea.vmem %s471_s2, %s360_s21 }
  0x14   : > { %v204_v2 = vmul.f32 %v203_v1, %v203_v1  ;;  %v212_v10 = vsub.f32 0.0, %v203_v1 }
  0x16   : > { %v206_v3 = vrot.slane %v204_v2, 7 }
  0x18   : > { %v208_v4 = vsub.f32 %v203_v1, %v206_v3 }
  0x1a   : > { %v209_v5 = vmax.f32 %v208_v4, 0.0 }
  0x1c   : > { %v210_v6 = vadd.f32 1e-05, %v209_v5 }
  0x1e   : > { %387 = vrsqrt.f32 %v210_v6 }
  0x28   : > { %v388_v11 = vpop.eup %387 }
  0x29   : > { %v214_v14 = vrot.slane %v388_v11, 1  ;;  %v220_v15 = vrot.slane %v388_v11, %v219_v9 }
  0x2b   : > { %v216_v17 = vmul.f32 %v214_v14, %v212_v10  ;;  %v221_v18 = vmul.f32 %v220_v15, %v200_v12  ;;  %v222_v19 = vmul.f32 %v220_v15, %v201_v13 }
  0x2d   : > { %v226_v20 = vrot.slane %v216_v17, %v225_v16 }
  0x2f   : > { %v227_v21 = vadd.f32 %v226_v20, %v221_v18  ;;  %v228_v22 = vadd.f32 %v226_v20, %v222_v19 }
  0x31   : > { %vm229_vm0 = vcmp.ge.f32.partialorder %v227_v21, 0.0  ;;  %v231_v23 = vmul.f32 0.2, %v227_v21  ;;  %vm230_vm1 = vcmp.ge.f32.partialorder %v228_v22, 0.0  ;;  %v232_v24 = vmul.f32 0.2, %v228_v22 }
  0x33   : > { %v233_v25 = vsel %vm229_vm0, %v227_v21, %v231_v23  ;;  %v234_v26 = vsel %vm230_vm1, %v228_v22, %v232_v24 }
  0x34   : > { %v361_v27 = vpack.c.bf16 %v233_v25, %v233_v25  ;;  %v362_v28 = vpack.c.bf16 %v234_v26, %v234_v26 }
  0x36   : > { %244 = vst.msk [vmem:[%s198_s24] sm:$0xf] %vm243_vm2, %v361_v27  ;;  %245 = vst.msk [vmem:[%s198_s24 + $0x4] sm:$0xf] %vm243_vm2, %v362_v28 }
  0x37 PF: > { %s12_s11 = sadd.s32 1, %s411_s11   ;;  %s472_s9 = smov %s407_s10 }
  0x38   : > { %p9_p5 = scmp.ge.s32.totalorder %s12_s11, 4   ;;  %s473_s10 = smov %s475_s12 }
  0x3a   :  { %11 = sbr.rel (!%p9_p5) target bundleno = 2 (0x2), region = 61 }

// kernel: unet_forward.37
= control target key start
LH: loop header
LB: loop body
LE: loop exit
PB: predicated region body
PF: predicated region fallthrough
CT: control target
= control target key end

     0   :  { %s619_s12 = smov 0   ;;  %s621_s13 = smov 0   ;;  %s697_s0 = inlined_call_operand.vmem [shape: bf16[2,16,144], index: 0, kind: input, shape index: {}]   ;;  %s698_s1 = inlined_call_operand.vmem [shape: bf16[144,32], index: 1, kind: input, shape index: {}]   ;;  %s699_s2 = inlined_call_operand.vmem [shape: f32[2,16,32], index: 2, kind: output, shape index: {0}]   ;;  %s700_s3 = inlined_call_operand.vmem [shape: f32[2,2,32], index: 3, kind: output, shape index: {1}]  }
   0x1   :  { %s623_s14 = smov 0  }
   0x2 LB: > { %s26_s15 = sadd.s32 1, %s591_s13  ;;  %p513_p0 = scmp.ge.s32.totalorder %s595_s14, 1  ;;  %s595_s14 = sphi %s623_s14, %s14_s14   ;;  %s591_s13 = sphi %s621_s13, %s702_s13   ;;  %s587_s12 = sphi %s619_s12, %s701_s12  }
   0x3   : > { %p28_p1 = scmp.ge.s32.totalorder %s26_s15, 2  ;;  %p162_p2 = scmp.lt.s32.totalorder %s595_s14, 3 }
   0x5   : > { %s704_s15 = smov (%p28_p1, %s26_s15), 0  ;;  %p163_p3 = pnand %p513_p0, %p162_p2 }
   0x6   : > { %v561_v0 = vld [vmem:[%s698_s1] sm:$0xff] (!%p163_p3)   ;;  %v597_v1 = vmov (!%p163_p3), 0   ;;  %p200_p4 = scmp.lt.s32.totalorder (!%p163_p3), %s587_s12, 1  ;;  %v562_v2 = vld [vmem:[%s698_s1 + $0x8] sm:$0xff] (!%p163_p3)   ;;  %v563_v3 = vld [vmem:[%s698_s1 + $0x10] sm:$0xff] (!%p163_p3)   ;;  %vm382_vm0 = vcmask (!%p163_p3), 254976  }
   0x7   : > { %166 = sbr.rel (%p163_p3) target bundleno = 278 (0x116), region = 28  ;;  %312 = vmatprep.subr.bf16.mxu0 (!%p163_p3), %v597_v1  ;;  %vm308_vm1 = vcmask (!%p163_p3), 130048   ;;  %v598_v4 = vmov (!%p163_p3), 0.0   ;;  %v564_v5 = vld [vmem:[%s698_s1 + $0x18] sm:$0xff] (!%p163_p3)   ;;  %v565_v7 = vld [vmem:[%s698_s1 + $0x20] sm:$0xff] (!%p163_p3)   ;;  %v566_v8 = vld [vmem:[%s698_s1 + $0x28] sm:$0xff] (!%p163_p3)  }
   0x8   : > { %313 = vmatpush1.bf16.msra.mxu0 (!%p163_p3), %v561_v0  ;;  %v567_v9 = vld [vmem:[%s698_s1 + $0x30] sm:$0xff] (!%p163_p3)   ;;  %v568_v10 = vld [vmem:[%s698_s1 + $0x38] sm:$0xff] (!%p163_p3)   ;;  %v569_v11 = vld [vmem:[%s698_s1 + $0x40] sm:$0xff] (!%p163_p3)   ;;  %vm353_vm2 = vcmask (!%p163_p3), 261120   ;;  %vm376_vm3 = vcmask (!%p163_p3), 1040384  }
   0x9   : > { %314 = vmatprep.subr.bf16.mxu0 (!%p163_p3), %v597_v1 }
   0xc   : > { %315 = vmatpush1.bf16.msra.mxu0 (!%p163_p3), %v562_v2 }
   0xd   : > { %316 = vmatprep.subr.bf16.mxu0 (!%p163_p3), %v597_v1 }
   0xe   : > { %s706_s12 = smov (!%p200_p4, %s587_s12), 1 }
   0xf   : > { %s533_s22 = sshll.u32 %s706_s12, 4  ;;  %s518_s26 = sshll.u32 %s706_s12, 1 }
  0x10   : > { %s208_s25 = scalar_lea.vmem %s697_s0, %s533_s22  ;;  %s658_s29 = scalar_lea.vmem %s700_s3, %s518_s26  ;;  %317 = vmatpush1.bf16.msra.mxu0 %v563_v3 }
  0x11   : > { %383 = vst.msk [vmem:[%s658_s29] sm:$0x3] %vm382_vm0, %v598_v4  ;;  %v572_v6 = vld [vmem:[%s208_s25 + $0x4] ss:$8 sps:$4 sm:$0xff]   ;;  %318 = vmatprep.subr.bf16.mxu0 %v597_v1  ;;  %v570_v12 = vld [vmem:[%s208_s25] ss:$8 sps:$4 sm:$0xff]   ;;  %s218_s21 = scalar_lea.vmem %s699_s2, %s533_s22 }
  0x12   : > { %530 = vmatprep.mubr.msk.bf16.mxu0 %vm308_vm1, %v572_v6 }
  0x14   : > { %319 = vmatpush1.bf16.msra.mxu0 %v564_v5 }
  0x15   : > { %320 = vmatprep.subr.bf16.mxu0 %v597_v1 }
  0x18   : > { %321 = vmatpush1.bf16.msra.mxu0 %v565_v7  ;;  %v384_v35 = vld [vmem:[%s658_s29] sm:$0x3] }
  0x19   : > { %322 = vmatprep.subr.bf16.mxu0 %v597_v1 }
  0x1c   : > { %323 = vmatpush1.bf16.msra.mxu0 %v566_v8 }
  0x1d   : > { %324 = vmatprep.subr.bf16.mxu0 %v597_v1 }
  0x20   : > { %325 = vmatpush1.bf16.msra.mxu0 %v567_v9 }
  0x21   : > { %326 = vmatprep.subr.bf16.mxu0 %v597_v1 }
  0x24   : > { %327 = vmatpush1.bf16.msra.mxu0 %v568_v10 }
  0x25   : > { %328 = vmatprep.subr.bf16.mxu0 %v597_v1 }
  0x28   : > { %329 = vmatpush1.bf16.msra.mxu0 %v569_v11 }
  0x2b   : > { %345 = vmatmul.mubr.bf16.vlgmr.msra.gmra.mrb[0].mxu0 %v570_v12 }
  0xfe   : > { %v346_v13 = vpop.f32.mrb[0].mxu0 }
  0xff   : > { %354 = vst.msk [vmem:[%s218_s21] sm:$0xff] %vm353_vm2, %v346_v13  ;;  %v365_v14 = vmul.f32 %v346_v13, %v346_v13  ;;  %v348_v15 = vpop.f32.mrb[1].mxu0  ;;  %v356_v17 = vsel %vm353_vm2, %v346_v13, 0.0 }
 0x100   : > { %v349_v16 = vpop.f32.mrb[2].mxu0 }
 0x101   : > { %355 = vst.msk [vmem:[%s218_s21 + $0x8] sm:$0xff] %vm353_vm2, %v349_v16  ;;  %v357_v18 = vsel %vm353_vm2, %v349_v16, 0.0  ;;  %v366_v19 = vmul.f32 %v349_v16, %v349_v16  ;;  %v351_v20 = vpop.f32.mrb[3].mxu0  ;;  %v367_v22 = vsel %vm353_vm2, %v365_v14, 0.0 }
 0x102   : > { %v358_v21 = vadd.f32 %v357_v18, %v356_v17 }
 0x103   : > { %v368_v23 = vsel %vm353_vm2, %v366_v19, 0.0 }
 0x104   : > { %v359_v24 = vrot.slane %v358_v21, 4  ;;  %v369_v25 = vadd.f32 %v368_v23, %v367_v22 }
 0x106   : > { %v360_v26 = vadd.f32 %v359_v24, %v358_v21  ;;  %v370_v27 = vrot.slane %v369_v25, 4 }
 0x108   : > { %v361_v28 = vrot.slane %v360_v26, 2  ;;  %v371_v29 = vadd.f32 %v370_v27, %v369_v25 }
 0x10a   : > { %v362_v30 = vadd.f32 %v361_v28, %v360_v26  ;;  %v372_v31 = vrot.slane %v371_v29, 2 }
 0x10c   : > { %v363_v32 = vrot.slane %v362_v30, 1  ;;  %v373_v33 = vadd.f32 %v372_v31, %v371_v29 }
 0x10e   : > { %v374_v34 = vrot.slane %v373_v33, 1  ;;  %v364_v36 = vadd.f32 %v363_v32, %v362_v30 }
 0x110   : > { %v375_v37 = vadd.f32 %v374_v34, %v373_v33 }
 0x112   : > { %v377_v38 = vsel %vm376_vm3, %v364_v36, %v375_v37 }
 0x113   : > { %v385_v39 = vadd.f32 %v384_v35, %v377_v38 }
 0x115   : > { %387 = vst.msk [vmem:[%s658_s29] sm:$0x3] %vm382_vm0, %v385_v39 }
 0x116 PF: > { %s14_s14 = sadd.s32 1, %s595_s14   ;;  %s701_s12 = smov %s591_s13 }
 0x117   : > { %p11_p5 = scmp.ge.s32.totalorder %s14_s14, 4   ;;  %s702_s13 = smov %s704_s15 }
 0x119   :  { %13 = sbr.rel (!%p11_p5) target bundleno = 2 (0x2), region = 74 }

// kernel: tile.14
= control target key start
LH: loop header
LB: loop body
LE: loop exit
PB: predicated region body
PF: predicated region fallthrough
CT: control target
= control target key end

     0   :  { %vm21_vm0 = vcmask 130048   ;;  %s70_s14 = smov 16   ;;  %s71_s15 = smov 32   ;;  %vm29_vm1 = vcmask 523648   ;;  %vm37_vm2 = vcmask 392448   ;;  %vm45_vm3 = vcmask 261248   ;;  %s100_s0 = inlined_call_operand.vmem [shape: f32[2,2,4,16], index: 0, kind: input, shape index: {}]   ;;  %s101_s1 = inlined_call_operand.vmem [shape: f32[2,2,64], index: 1, kind: output, shape index: {}]  }
   0x1   :  { %v62_v0 = vld [vmem:[%s100_s0 + $0xc] sm:$0xf]  ;;  %v63_v1 = vld [vmem:[%s100_s0 + $0x8] sm:$0xf]  ;;  %v64_v2 = vld [vmem:[%s100_s0 + $0x4] sm:$0xf] }
   0x2   :  { %8 = vst [vmem:[#allocation1 + $0x18] sm:$0xf] %v62_v0  ;;  %13 = vst [vmem:[#allocation1 + $0x10] sm:$0xf] %v63_v1  ;;  %v18_v3 = vld [vmem:[%s100_s0] sm:$0xf] }
   0x3   :  { %17 = vst [vmem:[#allocation1 + $0x8] sm:$0xf] %v64_v2  ;;  %19 = vst [vmem:[#allocation1] sm:$0xf] %v18_v3  ;;  %s69_s0 = smov 48  }
   0xa   :  { %v26_v4 = vld [vmem:[#allocation1 + $0x3] ss:$8 sm:$0xf]   ;;  %v42_v5 = vld [vmem:[#allocation1 + $0x1] ss:$8 sm:$0xf]  }
   0xb   :  { %27 = vrot.lane.b32.xlu0 %v26_v4, %s69_s0  ;;  %v20_v6 = vld [vmem:[#allocation1] ss:$8 sm:$0xf]   ;;  %v34_v7 = vld [vmem:[#allocation1 + $0x2] ss:$8 sm:$0xf]   ;;  %43 = vrot.lane.b32.xlu1 %v42_v5, %s70_s14 }
   0xc   :  { %22 = vst.msk [vmem:[#allocation0] sm:$0x3] %vm21_vm0, %v20_v6   ;;  %24 = vst.msk [vmem:[#allocation0 + $0x6] sm:$0xc] %vm21_vm0, %v20_v6  }
   0xf   :  { %35 = vrot.lane.b32.xlu0 %v34_v7, %s71_s15 }
  0x7d   :  { %v28_v8 = vpop.permute.xlu0 %27   ;;  %v44_v9 = vpop.permute.xlu1 %43  }
  0x7e   :  { %30 = vst.msk [vmem:[#allocation0] sm:$0x3] %vm29_vm1, %v28_v8   ;;  %32 = vst.msk [vmem:[#allocation0 + $0x6] sm:$0xc] %vm29_vm1, %v28_v8  }
  0x81   :  { %v36_v10 = vpop.permute.xlu0 %35  }
  0x82   :  { %38 = vst.msk [vmem:[#allocation0] sm:$0x3] %vm37_vm2, %v36_v10   ;;  %40 = vst.msk [vmem:[#allocation0 + $0x6] sm:$0xc] %vm37_vm2, %v36_v10  }
  0x83   :  { %46 = vst.msk [vmem:[#allocation0] sm:$0x3] %vm45_vm3, %v44_v9   ;;  %48 = vst.msk [vmem:[#allocation0 + $0x6] sm:$0xc] %vm45_vm3, %v44_v9  }
  0x8a   :  { %v52_v11 = vld [vmem:[#allocation0] sm:$0x3]  ;;  %v56_v12 = vld [vmem:[#allocation0 + $0x8] sm:$0x3] }
  0x8b   :  { %54 = vst [vmem:[%s101_s1] sm:$0x3] %v52_v11  ;;  %65 = vst [vmem:[%s101_s1 + $0x2] sm:$0x3] %v56_v12 }

// kernel: unet_forward.39
= control target key start
LH: loop header
LB: loop body
LE: loop exit
PB: predicated region body
PF: predicated region fallthrough
CT: control target
= control target key end

     0   :  { %s791_s12 = smov 0   ;;  %s793_s13 = smov 0   ;;  %s900_s0 = inlined_call_operand.vmem [shape: bf16[2,16,288], index: 0, kind: input, shape index: {}]   ;;  %s901_s1 = inlined_call_operand.vmem [shape: bf16[288,32], index: 1, kind: input, shape index: {}]   ;;  %s902_s2 = inlined_call_operand.vmem [shape: f32[2,16,32], index: 2, kind: output, shape index: {0}]   ;;  %s903_s3 = inlined_call_operand.vmem [shape: f32[2,2,32], index: 3, kind: output, shape index: {1}]  }
   0x1   :  { %s795_s14 = smov 0  }
   0x2 LB: > { %s26_s15 = sadd.s32 1, %s763_s13  ;;  %p633_p0 = scmp.ge.s32.totalorder %s767_s14, 1  ;;  %s767_s14 = sphi %s795_s14, %s14_s14   ;;  %s763_s13 = sphi %s793_s13, %s905_s13   ;;  %s759_s12 = sphi %s791_s12, %s904_s12  }
   0x3   : > { %p28_p1 = scmp.ge.s32.totalorder %s26_s15, 2  ;;  %p162_p2 = scmp.lt.s32.totalorder %s767_s14, 3 }
   0x5   : > { %s907_s15 = smov (%p28_p1, %s26_s15), 0  ;;  %p163_p3 = pnand %p633_p0, %p162_p2 }
   0x6   : > { %v723_v0 = vld [vmem:[%s901_s1 + $0x40] sm:$0xff] (!%p163_p3)   ;;  %p200_p4 = scmp.lt.s32.totalorder (!%p163_p3), %s759_s12, 1  ;;  %v725_v2 = vld [vmem:[%s901_s1 + $0x48] sm:$0xff] (!%p163_p3)   ;;  %v769_v3 = vmov (!%p163_p3), 0.0   ;;  %vm502_vm0 = vcmask (!%p163_p3), 254976   ;;  %v727_v5 = vld [vmem:[%s901_s1 + $0x50] sm:$0xff] (!%p163_p3)  }
   0x7   : > { %166 = sbr.rel (%p163_p3) target bundleno = 279 (0x117), region = 28  ;;  %v724_v1 = vld [vmem:[%s901_s1] sm:$0xff] (!%p163_p3)   ;;  %663 = vmatprep.subr.bf16.mxu0 (!%p163_p3), %v723_v0  ;;  %688 = vmatprep.subr.bf16.mxu1 (!%p163_p3), %v769_v3  ;;  %v726_v4 = vld [vmem:[%s901_s1 + $0x8] sm:$0xff] (!%p163_p3)   ;;  %v728_v6 = vld [vmem:[%s901_s1 + $0x10] sm:$0xff] (!%p163_p3)   ;;  %vm770_vm1 = vmmov (!%p163_p3), 0   ;;  %vm388_vm2 = vcmask (!%p163_p3), 261120  }
   0x8   : > { %664 = vmatpush3.bf16.msra.mxu0 (!%p163_p3), %v724_v1  ;;  %692 = vmatprep.mubr.msk.bf16.mxu1 (!%p163_p3), %vm770_vm1, %v769_v3  ;;  %v729_v7 = vld [vmem:[%s901_s1 + $0x58] sm:$0xff] (!%p163_p3)   ;;  %v731_v9 = vld [vmem:[%s901_s1 + $0x60] sm:$0xff] (!%p163_p3)   ;;  %v733_v12 = vld [vmem:[%s901_s1 + $0x68] sm:$0xff] (!%p163_p3)   ;;  %vm496_vm3 = vcmask (!%p163_p3), 1040384  }
   0x9   : > { %665 = vmatprep.subr.bf16.mxu0 (!%p163_p3), %v725_v2  ;;  %v730_v8 = vld [vmem:[%s901_s1 + $0x18] sm:$0xff] (!%p163_p3)   ;;  %v732_v10 = vld [vmem:[%s901_s1 + $0x20] sm:$0xff] (!%p163_p3)   ;;  %v740_v13 = vld [vmem:[%s901_s1 + $0x88] sm:$0xff] (!%p163_p3)  }
   0xa   : > { %v737_v11 = vld [vmem:[%s901_s1 + $0x80] sm:$0xff] (!%p163_p3)   ;;  %v734_v14 = vld [vmem:[%s901_s1 + $0x28] sm:$0xff] (!%p163_p3)   ;;  %v735_v16 = vld [vmem:[%s901_s1 + $0x70] sm:$0xff] (!%p163_p3)  }
   0xb   : > { %689 = vmatpush3.bf16.msra.mxu1 (!%p163_p3), %v737_v11  ;;  %v736_v18 = vld [vmem:[%s901_s1 + $0x30] sm:$0xff] (!%p163_p3)   ;;  %v738_v19 = vld [vmem:[%s901_s1 + $0x78] sm:$0xff] (!%p163_p3)  }
   0xc   : > { %666 = vmatpush3.bf16.msra.mxu0 (!%p163_p3), %v726_v4  ;;  %690 = vmatprep.subr.bf16.mxu1 (!%p163_p3), %v769_v3  ;;  %v739_v20 = vld [vmem:[%s901_s1 + $0x38] sm:$0xff] (!%p163_p3)  }
   0xd   : > { %667 = vmatprep.subr.bf16.mxu0 (!%p163_p3), %v727_v5 }
   0xe   : > { %s909_s12 = smov (!%p200_p4, %s759_s12), 1 }
   0xf   : > { %s637_s26 = sshll.u32 %s909_s12, 1  ;;  %s696_s11 = smul.u32 24, %s909_s12  ;;  %691 = vmatpush3.bf16.msra.mxu1 %v740_v13 }
  0x10   : > { %s830_s29 = scalar_lea.vmem %s903_s3, %s637_s26  ;;  %668 = vmatpush3.bf16.msra.mxu0 %v728_v6 }
  0x11   : > { %503 = vst.msk [vmem:[%s830_s29] sm:$0x3] %vm502_vm0, %v769_v3  ;;  %669 = vmatprep.subr.bf16.mxu0 %v729_v7  ;;  %s208_s24 = scalar_lea.vmem %s900_s0, %s696_s11  ;;  %s662_s11 = sshll.u32 %s909_s12, 4 }
  0x12   : > { %v743_v15 = vld [vmem:[%s208_s24 + $0x4] ss:$12 sps:$4 sm:$0xff]   ;;  %v744_v17 = vld [vmem:[%s208_s24 + $0x8] ss:$12 sps:$4 sm:$0xff]   ;;  %v741_v21 = vld [vmem:[%s208_s24] ss:$12 sps:$4 sm:$0xff]   ;;  %s218_s18 = scalar_lea.vmem %s902_s2, %s662_s11 }
  0x13   : > { %424 = vmatprep.mubr.bf16.mxu0 %v743_v15  ;;  %693 = vmatmul.mubr.msk.bf16.vlgmr.msra.gmra.mrb[0].mxu1 %vm388_vm2, %v744_v17 }
  0x14   : > { %670 = vmatpush3.bf16.msra.mxu0 %v730_v8 }
  0x15   : > { %671 = vmatprep.subr.bf16.mxu0 %v731_v9 }
  0x18   : > { %672 = vmatpush3.bf16.msra.mxu0 %v732_v10  ;;  %v504_v52 = vld [vmem:[%s830_s29] sm:$0x3] }
  0x19   : > { %673 = vmatprep.subr.bf16.mxu0 %v733_v12 }
  0x1c   : > { %674 = vmatpush3.bf16.msra.mxu0 %v734_v14 }
  0x1d   : > { %675 = vmatprep.subr.bf16.mxu0 %v735_v16 }
  0x20   : > { %676 = vmatpush3.bf16.msra.mxu0 %v736_v18 }
  0x21   : > { %677 = vmatprep.subr.bf16.mxu0 %v738_v19 }
  0x24   : > { %678 = vmatpush3.bf16.msra.mxu0 %v739_v20 }
  0x27   : > { %425 = vmatmul.mubr.bf16.vlgmr.msra.gmra.mrb[0].mxu0 %v741_v21 }
  0xe6   : > { %v467_v22 = vpop.f32.mrb[0].mxu1 }
  0xe7   : > { %v694_v23 = vpop.f32.mrb[1].mxu1 }
  0xe8   : > { %v470_v24 = vpop.f32.mrb[2].mxu1 }
  0xe9   : > { %v695_v25 = vpop.f32.mrb[3].mxu1 }
  0xfa   : > { %v679_v26 = vpop.f32.mrb[0].mxu0 }
  0xfb   : > { %v680_v27 = vpop.f32.mrb[1].mxu0 }
  0xfc   : > { %v681_v28 = vadd.f32 %v680_v27, %v679_v26  ;;  %v682_v29 = vpop.f32.mrb[2].mxu0 }
  0xfd   : > { %v683_v30 = vpop.f32.mrb[3].mxu0 }
  0xfe   : > { %v468_v31 = vadd.f32 %v681_v28, %v467_v22  ;;  %v684_v32 = vadd.f32 %v683_v30, %v682_v29 }
 0x100   : > { %474 = vst.msk [vmem:[%s218_s18] sm:$0xff] %vm388_vm2, %v468_v31  ;;  %v485_v33 = vmul.f32 %v468_v31, %v468_v31  ;;  %v471_v34 = vadd.f32 %v684_v32, %v470_v24  ;;  %v476_v35 = vsel %vm388_vm2, %v468_v31, 0.0 }
 0x102   : > { %475 = vst.msk [vmem:[%s218_s18 + $0x8] sm:$0xff] %vm388_vm2, %v471_v34  ;;  %v477_v36 = vsel %vm388_vm2, %v471_v34, 0.0  ;;  %v486_v37 = vmul.f32 %v471_v34, %v471_v34  ;;  %v487_v39 = vsel %vm388_vm2, %v485_v33, 0.0 }
 0x103   : > { %v478_v38 = vadd.f32 %v477_v36, %v476_v35 }
 0x104   : > { %v488_v40 = vsel %vm388_vm2, %v486_v37, 0.0 }
 0x105   : > { %v479_v41 = vrot.slane %v478_v38, 4  ;;  %v489_v42 = vadd.f32 %v488_v40, %v487_v39 }
 0x107   : > { %v480_v43 = vadd.f32 %v479_v41, %v478_v38  ;;  %v490_v44 = vrot.slane %v489_v42, 4 }
 0x109   : > { %v481_v45 = vrot.slane %v480_v43, 2  ;;  %v491_v46 = vadd.f32 %v490_v44, %v489_v42 }
 0x10b   : > { %v482_v47 = vadd.f32 %v481_v45, %v480_v43  ;;  %v492_v48 = vrot.slane %v491_v46, 2 }
 0x10d   : > { %v483_v49 = vrot.slane %v482_v47, 1  ;;  %v493_v50 = vadd.f32 %v492_v48, %v491_v46 }
 0x10f   : > { %v494_v51 = vrot.slane %v493_v50, 1  ;;  %v484_v53 = vadd.f32 %v483_v49, %v482_v47 }
 0x111   : > { %v495_v54 = vadd.f32 %v494_v51, %v493_v50 }
 0x113   : > { %v497_v55 = vsel %vm496_vm3, %v484_v53, %v495_v54 }
 0x114   : > { %v505_v56 = vadd.f32 %v504_v52, %v497_v55 }
 0x116   : > { %507 = vst.msk [vmem:[%s830_s29] sm:$0x3] %vm502_vm0, %v505_v56 }
 0x117 PF: > { %s14_s14 = sadd.s32 1, %s767_s14   ;;  %s904_s12 = smov %s763_s13 }
 0x118   : > { %p11_p5 = scmp.ge.s32.totalorder %s14_s14, 4   ;;  %s905_s13 = smov %s907_s15 }
 0x11a   :  { %13 = sbr.rel (!%p11_p5) target bundleno = 2 (0x2), region = 74 }

// kernel: unet_forward.41
= control target key start
LH: loop header
LB: loop body
LE: loop exit
PB: predicated region body
PF: predicated region fallthrough
CT: control target
= control target key end

     0   :  { %s547_s12 = smov 0   ;;  %s549_s13 = smov 0   ;;  %s596_s0 = inlined_call_operand.vmem [shape: bf16[2,16,32], index: 0, kind: input, shape index: {}]   ;;  %s597_s1 = inlined_call_operand.vmem [shape: bf16[32,64], index: 1, kind: input, shape index: {}]   ;;  %s598_s2 = inlined_call_operand.vmem [shape: f32[2,16,64], index: 2, kind: output, shape index: {0}]   ;;  %s599_s3 = inlined_call_operand.vmem [shape: f32[2,2,64], index: 3, kind: output, shape index: {1}]  }
   0x1   :  { %s551_s14 = smov 0  }
   0x2 LB: > { %s26_s15 = sadd.s32 1, %s519_s13  ;;  %p447_p0 = scmp.ge.s32.totalorder %s523_s14, 1  ;;  %s523_s14 = sphi %s551_s14, %s14_s14   ;;  %s519_s13 = sphi %s549_s13, %s601_s13   ;;  %s515_s12 = sphi %s547_s12, %s600_s12  }
   0x3   : > { %p28_p1 = scmp.ge.s32.totalorder %s26_s15, 2  ;;  %p161_p2 = scmp.lt.s32.totalorder %s523_s14, 3 }
   0x5   : > { %s603_s15 = smov (%p28_p1, %s26_s15), 0  ;;  %p162_p3 = pnand %p447_p0, %p161_p2 }
   0x6   : > { %p198_p4 = scmp.lt.s32.totalorder (!%p162_p3), %s515_s12, 1  ;;  %v498_v0 = vld [vmem:[%s597_s1] sm:$0xff] (!%p162_p3)   ;;  %v525_v1 = vmov (!%p162_p3), 0.0   ;;  %v499_v2 = vld [vmem:[%s597_s1 + $0x8] sm:$0xff] (!%p162_p3)   ;;  %vm319_vm0 = vcmask (!%p162_p3), 517120   ;;  %vm526_vm1 = vmmov (!%p162_p3), 0  }
   0x7   : > { %165 = sbr.rel (%p162_p3) target bundleno = 253 (0xfd), region = 28  ;;  %464 = vmatprep.subr.bf16.mxu0 (!%p162_p3), %v525_v1  ;;  %468 = vmatprep.mubr.msk.bf16.mxu0 (!%p162_p3), %vm526_vm1, %v525_v1  ;;  %vm245_vm2 = vcmask (!%p162_p3), 261120   ;;  %vm290_vm3 = vcmask (!%p162_p3), 523264   ;;  %vm313_vm4 = vcmask (!%p162_p3), 1040384  }
   0x8   : > { %465 = vmatpush3.bf16.msra.mxu0 (!%p162_p3), %v498_v0 }
   0x9   : > { %466 = vmatprep.subr.bf16.mxu0 (!%p162_p3), %v525_v1 }
   0xc   : > { %467 = vmatpush3.bf16.msra.mxu0 (!%p162_p3), %v499_v2 }
   0xe   : > { %s605_s12 = smov (!%p198_p4, %s515_s12), 1 }
   0xf   : > { %s452_s20 = sshll.u32 %s605_s12, 1  ;;  %s459_s21 = sshll.u32 %s605_s12, 3 }
  0x10   : > { %s574_s24 = scalar_lea.vmem %s599_s3, %s452_s20  ;;  %s205_s27 = scalar_lea.vmem %s596_s0, %s459_s21 }
  0x11   : > { %320 = vst.msk [vmem:[%s574_s24] sm:$0x3] %vm319_vm0, %v525_v1  ;;  %v500_v3 = vld [vmem:[%s205_s27] sm:$0xff]   ;;  %s460_s28 = sshll.u32 %s605_s12, 4 }
  0x12   : > { %469 = vmatmul.mubr.msk.bf16.vlgmr.msra.gmra.mrb[0].mxu0 %vm245_vm2, %v500_v3  ;;  %s215_s4 = scalar_lea.vmem %s598_s2, %s460_s28 }
  0x18   : > { %v321_v26 = vld [vmem:[%s574_s24] sm:$0x3] }
  0xe5   : > { %v283_v4 = vpop.f32.mrb[0].mxu0 }
  0xe6   : > { %291 = vst.msk [vmem:[%s215_s4] sm:$0xff] %vm290_vm3, %v283_v4  ;;  %v302_v5 = vmul.f32 %v283_v4, %v283_v4  ;;  %v470_v6 = vpop.f32.mrb[1].mxu0  ;;  %v293_v8 = vsel %vm290_vm3, %v283_v4, 0.0 }
  0xe7   : > { %v286_v7 = vpop.f32.mrb[2].mxu0 }
  0xe8   : > { %292 = vst.msk [vmem:[%s215_s4 + $0x8] sm:$0xff] %vm290_vm3, %v286_v7  ;;  %v294_v9 = vsel %vm290_vm3, %v286_v7, 0.0  ;;  %v303_v10 = vmul.f32 %v286_v7, %v286_v7  ;;  %v471_v11 = vpop.f32.mrb[3].mxu0  ;;  %v304_v13 = vsel %vm290_vm3, %v302_v5, 0.0 }
  0xe9   : > { %v295_v12 = vadd.f32 %v294_v9, %v293_v8 }
  0xea   : > { %v305_v14 = vsel %vm290_vm3, %v303_v10, 0.0 }
  0xeb   : > { %v296_v15 = vrot.slane %v295_v12, 4  ;;  %v306_v16 = vadd.f32 %v305_v14, %v304_v13 }
  0xed   : > { %v297_v17 = vadd.f32 %v296_v15, %v295_v12  ;;  %v307_v18 = vrot.slane %v306_v16, 4 }
  0xef   : > { %v298_v19 = vrot.slane %v297_v17, 2  ;;  %v308_v20 = vadd.f32 %v307_v18, %v306_v16 }
  0xf1   : > { %v299_v21 = vadd.f32 %v298_v19, %v297_v17  ;;  %v309_v22 = vrot.slane %v308_v20, 2 }
  0xf3   : > { %v300_v23 = vrot.slane %v299_v21, 1  ;;  %v310_v24 = vadd.f32 %v309_v22, %v308_v20 }
  0xf5   : > { %v311_v25 = vrot.slane %v310_v24, 1  ;;  %v301_v27 = vadd.f32 %v300_v23, %v299_v21 }
  0xf7   : > { %v312_v28 = vadd.f32 %v311_v25, %v310_v24 }
  0xf9   : > { %v314_v29 = vsel %vm313_vm4, %v301_v27, %v312_v28 }
  0xfa   : > { %v322_v30 = vadd.f32 %v321_v26, %v314_v29 }
  0xfc   : > { %324 = vst.msk [vmem:[%s574_s24] sm:$0x3] %vm319_vm0, %v322_v30 }
  0xfd PF: > { %s14_s14 = sadd.s32 1, %s523_s14   ;;  %s600_s12 = smov %s519_s13 }
  0xfe   : > { %p11_p5 = scmp.ge.s32.totalorder %s14_s14, 4   ;;  %s601_s13 = smov %s603_s15 }
 0x100   :  { %13 = sbr.rel (!%p11_p5) target bundleno = 2 (0x2), region = 74 }

// kernel: unet_forward.42
= control target key start
LH: loop header
LB: loop body
LE: loop exit
PB: predicated region body
PF: predicated region fallthrough
CT: control target
= control target key end

     0   :  { %s428_s9 = smov 0   ;;  %s430_s10 = smov 0   ;;  %s469_s0 = inlined_call_operand.vmem [shape: f32[2,16,64], index: 0, kind: input, shape index: {}]   ;;  %s470_s1 = inlined_call_operand.vmem [shape: f32[2,2,64], index: 1, kind: input, shape index: {}]   ;;  %s471_s2 = inlined_call_operand.vmem [shape: bf16[2,16,64], index: 2, kind: output, shape index: {}]  }
   0x1   :  { %s432_s11 = smov 0  }
   0x2 LB: > { %s24_s12 = sadd.s32 1, %s407_s10  ;;  %p349_p0 = scmp.ge.s32.totalorder %s411_s11, 1  ;;  %s411_s11 = sphi %s432_s11, %s12_s11   ;;  %s407_s10 = sphi %s430_s10, %s473_s10   ;;  %s403_s9 = sphi %s428_s9, %s472_s9  }
   0x3   : > { %p26_p1 = scmp.ge.s32.totalorder %s24_s12, 2  ;;  %p142_p2 = scmp.lt.s32.totalorder %s411_s11, 3 }
   0x5   : > { %s475_s12 = smov (%p26_p1, %s24_s12), 0  ;;  %p143_p3 = pnand %p349_p0, %p142_p2 }
   0x6   : > { %p177_p4 = scmp.lt.s32.totalorder (!%p143_p3), %s403_s9, 1  ;;  %v217_v7 = vlaneseq (!%p143_p3)  ;;  %vm243_vm2 = vcmask (!%p143_p3), 519168  }
   0x7   : > { %146 = sbr.rel (%p143_p3) target bundleno = 55 (0x37), region = 28 }
   0x8   : > { %v218_v8 = vshrl.u32 (!%p143_p3), %v217_v7, 7 }
   0xa   : > { %v219_v9 = vsub.s32 (!%p143_p3), 1, %v218_v8  ;;  %v225_v16 = vsub.s32 (!%p143_p3), 0, %v218_v8 }
   0xe   : > { %s477_s9 = smov (!%p177_p4, %s403_s9), 1 }
   0xf   : > { %s352_s13 = sshll.u32 %s477_s9, 1  ;;  %s359_s17 = sshll.u32 %s477_s9, 4 }
  0x10   : > { %s189_s16 = scalar_lea.vmem %s470_s1, %s352_s13  ;;  %s184_s20 = scalar_lea.vmem %s469_s0, %s359_s17 }
  0x11   : > { %v202_v0 = vld [vmem:[%s189_s16] sm:$0x3]  ;;  %v201_v13 = vld [vmem:[%s184_s20 + $0x8] sm:$0xff]  ;;  %s360_s21 = sshll.u32 %s477_s9, 3 }
  0x12   : > { %v203_v1 = vmul.f32 0.015625, %v202_v0  ;;  %v200_v12 = vld [vmem:[%s184_s20] sm:$0xff]  ;;  %s198_s24 = scalar_lea.vmem %s471_s2, %s360_s21 }
  0x14   : > { %v204_v2 = vmul.f32 %v203_v1, %v203_v1  ;;  %v212_v10 = vsub.f32 0.0, %v203_v1 }
  0x16   : > { %v206_v3 = vrot.slane %v204_v2, 7 }
  0x18   : > { %v208_v4 = vsub.f32 %v203_v1, %v206_v3 }
  0x1a   : > { %v209_v5 = vmax.f32 %v208_v4, 0.0 }
  0x1c   : > { %v210_v6 = vadd.f32 1e-05, %v209_v5 }
  0x1e   : > { %387 = vrsqrt.f32 %v210_v6 }
  0x28   : > { %v388_v11 = vpop.eup %387 }
  0x29   : > { %v214_v14 = vrot.slane %v388_v11, 1  ;;  %v220_v15 = vrot.slane %v388_v11, %v219_v9 }
  0x2b   : > { %v216_v17 = vmul.f32 %v214_v14, %v212_v10  ;;  %v221_v18 = vmul.f32 %v220_v15, %v200_v12  ;;  %v222_v19 = vmul.f32 %v220_v15, %v201_v13 }
  0x2d   : > { %v226_v20 = vrot.slane %v216_v17, %v225_v16 }
  0x2f   : > { %v227_v21 = vadd.f32 %v226_v20, %v221_v18  ;;  %v228_v22 = vadd.f32 %v226_v20, %v222_v19 }
  0x31   : > { %vm229_vm0 = vcmp.ge.f32.partialorder %v227_v21, 0.0  ;;  %v231_v23 = vmul.f32 0.2, %v227_v21  ;;  %vm230_vm1 = vcmp.ge.f32.partialorder %v228_v22, 0.0  ;;  %v232_v24 = vmul.f32 0.2, %v228_v22 }
  0x33   : > { %v233_v25 = vsel %vm229_vm0, %v227_v21, %v231_v23  ;;  %v234_v26 = vsel %vm230_vm1, %v228_v22, %v232_v24 }
  0x34   : > { %v361_v27 = vpack.c.bf16 %v233_v25, %v233_v25  ;;  %v362_v28 = vpack.c.bf16 %v234_v26, %v234_v26 }
  0x36   : > { %244 = vst.msk [vmem:[%s198_s24] sm:$0xf] %vm243_vm2, %v361_v27  ;;  %245 = vst.msk [vmem:[%s198_s24 + $0x4] sm:$0xf] %vm243_vm2, %v362_v28 }
  0x37 PF: > { %s12_s11 = sadd.s32 1, %s411_s11   ;;  %s472_s9 = smov %s407_s10 }
  0x38   : > { %p9_p5 = scmp.ge.s32.totalorder %s12_s11, 4   ;;  %s473_s10 = smov %s475_s12 }
  0x3a   :  { %11 = sbr.rel (!%p9_p5) target bundleno = 2 (0x2), region = 61 }

// kernel: tile.19
= control target key start
LH: loop header
LB: loop body
LE: loop exit
PB: predicated region body
PF: predicated region fallthrough
CT: control target
= control target key end

     0   :  { %vm21_vm0 = vcmask 64512   ;;  %s70_s14 = smov 8   ;;  %s71_s15 = smov 16   ;;  %vm29_vm1 = vcmask 261312   ;;  %vm37_vm2 = vcmask 195712   ;;  %vm45_vm3 = vcmask 130112   ;;  %s100_s0 = inlined_call_operand.vmem [shape: f32[2,2,4,8], index: 0, kind: input, shape index: {}]   ;;  %s101_s1 = inlined_call_operand.vmem [shape: f32[2,2,32], index: 1, kind: output, shape index: {}]  }
   0x1   :  { %v62_v0 = vld [vmem:[%s100_s0 + $0xc] sm:$0xf]  ;;  %v63_v1 = vld [vmem:[%s100_s0 + $0x8] sm:$0xf]  ;;  %v64_v2 = vld [vmem:[%s100_s0 + $0x4] sm:$0xf] }
   0x2   :  { %8 = vst [vmem:[#allocation1 + $0x18] sm:$0xf] %v62_v0  ;;  %13 = vst [vmem:[#allocation1 + $0x10] sm:$0xf] %v63_v1  ;;  %v18_v3 = vld [vmem:[%s100_s0] sm:$0xf] }
   0x3   :  { %17 = vst [vmem:[#allocation1 + $0x8] sm:$0xf] %v64_v2  ;;  %19 = vst [vmem:[#allocation1] sm:$0xf] %v18_v3  ;;  %s69_s0 = smov 24  }
   0xa   :  { %v26_v4 = vld [vmem:[#allocation1 + $0x3] ss:$8 sm:$0xf]   ;;  %v42_v5 = vld [vmem:[#allocation1 + $0x1] ss:$8 sm:$0xf]  }
   0xb   :  { %27 = vrot.lane.b32.xlu0 %v26_v4, %s69_s0  ;;  %v20_v6 = vld [vmem:[#allocation1] ss:$8 sm:$0xf]   ;;  %v34_v7 = vld [vmem:[#allocation1 + $0x2] ss:$8 sm:$0xf]   ;;  %43 = vrot.lane.b32.xlu1 %v42_v5, %s70_s14 }
   0xc   :  { %22 = vst.msk [vmem:[#allocation0] sm:$0x3] %vm21_vm0, %v20_v6   ;;  %24 = vst.msk [vmem:[#allocation0 + $0x6] sm:$0xc] %vm21_vm0, %v20_v6  }
   0xf   :  { %35 = vrot.lane.b32.xlu0 %v34_v7, %s71_s15 }
  0x7d   :  { %v28_v8 = vpop.permute.xlu0 %27   ;;  %v44_v9 = vpop.permute.xlu1 %43  }
  0x7e   :  { %30 = vst.msk [vmem:[#allocation0] sm:$0x3] %vm29_vm1, %v28_v8   ;;  %32 = vst.msk [vmem:[#allocation0 + $0x6] sm:$0xc] %vm29_vm1, %v28_v8  }
  0x81   :  { %v36_v10 = vpop.permute.xlu0 %35  }
  0x82   :  { %38 = vst.msk [vmem:[#allocation0] sm:$0x3] %vm37_vm2, %v36_v10   ;;  %40 = vst.msk [vmem:[#allocation0 + $0x6] sm:$0xc] %vm37_vm2, %v36_v10  }
  0x83   :  { %46 = vst.msk [vmem:[#allocation0] sm:$0x3] %vm45_vm3, %v44_v9   ;;  %48 = vst.msk [vmem:[#allocation0 + $0x6] sm:$0xc] %vm45_vm3, %v44_v9  }
  0x8a   :  { %v52_v11 = vld [vmem:[#allocation0] sm:$0x3]  ;;  %v56_v12 = vld [vmem:[#allocation0 + $0x8] sm:$0x3] }
  0x8b   :  { %54 = vst [vmem:[%s101_s1] sm:$0x3] %v52_v11  ;;  %65 = vst [vmem:[%s101_s1 + $0x2] sm:$0x3] %v56_v12 }

// kernel: unet_forward.43
= control target key start
LH: loop header
LB: loop body
LE: loop exit
PB: predicated region body
PF: predicated region fallthrough
CT: control target
= control target key end

     0   :  { %s1108_s18 = smov 0   ;;  %s1110_s19 = smov 0   ;;  %s1279_s0 = inlined_call_operand.vmem [shape: bf16[2,64,144], index: 0, kind: input, shape index: {}]   ;;  %s1280_s1 = inlined_call_operand.vmem [shape: bf16[144,16], index: 1, kind: input, shape index: {}]   ;;  %s1281_s2 = inlined_call_operand.vmem [shape: bf16[2,64,144], index: 2, kind: input, shape index: {}]   ;;  %s1282_s3 = inlined_call_operand.vmem [shape: bf16[144,16], index: 3, kind: input, shape index: {}]   ;;  %s1283_s4 = inlined_call_operand.vmem [shape: f32[2,64,16], index: 4, kind: output, shape index: {0}]   ;;  %s1284_s5 = inlined_call_operand.vmem [shape: f32[2,2,16], index: 5, kind: output, shape index: {1}]  }
   0x1   :  { %s1112_s20 = smov 0  }
   0x2 LB: > { %s28_s21 = sadd.s32 1, %s1070_s19  ;;  %p921_p0 = scmp.ge.s32.totalorder %s1074_s20, 1  ;;  %s1074_s20 = sphi %s1112_s20, %s16_s20   ;;  %s1070_s19 = sphi %s1110_s19, %s1286_s19   ;;  %s1066_s18 = sphi %s1108_s18, %s1285_s18  }
   0x3   : > { %p30_p1 = scmp.ge.s32.totalorder %s28_s21, 2  ;;  %p230_p2 = scmp.lt.s32.totalorder %s1074_s20, 3 }
   0x5   : > { %s1288_s21 = smov (%p30_p1, %s28_s21), 0  ;;  %p231_p3 = pnand %p921_p0, %p230_p2 }
   0x6   : > { %v1010_v0 = vld [vmem:[%s1282_s3] sm:$0xff] (!%p231_p3)   ;;  %v1076_v1 = vmov (!%p231_p3), 0   ;;  %v1012_v3 = vld [vmem:[%s1282_s3 + $0x8] sm:$0xff] (!%p231_p3)   ;;  %p282_p4 = scmp.lt.s32.totalorder (!%p231_p3), %s1066_s18, 1  ;;  %v1014_v5 = vld [vmem:[%s1282_s3 + $0x10] sm:$0xff] (!%p231_p3)   ;;  %vm460_vm0 = vcmask (!%p231_p3), 130048  }
   0x7   : > { %234 = sbr.rel (%p231_p3) target bundleno = 304 (0x130), region = 36  ;;  %473 = vmatprep.subr.bf16.mxu1 (!%p231_p3), %v1076_v1  ;;  %640 = vmatprep.subr.bf16.mxu0 (!%p231_p3), %v1076_v1  ;;  %v1011_v2 = vld [vmem:[%s1280_s1] sm:$0xff] (!%p231_p3)   ;;  %v1013_v4 = vld [vmem:[%s1280_s1 + $0x8] sm:$0xff] (!%p231_p3)   ;;  %v1015_v6 = vld [vmem:[%s1280_s1 + $0x10] sm:$0xff] (!%p231_p3)   ;;  %vm769_vm1 = vcmask (!%p231_p3), 123904   ;;  %v1077_v35 = vmov (!%p231_p3), 0.0  }
   0x8   : > { %474 = vmatpush1.bf16.msra.mxu1 (!%p231_p3), %v1010_v0  ;;  %641 = vmatpush1.bf16.msra.mxu0 (!%p231_p3), %v1011_v2  ;;  %v1016_v7 = vld [vmem:[%s1282_s3 + $0x18] sm:$0xff] (!%p231_p3)   ;;  %v1018_v9 = vld [vmem:[%s1282_s3 + $0x20] sm:$0xff] (!%p231_p3)   ;;  %v1020_v11 = vld [vmem:[%s1282_s3 + $0x28] sm:$0xff] (!%p231_p3)   ;;  %vm763_vm2 = vcmask (!%p231_p3), 1040384  }
   0x9   : > { %475 = vmatprep.subr.bf16.mxu1 (!%p231_p3), %v1076_v1  ;;  %642 = vmatprep.subr.bf16.mxu0 (!%p231_p3), %v1076_v1  ;;  %v1017_v8 = vld [vmem:[%s1280_s1 + $0x18] sm:$0xff] (!%p231_p3)   ;;  %v1019_v10 = vld [vmem:[%s1280_s1 + $0x20] sm:$0xff] (!%p231_p3)   ;;  %v1021_v12 = vld [vmem:[%s1280_s1 + $0x28] sm:$0xff] (!%p231_p3)  }
   0xa   : > { %v1022_v15 = vld [vmem:[%s1282_s3 + $0x30] sm:$0xff] (!%p231_p3)   ;;  %v1024_v17 = vld [vmem:[%s1282_s3 + $0x38] sm:$0xff] (!%p231_p3)   ;;  %v1026_v19 = vld [vmem:[%s1282_s3 + $0x40] sm:$0xff] (!%p231_p3)  }
   0xb   : > { %v1023_v16 = vld [vmem:[%s1280_s1 + $0x30] sm:$0xff] (!%p231_p3)   ;;  %v1025_v18 = vld [vmem:[%s1280_s1 + $0x38] sm:$0xff] (!%p231_p3)   ;;  %v1027_v20 = vld [vmem:[%s1280_s1 + $0x40] sm:$0xff] (!%p231_p3)  }
   0xc   : > { %476 = vmatpush1.bf16.msra.mxu1 (!%p231_p3), %v1012_v3  ;;  %643 = vmatpush1.bf16.msra.mxu0 (!%p231_p3), %v1013_v4 }
   0xd   : > { %477 = vmatprep.subr.bf16.mxu1 (!%p231_p3), %v1076_v1  ;;  %644 = vmatprep.subr.bf16.mxu0 (!%p231_p3), %v1076_v1 }
   0xe   : > { %s1290_s18 = smov (!%p282_p4, %s1066_s18), 1 }
   0xf   : > { %s1153_s13 = sshll.u32 %s1290_s18, 6  ;;  %s928_s25 = sshll.u32 %s1290_s18, 1 }
  0x10   : > { %478 = vmatpush1.bf16.msra.mxu1 %v1014_v5  ;;  %645 = vmatpush1.bf16.msra.mxu0 %v1015_v6  ;;  %s1165_s24 = scalar_lea.vmem %s1281_s2, %s1153_s13  ;;  %s1174_s29 = scalar_lea.vmem %s1279_s0, %s1153_s13 }
  0x11   : > { %479 = vmatprep.subr.bf16.mxu1 %v1076_v1  ;;  %646 = vmatprep.subr.bf16.mxu0 %v1076_v1  ;;  %v1030_v13 = vld [vmem:[%s1165_s24 + $0x4] ss:$8 sps:$4 sm:$0xff]   ;;  %v1028_v21 = vld [vmem:[%s1165_s24] ss:$8 sps:$4 sm:$0xff]   ;;  %v1034_v23 = vld [vmem:[%s1165_s24 + $0x14] ss:$8 sps:$4 sm:$0xff]   ;;  %s1225_s28 = scalar_lea.vmem %s1284_s5, %s928_s25  ;;  %s1233_s7 = scalar_lea.vmem %s1283_s4, %s1153_s13 }
  0x12   : > { %v1033_v14 = vld [vmem:[%s1174_s29 + $0x4] ss:$8 sps:$4 sm:$0xff]   ;;  %946 = vmatprep.mubr.msk.bf16.mxu1 %vm460_vm0, %v1030_v13  ;;  %v1031_v22 = vld [vmem:[%s1174_s29] ss:$8 sps:$4 sm:$0xff]   ;;  %v1036_v24 = vld [vmem:[%s1174_s29 + $0x14] ss:$8 sps:$4 sm:$0xff]  }
  0x13   : > { %967 = vmatprep.mubr.msk.bf16.mxu0 %vm460_vm0, %v1033_v14  ;;  %v1038_v25 = vld [vmem:[%s1165_s24 + $0x10] ss:$8 sps:$4 sm:$0xff]   ;;  %v1040_v27 = vld [vmem:[%s1165_s24 + $0x24] ss:$8 sps:$4 sm:$0xff]   ;;  %v1044_v29 = vld [vmem:[%s1165_s24 + $0x20] ss:$8 sps:$4 sm:$0xff]  }
  0x14   : > { %480 = vmatpush1.bf16.msra.mxu1 %v1016_v7  ;;  %647 = vmatpush1.bf16.msra.mxu0 %v1017_v8  ;;  %v1039_v26 = vld [vmem:[%s1174_s29 + $0x10] ss:$8 sps:$4 sm:$0xff]   ;;  %v1042_v28 = vld [vmem:[%s1174_s29 + $0x24] ss:$8 sps:$4 sm:$0xff]   ;;  %v1045_v30 = vld [vmem:[%s1174_s29 + $0x20] ss:$8 sps:$4 sm:$0xff]  }
  0x15   : > { %481 = vmatprep.subr.bf16.mxu1 %v1076_v1  ;;  %648 = vmatprep.subr.bf16.mxu0 %v1076_v1  ;;  %v1046_v31 = vld [vmem:[%s1165_s24 + $0x34] ss:$8 sps:$4 sm:$0xff]   ;;  %v1050_v33 = vld [vmem:[%s1165_s24 + $0x30] ss:$8 sps:$4 sm:$0xff]   ;;  %770 = vst.msk [vmem:[%s1225_s28] sm:$0x3] %vm769_vm1, %v1077_v35 }
  0x16   : > { %v1048_v32 = vld [vmem:[%s1174_s29 + $0x34] ss:$8 sps:$4 sm:$0xff]   ;;  %v1051_v34 = vld [vmem:[%s1174_s29 + $0x30] ss:$8 sps:$4 sm:$0xff]  }
  0x18   : > { %482 = vmatpush1.bf16.msra.mxu1 %v1018_v9  ;;  %649 = vmatpush1.bf16.msra.mxu0 %v1019_v10 }
  0x19   : > { %483 = vmatprep.subr.bf16.mxu1 %v1076_v1  ;;  %650 = vmatprep.subr.bf16.mxu0 %v1076_v1 }
  0x1c   : > { %484 = vmatpush1.bf16.msra.mxu1 %v1020_v11  ;;  %651 = vmatpush1.bf16.msra.mxu0 %v1021_v12 }
  0x1d   : > { %485 = vmatprep.subr.bf16.mxu1 %v1076_v1  ;;  %652 = vmatprep.subr.bf16.mxu0 %v1076_v1 }
  0x20   : > { %486 = vmatpush1.bf16.msra.mxu1 %v1022_v15  ;;  %653 = vmatpush1.bf16.msra.mxu0 %v1023_v16 }
  0x21   : > { %487 = vmatprep.subr.bf16.mxu1 %v1076_v1  ;;  %654 = vmatprep.subr.bf16.mxu0 %v1076_v1 }
  0x24   : > { %488 = vmatpush1.bf16.msra.mxu1 %v1024_v17  ;;  %655 = vmatpush1.bf16.msra.mxu0 %v1025_v18 }
  0x25   : > { %489 = vmatprep.subr.bf16.mxu1 %v1076_v1  ;;  %656 = vmatprep.subr.bf16.mxu0 %v1076_v1 }
  0x28   : > { %490 = vmatpush1.bf16.msra.mxu1 %v1026_v19  ;;  %657 = vmatpush1.bf16.msra.mxu0 %v1027_v20 }
  0x2b   : > { %506 = vmatmul.mubr.bf16.vlgmr.msra.gmra.mrb[0].mxu1 %v1028_v21  ;;  %673 = vmatmul.mubr.bf16.vlgmr.msra.gmra.mrb[0].mxu0 %v1031_v22 }
  0x2c   : > { %947 = vmatprep.mubr.msk.bf16.mxu1 %vm460_vm0, %v1034_v23  ;;  %968 = vmatprep.mubr.msk.bf16.mxu0 %vm460_vm0, %v1036_v24 }
  0x33   : > { %514 = vmatmul.mubr.bf16.gmra.mrb[4].mxu1 %v1038_v25  ;;  %681 = vmatmul.mubr.bf16.gmra.mrb[4].mxu0 %v1039_v26 }
  0x34   : > { %948 = vmatprep.mubr.msk.bf16.mxu1 %vm460_vm0, %v1040_v27  ;;  %969 = vmatprep.mubr.msk.bf16.mxu0 %vm460_vm0, %v1042_v28 }
  0x3b   : > { %522 = vmatmul.mubr.bf16.gmra.mrb[8].mxu1 %v1044_v29  ;;  %689 = vmatmul.mubr.bf16.gmra.mrb[8].mxu0 %v1045_v30 }
  0x3c   : > { %949 = vmatprep.mubr.msk.bf16.mxu1 %vm460_vm0, %v1046_v31  ;;  %970 = vmatprep.mubr.msk.bf16.mxu0 %vm460_vm0, %v1048_v32 }
  0x43   : > { %530 = vmatmul.mubr.bf16.gmra.mrb[12].mxu1 %v1050_v33  ;;  %697 = vmatmul.mubr.bf16.gmra.mrb[12].mxu0 %v1051_v34 }
  0xfe   : > { %v507_v36 = vpop.f32.mrb[0].mxu1  ;;  %v674_v37 = vpop.f32.mrb[0].mxu0 }
  0xff   : > { %v509_v38 = vpop.f32.mrb[1].mxu1  ;;  %v675_v39 = vadd.f32 %v674_v37, %v507_v36  ;;  %v676_v40 = vpop.f32.mrb[1].mxu0 }
 0x100   : > { %v510_v41 = vpop.f32.mrb[2].mxu1  ;;  %v677_v42 = vpop.f32.mrb[2].mxu0 }
 0x101   : > { %v512_v43 = vpop.f32.mrb[3].mxu1  ;;  %705 = vst.msk [vmem:[%s1233_s7] sm:$0xff] %vm460_vm0, %v675_v39  ;;  %v734_v44 = vmul.f32 %v675_v39, %v675_v39  ;;  %v678_v45 = vadd.f32 %v677_v42, %v510_v41  ;;  %v679_v46 = vpop.f32.mrb[3].mxu0  ;;  %v713_v47 = vsel %vm460_vm0, %v675_v39, 0.0 }
 0x103   : > { %706 = vst.msk [vmem:[%s1233_s7 + $0x8] sm:$0xff] %vm460_vm0, %v678_v45  ;;  %v714_v48 = vsel %vm460_vm0, %v678_v45, 0.0  ;;  %v735_v49 = vmul.f32 %v678_v45, %v678_v45  ;;  %v742_v51 = vsel %vm460_vm0, %v734_v44, 0.0 }
 0x104   : > { %v715_v50 = vadd.f32 %v714_v48, %v713_v47 }
 0x105   : > { %v743_v52 = vsel %vm460_vm0, %v735_v49, 0.0 }
 0x106   : > { %v515_v53 = vpop.f32.mrb[4].mxu1  ;;  %v744_v54 = vadd.f32 %v743_v52, %v742_v51  ;;  %v682_v55 = vpop.f32.mrb[4].mxu0 }
 0x107   : > { %v517_v56 = vpop.f32.mrb[5].mxu1  ;;  %v683_v57 = vadd.f32 %v682_v55, %v515_v53  ;;  %v684_v58 = vpop.f32.mrb[5].mxu0 }
 0x108   : > { %v518_v59 = vpop.f32.mrb[6].mxu1  ;;  %v685_v60 = vpop.f32.mrb[6].mxu0 }
 0x109   : > { %v520_v61 = vpop.f32.mrb[7].mxu1  ;;  %707 = vst.msk [vmem:[%s1233_s7 + $0x10] sm:$0xff] %vm460_vm0, %v683_v57  ;;  %v716_v62 = vsel %vm460_vm0, %v683_v57, 0.0  ;;  %v736_v63 = vmul.f32 %v683_v57, %v683_v57  ;;  %v686_v0 = vadd.f32 %v685_v60, %v518_v59  ;;  %v687_v1 = vpop.f32.mrb[7].mxu0 }
 0x10a   : > { %v717_v2 = vadd.f32 %v716_v62, %v715_v50  ;;  %v771_v62 = vld [vmem:[%s1225_s28] sm:$0x3] }
 0x10b   : > { %v745_v3 = vsel %vm460_vm0, %v736_v63, 0.0  ;;  %708 = vst.msk [vmem:[%s1233_s7 + $0x18] sm:$0xff] %vm460_vm0, %v686_v0  ;;  %v718_v4 = vsel %vm460_vm0, %v686_v0, 0.0  ;;  %v737_v5 = vmul.f32 %v686_v0, %v686_v0 }
 0x10c   : > { %v746_v6 = vadd.f32 %v745_v3, %v744_v54  ;;  %v719_v7 = vadd.f32 %v718_v4, %v717_v2 }
 0x10d   : > { %v747_v8 = vsel %vm460_vm0, %v737_v5, 0.0 }
 0x10e   : > { %v523_v9 = vpop.f32.mrb[8].mxu1  ;;  %v748_v10 = vadd.f32 %v747_v8, %v746_v6  ;;  %v690_v11 = vpop.f32.mrb[8].mxu0 }
 0x10f   : > { %v525_v12 = vpop.f32.mrb[9].mxu1  ;;  %v691_v13 = vadd.f32 %v690_v11, %v523_v9  ;;  %v692_v14 = vpop.f32.mrb[9].mxu0 }
 0x110   : > { %v526_v15 = vpop.f32.mrb[10].mxu1  ;;  %v693_v16 = vpop.f32.mrb[10].mxu0 }
 0x111   : > { %v528_v17 = vpop.f32.mrb[11].mxu1  ;;  %709 = vst.msk [vmem:[%s1233_s7 + $0x20] sm:$0xff] %vm460_vm0, %v691_v13  ;;  %v720_v18 = vsel %vm460_vm0, %v691_v13, 0.0  ;;  %v738_v19 = vmul.f32 %v691_v13, %v691_v13  ;;  %v694_v20 = vadd.f32 %v693_v16, %v526_v15  ;;  %v695_v21 = vpop.f32.mrb[11].mxu0 }
 0x112   : > { %v721_v22 = vadd.f32 %v720_v18, %v719_v7 }
 0x113   : > { %v749_v23 = vsel %vm460_vm0, %v738_v19, 0.0  ;;  %710 = vst.msk [vmem:[%s1233_s7 + $0x28] sm:$0xff] %vm460_vm0, %v694_v20  ;;  %v722_v24 = vsel %vm460_vm0, %v694_v20, 0.0  ;;  %v739_v25 = vmul.f32 %v694_v20, %v694_v20 }
 0x114   : > { %v750_v26 = vadd.f32 %v749_v23, %v748_v10  ;;  %v723_v27 = vadd.f32 %v722_v24, %v721_v22 }
 0x115   : > { %v751_v28 = vsel %vm460_vm0, %v739_v25, 0.0 }
 0x116   : > { %v531_v29 = vpop.f32.mrb[12].mxu1  ;;  %v752_v30 = vadd.f32 %v751_v28, %v750_v26  ;;  %v698_v31 = vpop.f32.mrb[12].mxu0 }
 0x117   : > { %v533_v32 = vpop.f32.mrb[13].mxu1  ;;  %v699_v33 = vadd.f32 %v698_v31, %v531_v29  ;;  %v700_v34 = vpop.f32.mrb[13].mxu0 }
 0x118   : > { %v534_v35 = vpop.f32.mrb[14].mxu1  ;;  %v701_v36 = vpop.f32.mrb[14].mxu0 }
 0x119   : > { %v536_v37 = vpop.f32.mrb[15].mxu1  ;;  %711 = vst.msk [vmem:[%s1233_s7 + $0x30] sm:$0xff] %vm460_vm0, %v699_v33  ;;  %v724_v38 = vsel %vm460_vm0, %v699_v33, 0.0  ;;  %v740_v39 = vmul.f32 %v699_v33, %v699_v33  ;;  %v702_v40 = vadd.f32 %v701_v36, %v534_v35  ;;  %v703_v41 = vpop.f32.mrb[15].mxu0 }
 0x11a   : > { %v725_v42 = vadd.f32 %v724_v38, %v723_v27 }
 0x11b   : > { %v753_v43 = vsel %vm460_vm0, %v740_v39, 0.0  ;;  %712 = vst.msk [vmem:[%s1233_s7 + $0x38] sm:$0xff] %vm460_vm0, %v702_v40  ;;  %v726_v44 = vsel %vm460_vm0, %v702_v40, 0.0  ;;  %v741_v45 = vmul.f32 %v702_v40, %v702_v40 }
 0x11c   : > { %v754_v46 = vadd.f32 %v753_v43, %v752_v30  ;;  %v727_v47 = vadd.f32 %v726_v44, %v725_v42 }
 0x11d   : > { %v755_v48 = vsel %vm460_vm0, %v741_v45, 0.0 }
 0x11e   : > { %v728_v49 = vrot.slane %v727_v47, 4  ;;  %v756_v50 = vadd.f32 %v755_v48, %v754_v46 }
 0x120   : > { %v729_v51 = vadd.f32 %v728_v49, %v727_v47  ;;  %v757_v52 = vrot.slane %v756_v50, 4 }
 0x122   : > { %v730_v53 = vrot.slane %v729_v51, 2  ;;  %v758_v54 = vadd.f32 %v757_v52, %v756_v50 }
 0x124   : > { %v731_v55 = vadd.f32 %v730_v53, %v729_v51  ;;  %v759_v56 = vrot.slane %v758_v54, 2 }
 0x126   : > { %v732_v57 = vrot.slane %v731_v55, 1  ;;  %v760_v58 = vadd.f32 %v759_v56, %v758_v54 }
 0x128   : > { %v761_v59 = vrot.slane %v760_v58, 1  ;;  %v733_v60 = vadd.f32 %v732_v57, %v731_v55 }
 0x12a   : > { %v762_v61 = vadd.f32 %v761_v59, %v760_v58 }
 0x12c   : > { %v764_v63 = vsel %vm763_vm2, %v733_v60, %v762_v61 }
 0x12d   : > { %v772_v0 = vadd.f32 %v771_v62, %v764_v63 }
 0x12f   : > { %774 = vst.msk [vmem:[%s1225_s28] sm:$0x3] %vm769_vm1, %v772_v0 }
 0x130 PF: > { %s16_s20 = sadd.s32 1, %s1074_s20   ;;  %s1285_s18 = smov %s1070_s19 }
 0x131   : > { %p13_p5 = scmp.ge.s32.totalorder %s16_s20, 4   ;;  %s1286_s19 = smov %s1288_s21 }
 0x133   :  { %15 = sbr.rel (!%p13_p5) target bundleno = 2 (0x2), region = 85 }

// kernel: unet_forward.47
= control target key start
LH: loop header
LB: loop body
LE: loop exit
PB: predicated region body
PF: predicated region fallthrough
CT: control target
= control target key end

     0   :  { %s640_s12 = smov 0   ;;  %s642_s13 = smov 0   ;;  %s710_s0 = inlined_call_operand.vmem [shape: bf16[2,64,16], index: 0, kind: input, shape index: {}]   ;;  %s711_s1 = inlined_call_operand.vmem [shape: bf16[16,32], index: 1, kind: input, shape index: {}]   ;;  %s712_s2 = inlined_call_operand.vmem [shape: f32[2,64,32], index: 2, kind: output, shape index: {0}]   ;;  %s713_s3 = inlined_call_operand.vmem [shape: f32[2,2,32], index: 3, kind: output, shape index: {1}]  }
   0x1   :  { %s644_s14 = smov 0  }
   0x2 LB: > { %s26_s15 = sadd.s32 1, %s613_s13  ;;  %p529_p0 = scmp.ge.s32.totalorder %s617_s14, 1  ;;  %s617_s14 = sphi %s644_s14, %s14_s14   ;;  %s613_s13 = sphi %s642_s13, %s715_s13   ;;  %s609_s12 = sphi %s640_s12, %s714_s12  }
   0x3   : > { %p28_p1 = scmp.ge.s32.totalorder %s26_s15, 2  ;;  %p161_p2 = scmp.lt.s32.totalorder %s617_s14, 3 }
   0x5   : > { %s717_s15 = smov (%p28_p1, %s26_s15), 0  ;;  %p162_p3 = pnand %p529_p0, %p161_p2 }
   0x6   : > { %v590_v0 = vld [vmem:[%s711_s1] sm:$0xff] (!%p162_p3)   ;;  %p198_p4 = scmp.lt.s32.totalorder (!%p162_p3), %s609_s12, 1  ;;  %vm258_vm0 = vcmask (!%p162_p3), 130048   ;;  %vm401_vm1 = vcmask (!%p162_p3), 254976   ;;  %v619_v5 = vmov (!%p162_p3), 0.0   ;;  %vm336_vm2 = vcmask (!%p162_p3), 261120  }
   0x7   : > { %165 = sbr.rel (%p162_p3) target bundleno = 267 (0x10b), region = 28  ;;  %553 = vmatprep.subr.bf16.mxu0 (!%p162_p3), %v590_v0  ;;  %563 = vmatprep.subr.bf16.mxu1 (!%p162_p3), %v590_v0  ;;  %vm395_vm3 = vcmask (!%p162_p3), 1040384  }
   0x8   : > { %554 = vmatpush3.bf16.msra.mxu0 (!%p162_p3), %v590_v0  ;;  %564 = vmatpush3.bf16.msra.mxu1 (!%p162_p3), %v590_v0 }
   0xe   : > { %s719_s12 = smov (!%p198_p4, %s609_s12), 1 }
   0xf   : > { %s546_s18 = sshll.u32 %s719_s12, 5  ;;  %s534_s22 = sshll.u32 %s719_s12, 1 }
  0x10   : > { %s205_s21 = scalar_lea.vmem %s710_s0, %s546_s18  ;;  %s667_s25 = scalar_lea.vmem %s713_s3, %s534_s22 }
  0x11   : > { %v591_v1 = vld [vmem:[%s205_s21] sm:$0xff]   ;;  %v592_v2 = vld [vmem:[%s205_s21 + $0x8] sm:$0xff]   ;;  %v593_v3 = vld [vmem:[%s205_s21 + $0x10] sm:$0xff]   ;;  %402 = vst.msk [vmem:[%s667_s25] sm:$0x3] %vm401_vm1, %v619_v5  ;;  %s547_s26 = sshll.u32 %s719_s12, 6 }
  0x12   : > { %555 = vmatprep.mubr.msk.bf16.mxu0 %vm258_vm0, %v591_v1  ;;  %v594_v4 = vld [vmem:[%s205_s21 + $0x18] sm:$0xff]   ;;  %559 = vmatprep.mubr.msk.bf16.mxu1 %vm258_vm0, %v593_v3  ;;  %s215_s29 = scalar_lea.vmem %s712_s2, %s547_s26 }
  0x13   : > { %556 = vmatmul.mubr.msk.bf16.vlgmr.msra.gmra.mrb[0].mxu0 %vm258_vm0, %v592_v2  ;;  %560 = vmatmul.mubr.msk.bf16.vlgmr.msra.gmra.mrb[0].mxu1 %vm258_vm0, %v594_v4 }
  0x18   : > { %v403_v0 = vld [vmem:[%s667_s25] sm:$0x3] }
  0xe6   : > { %v557_v6 = vpop.f32.mrb[0].mxu0  ;;  %v561_v10 = vpop.f32.mrb[0].mxu1 }
  0xe7   : > { %339 = vst.msk [vmem:[%s215_s29 + $0x10] sm:$0xff] %vm336_vm2, %v557_v6  ;;  %v305_v7 = vpop.f32.mrb[1].mxu0  ;;  %343 = vst.msk [vmem:[%s215_s29 + $0x30] sm:$0xff] %vm336_vm2, %v561_v10  ;;  %v321_v12 = vpop.f32.mrb[1].mxu1  ;;  %v368_v13 = vmul.f32 %v557_v6, %v557_v6  ;;  %v348_v18 = vsel %vm336_vm2, %v557_v6, 0.0  ;;  %v372_v37 = vmul.f32 %v561_v10, %v561_v10  ;;  %v356_v41 = vsel %vm336_vm2, %v561_v10, 0.0 }
  0xe8   : > { %337 = vst.msk [vmem:[%s215_s29] sm:$0xff] %vm336_vm2, %v305_v7  ;;  %v366_v8 = vmul.f32 %v305_v7, %v305_v7  ;;  %v558_v9 = vpop.f32.mrb[2].mxu0  ;;  %v345_v14 = vsel %vm336_vm2, %v305_v7, 0.0  ;;  %341 = vst.msk [vmem:[%s215_s29 + $0x20] sm:$0xff] %vm336_vm2, %v321_v12  ;;  %v562_v17 = vpop.f32.mrb[2].mxu1  ;;  %v370_v24 = vmul.f32 %v321_v12, %v321_v12  ;;  %v352_v29 = vsel %vm336_vm2, %v321_v12, 0.0 }
  0xe9   : > { %340 = vst.msk [vmem:[%s215_s29 + $0x18] sm:$0xff] %vm336_vm2, %v558_v9  ;;  %v308_v11 = vpop.f32.mrb[3].mxu0  ;;  %344 = vst.msk [vmem:[%s215_s29 + $0x38] sm:$0xff] %vm336_vm2, %v562_v17  ;;  %v324_v20 = vpop.f32.mrb[3].mxu1  ;;  %v369_v22 = vmul.f32 %v558_v9, %v558_v9  ;;  %v377_v27 = vsel %vm336_vm2, %v368_v13, 0.0  ;;  %v350_v28 = vsel %vm336_vm2, %v558_v9, 0.0  ;;  %v373_v42 = vmul.f32 %v562_v17, %v562_v17 }
  0xea   : > { %338 = vst.msk [vmem:[%s215_s29 + $0x8] sm:$0xff] %vm336_vm2, %v308_v11  ;;  %v346_v15 = vsel %vm336_vm2, %v308_v11, 0.0  ;;  %v367_v16 = vmul.f32 %v308_v11, %v308_v11  ;;  %v374_v21 = vsel %vm336_vm2, %v366_v8, 0.0  ;;  %342 = vst.msk [vmem:[%s215_s29 + $0x28] sm:$0xff] %vm336_vm2, %v324_v20  ;;  %v381_v33 = vsel %vm336_vm2, %v370_v24, 0.0 }
  0xeb   : > { %v347_v19 = vadd.f32 %v346_v15, %v345_v14  ;;  %v379_v32 = vsel %vm336_vm2, %v369_v22, 0.0  ;;  %v371_v34 = vmul.f32 %v324_v20, %v324_v20  ;;  %v354_v38 = vsel %vm336_vm2, %v324_v20, 0.0 }
  0xec   : > { %v375_v23 = vsel %vm336_vm2, %v367_v16, 0.0  ;;  %v385_v46 = vsel %vm336_vm2, %v372_v37, 0.0  ;;  %v358_v47 = vsel %vm336_vm2, %v562_v17, 0.0  ;;  %v387_v50 = vsel %vm336_vm2, %v373_v42, 0.0 }
  0xed   : > { %v349_v25 = vadd.f32 %v348_v18, %v347_v19  ;;  %v376_v26 = vadd.f32 %v375_v23, %v374_v21  ;;  %v383_v43 = vsel %vm336_vm2, %v371_v34, 0.0 }
  0xef   : > { %v378_v30 = vadd.f32 %v377_v27, %v376_v26  ;;  %v351_v31 = vadd.f32 %v350_v28, %v349_v25 }
  0xf1   : > { %v353_v35 = vadd.f32 %v352_v29, %v351_v31  ;;  %v380_v36 = vadd.f32 %v379_v32, %v378_v30 }
  0xf3   : > { %v382_v39 = vadd.f32 %v381_v33, %v380_v36  ;;  %v355_v40 = vadd.f32 %v354_v38, %v353_v35 }
  0xf5   : > { %v357_v44 = vadd.f32 %v356_v41, %v355_v40  ;;  %v384_v45 = vadd.f32 %v383_v43, %v382_v39 }
  0xf7   : > { %v359_v48 = vadd.f32 %v358_v47, %v357_v44  ;;  %v386_v49 = vadd.f32 %v385_v46, %v384_v45 }
  0xf9   : > { %v360_v51 = vrot.slane %v359_v48, 4  ;;  %v388_v52 = vadd.f32 %v387_v50, %v386_v49 }
  0xfb   : > { %v361_v53 = vadd.f32 %v360_v51, %v359_v48  ;;  %v389_v54 = vrot.slane %v388_v52, 4 }
  0xfd   : > { %v362_v55 = vrot.slane %v361_v53, 2  ;;  %v390_v56 = vadd.f32 %v389_v54, %v388_v52 }
  0xff   : > { %v363_v57 = vadd.f32 %v362_v55, %v361_v53  ;;  %v391_v58 = vrot.slane %v390_v56, 2 }
 0x101   : > { %v364_v59 = vrot.slane %v363_v57, 1  ;;  %v392_v60 = vadd.f32 %v391_v58, %v390_v56 }
 0x103   : > { %v393_v61 = vrot.slane %v392_v60, 1  ;;  %v365_v62 = vadd.f32 %v364_v59, %v363_v57 }
 0x105   : > { %v394_v63 = vadd.f32 %v393_v61, %v392_v60 }
 0x107   : > { %v396_v1 = vsel %vm395_vm3, %v365_v62, %v394_v63 }
 0x108   : > { %v404_v2 = vadd.f32 %v403_v0, %v396_v1 }
 0x10a   : > { %406 = vst.msk [vmem:[%s667_s25] sm:$0x3] %vm401_vm1, %v404_v2 }
 0x10b PF: > { %s14_s14 = sadd.s32 1, %s617_s14   ;;  %s714_s12 = smov %s613_s13 }
 0x10c   : > { %p11_p5 = scmp.ge.s32.totalorder %s14_s14, 4   ;;  %s715_s13 = smov %s717_s15 }
 0x10e   :  { %13 = sbr.rel (!%p11_p5) target bundleno = 2 (0x2), region = 74 }

// kernel: unet_forward.48
= control target key start
LH: loop header
LB: loop body
LE: loop exit
PB: predicated region body
PF: predicated region fallthrough
CT: control target
= control target key end

     0   :  { %s506_s9 = smov 0   ;;  %s508_s10 = smov 0   ;;  %s565_s0 = inlined_call_operand.vmem [shape: f32[2,64,32], index: 0, kind: input, shape index: {}]   ;;  %s566_s1 = inlined_call_operand.vmem [shape: f32[2,2,32], index: 1, kind: input, shape index: {}]   ;;  %s567_s2 = inlined_call_operand.vmem [shape: bf16[2,64,32], index: 2, kind: output, shape index: {}]  }
   0x1   :  { %s510_s11 = smov 0  }
   0x2 LB: > { %s24_s12 = sadd.s32 1, %s485_s10  ;;  %p415_p0 = scmp.ge.s32.totalorder %s489_s11, 1  ;;  %s489_s11 = sphi %s510_s11, %s12_s11   ;;  %s485_s10 = sphi %s508_s10, %s569_s10   ;;  %s481_s9 = sphi %s506_s9, %s568_s9  }
   0x3   : > { %p26_p1 = scmp.ge.s32.totalorder %s24_s12, 2  ;;  %p142_p2 = scmp.lt.s32.totalorder %s489_s11, 3 }
   0x5   : > { %s571_s12 = smov (%p26_p1, %s24_s12), 0  ;;  %p143_p3 = pnand %p415_p0, %p142_p2 }
   0x6   : > { %p177_p4 = scmp.lt.s32.totalorder (!%p143_p3), %s481_s9, 1  ;;  %v223_v7 = vlaneseq (!%p143_p3)  ;;  %vm303_vm0 = vcmask (!%p143_p3), 257024  }
   0x7   : > { %146 = sbr.rel (%p143_p3) target bundleno = 62 (0x3e), region = 28 }
   0x8   : > { %v224_v8 = vshrl.u32 (!%p143_p3), %v223_v7, 7 }
   0xa   : > { %v225_v9 = vsub.s32 (!%p143_p3), 1, %v224_v8  ;;  %v237_v18 = vsub.s32 (!%p143_p3), 0, %v224_v8 }
   0xe   : > { %s573_s9 = smov (!%p177_p4, %s481_s9), 1 }
   0xf   : > { %s418_s13 = sshll.u32 %s573_s9, 1  ;;  %s431_s17 = sshll.u32 %s573_s9, 6 }
  0x10   : > { %s189_s16 = scalar_lea.vmem %s566_s1, %s418_s13  ;;  %s184_s20 = scalar_lea.vmem %s565_s0, %s431_s17 }
  0x11   : > { %v208_v0 = vld [vmem:[%s189_s16] sm:$0x3]  ;;  %v201_v13 = vld [vmem:[%s184_s20 + $0x8] sm:$0xff]  ;;  %v202_v14 = vld [vmem:[%s184_s20 + $0x10] sm:$0xff]  ;;  %s432_s21 = sshll.u32 %s573_s9, 5 }
  0x12   : > { %v209_v1 = vmul.f32 0.00390625, %v208_v0  ;;  %v200_v10 = vld [vmem:[%s184_s20] sm:$0xff]  ;;  %v203_v15 = vld [vmem:[%s184_s20 + $0x18] sm:$0xff]  ;;  %v205_v20 = vld [vmem:[%s184_s20 + $0x28] sm:$0xff]  ;;  %s538_s24 = scalar_lea.vmem %s567_s2, %s432_s21 }
  0x13   : > { %v204_v19 = vld [vmem:[%s184_s20 + $0x20] sm:$0xff]  ;;  %v206_v21 = vld [vmem:[%s184_s20 + $0x30] sm:$0xff]  ;;  %v207_v22 = vld [vmem:[%s184_s20 + $0x38] sm:$0xff] }
  0x14   : > { %v210_v2 = vmul.f32 %v209_v1, %v209_v1  ;;  %v218_v11 = vsub.f32 0.0, %v209_v1 }
  0x16   : > { %v212_v3 = vrot.slane %v210_v2, 7 }
  0x18   : > { %v214_v4 = vsub.f32 %v209_v1, %v212_v3 }
  0x1a   : > { %v215_v5 = vmax.f32 %v214_v4, 0.0 }
  0x1c   : > { %v216_v6 = vadd.f32 1e-05, %v215_v5 }
  0x1e   : > { %465 = vrsqrt.f32 %v216_v6 }
  0x28   : > { %v466_v12 = vpop.eup %465 }
  0x29   : > { %v220_v16 = vrot.slane %v466_v12, 1  ;;  %v226_v17 = vrot.slane %v466_v12, %v225_v9 }
  0x2b   : > { %v222_v23 = vmul.f32 %v220_v16, %v218_v11  ;;  %v227_v24 = vmul.f32 %v226_v17, %v200_v10  ;;  %v228_v25 = vmul.f32 %v226_v17, %v201_v13  ;;  %v229_v26 = vmul.f32 %v226_v17, %v202_v14 }
  0x2c   : > { %v230_v27 = vmul.f32 %v226_v17, %v203_v15  ;;  %v231_v28 = vmul.f32 %v226_v17, %v204_v19  ;;  %v232_v29 = vmul.f32 %v226_v17, %v205_v20  ;;  %v233_v30 = vmul.f32 %v226_v17, %v206_v21 }
  0x2d   : > { %v238_v31 = vrot.slane %v222_v23, %v237_v18  ;;  %v234_v32 = vmul.f32 %v226_v17, %v207_v22 }
  0x2f   : > { %v239_v33 = vadd.f32 %v238_v31, %v227_v24  ;;  %v240_v34 = vadd.f32 %v238_v31, %v228_v25  ;;  %v241_v35 = vadd.f32 %v238_v31, %v229_v26  ;;  %v242_v36 = vadd.f32 %v238_v31, %v230_v27 }
  0x30   : > { %v243_v37 = vadd.f32 %v238_v31, %v231_v28  ;;  %v244_v38 = vadd.f32 %v238_v31, %v232_v29  ;;  %v245_v39 = vadd.f32 %v238_v31, %v233_v30  ;;  %v246_v40 = vadd.f32 %v238_v31, %v234_v32 }
  0x31   : > { %vm247_vm1 = vcmp.ge.f32.partialorder %v239_v33, 0.0  ;;  %v255_v41 = vmul.f32 0.2, %v239_v33  ;;  %vm248_vm2 = vcmp.ge.f32.partialorder %v240_v34, 0.0  ;;  %v256_v42 = vmul.f32 0.2, %v240_v34 }
  0x32   : > { %vm249_vm3 = vcmp.ge.f32.partialorder %v241_v35, 0.0  ;;  %v257_v43 = vmul.f32 0.2, %v241_v35  ;;  %vm250_vm4 = vcmp.ge.f32.partialorder %v242_v36, 0.0  ;;  %v258_v44 = vmul.f32 0.2, %v242_v36 }
  0x33   : > { %v263_v45 = vsel %vm247_vm1, %v239_v33, %v255_v41  ;;  %v264_v46 = vsel %vm248_vm2, %v240_v34, %v256_v42  ;;  %vm251_vm5 = vcmp.ge.f32.partialorder %v243_v37, 0.0  ;;  %v259_v47 = vmul.f32 0.2, %v243_v37 }
  0x34   : > { %v433_v48 = vpack.c.bf16 %v263_v45, %v263_v45  ;;  %v434_v49 = vpack.c.bf16 %v264_v46, %v264_v46  ;;  %v265_v50 = vsel %vm249_vm3, %v241_v35, %v257_v43  ;;  %v266_v51 = vsel %vm250_vm4, %v242_v36, %v258_v44 }
  0x35   : > { %v435_v52 = vpack.c.bf16 %v265_v50, %v265_v50  ;;  %v436_v53 = vpack.c.bf16 %v266_v51, %v266_v51  ;;  %v267_v54 = vsel %vm251_vm5, %v243_v37, %v259_v47  ;;  %vm252_vm6 = vcmp.ge.f32.partialorder %v244_v38, 0.0 }
  0x36   : > { %304 = vst.msk [vmem:[%s538_s24] sm:$0xf] %vm303_vm0, %v433_v48  ;;  %305 = vst.msk [vmem:[%s538_s24 + $0x4] sm:$0xf] %vm303_vm0, %v434_v49  ;;  %v437_v55 = vpack.c.bf16 %v267_v54, %v267_v54  ;;  %v260_v56 = vmul.f32 0.2, %v244_v38 }
  0x37   : > { %vm253_vm7 = vcmp.ge.f32.partialorder %v245_v39, 0.0  ;;  %v261_v57 = vmul.f32 0.2, %v245_v39  ;;  %306 = vst.msk [vmem:[%s538_s24 + $0x8] sm:$0xf] %vm303_vm0, %v435_v52  ;;  %vm254_vm8 = vcmp.ge.f32.partialorder %v246_v40, 0.0 }
  0x38   : > { %307 = vst.msk [vmem:[%s538_s24 + $0xc] sm:$0xf] %vm303_vm0, %v436_v53  ;;  %v262_v58 = vmul.f32 0.2, %v246_v40  ;;  %308 = vst.msk [vmem:[%s538_s24 + $0x10] sm:$0xf] %vm303_vm0, %v437_v55  ;;  %v268_v59 = vsel %vm252_vm6, %v244_v38, %v260_v56 }
  0x39   : > { %v269_v60 = vsel %vm253_vm7, %v245_v39, %v261_v57  ;;  %v438_v61 = vpack.c.bf16 %v268_v59, %v268_v59 }
  0x3a   : > { %v439_v62 = vpack.c.bf16 %v269_v60, %v269_v60  ;;  %v270_v63 = vsel %vm254_vm8, %v246_v40, %v262_v58 }
  0x3b   : > { %v440_v0 = vpack.c.bf16 %v270_v63, %v270_v63  ;;  %309 = vst.msk [vmem:[%s538_s24 + $0x14] sm:$0xf] %vm303_vm0, %v438_v61 }
  0x3c   : > { %310 = vst.msk [vmem:[%s538_s24 + $0x18] sm:$0xf] %vm303_vm0, %v439_v62 }
  0x3d   : > { %311 = vst.msk [vmem:[%s538_s24 + $0x1c] sm:$0xf] %vm303_vm0, %v440_v0 }
  0x3e PF: > { %s12_s11 = sadd.s32 1, %s489_s11   ;;  %s568_s9 = smov %s485_s10 }
  0x3f   : > { %p9_p5 = scmp.ge.s32.totalorder %s12_s11, 4   ;;  %s569_s10 = smov %s571_s12 }
  0x41   :  { %11 = sbr.rel (!%p9_p5) target bundleno = 2 (0x2), region = 61 }

// kernel: unet_forward.53
= control target key start
LH: loop header
LB: loop body
LE: loop exit
PB: predicated region body
PF: predicated region fallthrough
CT: control target
= control target key end

     0   :  { %s466_s12 = smov 0   ;;  %s468_s13 = smov 0   ;;  %s505_s0 = inlined_call_operand.vmem [shape: bf16[2,8,256], index: 0, kind: input, shape index: {}]   ;;  %s506_s1 = inlined_call_operand.vmem [shape: bf16[2,8], index: 1, kind: input, shape index: {}]   ;;  %s507_s2 = inlined_call_operand.vmem [shape: f32[2,1], index: 2, kind: input, shape index: {}]   ;;  %s508_s3 = inlined_call_operand.vmem [shape: f32[2,2,256], index: 3, kind: output, shape index: {}]  }
   0x1   :  { %s470_s14 = smov 0  }
   0x2 LB: > { %s25_s15 = sadd.s32 1, %s439_s13  ;;  %p379_p0 = scmp.ge.s32.totalorder %s443_s14, 1  ;;  %s443_s14 = sphi %s470_s14, %s13_s14   ;;  %s439_s13 = sphi %s468_s13, %s510_s13   ;;  %s435_s12 = sphi %s466_s12, %s509_s12  }
   0x3   : > { %p27_p1 = scmp.ge.s32.totalorder %s25_s15, 2  ;;  %p158_p2 = scmp.lt.s32.totalorder %s443_s14, 3 }
   0x5   : > { %s512_s15 = smov (%p27_p1, %s25_s15), 0  ;;  %p159_p3 = pnand %p379_p0, %p158_p2 }
   0x6   : > { %p191_p4 = scmp.lt.s32.totalorder (!%p159_p3), %s435_s12, 1  ;;  %v445_v0 = vmov (!%p159_p3), 0   ;;  %v213_v1 = vld [vmem:[%s507_s2] sm:$0x3] (!%p159_p3)  ;;  %vm228_vm0 = vcmask (!%p159_p3), 1043456   ;;  %vm224_vm1 = vcmask (!%p159_p3), 64512  }
   0x7   : > { %162 = sbr.rel (%p159_p3) target bundleno = 242 (0xf2), region = 32  ;;  %267 = vmatprep.mubr.bf16.mxu0 (!%p159_p3), %v445_v0  ;;  %418 = vset.pattern.permute.xlu0 (!%p159_p3), %v445_v0  ;;  %v211_v6 = vld [vmem:[%s506_s1] sm:$0x1] (!%p159_p3) }
   0x8   : > { %216 = vperm.xlu0 (!%p159_p3), %418, %v213_v1  }
   0xe   : > { %s514_s12 = smov (!%p191_p4, %s435_s12), 1 }
   0xf   : > { %s391_s18 = sshll.u32 %s514_s12, 3  ;;  %s392_s24 = sshll.u32 %s514_s12, 2 }
  0x10   : > { %s198_s21 = scalar_lea.vmem %s505_s0, %s391_s18  ;;  %s208_s27 = scalar_lea.vmem %s508_s3, %s392_s24 }
  0x11   : > { %v212_v2 = vld [vmem:[%s198_s21] sm:$0xff] }
  0x12   : > { %v385_v3 = vcombine.high %v212_v2, %v212_v2  ;;  %v384_v4 = vcombine.low %v212_v2, %v212_v2 }
  0x14   : > { %386 = vmatprep.subr.msk.bf16.mxu0 %vm228_vm0, %v385_v3  ;;  %v230_v5 = vsel %vm228_vm0, %v384_v4, 0 }
  0x15   : > { %236 = vmatpush1.bf16.msra.mxu0 %v230_v5 }
  0x18   : > { %387 = vmatmul.mubr.msk.bf16.vlgmr.msra.gmra.mrb[0].mxu0 %vm224_vm1, %v211_v6 }
  0x87   : > { %v217_v7 = vpop.permute.xlu0 %216 }
  0xeb   : > { %v269_v8 = vpop.f32.mrb[0].mxu0 }
  0xec   : > { %v270_v9 = vadd.f32 %v269_v8, %v217_v7  ;;  %v271_v10 = vpop.f32.mrb[1].mxu0 }
  0xed   : > { %v272_v11 = vadd.f32 %v271_v10, %v217_v7  ;;  %v273_v12 = vpop.f32.mrb[2].mxu0 }
  0xee   : > { %v274_v13 = vpop.f32.mrb[3].mxu0 }
  0xef   : > { %v278_v14 = vcombine.low %v270_v9, %v272_v11 }
  0xf1   : > { %388 = vst.sshfl [vmem:[%s208_s27] sm:$0x33 pattern:$0x76325410] %v278_v14 }
  0xf2 PF: > { %s13_s14 = sadd.s32 1, %s443_s14   ;;  %s509_s12 = smov %s439_s13 }
  0xf3   : > { %p10_p5 = scmp.ge.s32.totalorder %s13_s14, 4   ;;  %s510_s13 = smov %s512_s15 }
  0xf5   :  { %12 = sbr.rel (!%p10_p5) target bundleno = 2 (0x2), region = 62 }

// kernel: unet_forward.49
= control target key start
LH: loop header
LB: loop body
LE: loop exit
PB: predicated region body
PF: predicated region fallthrough
CT: control target
= control target key end

     0   :  { %s1758_s18 = smov 0   ;;  %s1760_s19 = smov 0   ;;  %s2037_s0 = inlined_call_operand.vmem [shape: bf16[2,256,72], index: 0, kind: input, shape index: {}]   ;;  %s2038_s1 = inlined_call_operand.vmem [shape: bf16[72,8], index: 1, kind: input, shape index: {}]   ;;  %s2039_s2 = inlined_call_operand.vmem [shape: bf16[2,256,72], index: 2, kind: input, shape index: {}]   ;;  %s2040_s3 = inlined_call_operand.vmem [shape: bf16[72,8], index: 3, kind: input, shape index: {}]   ;;  %s2041_s4 = inlined_call_operand.vmem [shape: f32[2,256,8], index: 4, kind: output, shape index: {0}]   ;;  %s2042_s5 = inlined_call_operand.vmem [shape: f32[2,2,8], index: 5, kind: output, shape index: {1}]  }
   0x1   :  { %s1762_s20 = smov 0  }
   0x2 LB: > { %s28_s21 = sadd.s32 1, %s1721_s19  ;;  %p1389_p0 = scmp.ge.s32.totalorder %s1725_s20, 1  ;;  %s1725_s20 = sphi %s1762_s20, %s16_s20   ;;  %s1721_s19 = sphi %s1760_s19, %s2044_s19   ;;  %s1717_s18 = sphi %s1758_s18, %s2043_s18  }
   0x3   : > { %p30_p1 = scmp.ge.s32.totalorder %s28_s21, 2  ;;  %p228_p2 = scmp.lt.s32.totalorder %s1725_s20, 3 }
   0x5   : > { %s2046_s21 = smov (%p30_p1, %s28_s21), 0  ;;  %p229_p3 = pnand %p1389_p0, %p228_p2 }
   0x6   : > { %v1661_v0 = vld [vmem:[%s2040_s3] sm:$0xff] (!%p229_p3)   ;;  %p278_p4 = scmp.lt.s32.totalorder (!%p229_p3), %s1717_s18, 1  ;;  %v1663_v2 = vld [vmem:[%s2040_s3 + $0x8] sm:$0xff] (!%p229_p3)   ;;  %v1665_v4 = vld [vmem:[%s2040_s3 + $0x10] sm:$0xff] (!%p229_p3)   ;;  %vm501_vm0 = vcmask (!%p229_p3), 588800   ;;  %vm550_vm1 = vcmask (!%p229_p3), 1043456  }
   0x7   : > { %232 = sbr.rel (%p229_p3) target bundleno = 327 (0x147), region = 36  ;;  %v1662_v1 = vld [vmem:[%s2038_s1] sm:$0xff] (!%p229_p3)   ;;  %1518 = vmatprep.subr.bf16.mxu1 (!%p229_p3), %v1661_v0  ;;  %v1664_v3 = vld [vmem:[%s2038_s1 + $0x8] sm:$0xff] (!%p229_p3)   ;;  %v1666_v5 = vld [vmem:[%s2038_s1 + $0x10] sm:$0xff] (!%p229_p3)   ;;  %vm1243_vm2 = vcmask (!%p229_p3), 58368   ;;  %v1727_v44 = vmov (!%p229_p3), 0.0  }
   0x8   : > { %1560 = vmatprep.subr.bf16.mxu0 (!%p229_p3), %v1662_v1  ;;  %1519 = vmatpush3.bf16.msra.mxu1 (!%p229_p3), %v1661_v0  ;;  %v1667_v6 = vld [vmem:[%s2040_s3 + $0x18] sm:$0xff] (!%p229_p3)   ;;  %v1669_v10 = vld [vmem:[%s2040_s3 + $0x20] ss:$0 sps:$4 sm:$0xff] (!%p229_p3)   ;;  %vm1034_vm3 = vcmask (!%p229_p3), 64512   ;;  %vm1237_vm4 = vcmask (!%p229_p3), 1040384  }
   0x9   : > { %1561 = vmatpush3.bf16.msra.mxu0 (!%p229_p3), %v1662_v1  ;;  %1520 = vmatprep.subr.bf16.mxu1 (!%p229_p3), %v1663_v2  ;;  %v1668_v7 = vld [vmem:[%s2038_s1 + $0x18] sm:$0xff] (!%p229_p3)   ;;  %v1670_v11 = vld [vmem:[%s2038_s1 + $0x20] ss:$0 sps:$4 sm:$0xff] (!%p229_p3)   ;;  %v552_v12 = vsel (!%p229_p3), %vm550_vm1, %v1669_v10, 0 }
   0xa   : > { %1562 = vmatprep.subr.bf16.mxu0 (!%p229_p3), %v1664_v3  ;;  %v871_v13 = vsel (!%p229_p3), %vm550_vm1, %v1670_v11, 0 }
   0xc   : > { %1521 = vmatpush3.bf16.msra.mxu1 (!%p229_p3), %v1663_v2 }
   0xd   : > { %1563 = vmatpush3.bf16.msra.mxu0 (!%p229_p3), %v1664_v3  ;;  %1522 = vmatprep.subr.bf16.mxu1 (!%p229_p3), %v1665_v4 }
   0xe   : > { %s2048_s18 = smov (!%p278_p4, %s1717_s18), 1  ;;  %1564 = vmatprep.subr.bf16.mxu0 %v1666_v5 }
   0xf   : > { %s1473_s9 = sshll.u32 %s2048_s18, 7  ;;  %s1396_s28 = sshll.u32 %s2048_s18, 1 }
  0x10   : > { %s1800_s12 = scalar_lea.vmem %s2039_s2, %s1473_s9  ;;  %s1808_s17 = scalar_lea.vmem %s2037_s0, %s1473_s9  ;;  %1523 = vmatpush3.bf16.msra.mxu1 %v1665_v4 }
  0x11   : > { %v1671_v8 = vld [vmem:[%s1800_s12] sm:$0xff]   ;;  %1565 = vmatpush3.bf16.msra.mxu0 %v1666_v5  ;;  %1524 = vmatprep.subr.bf16.mxu1 %v1667_v6  ;;  %v1673_v14 = vld [vmem:[%s1800_s12 + $0x8] sm:$0xff]   ;;  %v1675_v16 = vld [vmem:[%s1800_s12 + $0x10] sm:$0xff]   ;;  %s1887_s6 = scalar_lea.vmem %s2042_s5, %s1396_s28  ;;  %s1475_s7 = sshll.u32 %s2048_s18, 8 }
  0x12   : > { %v1672_v9 = vld [vmem:[%s1808_s17] sm:$0xff]   ;;  %1566 = vmatprep.subr.bf16.mxu0 %v1668_v7  ;;  %1528 = vmatprep.mubr.msk.bf16.mxu1 %vm501_vm0, %v1671_v8  ;;  %v1674_v15 = vld [vmem:[%s1808_s17 + $0x8] sm:$0xff]   ;;  %v1676_v17 = vld [vmem:[%s1808_s17 + $0x10] sm:$0xff]   ;;  %1244 = vst.msk [vmem:[%s1887_s6] sm:$0x3] %vm1243_vm2, %v1727_v44  ;;  %s1895_s10 = scalar_lea.vmem %s2041_s4, %s1475_s7 }
  0x13   : > { %1570 = vmatprep.mubr.msk.bf16.mxu0 %vm501_vm0, %v1672_v9  ;;  %v1677_v18 = vld [vmem:[%s1800_s12 + $0x18] sm:$0xff]   ;;  %v1679_v20 = vld [vmem:[%s1800_s12 + $0x20] sm:$0xff]   ;;  %v1681_v22 = vld [vmem:[%s1800_s12 + $0x28] sm:$0xff]  }
  0x14   : > { %1525 = vmatpush3.bf16.msra.mxu1 %v1667_v6  ;;  %v1678_v19 = vld [vmem:[%s1808_s17 + $0x18] sm:$0xff]   ;;  %v1680_v21 = vld [vmem:[%s1808_s17 + $0x20] sm:$0xff]   ;;  %v1682_v23 = vld [vmem:[%s1808_s17 + $0x28] sm:$0xff]  }
  0x15   : > { %1567 = vmatpush3.bf16.msra.mxu0 %v1668_v7  ;;  %1634 = vmatprep.subr.msk.bf16.mxu1 %vm550_vm1, %v1669_v10  ;;  %v1683_v24 = vld [vmem:[%s1800_s12 + $0x30] sm:$0xff]   ;;  %v1685_v26 = vld [vmem:[%s1800_s12 + $0x38] sm:$0xff]   ;;  %v1687_v28 = vld [vmem:[%s1800_s12 + $0x40] sm:$0xff]  }
  0x16   : > { %1635 = vmatprep.subr.msk.bf16.mxu0 %vm550_vm1, %v1670_v11  ;;  %v1684_v25 = vld [vmem:[%s1808_s17 + $0x30] sm:$0xff]   ;;  %v1686_v27 = vld [vmem:[%s1808_s17 + $0x38] sm:$0xff]   ;;  %v1688_v29 = vld [vmem:[%s1808_s17 + $0x40] sm:$0xff]  }
  0x17   : > { %v1689_v30 = vld [vmem:[%s1800_s12 + $0x48] sm:$0xff]   ;;  %v1691_v32 = vld [vmem:[%s1800_s12 + $0x50] sm:$0xff]   ;;  %v1693_v34 = vld [vmem:[%s1800_s12 + $0x58] sm:$0xff]  }
  0x18   : > { %1527 = vmatpush3.bf16.msra.mxu1 %v552_v12  ;;  %v1690_v31 = vld [vmem:[%s1808_s17 + $0x48] sm:$0xff]   ;;  %v1692_v33 = vld [vmem:[%s1808_s17 + $0x50] sm:$0xff]   ;;  %v1694_v35 = vld [vmem:[%s1808_s17 + $0x58] sm:$0xff]  }
  0x19   : > { %1569 = vmatpush3.bf16.msra.mxu0 %v871_v13  ;;  %v1695_v36 = vld [vmem:[%s1800_s12 + $0x60] sm:$0xff]   ;;  %v1697_v38 = vld [vmem:[%s1800_s12 + $0x68] sm:$0xff]   ;;  %v1699_v40 = vld [vmem:[%s1800_s12 + $0x70] sm:$0xff]  }
  0x1a   : > { %v1696_v37 = vld [vmem:[%s1808_s17 + $0x60] sm:$0xff]   ;;  %v1698_v39 = vld [vmem:[%s1808_s17 + $0x68] sm:$0xff]   ;;  %v1700_v41 = vld [vmem:[%s1808_s17 + $0x70] sm:$0xff]  }
  0x1b   : > { %1529 = vmatmul.mubr.msk.bf16.vlgmr.msra.gmra.mrb[0].mxu1 %vm501_vm0, %v1673_v14  ;;  %v1701_v42 = vld [vmem:[%s1800_s12 + $0x78] sm:$0xff]  }
  0x1c   : > { %1571 = vmatmul.mubr.msk.bf16.vlgmr.msra.gmra.mrb[0].mxu0 %vm501_vm0, %v1674_v15  ;;  %1532 = vmatprep.mubr.msk.bf16.mxu1 %vm501_vm0, %v1675_v16  ;;  %v1702_v43 = vld [vmem:[%s1808_s17 + $0x78] sm:$0xff]  }
  0x1d   : > { %1574 = vmatprep.mubr.msk.bf16.mxu0 %vm501_vm0, %v1676_v17 }
  0x23   : > { %1533 = vmatmul.mubr.msk.bf16.gmra.mrb[4].mxu1 %vm501_vm0, %v1677_v18 }
  0x24   : > { %1575 = vmatmul.mubr.msk.bf16.gmra.mrb[4].mxu0 %vm501_vm0, %v1678_v19  ;;  %1536 = vmatprep.mubr.msk.bf16.mxu1 %vm501_vm0, %v1679_v20 }
  0x25   : > { %1578 = vmatprep.mubr.msk.bf16.mxu0 %vm501_vm0, %v1680_v21 }
  0x2b   : > { %1537 = vmatmul.mubr.msk.bf16.gmra.mrb[8].mxu1 %vm501_vm0, %v1681_v22 }
  0x2c   : > { %1579 = vmatmul.mubr.msk.bf16.gmra.mrb[8].mxu0 %vm501_vm0, %v1682_v23  ;;  %1540 = vmatprep.mubr.msk.bf16.mxu1 %vm501_vm0, %v1683_v24 }
  0x2d   : > { %1582 = vmatprep.mubr.msk.bf16.mxu0 %vm501_vm0, %v1684_v25 }
  0x33   : > { %1541 = vmatmul.mubr.msk.bf16.gmra.mrb[12].mxu1 %vm501_vm0, %v1685_v26 }
  0x34   : > { %1583 = vmatmul.mubr.msk.bf16.gmra.mrb[12].mxu0 %vm501_vm0, %v1686_v27  ;;  %1544 = vmatprep.mubr.msk.bf16.mxu1 %vm501_vm0, %v1687_v28 }
  0x35   : > { %1586 = vmatprep.mubr.msk.bf16.mxu0 %vm501_vm0, %v1688_v29 }
  0x3b   : > { %1545 = vmatmul.mubr.msk.bf16.gmra.mrb[16].mxu1 %vm501_vm0, %v1689_v30 }
  0x3c   : > { %1587 = vmatmul.mubr.msk.bf16.gmra.mrb[16].mxu0 %vm501_vm0, %v1690_v31  ;;  %1548 = vmatprep.mubr.msk.bf16.mxu1 %vm501_vm0, %v1691_v32 }
  0x3d   : > { %1590 = vmatprep.mubr.msk.bf16.mxu0 %vm501_vm0, %v1692_v33 }
  0x43   : > { %1549 = vmatmul.mubr.msk.bf16.gmra.mrb[20].mxu1 %vm501_vm0, %v1693_v34 }
  0x44   : > { %1591 = vmatmul.mubr.msk.bf16.gmra.mrb[20].mxu0 %vm501_vm0, %v1694_v35  ;;  %1552 = vmatprep.mubr.msk.bf16.mxu1 %vm501_vm0, %v1695_v36 }
  0x45   : > { %1594 = vmatprep.mubr.msk.bf16.mxu0 %vm501_vm0, %v1696_v37 }
  0x4b   : > { %1553 = vmatmul.mubr.msk.bf16.gmra.mrb[24].mxu1 %vm501_vm0, %v1697_v38 }
  0x4c   : > { %1595 = vmatmul.mubr.msk.bf16.gmra.mrb[24].mxu0 %vm501_vm0, %v1698_v39  ;;  %1556 = vmatprep.mubr.msk.bf16.mxu1 %vm501_vm0, %v1699_v40 }
  0x4d   : > { %1598 = vmatprep.mubr.msk.bf16.mxu0 %vm501_vm0, %v1700_v41 }
  0x53   : > { %1557 = vmatmul.mubr.msk.bf16.gmra.mrb[28].mxu1 %vm501_vm0, %v1701_v42 }
  0x54   : > { %1599 = vmatmul.mubr.msk.bf16.gmra.mrb[28].mxu0 %vm501_vm0, %v1702_v43 }
  0xee   : > { %v1530_v45 = vpop.f32.mrb[0].mxu1 }
  0xef   : > { %v1572_v46 = vpop.f32.mrb[0].mxu0  ;;  %v588_v47 = vpop.f32.mrb[1].mxu1 }
  0xf0   : > { %v916_v48 = vadd.f32 %v1572_v46, %v1530_v45  ;;  %v907_v49 = vpop.f32.mrb[1].mxu0  ;;  %v1531_v50 = vpop.f32.mrb[2].mxu1 }
  0xf1   : > { %v908_v51 = vadd.f32 %v907_v49, %v588_v47  ;;  %v1573_v52 = vpop.f32.mrb[2].mxu0  ;;  %v591_v53 = vpop.f32.mrb[3].mxu1 }
  0xf2   : > { %1037 = vst.msk [vmem:[%s1895_s10 + $0x10] sm:$0xff] %vm1034_vm3, %v916_v48  ;;  %v919_v54 = vadd.f32 %v1573_v52, %v1531_v50  ;;  %v910_v55 = vpop.f32.mrb[3].mxu0  ;;  %v1138_v58 = vmul.f32 %v916_v48, %v916_v48  ;;  %v1070_v1 = vsel %vm1034_vm3, %v916_v48, 0.0 }
  0xf3   : > { %1035 = vst.msk [vmem:[%s1895_s10] sm:$0xff] %vm1034_vm3, %v908_v51  ;;  %v1136_v56 = vmul.f32 %v908_v51, %v908_v51  ;;  %v911_v57 = vadd.f32 %v910_v55, %v591_v53  ;;  %v1067_v59 = vsel %vm1034_vm3, %v908_v51, 0.0 }
  0xf4   : > { %1038 = vst.msk [vmem:[%s1895_s10 + $0x18] sm:$0xff] %vm1034_vm3, %v919_v54  ;;  %v1139_v62 = vmul.f32 %v919_v54, %v919_v54  ;;  %v1171_v11 = vsel %vm1034_vm3, %v1138_v58, 0.0  ;;  %v1072_v12 = vsel %vm1034_vm3, %v919_v54, 0.0 }
  0xf5   : > { %1036 = vst.msk [vmem:[%s1895_s10 + $0x8] sm:$0xff] %vm1034_vm3, %v911_v57  ;;  %v1068_v60 = vsel %vm1034_vm3, %v911_v57, 0.0  ;;  %v1137_v61 = vmul.f32 %v911_v57, %v911_v57  ;;  %v1168_v2 = vsel %vm1034_vm3, %v1136_v56, 0.0 }
  0xf6   : > { %v1069_v63 = vadd.f32 %v1068_v60, %v1067_v59  ;;  %v1534_v0 = vpop.f32.mrb[4].mxu1  ;;  %v1173_v16 = vsel %vm1034_vm3, %v1139_v62, 0.0 }
  0xf7   : > { %v1169_v3 = vsel %vm1034_vm3, %v1137_v61, 0.0  ;;  %v1576_v4 = vpop.f32.mrb[4].mxu0  ;;  %v604_v5 = vpop.f32.mrb[5].mxu1 }
  0xf8   : > { %v1071_v6 = vadd.f32 %v1070_v1, %v1069_v63  ;;  %v1170_v7 = vadd.f32 %v1169_v3, %v1168_v2  ;;  %v932_v8 = vadd.f32 %v1576_v4, %v1534_v0  ;;  %v923_v9 = vpop.f32.mrb[5].mxu0  ;;  %v1535_v10 = vpop.f32.mrb[6].mxu1 }
  0xf9   : > { %v924_v13 = vadd.f32 %v923_v9, %v604_v5  ;;  %v1577_v14 = vpop.f32.mrb[6].mxu0  ;;  %v607_v15 = vpop.f32.mrb[7].mxu1 }
  0xfa   : > { %v1172_v17 = vadd.f32 %v1171_v11, %v1170_v7  ;;  %1041 = vst.msk [vmem:[%s1895_s10 + $0x30] sm:$0xff] %vm1034_vm3, %v932_v8  ;;  %v1073_v18 = vadd.f32 %v1072_v12, %v1071_v6  ;;  %v926_v19 = vpop.f32.mrb[7].mxu0  ;;  %v935_v22 = vadd.f32 %v1577_v14, %v1535_v10  ;;  %v1142_v28 = vmul.f32 %v932_v8, %v932_v8 }
  0xfb   : > { %1039 = vst.msk [vmem:[%s1895_s10 + $0x20] sm:$0xff] %vm1034_vm3, %v924_v13  ;;  %v1074_v20 = vsel %vm1034_vm3, %v924_v13, 0.0  ;;  %v1140_v21 = vmul.f32 %v924_v13, %v924_v13  ;;  %v927_v23 = vadd.f32 %v926_v19, %v607_v15  ;;  %v1078_v33 = vsel %vm1034_vm3, %v932_v8, 0.0 }
  0xfc   : > { %v1075_v24 = vadd.f32 %v1074_v20, %v1073_v18  ;;  %v1174_v25 = vadd.f32 %v1173_v16, %v1172_v17  ;;  %1042 = vst.msk [vmem:[%s1895_s10 + $0x38] sm:$0xff] %vm1034_vm3, %v935_v22  ;;  %v1143_v36 = vmul.f32 %v935_v22, %v935_v22  ;;  %v1080_v42 = vsel %vm1034_vm3, %v935_v22, 0.0 }
  0xfd   : > { %v1175_v26 = vsel %vm1034_vm3, %v1140_v21, 0.0  ;;  %1040 = vst.msk [vmem:[%s1895_s10 + $0x28] sm:$0xff] %vm1034_vm3, %v927_v23  ;;  %v1076_v27 = vsel %vm1034_vm3, %v927_v23, 0.0  ;;  %v1141_v31 = vmul.f32 %v927_v23, %v927_v23  ;;  %v1179_v47 = vsel %vm1034_vm3, %v1142_v28, 0.0 }
  0xfe   : > { %v1176_v29 = vadd.f32 %v1175_v26, %v1174_v25  ;;  %v1077_v30 = vadd.f32 %v1076_v27, %v1075_v24  ;;  %v1538_v32 = vpop.f32.mrb[8].mxu1  ;;  %v1181_v55 = vsel %vm1034_vm3, %v1143_v36, 0.0 }
  0xff   : > { %v1580_v34 = vpop.f32.mrb[8].mxu0  ;;  %v620_v35 = vpop.f32.mrb[9].mxu1  ;;  %v1177_v38 = vsel %vm1034_vm3, %v1141_v31, 0.0 }
 0x100   : > { %v1079_v37 = vadd.f32 %v1078_v33, %v1077_v30  ;;  %v948_v39 = vadd.f32 %v1580_v34, %v1538_v32  ;;  %v939_v40 = vpop.f32.mrb[9].mxu0  ;;  %v1539_v41 = vpop.f32.mrb[10].mxu1  ;;  %v1178_v43 = vadd.f32 %v1177_v38, %v1176_v29 }
 0x101   : > { %v940_v44 = vadd.f32 %v939_v40, %v620_v35  ;;  %v1581_v45 = vpop.f32.mrb[10].mxu0  ;;  %v623_v46 = vpop.f32.mrb[11].mxu1 }
 0x102   : > { %1045 = vst.msk [vmem:[%s1895_s10 + $0x50] sm:$0xff] %vm1034_vm3, %v948_v39  ;;  %v1081_v48 = vadd.f32 %v1080_v42, %v1079_v37  ;;  %v951_v49 = vadd.f32 %v1581_v45, %v1539_v41  ;;  %v942_v50 = vpop.f32.mrb[11].mxu0  ;;  %v1180_v51 = vadd.f32 %v1179_v47, %v1178_v43  ;;  %v1146_v61 = vmul.f32 %v948_v39, %v948_v39 }
 0x103   : > { %1043 = vst.msk [vmem:[%s1895_s10 + $0x40] sm:$0xff] %vm1034_vm3, %v940_v44  ;;  %v1082_v52 = vsel %vm1034_vm3, %v940_v44, 0.0  ;;  %v1144_v53 = vmul.f32 %v940_v44, %v940_v44  ;;  %v943_v54 = vadd.f32 %v942_v50, %v623_v46  ;;  %v1086_v0 = vsel %vm1034_vm3, %v948_v39, 0.0 }
 0x104   : > { %v1083_v56 = vadd.f32 %v1082_v52, %v1081_v48  ;;  %1046 = vst.msk [vmem:[%s1895_s10 + $0x58] sm:$0xff] %vm1034_vm3, %v951_v49  ;;  %v1182_v57 = vadd.f32 %v1181_v55, %v1180_v51  ;;  %v1147_v5 = vmul.f32 %v951_v49, %v951_v49  ;;  %v1088_v10 = vsel %vm1034_vm3, %v951_v49, 0.0 }
 0x105   : > { %v1183_v58 = vsel %vm1034_vm3, %v1144_v53, 0.0  ;;  %1044 = vst.msk [vmem:[%s1895_s10 + $0x48] sm:$0xff] %vm1034_vm3, %v943_v54  ;;  %v1084_v59 = vsel %vm1034_vm3, %v943_v54, 0.0  ;;  %v1145_v60 = vmul.f32 %v943_v54, %v943_v54  ;;  %v1187_v15 = vsel %vm1034_vm3, %v1146_v61, 0.0 }
 0x106   : > { %v1085_v62 = vadd.f32 %v1084_v59, %v1083_v56  ;;  %v1542_v63 = vpop.f32.mrb[12].mxu1  ;;  %v1184_v1 = vadd.f32 %v1183_v58, %v1182_v57  ;;  %v1189_v23 = vsel %vm1034_vm3, %v1147_v5, 0.0 }
 0x107   : > { %v1185_v2 = vsel %vm1034_vm3, %v1145_v60, 0.0  ;;  %v1584_v3 = vpop.f32.mrb[12].mxu0  ;;  %v636_v4 = vpop.f32.mrb[13].mxu1 }
 0x108   : > { %v1087_v6 = vadd.f32 %v1086_v0, %v1085_v62  ;;  %v964_v7 = vadd.f32 %v1584_v3, %v1542_v63  ;;  %v955_v8 = vpop.f32.mrb[13].mxu0  ;;  %v1543_v9 = vpop.f32.mrb[14].mxu1  ;;  %v1186_v11 = vadd.f32 %v1185_v2, %v1184_v1 }
 0x109   : > { %v956_v12 = vadd.f32 %v955_v8, %v636_v4  ;;  %v1585_v13 = vpop.f32.mrb[14].mxu0  ;;  %v639_v14 = vpop.f32.mrb[15].mxu1 }
 0x10a   : > { %1049 = vst.msk [vmem:[%s1895_s10 + $0x70] sm:$0xff] %vm1034_vm3, %v964_v7  ;;  %v1089_v16 = vadd.f32 %v1088_v10, %v1087_v6  ;;  %v967_v17 = vadd.f32 %v1585_v13, %v1543_v9  ;;  %v958_v18 = vpop.f32.mrb[15].mxu0  ;;  %v1188_v19 = vadd.f32 %v1187_v15, %v1186_v11  ;;  %v1150_v29 = vmul.f32 %v964_v7, %v964_v7 }
 0x10b   : > { %1047 = vst.msk [vmem:[%s1895_s10 + $0x60] sm:$0xff] %vm1034_vm3, %v956_v12  ;;  %v1090_v20 = vsel %vm1034_vm3, %v956_v12, 0.0  ;;  %v1148_v21 = vmul.f32 %v956_v12, %v956_v12  ;;  %v959_v22 = vadd.f32 %v958_v18, %v639_v14  ;;  %v1094_v32 = vsel %vm1034_vm3, %v964_v7, 0.0 }
 0x10c   : > { %v1091_v24 = vadd.f32 %v1090_v20, %v1089_v16  ;;  %1050 = vst.msk [vmem:[%s1895_s10 + $0x78] sm:$0xff] %vm1034_vm3, %v967_v17  ;;  %v1190_v25 = vadd.f32 %v1189_v23, %v1188_v19  ;;  %v1151_v37 = vmul.f32 %v967_v17, %v967_v17  ;;  %v1096_v42 = vsel %vm1034_vm3, %v967_v17, 0.0 }
 0x10d   : > { %v1191_v26 = vsel %vm1034_vm3, %v1148_v21, 0.0  ;;  %1048 = vst.msk [vmem:[%s1895_s10 + $0x68] sm:$0xff] %vm1034_vm3, %v959_v22  ;;  %v1092_v27 = vsel %vm1034_vm3, %v959_v22, 0.0  ;;  %v1149_v28 = vmul.f32 %v959_v22, %v959_v22  ;;  %v1195_v47 = vsel %vm1034_vm3, %v1150_v29, 0.0 }
 0x10e   : > { %v1093_v30 = vadd.f32 %v1092_v27, %v1091_v24  ;;  %v1546_v31 = vpop.f32.mrb[16].mxu1  ;;  %v1192_v33 = vadd.f32 %v1191_v26, %v1190_v25  ;;  %v1197_v55 = vsel %vm1034_vm3, %v1151_v37, 0.0 }
 0x10f   : > { %v1193_v34 = vsel %vm1034_vm3, %v1149_v28, 0.0  ;;  %v1588_v35 = vpop.f32.mrb[16].mxu0  ;;  %v652_v36 = vpop.f32.mrb[17].mxu1 }
 0x110   : > { %v1095_v38 = vadd.f32 %v1094_v32, %v1093_v30  ;;  %v980_v39 = vadd.f32 %v1588_v35, %v1546_v31  ;;  %v971_v40 = vpop.f32.mrb[17].mxu0  ;;  %v1547_v41 = vpop.f32.mrb[18].mxu1  ;;  %v1194_v43 = vadd.f32 %v1193_v34, %v1192_v33 }
 0x111   : > { %v972_v44 = vadd.f32 %v971_v40, %v652_v36  ;;  %v1589_v45 = vpop.f32.mrb[18].mxu0  ;;  %v655_v46 = vpop.f32.mrb[19].mxu1 }
 0x112   : > { %1053 = vst.msk [vmem:[%s1895_s10 + $0x90] sm:$0xff] %vm1034_vm3, %v980_v39  ;;  %v1097_v48 = vadd.f32 %v1096_v42, %v1095_v38  ;;  %v983_v49 = vadd.f32 %v1589_v45, %v1547_v41  ;;  %v974_v50 = vpop.f32.mrb[19].mxu0  ;;  %v1196_v51 = vadd.f32 %v1195_v47, %v1194_v43  ;;  %v1154_v61 = vmul.f32 %v980_v39, %v980_v39 }
 0x113   : > { %1051 = vst.msk [vmem:[%s1895_s10 + $0x80] sm:$0xff] %vm1034_vm3, %v972_v44  ;;  %v1098_v52 = vsel %vm1034_vm3, %v972_v44, 0.0  ;;  %v1152_v53 = vmul.f32 %v972_v44, %v972_v44  ;;  %v975_v54 = vadd.f32 %v974_v50, %v655_v46  ;;  %v1102_v0 = vsel %vm1034_vm3, %v980_v39, 0.0 }
 0x114   : > { %v1099_v56 = vadd.f32 %v1098_v52, %v1097_v48  ;;  %1054 = vst.msk [vmem:[%s1895_s10 + $0x98] sm:$0xff] %vm1034_vm3, %v983_v49  ;;  %v1198_v57 = vadd.f32 %v1197_v55, %v1196_v51  ;;  %v1155_v5 = vmul.f32 %v983_v49, %v983_v49  ;;  %v1104_v10 = vsel %vm1034_vm3, %v983_v49, 0.0 }
 0x115   : > { %v1199_v58 = vsel %vm1034_vm3, %v1152_v53, 0.0  ;;  %1052 = vst.msk [vmem:[%s1895_s10 + $0x88] sm:$0xff] %vm1034_vm3, %v975_v54  ;;  %v1100_v59 = vsel %vm1034_vm3, %v975_v54, 0.0  ;;  %v1153_v60 = vmul.f32 %v975_v54, %v975_v54  ;;  %v1203_v15 = vsel %vm1034_vm3, %v1154_v61, 0.0 }
 0x116   : > { %v1101_v62 = vadd.f32 %v1100_v59, %v1099_v56  ;;  %v1550_v63 = vpop.f32.mrb[20].mxu1  ;;  %v1200_v1 = vadd.f32 %v1199_v58, %v1198_v57  ;;  %v1205_v23 = vsel %vm1034_vm3, %v1155_v5, 0.0 }
 0x117   : > { %v1201_v2 = vsel %vm1034_vm3, %v1153_v60, 0.0  ;;  %v1592_v3 = vpop.f32.mrb[20].mxu0  ;;  %v668_v4 = vpop.f32.mrb[21].mxu1 }
 0x118   : > { %v1103_v6 = vadd.f32 %v1102_v0, %v1101_v62  ;;  %v996_v7 = vadd.f32 %v1592_v3, %v1550_v63  ;;  %v987_v8 = vpop.f32.mrb[21].mxu0  ;;  %v1551_v9 = vpop.f32.mrb[22].mxu1  ;;  %v1202_v11 = vadd.f32 %v1201_v2, %v1200_v1 }
 0x119   : > { %v988_v12 = vadd.f32 %v987_v8, %v668_v4  ;;  %v1593_v13 = vpop.f32.mrb[22].mxu0  ;;  %v671_v14 = vpop.f32.mrb[23].mxu1 }
 0x11a   : > { %1057 = vst.msk [vmem:[%s1895_s10 + $0xb0] sm:$0xff] %vm1034_vm3, %v996_v7  ;;  %v1105_v16 = vadd.f32 %v1104_v10, %v1103_v6  ;;  %v999_v17 = vadd.f32 %v1593_v13, %v1551_v9  ;;  %v990_v18 = vpop.f32.mrb[23].mxu0  ;;  %v1204_v19 = vadd.f32 %v1203_v15, %v1202_v11  ;;  %v1158_v29 = vmul.f32 %v996_v7, %v996_v7 }
 0x11b   : > { %1055 = vst.msk [vmem:[%s1895_s10 + $0xa0] sm:$0xff] %vm1034_vm3, %v988_v12  ;;  %v1106_v20 = vsel %vm1034_vm3, %v988_v12, 0.0  ;;  %v1156_v21 = vmul.f32 %v988_v12, %v988_v12  ;;  %v991_v22 = vadd.f32 %v990_v18, %v671_v14  ;;  %v1110_v32 = vsel %vm1034_vm3, %v996_v7, 0.0 }
 0x11c   : > { %v1107_v24 = vadd.f32 %v1106_v20, %v1105_v16  ;;  %1058 = vst.msk [vmem:[%s1895_s10 + $0xb8] sm:$0xff] %vm1034_vm3, %v999_v17  ;;  %v1206_v25 = vadd.f32 %v1205_v23, %v1204_v19  ;;  %v1159_v37 = vmul.f32 %v999_v17, %v999_v17  ;;  %v1112_v42 = vsel %vm1034_vm3, %v999_v17, 0.0 }
 0x11d   : > { %v1207_v26 = vsel %vm1034_vm3, %v1156_v21, 0.0  ;;  %1056 = vst.msk [vmem:[%s1895_s10 + $0xa8] sm:$0xff] %vm1034_vm3, %v991_v22  ;;  %v1108_v27 = vsel %vm1034_vm3, %v991_v22, 0.0  ;;  %v1157_v28 = vmul.f32 %v991_v22, %v991_v22  ;;  %v1211_v47 = vsel %vm1034_vm3, %v1158_v29, 0.0 }
 0x11e   : > { %v1109_v30 = vadd.f32 %v1108_v27, %v1107_v24  ;;  %v1554_v31 = vpop.f32.mrb[24].mxu1  ;;  %v1208_v33 = vadd.f32 %v1207_v26, %v1206_v25  ;;  %v1213_v55 = vsel %vm1034_vm3, %v1159_v37, 0.0 }
 0x11f   : > { %v1209_v34 = vsel %vm1034_vm3, %v1157_v28, 0.0  ;;  %v1596_v35 = vpop.f32.mrb[24].mxu0  ;;  %v684_v36 = vpop.f32.mrb[25].mxu1 }
 0x120   : > { %v1111_v38 = vadd.f32 %v1110_v32, %v1109_v30  ;;  %v1012_v39 = vadd.f32 %v1596_v35, %v1554_v31  ;;  %v1003_v40 = vpop.f32.mrb[25].mxu0  ;;  %v1555_v41 = vpop.f32.mrb[26].mxu1  ;;  %v1210_v43 = vadd.f32 %v1209_v34, %v1208_v33 }
 0x121   : > { %v1004_v44 = vadd.f32 %v1003_v40, %v684_v36  ;;  %v1597_v45 = vpop.f32.mrb[26].mxu0  ;;  %v687_v46 = vpop.f32.mrb[27].mxu1 }
 0x122   : > { %1061 = vst.msk [vmem:[%s1895_s10 + $0xd0] sm:$0xff] %vm1034_vm3, %v1012_v39  ;;  %v1113_v48 = vadd.f32 %v1112_v42, %v1111_v38  ;;  %v1015_v49 = vadd.f32 %v1597_v45, %v1555_v41  ;;  %v1006_v50 = vpop.f32.mrb[27].mxu0  ;;  %v1212_v51 = vadd.f32 %v1211_v47, %v1210_v43  ;;  %v1162_v56 = vmul.f32 %v1012_v39, %v1012_v39 }
 0x123   : > { %1059 = vst.msk [vmem:[%s1895_s10 + $0xc0] sm:$0xff] %vm1034_vm3, %v1004_v44  ;;  %v1114_v52 = vsel %vm1034_vm3, %v1004_v44, 0.0  ;;  %v1160_v53 = vmul.f32 %v1004_v44, %v1004_v44  ;;  %v1007_v54 = vadd.f32 %v1006_v50, %v687_v46  ;;  %v1118_v1 = vsel %vm1034_vm3, %v1012_v39, 0.0 }
 0x124   : > { %v1115_v57 = vadd.f32 %v1114_v52, %v1113_v48  ;;  %1062 = vst.msk [vmem:[%s1895_s10 + $0xd8] sm:$0xff] %vm1034_vm3, %v1015_v49  ;;  %v1163_v58 = vmul.f32 %v1015_v49, %v1015_v49  ;;  %v1214_v59 = vadd.f32 %v1213_v55, %v1212_v51  ;;  %v1219_v6 = vsel %vm1034_vm3, %v1162_v56, 0.0  ;;  %v1245_v55 = vld [vmem:[%s1887_s6] sm:$0x3] }
 0x125   : > { %v1215_v60 = vsel %vm1034_vm3, %v1160_v53, 0.0  ;;  %1060 = vst.msk [vmem:[%s1895_s10 + $0xc8] sm:$0xff] %vm1034_vm3, %v1007_v54  ;;  %v1116_v61 = vsel %vm1034_vm3, %v1007_v54, 0.0  ;;  %v1161_v62 = vmul.f32 %v1007_v54, %v1007_v54  ;;  %v1120_v11 = vsel %vm1034_vm3, %v1015_v49, 0.0 }
 0x126   : > { %v1117_v63 = vadd.f32 %v1116_v61, %v1115_v57  ;;  %v1558_v0 = vpop.f32.mrb[28].mxu1  ;;  %v1216_v2 = vadd.f32 %v1215_v60, %v1214_v59  ;;  %v1221_v12 = vsel %vm1034_vm3, %v1163_v58, 0.0 }
 0x127   : > { %v1217_v3 = vsel %vm1034_vm3, %v1161_v62, 0.0  ;;  %v1600_v4 = vpop.f32.mrb[28].mxu0  ;;  %v700_v5 = vpop.f32.mrb[29].mxu1 }
 0x128   : > { %v1119_v7 = vadd.f32 %v1118_v1, %v1117_v63  ;;  %v1028_v8 = vadd.f32 %v1600_v4, %v1558_v0  ;;  %v1019_v9 = vpop.f32.mrb[29].mxu0  ;;  %v1559_v10 = vpop.f32.mrb[30].mxu1  ;;  %v1218_v13 = vadd.f32 %v1217_v3, %v1216_v2 }
 0x129   : > { %v1020_v14 = vadd.f32 %v1019_v9, %v700_v5  ;;  %v1601_v15 = vpop.f32.mrb[30].mxu0  ;;  %v703_v16 = vpop.f32.mrb[31].mxu1 }
 0x12a   : > { %1065 = vst.msk [vmem:[%s1895_s10 + $0xf0] sm:$0xff] %vm1034_vm3, %v1028_v8  ;;  %v1126_v17 = vsel %vm1034_vm3, %v1028_v8, 0.0  ;;  %v1166_v18 = vmul.f32 %v1028_v8, %v1028_v8  ;;  %v1121_v19 = vadd.f32 %v1120_v11, %v1119_v7  ;;  %v1031_v20 = vadd.f32 %v1601_v15, %v1559_v10  ;;  %v1022_v21 = vpop.f32.mrb[31].mxu0 }
 0x12b   : > { %v1220_v22 = vadd.f32 %v1219_v6, %v1218_v13  ;;  %1063 = vst.msk [vmem:[%s1895_s10 + $0xe0] sm:$0xff] %vm1034_vm3, %v1020_v14  ;;  %v1122_v23 = vsel %vm1034_vm3, %v1020_v14, 0.0  ;;  %v1164_v24 = vmul.f32 %v1020_v14, %v1020_v14  ;;  %v1023_v25 = vadd.f32 %v1022_v21, %v703_v16 }
 0x12c   : > { %v1227_v26 = vsel %vm1034_vm3, %v1166_v18, 0.0  ;;  %v1123_v27 = vadd.f32 %v1122_v23, %v1121_v19  ;;  %1066 = vst.msk [vmem:[%s1895_s10 + $0xf8] sm:$0xff] %vm1034_vm3, %v1031_v20  ;;  %v1128_v28 = vsel %vm1034_vm3, %v1031_v20, 0.0  ;;  %v1167_v29 = vmul.f32 %v1031_v20, %v1031_v20 }
 0x12d   : > { %v1222_v30 = vadd.f32 %v1221_v12, %v1220_v22  ;;  %v1223_v31 = vsel %vm1034_vm3, %v1164_v24, 0.0  ;;  %1064 = vst.msk [vmem:[%s1895_s10 + $0xe8] sm:$0xff] %vm1034_vm3, %v1023_v25  ;;  %v1124_v32 = vsel %vm1034_vm3, %v1023_v25, 0.0  ;;  %v1165_v33 = vmul.f32 %v1023_v25, %v1023_v25 }
 0x12e   : > { %v1229_v34 = vsel %vm1034_vm3, %v1167_v29, 0.0  ;;  %v1125_v35 = vadd.f32 %v1124_v32, %v1123_v27 }
 0x12f   : > { %v1224_v36 = vadd.f32 %v1223_v31, %v1222_v30  ;;  %v1225_v37 = vsel %vm1034_vm3, %v1165_v33, 0.0 }
 0x130   : > { %v1127_v38 = vadd.f32 %v1126_v17, %v1125_v35 }
 0x131   : > { %v1226_v39 = vadd.f32 %v1225_v37, %v1224_v36 }
 0x132   : > { %v1129_v40 = vadd.f32 %v1128_v28, %v1127_v38 }
 0x133   : > { %v1228_v41 = vadd.f32 %v1227_v26, %v1226_v39 }
 0x134   : > { %v1130_v42 = vrot.slane %v1129_v40, 4 }
 0x135   : > { %v1230_v43 = vadd.f32 %v1229_v34, %v1228_v41 }
 0x136   : > { %v1131_v44 = vadd.f32 %v1130_v42, %v1129_v40 }
 0x137   : > { %v1231_v45 = vrot.slane %v1230_v43, 4 }
 0x138   : > { %v1132_v46 = vrot.slane %v1131_v44, 2 }
 0x139   : > { %v1232_v47 = vadd.f32 %v1231_v45, %v1230_v43 }
 0x13a   : > { %v1133_v48 = vadd.f32 %v1132_v46, %v1131_v44 }
 0x13b   : > { %v1233_v49 = vrot.slane %v1232_v47, 2 }
 0x13c   : > { %v1134_v50 = vrot.slane %v1133_v48, 1 }
 0x13d   : > { %v1234_v51 = vadd.f32 %v1233_v49, %v1232_v47 }
 0x13e   : > { %v1135_v53 = vadd.f32 %v1134_v50, %v1133_v48 }
 0x13f   : > { %v1235_v52 = vrot.slane %v1234_v51, 1 }
 0x141   : > { %v1236_v54 = vadd.f32 %v1235_v52, %v1234_v51 }
 0x143   : > { %v1238_v56 = vsel %vm1237_vm4, %v1135_v53, %v1236_v54 }
 0x144   : > { %v1246_v57 = vadd.f32 %v1245_v55, %v1238_v56 }
 0x146   : > { %1248 = vst.msk [vmem:[%s1887_s6] sm:$0x3] %vm1243_vm2, %v1246_v57 }
 0x147 PF: > { %s16_s20 = sadd.s32 1, %s1725_s20   ;;  %s2043_s18 = smov %s1721_s19 }
 0x148   : > { %p13_p5 = scmp.ge.s32.totalorder %s16_s20, 4   ;;  %s2044_s19 = smov %s2046_s21 }
 0x14a   :  { %15 = sbr.rel (!%p13_p5) target bundleno = 2 (0x2), region = 85 }

</bundles_post_ra>
